<compile_context>
chip_gen: v5e
topology: v5e:2x2
jax: 0.10.0
libtpu: 0.0.40
codegen_flags: <defaults>
</compile_context>

<pallas_src>
import math
import jax
import jax.numpy as jnp
from jax import lax
from jax.experimental import pallas as pl
from jax.experimental.pallas import tpu as pltpu

# ---- model hyperparameters (small, consistent with the module) ----
D_MODEL = 32
NHEAD = 4
HEAD_DIM = D_MODEL // NHEAD
D_HID = 64
NLAYERS = 2
VOCAB = 30000
EPS = 1e-5          # PyTorch LayerNorm default

L0 = 8              # "seq_len" axis (positional-encoding axis; batch axis of batch_first encoder)
L1 = 4              # attention axis (seq axis of the batch_first=True encoder); mask is [L1, L1]
N_TOK = L0 * L1

TV = 10240                      # decoder vocab tile (multiple of 128) -> 3 grid steps
NV = pl.cdiv(VOCAB, TV)         # 3
VP = NV * TV                    # 30720 (padded vocab for weight/bias, padded once)

NEG_INF = -1e9
LOGITS_DTYPE = jnp.bfloat16     # set to jnp.float32 for full-precision logits (2x HBM write)

NW = 16                         # weight arrays per encoder layer (see init_params ordering)


# ----------------------------------------------------------------------------
# Pallas kernel
# ----------------------------------------------------------------------------
def _layer_norm(x, gamma, beta):
    mu = jnp.mean(x, axis=-1, keepdims=True)
    var = jnp.mean((x - mu) ** 2, axis=-1, keepdims=True)
    return (x - mu) * lax.rsqrt(var + EPS) * gamma + beta


def _encoder_layer(x, mask, refs):
    """One post-norm TransformerEncoderLayer on flattened tokens x: [N_TOK, D].

    mask: [N_TOK, N_TOK] additive, block-diagonal over the L0 groups with the [L1, L1]
    attention mask inside each block -> batched MHA over L1 becomes plain 2-D matmuls.
    Per-head projections use pre-split [D, HEAD_DIM] weights (no narrow lane slices).
    """
    (wq_r, wk_r, wv_r, bq_r, bk_r, bv_r, wo_r, bo_r,
     g1_r, be1_r, w1_r, bb1_r, w2_r, bb2_r, g2_r, be2_r) = refs

    n = x.shape[0]
    scale = 1.0 / math.sqrt(HEAD_DIM)

    attn = jnp.zeros((n, D_MODEL), jnp.float32)
    for h in range(NHEAD):                 # static unroll; accumulate through W_o (no concat)
        q = jnp.dot(x, wq_r[h], preferred_element_type=jnp.float32) + bq_r[h]   # [N, HD]
        k = jnp.dot(x, wk_r[h], preferred_element_type=jnp.float32) + bk_r[h]
        v = jnp.dot(x, wv_r[h], preferred_element_type=jnp.float32) + bv_r[h]
        s = lax.dot_general(q, k, (((1,), (1,)), ((), ())),
                            preferred_element_type=jnp.float32)                 # [N, N]
        s = s * scale + mask
        s = s - jnp.max(s, axis=-1, keepdims=True)
        p = jnp.exp(s)
        p = p * pl.reciprocal(jnp.sum(p, axis=-1, keepdims=True), approx=True)
        ctx = jnp.dot(p, v, preferred_element_type=jnp.float32)                 # [N, HD]
        attn = attn + jnp.dot(ctx, wo_r[h], preferred_element_type=jnp.float32) # [N, D]
    attn = attn + bo_r[...]

    y = _layer_norm(x + attn, g1_r[...], be1_r[...])
    hid = jnp.maximum(jnp.dot(y, w1_r[...], preferred_element_type=jnp.float32)
                      + bb1_r[...], 0.0)
    ff = jnp.dot(hid, w2_r[...], preferred_element_type=jnp.float32) + bb2_r[...]
    return _layer_norm(y + ff, g2_r[...], be2_r[...])


def fused_kernel(x_ref, pe_ref, mask_ref, *rest):
    """PE add + NLAYERS encoder layers (step 0 only) + vocab-tiled decoder matmul.

    rest = NLAYERS*NW encoder-weight refs, dec_w_ref [D,TV] bf16, dec_b_ref [1,TV] f32,
           o_ref [N,TV] LOGITS_DTYPE, xs_ref VMEM scratch [N,D] bf16 (persists across steps).
    """
    xs_ref = rest[-1]
    o_ref = rest[-2]
    dec_b_ref = rest[-3]
    dec_w_ref = rest[-4]
    wrefs = rest[:-4]

    @pl.when(pl.program_id(0) == 0)
    def _():
        x = x_ref[...] + pe_ref[...]
        mask = mask_ref[...]
        for li in range(NLAYERS):
            x = _encoder_layer(x, mask, wrefs[li * NW:(li + 1) * NW])
        xs_ref[...] = x.astype(jnp.bfloat16)      # bf16 once; reused by every vocab step

    # bf16 x bf16 MXU matmul, f32 accumulate; last grid step writes a masked partial tile
    o_ref[...] = (jnp.dot(xs_ref[...], dec_w_ref[...],
                          preferred_element_type=jnp.float32)
                  + dec_b_ref[...]).astype(o_ref.dtype)


# ----------------------------------------------------------------------------
# Wrapper (pallas_call glue)
# ----------------------------------------------------------------------------
def _resident_spec(arr):
    """Full-array block, constant index_map -> fetched once, resident across the grid."""
    nd = arr.ndim

    def imap(j):
        return (0,) * nd

    return pl.BlockSpec(arr.shape, imap)


def run_fused(x2, mask_full, params):
    n = x2.shape[0]
    enc_inputs = (x2, params["pe_flat"], mask_full) + params["layers_flat"]
    in_specs = [_resident_spec(a) for a in enc_inputs]
    in_specs += [pl.BlockSpec((D_MODEL, TV), lambda j: (0, j)),   # decoder weight tile (bf16)
                 pl.BlockSpec((1, TV), lambda j: (0, j))]         # decoder bias tile (f32)
    return pl.pallas_call(
        fused_kernel,
        out_shape=jax.ShapeDtypeStruct((n, VOCAB), LOGITS_DTYPE),
        grid=(NV,),                                               # 3 vocab steps
        in_specs=in_specs,
        out_specs=pl.BlockSpec((n, TV), lambda j: (0, j)),
        scratch_shapes=[pltpu.VMEM((n, D_MODEL), jnp.bfloat16)],  # encoder output, persistent
        compiler_params=pltpu.CompilerParams(
            # step-0 encoder dependency -> must be "arbitrary" (fusion chosen over v7x TC split)
            dimension_semantics=("arbitrary",)),
    )(*enc_inputs, params["dec_w_pad"], params["dec_b_pad"])


def transformer_model_forward(src, src_mask, params):
    l0, l1, _ = src.shape
    n = l0 * l1

    x2 = src.reshape(n, D_MODEL)                        # contiguous reshape, free
    # block-diagonal additive mask on flattened tokens: attention only within each L0 group,
    # with the [L1, L1] src_mask inside a group. Group structure precomputed in init_params.
    mask_full = params["group_mask"] + jnp.tile(src_mask, (l0, l0))

    logits = run_fused(x2, mask_full, params)
    return logits.reshape(l0, l1, VOCAB)


# ----------------------------------------------------------------------------
# Deterministic parameter / buffer setup (all padding / transposing / splitting done ONCE)
# ----------------------------------------------------------------------------
def make_positional_encoding(max_len):
    position = jnp.arange(max_len, dtype=jnp.float32)[:, None]
    div_term = jnp.exp(jnp.arange(0, D_MODEL, 2, dtype=jnp.float32)
                       * (-math.log(10000.0) / D_MODEL))
    ang = position * div_term
    pe = jnp.zeros((max_len, D_MODEL), jnp.float32)
    pe = pe.at[:, 0::2].set(jnp.sin(ang))
    pe = pe.at[:, 1::2].set(jnp.cos(ang))
    return pe                                            # [max_len, D]


def init_params(key):
    def uni(k, shape, scale):
        return jax.random.uniform(k, shape, jnp.float32, -scale, scale)

    def split_heads_w(w):    # [D, D] (rows grouped per head) -> [NHEAD, D, HEAD_DIM], pre-transposed
        return jnp.stack([w[h * HEAD_DIM:(h + 1) * HEAD_DIM, :].T for h in range(NHEAD)])

    def split_heads_b(b):    # [D] -> [NHEAD, 1, HEAD_DIM]
        return jnp.stack([b[h * HEAD_DIM:(h + 1) * HEAD_DIM][None, :] for h in range(NHEAD)])

    layers_flat = []
    for _ in range(NLAYERS):
        key, k1, k2, k3, k4, k5, k6, k7, k8 = jax.random.split(key, 9)
        wqkv = uni(k1, (3 * D_MODEL, D_MODEL), 1.0 / math.sqrt(D_MODEL))
        bqkv = uni(k2, (3 * D_MODEL,), 0.05)
        wo = uni(k3, (D_MODEL, D_MODEL), 1.0 / math.sqrt(D_MODEL))
        bo = uni(k4, (1, D_MODEL), 0.05)
        w1 = uni(k5, (D_HID, D_MODEL), 1.0 / math.sqrt(D_MODEL))
        bb1 = uni(k6, (1, D_HID), 0.05)
        w2 = uni(k7, (D_MODEL, D_HID), 1.0 / math.sqrt(D_HID))
        bb2 = uni(k8, (1, D_MODEL), 0.05)
        g1 = jnp.ones((1, D_MODEL), jnp.float32)        # LayerNorm defaults
        be1 = jnp.zeros((1, D_MODEL), jnp.float32)
        g2 = jnp.ones((1, D_MODEL), jnp.float32)
        be2 = jnp.zeros((1, D_MODEL), jnp.float32)

        wq, wk, wv = wqkv[:D_MODEL], wqkv[D_MODEL:2 * D_MODEL], wqkv[2 * D_MODEL:]
        bq, bk, bv = bqkv[:D_MODEL], bqkv[D_MODEL:2 * D_MODEL], bqkv[2 * D_MODEL:]
        wo_t = wo.T
        wo_h = jnp.stack([wo_t[h * HEAD_DIM:(h + 1) * HEAD_DIM, :] for h in range(NHEAD)])

        layers_flat.extend([
            split_heads_w(wq), split_heads_w(wk), split_heads_w(wv),
            split_heads_b(bq), split_heads_b(bk), split_heads_b(bv),
            wo_h, bo, g1, be1, w1.T, bb1, w2.T, bb2, g2, be2])      # NW = 16 per layer

    key, kd = jax.random.split(key)
    # decoder init per init_weights(): weight ~ U(-0.1, 0.1), bias = 0
    dec_w = uni(kd, (VOCAB, D_MODEL), 0.1)
    dec_w_pad = (jnp.zeros((D_MODEL, VP), jnp.float32)
                 .at[:, :VOCAB].set(dec_w.T)).astype(jnp.bfloat16)   # padded + bf16, once
    dec_b_pad = jnp.zeros((1, VP), jnp.float32)

    # static per-token constants (precomputed once, not per forward)
    pe = make_positional_encoding(max_len=64)[:L0]                                    # [L0, D]
    pe_flat = jnp.broadcast_to(pe[:, None, :], (L0, L1, D_MODEL)).reshape(N_TOK, D_MODEL)
    idx = jnp.arange(N_TOK)
    same_group = (idx[:, None] // L1) == (idx[None, :] // L1)
    group_mask = jnp.where(same_group, 0.0, NEG_INF).astype(jnp.float32)              # [N, N]

    return {
        "pe_flat": pe_flat,
        "group_mask": group_mask,
        "layers_flat": tuple(layers_flat),
        "dec_w_pad": dec_w_pad,
        "dec_b_pad": dec_b_pad,
    }


# ----------------------------------------------------------------------------
if __name__ == "__main__":
    key = jax.random.PRNGKey(0)
    k_src, k_params = jax.random.split(key)

    # src is float [L0, L1, D] (the module has no embedding layer; the pos-encoder requires
    # a d_model-sized last axis). Additive causal mask over the L1 attention axis.
    src = jax.random.normal(k_src, (L0, L1, D_MODEL), jnp.float32)
    causal = jnp.triu(jnp.ones((L1, L1), dtype=bool), k=1)
    src_mask = jnp.where(causal, NEG_INF, 0.0).astype(jnp.float32)

    params = init_params(k_params)

    # TODO(synk): dropout (pos-encoder p=0.1, encoder layers p=0.5) is omitted — eval-mode forward.
    fwd = jax.jit(transformer_model_forward)
    out = jax.block_until_ready(fwd(src, src_mask, params))

    assert out.shape == (L0, L1, VOCAB), out.shape
    assert bool(jnp.isfinite(out.astype(jnp.float32)).all())
    print("KERNEL_OK")
</pallas_src>

<mosaic_0001>
module attributes {stable_mosaic.version = 11 : i64} {
  func.func @fused_kernel(%arg0: i32, %arg1: memref<32x32xf32, #tpu.memory_space<vmem>>, %arg2: memref<32x32xf32, #tpu.memory_space<vmem>>, %arg3: memref<32x32xf32, #tpu.memory_space<vmem>>, %arg4: memref<4x32x8xf32, #tpu.memory_space<vmem>>, %arg5: memref<4x32x8xf32, #tpu.memory_space<vmem>>, %arg6: memref<4x32x8xf32, #tpu.memory_space<vmem>>, %arg7: memref<4x1x8xf32, #tpu.memory_space<vmem>>, %arg8: memref<4x1x8xf32, #tpu.memory_space<vmem>>, %arg9: memref<4x1x8xf32, #tpu.memory_space<vmem>>, %arg10: memref<4x8x32xf32, #tpu.memory_space<vmem>>, %arg11: memref<1x32xf32, #tpu.memory_space<vmem>>, %arg12: memref<1x32xf32, #tpu.memory_space<vmem>>, %arg13: memref<1x32xf32, #tpu.memory_space<vmem>>, %arg14: memref<32x64xf32, #tpu.memory_space<vmem>>, %arg15: memref<1x64xf32, #tpu.memory_space<vmem>>, %arg16: memref<64x32xf32, #tpu.memory_space<vmem>>, %arg17: memref<1x32xf32, #tpu.memory_space<vmem>>, %arg18: memref<1x32xf32, #tpu.memory_space<vmem>>, %arg19: memref<1x32xf32, #tpu.memory_space<vmem>>, %arg20: memref<4x32x8xf32, #tpu.memory_space<vmem>>, %arg21: memref<4x32x8xf32, #tpu.memory_space<vmem>>, %arg22: memref<4x32x8xf32, #tpu.memory_space<vmem>>, %arg23: memref<4x1x8xf32, #tpu.memory_space<vmem>>, %arg24: memref<4x1x8xf32, #tpu.memory_space<vmem>>, %arg25: memref<4x1x8xf32, #tpu.memory_space<vmem>>, %arg26: memref<4x8x32xf32, #tpu.memory_space<vmem>>, %arg27: memref<1x32xf32, #tpu.memory_space<vmem>>, %arg28: memref<1x32xf32, #tpu.memory_space<vmem>>, %arg29: memref<1x32xf32, #tpu.memory_space<vmem>>, %arg30: memref<32x64xf32, #tpu.memory_space<vmem>>, %arg31: memref<1x64xf32, #tpu.memory_space<vmem>>, %arg32: memref<64x32xf32, #tpu.memory_space<vmem>>, %arg33: memref<1x32xf32, #tpu.memory_space<vmem>>, %arg34: memref<1x32xf32, #tpu.memory_space<vmem>>, %arg35: memref<1x32xf32, #tpu.memory_space<vmem>>, %arg36: memref<32x10240xbf16, #tpu.memory_space<vmem>>, %arg37: memref<1x10240xf32, #tpu.memory_space<vmem>>, %arg38: memref<32x10240xbf16, #tpu.memory_space<vmem>>, %arg39: memref<32x32xbf16, #tpu.memory_space<vmem>>) attributes {dimension_semantics = [#tpu.dimension_semantics<arbitrary>], iteration_bounds = array<i64: 3>, scalar_prefetch = 0 : i64, scratch_operands = 1 : i64, tpu.core_type = #tpu.core_type<tc>, window_params = [{pipeline_mode = #tpu.pipeline_mode<synchronous>, transform_indices = @transform_0, window_bounds = array<i64: 32, 32>}, {pipeline_mode = #tpu.pipeline_mode<synchronous>, transform_indices = @transform_1, window_bounds = array<i64: 32, 32>}, {pipeline_mode = #tpu.pipeline_mode<synchronous>, transform_indices = @transform_2, window_bounds = array<i64: 32, 32>}, {pipeline_mode = #tpu.pipeline_mode<synchronous>, transform_indices = @transform_3, window_bounds = array<i64: 4, 32, 8>}, {pipeline_mode = #tpu.pipeline_mode<synchronous>, transform_indices = @transform_4, window_bounds = array<i64: 4, 32, 8>}, {pipeline_mode = #tpu.pipeline_mode<synchronous>, transform_indices = @transform_5, window_bounds = array<i64: 4, 32, 8>}, {pipeline_mode = #tpu.pipeline_mode<synchronous>, transform_indices = @transform_6, window_bounds = array<i64: 4, 1, 8>}, {pipeline_mode = #tpu.pipeline_mode<synchronous>, transform_indices = @transform_7, window_bounds = array<i64: 4, 1, 8>}, {pipeline_mode = #tpu.pipeline_mode<synchronous>, transform_indices = @transform_8, window_bounds = array<i64: 4, 1, 8>}, {pipeline_mode = #tpu.pipeline_mode<synchronous>, transform_indices = @transform_9, window_bounds = array<i64: 4, 8, 32>}, {pipeline_mode = #tpu.pipeline_mode<synchronous>, transform_indices = @transform_10, window_bounds = array<i64: 1, 32>}, {pipeline_mode = #tpu.pipeline_mode<synchronous>, transform_indices = @transform_11, window_bounds = array<i64: 1, 32>}, {pipeline_mode = #tpu.pipeline_mode<synchronous>, transform_indices = @transform_12, window_bounds = array<i64: 1, 32>}, {pipeline_mode = #tpu.pipeline_mode<synchronous>, transform_indices = @transform_13, window_bounds = array<i64: 32, 64>}, {pipeline_mode = #tpu.pipeline_mode<synchronous>, transform_indices = @transform_14, window_bounds = array<i64: 1, 64>}, {pipeline_mode = #tpu.pipeline_mode<synchronous>, transform_indices = @transform_15, window_bounds = array<i64: 64, 32>}, {pipeline_mode = #tpu.pipeline_mode<synchronous>, transform_indices = @transform_16, window_bounds = array<i64: 1, 32>}, {pipeline_mode = #tpu.pipeline_mode<synchronous>, transform_indices = @transform_17, window_bounds = array<i64: 1, 32>}, {pipeline_mode = #tpu.pipeline_mode<synchronous>, transform_indices = @transform_18, window_bounds = array<i64: 1, 32>}, {pipeline_mode = #tpu.pipeline_mode<synchronous>, transform_indices = @transform_19, window_bounds = array<i64: 4, 32, 8>}, {pipeline_mode = #tpu.pipeline_mode<synchronous>, transform_indices = @transform_20, window_bounds = array<i64: 4, 32, 8>}, {pipeline_mode = #tpu.pipeline_mode<synchronous>, transform_indices = @transform_21, window_bounds = array<i64: 4, 32, 8>}, {pipeline_mode = #tpu.pipeline_mode<synchronous>, transform_indices = @transform_22, window_bounds = array<i64: 4, 1, 8>}, {pipeline_mode = #tpu.pipeline_mode<synchronous>, transform_indices = @transform_23, window_bounds = array<i64: 4, 1, 8>}, {pipeline_mode = #tpu.pipeline_mode<synchronous>, transform_indices = @transform_24, window_bounds = array<i64: 4, 1, 8>}, {pipeline_mode = #tpu.pipeline_mode<synchronous>, transform_indices = @transform_25, window_bounds = array<i64: 4, 8, 32>}, {pipeline_mode = #tpu.pipeline_mode<synchronous>, transform_indices = @transform_26, window_bounds = array<i64: 1, 32>}, {pipeline_mode = #tpu.pipeline_mode<synchronous>, transform_indices = @transform_27, window_bounds = array<i64: 1, 32>}, {pipeline_mode = #tpu.pipeline_mode<synchronous>, transform_indices = @transform_28, window_bounds = array<i64: 1, 32>}, {pipeline_mode = #tpu.pipeline_mode<synchronous>, transform_indices = @transform_29, window_bounds = array<i64: 32, 64>}, {pipeline_mode = #tpu.pipeline_mode<synchronous>, transform_indices = @transform_30, window_bounds = array<i64: 1, 64>}, {pipeline_mode = #tpu.pipeline_mode<synchronous>, transform_indices = @transform_31, window_bounds = array<i64: 64, 32>}, {pipeline_mode = #tpu.pipeline_mode<synchronous>, transform_indices = @transform_32, window_bounds = array<i64: 1, 32>}, {pipeline_mode = #tpu.pipeline_mode<synchronous>, transform_indices = @transform_33, window_bounds = array<i64: 1, 32>}, {pipeline_mode = #tpu.pipeline_mode<synchronous>, transform_indices = @transform_34, window_bounds = array<i64: 1, 32>}, {transform_indices = @transform_35, window_bounds = array<i64: 32, 10240>}, {transform_indices = @transform_36, window_bounds = array<i64: 1, 10240>}, {transform_indices = @transform_37, window_bounds = array<i64: 32, 10240>}]} {
    %c0_i32 = arith.constant 0 : i32
    %0 = arith.cmpi eq, %arg0, %c0_i32 : i32
    %1 = arith.extui %0 : i1 to i32
    %c0_i32_0 = arith.constant 0 : i32
    %2 = arith.cmpi ne, %1, %c0_i32_0 : i32
    scf.if %2 {
      %c0_8 = arith.constant 0 : index
      %c0_9 = arith.constant 0 : index
      %11 = vector.load %arg1[%c0_8, %c0_9] : memref<32x32xf32, #tpu.memory_space<vmem>>, vector<32x32xf32>
      %c0_10 = arith.constant 0 : index
      %c0_11 = arith.constant 0 : index
      %12 = vector.load %arg2[%c0_10, %c0_11] : memref<32x32xf32, #tpu.memory_space<vmem>>, vector<32x32xf32>
      %13 = arith.addf %11, %12 : vector<32x32xf32>
      %c0_12 = arith.constant 0 : index
      %c0_13 = arith.constant 0 : index
      %14 = vector.load %arg3[%c0_12, %c0_13] : memref<32x32xf32, #tpu.memory_space<vmem>>, vector<32x32xf32>
      %cst_14 = arith.constant 0.000000e+00 : f32
      %15 = vector.broadcast %cst_14 : f32 to vector<32x32xf32>
      %c0_15 = arith.constant 0 : index
      %c0_16 = arith.constant 0 : index
      %c0_17 = arith.constant 0 : index
      %16 = vector.load %arg4[%c0_15, %c0_16, %c0_17] : memref<4x32x8xf32, #tpu.memory_space<vmem>>, vector<1x32x8xf32>
      %17 = vector.shape_cast %16 : vector<1x32x8xf32> to vector<32x8xf32>
      %cst_18 = arith.constant dense<0.000000e+00> : vector<32x8xf32>
      %18 = tpu.matmul %13, %17, %cst_18 {dimension_numbers = #tpu.dot_dimension_numbers<[1], [0], [0], [1], [0, 0, 1, 1], [], []>} : vector<32x32xf32>, vector<32x8xf32>, vector<32x8xf32> -> vector<32x8xf32>
      %c0_19 = arith.constant 0 : index
      %c0_20 = arith.constant 0 : index
      %c0_21 = arith.constant 0 : index
      %19 = vector.load %arg7[%c0_19, %c0_20, %c0_21] : memref<4x1x8xf32, #tpu.memory_space<vmem>>, vector<1x1x8xf32>
      %20 = vector.shape_cast %19 : vector<1x1x8xf32> to vector<1x8xf32>
      %21 = vector.broadcast %20 : vector<1x8xf32> to vector<32x8xf32>
      %22 = arith.addf %18, %21 : vector<32x8xf32>
      %c0_22 = arith.constant 0 : index
      %c0_23 = arith.constant 0 : index
      %c0_24 = arith.constant 0 : index
      %23 = vector.load %arg5[%c0_22, %c0_23, %c0_24] : memref<4x32x8xf32, #tpu.memory_space<vmem>>, vector<1x32x8xf32>
      %24 = vector.shape_cast %23 : vector<1x32x8xf32> to vector<32x8xf32>
      %cst_25 = arith.constant dense<0.000000e+00> : vector<32x8xf32>
      %25 = tpu.matmul %13, %24, %cst_25 {dimension_numbers = #tpu.dot_dimension_numbers<[1], [0], [0], [1], [0, 0, 1, 1], [], []>} : vector<32x32xf32>, vector<32x8xf32>, vector<32x8xf32> -> vector<32x8xf32>
      %c0_26 = arith.constant 0 : index
      %c0_27 = arith.constant 0 : index
      %c0_28 = arith.constant 0 : index
      %26 = vector.load %arg8[%c0_26, %c0_27, %c0_28] : memref<4x1x8xf32, #tpu.memory_space<vmem>>, vector<1x1x8xf32>
      %27 = vector.shape_cast %26 : vector<1x1x8xf32> to vector<1x8xf32>
      %28 = vector.broadcast %27 : vector<1x8xf32> to vector<32x8xf32>
      %29 = arith.addf %25, %28 : vector<32x8xf32>
      %c0_29 = arith.constant 0 : index
      %c0_30 = arith.constant 0 : index
      %c0_31 = arith.constant 0 : index
      %30 = vector.load %arg6[%c0_29, %c0_30, %c0_31] : memref<4x32x8xf32, #tpu.memory_space<vmem>>, vector<1x32x8xf32>
      %31 = vector.shape_cast %30 : vector<1x32x8xf32> to vector<32x8xf32>
      %cst_32 = arith.constant dense<0.000000e+00> : vector<32x8xf32>
      %32 = tpu.matmul %13, %31, %cst_32 {dimension_numbers = #tpu.dot_dimension_numbers<[1], [0], [0], [1], [0, 0, 1, 1], [], []>} : vector<32x32xf32>, vector<32x8xf32>, vector<32x8xf32> -> vector<32x8xf32>
      %c0_33 = arith.constant 0 : index
      %c0_34 = arith.constant 0 : index
      %c0_35 = arith.constant 0 : index
      %33 = vector.load %arg9[%c0_33, %c0_34, %c0_35] : memref<4x1x8xf32, #tpu.memory_space<vmem>>, vector<1x1x8xf32>
      %34 = vector.shape_cast %33 : vector<1x1x8xf32> to vector<1x8xf32>
      %35 = vector.broadcast %34 : vector<1x8xf32> to vector<32x8xf32>
      %36 = arith.addf %32, %35 : vector<32x8xf32>
      %cst_36 = arith.constant dense<0.000000e+00> : vector<32x32xf32>
      %37 = tpu.matmul %22, %29, %cst_36 {dimension_numbers = #tpu.dot_dimension_numbers<[1], [1], [0], [0], [0, 0, 1, 0], [], []>} : vector<32x8xf32>, vector<32x8xf32>, vector<32x32xf32> -> vector<32x32xf32>
      %cst_37 = arith.constant 0.353553385 : f32
      %38 = vector.broadcast %cst_37 : f32 to vector<32x32xf32>
      %39 = arith.mulf %37, %38 : vector<32x32xf32>
      %40 = arith.addf %39, %14 : vector<32x32xf32>
      %cst_38 = arith.constant dense<0xFF800000> : vector<32xf32>
      %41 = vector.multi_reduction <maximumf>, %40, %cst_38 [1] : vector<32x32xf32> to vector<32xf32>
      %42 = vector.shape_cast %41 : vector<32xf32> to vector<32x1xf32>
      %43 = vector.broadcast %42 : vector<32x1xf32> to vector<32x32xf32>
      %44 = arith.subf %40, %43 : vector<32x32xf32>
      %45 = math.exp %44 : vector<32x32xf32>
      %cst_39 = arith.constant dense<0.000000e+00> : vector<32xf32>
      %46 = vector.multi_reduction <add>, %45, %cst_39 [1] : vector<32x32xf32> to vector<32xf32>
      %47 = vector.shape_cast %46 : vector<32xf32> to vector<32x1xf32>
      %48 = tpu.reciprocal %47 {approx = true} : vector<32x1xf32> -> vector<32x1xf32>
      %49 = vector.broadcast %48 : vector<32x1xf32> to vector<32x32xf32>
      %50 = arith.mulf %45, %49 : vector<32x32xf32>
      %cst_40 = arith.constant dense<0.000000e+00> : vector<32x8xf32>
      %51 = tpu.matmul %50, %36, %cst_40 {dimension_numbers = #tpu.dot_dimension_numbers<[1], [0], [0], [1], [0, 0, 1, 1], [], []>} : vector<32x32xf32>, vector<32x8xf32>, vector<32x8xf32> -> vector<32x8xf32>
      %c0_41 = arith.constant 0 : index
      %c0_42 = arith.constant 0 : index
      %c0_43 = arith.constant 0 : index
      %52 = vector.load %arg10[%c0_41, %c0_42, %c0_43] : memref<4x8x32xf32, #tpu.memory_space<vmem>>, vector<1x8x32xf32>
      %53 = vector.shape_cast %52 : vector<1x8x32xf32> to vector<8x32xf32>
      %cst_44 = arith.constant dense<0.000000e+00> : vector<32x32xf32>
      %54 = tpu.matmul %51, %53, %cst_44 {dimension_numbers = #tpu.dot_dimension_numbers<[1], [0], [0], [1], [0, 0, 1, 1], [], []>} : vector<32x8xf32>, vector<8x32xf32>, vector<32x32xf32> -> vector<32x32xf32>
      %55 = arith.addf %15, %54 : vector<32x32xf32>
      %c1 = arith.constant 1 : index
      %c0_45 = arith.constant 0 : index
      %c0_46 = arith.constant 0 : index
      %56 = vector.load %arg4[%c1, %c0_45, %c0_46] : memref<4x32x8xf32, #tpu.memory_space<vmem>>, vector<1x32x8xf32>
      %57 = vector.shape_cast %56 : vector<1x32x8xf32> to vector<32x8xf32>
      %cst_47 = arith.constant dense<0.000000e+00> : vector<32x8xf32>
      %58 = tpu.matmul %13, %57, %cst_47 {dimension_numbers = #tpu.dot_dimension_numbers<[1], [0], [0], [1], [0, 0, 1, 1], [], []>} : vector<32x32xf32>, vector<32x8xf32>, vector<32x8xf32> -> vector<32x8xf32>
      %c1_48 = arith.constant 1 : index
      %c0_49 = arith.constant 0 : index
      %c0_50 = arith.constant 0 : index
      %59 = vector.load %arg7[%c1_48, %c0_49, %c0_50] : memref<4x1x8xf32, #tpu.memory_space<vmem>>, vector<1x1x8xf32>
      %60 = vector.shape_cast %59 : vector<1x1x8xf32> to vector<1x8xf32>
      %61 = vector.broadcast %60 : vector<1x8xf32> to vector<32x8xf32>
      %62 = arith.addf %58, %61 : vector<32x8xf32>
      %c1_51 = arith.constant 1 : index
      %c0_52 = arith.constant 0 : index
      %c0_53 = arith.constant 0 : index
      %63 = vector.load %arg5[%c1_51, %c0_52, %c0_53] : memref<4x32x8xf32, #tpu.memory_space<vmem>>, vector<1x32x8xf32>
      %64 = vector.shape_cast %63 : vector<1x32x8xf32> to vector<32x8xf32>
      %cst_54 = arith.constant dense<0.000000e+00> : vector<32x8xf32>
      %65 = tpu.matmul %13, %64, %cst_54 {dimension_numbers = #tpu.dot_dimension_numbers<[1], [0], [0], [1], [0, 0, 1, 1], [], []>} : vector<32x32xf32>, vector<32x8xf32>, vector<32x8xf32> -> vector<32x8xf32>
      %c1_55 = arith.constant 1 : index
      %c0_56 = arith.constant 0 : index
      %c0_57 = arith.constant 0 : index
      %66 = vector.load %arg8[%c1_55, %c0_56, %c0_57] : memref<4x1x8xf32, #tpu.memory_space<vmem>>, vector<1x1x8xf32>
      %67 = vector.shape_cast %66 : vector<1x1x8xf32> to vector<1x8xf32>
      %68 = vector.broadcast %67 : vector<1x8xf32> to vector<32x8xf32>
      %69 = arith.addf %65, %68 : vector<32x8xf32>
      %c1_58 = arith.constant 1 : index
      %c0_59 = arith.constant 0 : index
      %c0_60 = arith.constant 0 : index
      %70 = vector.load %arg6[%c1_58, %c0_59, %c0_60] : memref<4x32x8xf32, #tpu.memory_space<vmem>>, vector<1x32x8xf32>
      %71 = vector.shape_cast %70 : vector<1x32x8xf32> to vector<32x8xf32>
      %cst_61 = arith.constant dense<0.000000e+00> : vector<32x8xf32>
      %72 = tpu.matmul %13, %71, %cst_61 {dimension_numbers = #tpu.dot_dimension_numbers<[1], [0], [0], [1], [0, 0, 1, 1], [], []>} : vector<32x32xf32>, vector<32x8xf32>, vector<32x8xf32> -> vector<32x8xf32>
      %c1_62 = arith.constant 1 : index
      %c0_63 = arith.constant 0 : index
      %c0_64 = arith.constant 0 : index
      %73 = vector.load %arg9[%c1_62, %c0_63, %c0_64] : memref<4x1x8xf32, #tpu.memory_space<vmem>>, vector<1x1x8xf32>
      %74 = vector.shape_cast %73 : vector<1x1x8xf32> to vector<1x8xf32>
      %75 = vector.broadcast %74 : vector<1x8xf32> to vector<32x8xf32>
      %76 = arith.addf %72, %75 : vector<32x8xf32>
      %cst_65 = arith.constant dense<0.000000e+00> : vector<32x32xf32>
      %77 = tpu.matmul %62, %69, %cst_65 {dimension_numbers = #tpu.dot_dimension_numbers<[1], [1], [0], [0], [0, 0, 1, 0], [], []>} : vector<32x8xf32>, vector<32x8xf32>, vector<32x32xf32> -> vector<32x32xf32>
      %cst_66 = arith.constant 0.353553385 : f32
      %78 = vector.broadcast %cst_66 : f32 to vector<32x32xf32>
      %79 = arith.mulf %77, %78 : vector<32x32xf32>
      %80 = arith.addf %79, %14 : vector<32x32xf32>
      %cst_67 = arith.constant dense<0xFF800000> : vector<32xf32>
      %81 = vector.multi_reduction <maximumf>, %80, %cst_67 [1] : vector<32x32xf32> to vector<32xf32>
      %82 = vector.shape_cast %81 : vector<32xf32> to vector<32x1xf32>
      %83 = vector.broadcast %82 : vector<32x1xf32> to vector<32x32xf32>
      %84 = arith.subf %80, %83 : vector<32x32xf32>
      %85 = math.exp %84 : vector<32x32xf32>
      %cst_68 = arith.constant dense<0.000000e+00> : vector<32xf32>
      %86 = vector.multi_reduction <add>, %85, %cst_68 [1] : vector<32x32xf32> to vector<32xf32>
      %87 = vector.shape_cast %86 : vector<32xf32> to vector<32x1xf32>
      %88 = tpu.reciprocal %87 {approx = true} : vector<32x1xf32> -> vector<32x1xf32>
      %89 = vector.broadcast %88 : vector<32x1xf32> to vector<32x32xf32>
      %90 = arith.mulf %85, %89 : vector<32x32xf32>
      %cst_69 = arith.constant dense<0.000000e+00> : vector<32x8xf32>
      %91 = tpu.matmul %90, %76, %cst_69 {dimension_numbers = #tpu.dot_dimension_numbers<[1], [0], [0], [1], [0, 0, 1, 1], [], []>} : vector<32x32xf32>, vector<32x8xf32>, vector<32x8xf32> -> vector<32x8xf32>
      %c1_70 = arith.constant 1 : index
      %c0_71 = arith.constant 0 : index
      %c0_72 = arith.constant 0 : index
      %92 = vector.load %arg10[%c1_70, %c0_71, %c0_72] : memref<4x8x32xf32, #tpu.memory_space<vmem>>, vector<1x8x32xf32>
      %93 = vector.shape_cast %92 : vector<1x8x32xf32> to vector<8x32xf32>
      %cst_73 = arith.constant dense<0.000000e+00> : vector<32x32xf32>
      %94 = tpu.matmul %91, %93, %cst_73 {dimension_numbers = #tpu.dot_dimension_numbers<[1], [0], [0], [1], [0, 0, 1, 1], [], []>} : vector<32x8xf32>, vector<8x32xf32>, vector<32x32xf32> -> vector<32x32xf32>
      %95 = arith.addf %55, %94 : vector<32x32xf32>
      %c2 = arith.constant 2 : index
      %c0_74 = arith.constant 0 : index
      %c0_75 = arith.constant 0 : index
      %96 = vector.load %arg4[%c2, %c0_74, %c0_75] : memref<4x32x8xf32, #tpu.memory_space<vmem>>, vector<1x32x8xf32>
      %97 = vector.shape_cast %96 : vector<1x32x8xf32> to vector<32x8xf32>
      %cst_76 = arith.constant dense<0.000000e+00> : vector<32x8xf32>
      %98 = tpu.matmul %13, %97, %cst_76 {dimension_numbers = #tpu.dot_dimension_numbers<[1], [0], [0], [1], [0, 0, 1, 1], [], []>} : vector<32x32xf32>, vector<32x8xf32>, vector<32x8xf32> -> vector<32x8xf32>
      %c2_77 = arith.constant 2 : index
      %c0_78 = arith.constant 0 : index
      %c0_79 = arith.constant 0 : index
      %99 = vector.load %arg7[%c2_77, %c0_78, %c0_79] : memref<4x1x8xf32, #tpu.memory_space<vmem>>, vector<1x1x8xf32>
      %100 = vector.shape_cast %99 : vector<1x1x8xf32> to vector<1x8xf32>
      %101 = vector.broadcast %100 : vector<1x8xf32> to vector<32x8xf32>
      %102 = arith.addf %98, %101 : vector<32x8xf32>
      %c2_80 = arith.constant 2 : index
      %c0_81 = arith.constant 0 : index
      %c0_82 = arith.constant 0 : index
      %103 = vector.load %arg5[%c2_80, %c0_81, %c0_82] : memref<4x32x8xf32, #tpu.memory_space<vmem>>, vector<1x32x8xf32>
      %104 = vector.shape_cast %103 : vector<1x32x8xf32> to vector<32x8xf32>
      %cst_83 = arith.constant dense<0.000000e+00> : vector<32x8xf32>
      %105 = tpu.matmul %13, %104, %cst_83 {dimension_numbers = #tpu.dot_dimension_numbers<[1], [0], [0], [1], [0, 0, 1, 1], [], []>} : vector<32x32xf32>, vector<32x8xf32>, vector<32x8xf32> -> vector<32x8xf32>
      %c2_84 = arith.constant 2 : index
      %c0_85 = arith.constant 0 : index
      %c0_86 = arith.constant 0 : index
      %106 = vector.load %arg8[%c2_84, %c0_85, %c0_86] : memref<4x1x8xf32, #tpu.memory_space<vmem>>, vector<1x1x8xf32>
      %107 = vector.shape_cast %106 : vector<1x1x8xf32> to vector<1x8xf32>
      %108 = vector.broadcast %107 : vector<1x8xf32> to vector<32x8xf32>
      %109 = arith.addf %105, %108 : vector<32x8xf32>
      %c2_87 = arith.constant 2 : index
      %c0_88 = arith.constant 0 : index
      %c0_89 = arith.constant 0 : index
      %110 = vector.load %arg6[%c2_87, %c0_88, %c0_89] : memref<4x32x8xf32, #tpu.memory_space<vmem>>, vector<1x32x8xf32>
      %111 = vector.shape_cast %110 : vector<1x32x8xf32> to vector<32x8xf32>
      %cst_90 = arith.constant dense<0.000000e+00> : vector<32x8xf32>
      %112 = tpu.matmul %13, %111, %cst_90 {dimension_numbers = #tpu.dot_dimension_numbers<[1], [0], [0], [1], [0, 0, 1, 1], [], []>} : vector<32x32xf32>, vector<32x8xf32>, vector<32x8xf32> -> vector<32x8xf32>
      %c2_91 = arith.constant 2 : index
      %c0_92 = arith.constant 0 : index
      %c0_93 = arith.constant 0 : index
      %113 = vector.load %arg9[%c2_91, %c0_92, %c0_93] : memref<4x1x8xf32, #tpu.memory_space<vmem>>, vector<1x1x8xf32>
      %114 = vector.shape_cast %113 : vector<1x1x8xf32> to vector<1x8xf32>
      %115 = vector.broadcast %114 : vector<1x8xf32> to vector<32x8xf32>
      %116 = arith.addf %112, %115 : vector<32x8xf32>
      %cst_94 = arith.constant dense<0.000000e+00> : vector<32x32xf32>
      %117 = tpu.matmul %102, %109, %cst_94 {dimension_numbers = #tpu.dot_dimension_numbers<[1], [1], [0], [0], [0, 0, 1, 0], [], []>} : vector<32x8xf32>, vector<32x8xf32>, vector<32x32xf32> -> vector<32x32xf32>
      %cst_95 = arith.constant 0.353553385 : f32
      %118 = vector.broadcast %cst_95 : f32 to vector<32x32xf32>
      %119 = arith.mulf %117, %118 : vector<32x32xf32>
      %120 = arith.addf %119, %14 : vector<32x32xf32>
      %cst_96 = arith.constant dense<0xFF800000> : vector<32xf32>
      %121 = vector.multi_reduction <maximumf>, %120, %cst_96 [1] : vector<32x32xf32> to vector<32xf32>
      %122 = vector.shape_cast %121 : vector<32xf32> to vector<32x1xf32>
      %123 = vector.broadcast %122 : vector<32x1xf32> to vector<32x32xf32>
      %124 = arith.subf %120, %123 : vector<32x32xf32>
      %125 = math.exp %124 : vector<32x32xf32>
      %cst_97 = arith.constant dense<0.000000e+00> : vector<32xf32>
      %126 = vector.multi_reduction <add>, %125, %cst_97 [1] : vector<32x32xf32> to vector<32xf32>
      %127 = vector.shape_cast %126 : vector<32xf32> to vector<32x1xf32>
      %128 = tpu.reciprocal %127 {approx = true} : vector<32x1xf32> -> vector<32x1xf32>
      %129 = vector.broadcast %128 : vector<32x1xf32> to vector<32x32xf32>
      %130 = arith.mulf %125, %129 : vector<32x32xf32>
      %cst_98 = arith.constant dense<0.000000e+00> : vector<32x8xf32>
      %131 = tpu.matmul %130, %116, %cst_98 {dimension_numbers = #tpu.dot_dimension_numbers<[1], [0], [0], [1], [0, 0, 1, 1], [], []>} : vector<32x32xf32>, vector<32x8xf32>, vector<32x8xf32> -> vector<32x8xf32>
      %c2_99 = arith.constant 2 : index
      %c0_100 = arith.constant 0 : index
      %c0_101 = arith.constant 0 : index
      %132 = vector.load %arg10[%c2_99, %c0_100, %c0_101] : memref<4x8x32xf32, #tpu.memory_space<vmem>>, vector<1x8x32xf32>
      %133 = vector.shape_cast %132 : vector<1x8x32xf32> to vector<8x32xf32>
      %cst_102 = arith.constant dense<0.000000e+00> : vector<32x32xf32>
      %134 = tpu.matmul %131, %133, %cst_102 {dimension_numbers = #tpu.dot_dimension_numbers<[1], [0], [0], [1], [0, 0, 1, 1], [], []>} : vector<32x8xf32>, vector<8x32xf32>, vector<32x32xf32> -> vector<32x32xf32>
      %135 = arith.addf %95, %134 : vector<32x32xf32>
      %c3 = arith.constant 3 : index
      %c0_103 = arith.constant 0 : index
      %c0_104 = arith.constant 0 : index
      %136 = vector.load %arg4[%c3, %c0_103, %c0_104] : memref<4x32x8xf32, #tpu.memory_space<vmem>>, vector<1x32x8xf32>
      %137 = vector.shape_cast %136 : vector<1x32x8xf32> to vector<32x8xf32>
      %cst_105 = arith.constant dense<0.000000e+00> : vector<32x8xf32>
      %138 = tpu.matmul %13, %137, %cst_105 {dimension_numbers = #tpu.dot_dimension_numbers<[1], [0], [0], [1], [0, 0, 1, 1], [], []>} : vector<32x32xf32>, vector<32x8xf32>, vector<32x8xf32> -> vector<32x8xf32>
      %c3_106 = arith.constant 3 : index
      %c0_107 = arith.constant 0 : index
      %c0_108 = arith.constant 0 : index
      %139 = vector.load %arg7[%c3_106, %c0_107, %c0_108] : memref<4x1x8xf32, #tpu.memory_space<vmem>>, vector<1x1x8xf32>
      %140 = vector.shape_cast %139 : vector<1x1x8xf32> to vector<1x8xf32>
      %141 = vector.broadcast %140 : vector<1x8xf32> to vector<32x8xf32>
      %142 = arith.addf %138, %141 : vector<32x8xf32>
      %c3_109 = arith.constant 3 : index
      %c0_110 = arith.constant 0 : index
      %c0_111 = arith.constant 0 : index
      %143 = vector.load %arg5[%c3_109, %c0_110, %c0_111] : memref<4x32x8xf32, #tpu.memory_space<vmem>>, vector<1x32x8xf32>
      %144 = vector.shape_cast %143 : vector<1x32x8xf32> to vector<32x8xf32>
      %cst_112 = arith.constant dense<0.000000e+00> : vector<32x8xf32>
      %145 = tpu.matmul %13, %144, %cst_112 {dimension_numbers = #tpu.dot_dimension_numbers<[1], [0], [0], [1], [0, 0, 1, 1], [], []>} : vector<32x32xf32>, vector<32x8xf32>, vector<32x8xf32> -> vector<32x8xf32>
      %c3_113 = arith.constant 3 : index
      %c0_114 = arith.constant 0 : index
      %c0_115 = arith.constant 0 : index
      %146 = vector.load %arg8[%c3_113, %c0_114, %c0_115] : memref<4x1x8xf32, #tpu.memory_space<vmem>>, vector<1x1x8xf32>
      %147 = vector.shape_cast %146 : vector<1x1x8xf32> to vector<1x8xf32>
      %148 = vector.broadcast %147 : vector<1x8xf32> to vector<32x8xf32>
      %149 = arith.addf %145, %148 : vector<32x8xf32>
      %c3_116 = arith.constant 3 : index
      %c0_117 = arith.constant 0 : index
      %c0_118 = arith.constant 0 : index
      %150 = vector.load %arg6[%c3_116, %c0_117, %c0_118] : memref<4x32x8xf32, #tpu.memory_space<vmem>>, vector<1x32x8xf32>
      %151 = vector.shape_cast %150 : vector<1x32x8xf32> to vector<32x8xf32>
      %cst_119 = arith.constant dense<0.000000e+00> : vector<32x8xf32>
      %152 = tpu.matmul %13, %151, %cst_119 {dimension_numbers = #tpu.dot_dimension_numbers<[1], [0], [0], [1], [0, 0, 1, 1], [], []>} : vector<32x32xf32>, vector<32x8xf32>, vector<32x8xf32> -> vector<32x8xf32>
      %c3_120 = arith.constant 3 : index
      %c0_121 = arith.constant 0 : index
      %c0_122 = arith.constant 0 : index
      %153 = vector.load %arg9[%c3_120, %c0_121, %c0_122] : memref<4x1x8xf32, #tpu.memory_space<vmem>>, vector<1x1x8xf32>
      %154 = vector.shape_cast %153 : vector<1x1x8xf32> to vector<1x8xf32>
      %155 = vector.broadcast %154 : vector<1x8xf32> to vector<32x8xf32>
      %156 = arith.addf %152, %155 : vector<32x8xf32>
      %cst_123 = arith.constant dense<0.000000e+00> : vector<32x32xf32>
      %157 = tpu.matmul %142, %149, %cst_123 {dimension_numbers = #tpu.dot_dimension_numbers<[1], [1], [0], [0], [0, 0, 1, 0], [], []>} : vector<32x8xf32>, vector<32x8xf32>, vector<32x32xf32> -> vector<32x32xf32>
      %cst_124 = arith.constant 0.353553385 : f32
      %158 = vector.broadcast %cst_124 : f32 to vector<32x32xf32>
      %159 = arith.mulf %157, %158 : vector<32x32xf32>
      %160 = arith.addf %159, %14 : vector<32x32xf32>
      %cst_125 = arith.constant dense<0xFF800000> : vector<32xf32>
      %161 = vector.multi_reduction <maximumf>, %160, %cst_125 [1] : vector<32x32xf32> to vector<32xf32>
      %162 = vector.shape_cast %161 : vector<32xf32> to vector<32x1xf32>
      %163 = vector.broadcast %162 : vector<32x1xf32> to vector<32x32xf32>
      %164 = arith.subf %160, %163 : vector<32x32xf32>
      %165 = math.exp %164 : vector<32x32xf32>
      %cst_126 = arith.constant dense<0.000000e+00> : vector<32xf32>
      %166 = vector.multi_reduction <add>, %165, %cst_126 [1] : vector<32x32xf32> to vector<32xf32>
      %167 = vector.shape_cast %166 : vector<32xf32> to vector<32x1xf32>
      %168 = tpu.reciprocal %167 {approx = true} : vector<32x1xf32> -> vector<32x1xf32>
      %169 = vector.broadcast %168 : vector<32x1xf32> to vector<32x32xf32>
      %170 = arith.mulf %165, %169 : vector<32x32xf32>
      %cst_127 = arith.constant dense<0.000000e+00> : vector<32x8xf32>
      %171 = tpu.matmul %170, %156, %cst_127 {dimension_numbers = #tpu.dot_dimension_numbers<[1], [0], [0], [1], [0, 0, 1, 1], [], []>} : vector<32x32xf32>, vector<32x8xf32>, vector<32x8xf32> -> vector<32x8xf32>
      %c3_128 = arith.constant 3 : index
      %c0_129 = arith.constant 0 : index
      %c0_130 = arith.constant 0 : index
      %172 = vector.load %arg10[%c3_128, %c0_129, %c0_130] : memref<4x8x32xf32, #tpu.memory_space<vmem>>, vector<1x8x32xf32>
      %173 = vector.shape_cast %172 : vector<1x8x32xf32> to vector<8x32xf32>
      %cst_131 = arith.constant dense<0.000000e+00> : vector<32x32xf32>
      %174 = tpu.matmul %171, %173, %cst_131 {dimension_numbers = #tpu.dot_dimension_numbers<[1], [0], [0], [1], [0, 0, 1, 1], [], []>} : vector<32x8xf32>, vector<8x32xf32>, vector<32x32xf32> -> vector<32x32xf32>
      %175 = arith.addf %135, %174 : vector<32x32xf32>
      %c0_132 = arith.constant 0 : index
      %c0_133 = arith.constant 0 : index
      %176 = vector.load %arg11[%c0_132, %c0_133] : memref<1x32xf32, #tpu.memory_space<vmem>>, vector<1x32xf32>
      %177 = vector.broadcast %176 : vector<1x32xf32> to vector<32x32xf32>
      %178 = arith.addf %175, %177 : vector<32x32xf32>
      %179 = arith.addf %13, %178 : vector<32x32xf32>
      %c0_134 = arith.constant 0 : index
      %c0_135 = arith.constant 0 : index
      %180 = vector.load %arg12[%c0_134, %c0_135] : memref<1x32xf32, #tpu.memory_space<vmem>>, vector<1x32xf32>
      %c0_136 = arith.constant 0 : index
      %c0_137 = arith.constant 0 : index
      %181 = vector.load %arg13[%c0_136, %c0_137] : memref<1x32xf32, #tpu.memory_space<vmem>>, vector<1x32xf32>
      %cst_138 = arith.constant dense<0.000000e+00> : vector<32xf32>
      %182 = vector.multi_reduction <add>, %179, %cst_138 [1] : vector<32x32xf32> to vector<32xf32>
      %183 = vector.shape_cast %182 : vector<32xf32> to vector<32x1xf32>
      %cst_139 = arith.constant 3.200000e+01 : f32
      %184 = vector.broadcast %cst_139 : f32 to vector<32x1xf32>
      %185 = arith.divf %183, %184 : vector<32x1xf32>
      %186 = vector.broadcast %185 : vector<32x1xf32> to vector<32x32xf32>
      %187 = arith.subf %179, %186 : vector<32x32xf32>
      %188 = arith.mulf %187, %187 : vector<32x32xf32>
      %cst_140 = arith.constant dense<0.000000e+00> : vector<32xf32>
      %189 = vector.multi_reduction <add>, %188, %cst_140 [1] : vector<32x32xf32> to vector<32xf32>
      %190 = vector.shape_cast %189 : vector<32xf32> to vector<32x1xf32>
      %cst_141 = arith.constant 3.200000e+01 : f32
      %191 = vector.broadcast %cst_141 : f32 to vector<32x1xf32>
      %192 = arith.divf %190, %191 : vector<32x1xf32>
      %193 = vector.broadcast %185 : vector<32x1xf32> to vector<32x32xf32>
      %194 = arith.subf %179, %193 : vector<32x32xf32>
      %cst_142 = arith.constant 9.99999974E-6 : f32
      %195 = vector.broadcast %cst_142 : f32 to vector<32x1xf32>
      %196 = arith.addf %192, %195 : vector<32x1xf32>
      %197 = math.rsqrt %196 : vector<32x1xf32>
      %198 = vector.broadcast %197 : vector<32x1xf32> to vector<32x32xf32>
      %199 = arith.mulf %194, %198 : vector<32x32xf32>
      %200 = vector.broadcast %180 : vector<1x32xf32> to vector<32x32xf32>
      %201 = arith.mulf %199, %200 : vector<32x32xf32>
      %202 = vector.broadcast %181 : vector<1x32xf32> to vector<32x32xf32>
      %203 = arith.addf %201, %202 : vector<32x32xf32>
      %c0_143 = arith.constant 0 : index
      %c0_144 = arith.constant 0 : index
      %204 = vector.load %arg14[%c0_143, %c0_144] : memref<32x64xf32, #tpu.memory_space<vmem>>, vector<32x64xf32>
      %cst_145 = arith.constant dense<0.000000e+00> : vector<32x64xf32>
      %205 = tpu.matmul %203, %204, %cst_145 {dimension_numbers = #tpu.dot_dimension_numbers<[1], [0], [0], [1], [0, 0, 1, 1], [], []>} : vector<32x32xf32>, vector<32x64xf32>, vector<32x64xf32> -> vector<32x64xf32>
      %c0_146 = arith.constant 0 : index
      %c0_147 = arith.constant 0 : index
      %206 = vector.load %arg15[%c0_146, %c0_147] : memref<1x64xf32, #tpu.memory_space<vmem>>, vector<1x64xf32>
      %207 = vector.broadcast %206 : vector<1x64xf32> to vector<32x64xf32>
      %208 = arith.addf %205, %207 : vector<32x64xf32>
      %cst_148 = arith.constant 0.000000e+00 : f32
      %209 = vector.broadcast %cst_148 : f32 to vector<32x64xf32>
      %210 = arith.maximumf %208, %209 : vector<32x64xf32>
      %c0_149 = arith.constant 0 : index
      %c0_150 = arith.constant 0 : index
      %211 = vector.load %arg16[%c0_149, %c0_150] : memref<64x32xf32, #tpu.memory_space<vmem>>, vector<64x32xf32>
      %cst_151 = arith.constant dense<0.000000e+00> : vector<32x32xf32>
      %212 = tpu.matmul %210, %211, %cst_151 {dimension_numbers = #tpu.dot_dimension_numbers<[1], [0], [0], [1], [0, 0, 1, 1], [], []>} : vector<32x64xf32>, vector<64x32xf32>, vector<32x32xf32> -> vector<32x32xf32>
      %c0_152 = arith.constant 0 : index
      %c0_153 = arith.constant 0 : index
      %213 = vector.load %arg17[%c0_152, %c0_153] : memref<1x32xf32, #tpu.memory_space<vmem>>, vector<1x32xf32>
      %214 = vector.broadcast %213 : vector<1x32xf32> to vector<32x32xf32>
      %215 = arith.addf %212, %214 : vector<32x32xf32>
      %216 = arith.addf %203, %215 : vector<32x32xf32>
      %c0_154 = arith.constant 0 : index
      %c0_155 = arith.constant 0 : index
      %217 = vector.load %arg18[%c0_154, %c0_155] : memref<1x32xf32, #tpu.memory_space<vmem>>, vector<1x32xf32>
      %c0_156 = arith.constant 0 : index
      %c0_157 = arith.constant 0 : index
      %218 = vector.load %arg19[%c0_156, %c0_157] : memref<1x32xf32, #tpu.memory_space<vmem>>, vector<1x32xf32>
      %cst_158 = arith.constant dense<0.000000e+00> : vector<32xf32>
      %219 = vector.multi_reduction <add>, %216, %cst_158 [1] : vector<32x32xf32> to vector<32xf32>
      %220 = vector.shape_cast %219 : vector<32xf32> to vector<32x1xf32>
      %cst_159 = arith.constant 3.200000e+01 : f32
      %221 = vector.broadcast %cst_159 : f32 to vector<32x1xf32>
      %222 = arith.divf %220, %221 : vector<32x1xf32>
      %223 = vector.broadcast %222 : vector<32x1xf32> to vector<32x32xf32>
      %224 = arith.subf %216, %223 : vector<32x32xf32>
      %225 = arith.mulf %224, %224 : vector<32x32xf32>
      %cst_160 = arith.constant dense<0.000000e+00> : vector<32xf32>
      %226 = vector.multi_reduction <add>, %225, %cst_160 [1] : vector<32x32xf32> to vector<32xf32>
      %227 = vector.shape_cast %226 : vector<32xf32> to vector<32x1xf32>
      %cst_161 = arith.constant 3.200000e+01 : f32
      %228 = vector.broadcast %cst_161 : f32 to vector<32x1xf32>
      %229 = arith.divf %227, %228 : vector<32x1xf32>
      %230 = vector.broadcast %222 : vector<32x1xf32> to vector<32x32xf32>
      %231 = arith.subf %216, %230 : vector<32x32xf32>
      %cst_162 = arith.constant 9.99999974E-6 : f32
      %232 = vector.broadcast %cst_162 : f32 to vector<32x1xf32>
      %233 = arith.addf %229, %232 : vector<32x1xf32>
      %234 = math.rsqrt %233 : vector<32x1xf32>
      %235 = vector.broadcast %234 : vector<32x1xf32> to vector<32x32xf32>
      %236 = arith.mulf %231, %235 : vector<32x32xf32>
      %237 = vector.broadcast %217 : vector<1x32xf32> to vector<32x32xf32>
      %238 = arith.mulf %236, %237 : vector<32x32xf32>
      %239 = vector.broadcast %218 : vector<1x32xf32> to vector<32x32xf32>
      %240 = arith.addf %238, %239 : vector<32x32xf32>
      %cst_163 = arith.constant 0.000000e+00 : f32
      %241 = vector.broadcast %cst_163 : f32 to vector<32x32xf32>
      %c0_164 = arith.constant 0 : index
      %c0_165 = arith.constant 0 : index
      %c0_166 = arith.constant 0 : index
      %242 = vector.load %arg20[%c0_164, %c0_165, %c0_166] : memref<4x32x8xf32, #tpu.memory_space<vmem>>, vector<1x32x8xf32>
      %243 = vector.shape_cast %242 : vector<1x32x8xf32> to vector<32x8xf32>
      %cst_167 = arith.constant dense<0.000000e+00> : vector<32x8xf32>
      %244 = tpu.matmul %240, %243, %cst_167 {dimension_numbers = #tpu.dot_dimension_numbers<[1], [0], [0], [1], [0, 0, 1, 1], [], []>} : vector<32x32xf32>, vector<32x8xf32>, vector<32x8xf32> -> vector<32x8xf32>
      %c0_168 = arith.constant 0 : index
      %c0_169 = arith.constant 0 : index
      %c0_170 = arith.constant 0 : index
      %245 = vector.load %arg23[%c0_168, %c0_169, %c0_170] : memref<4x1x8xf32, #tpu.memory_space<vmem>>, vector<1x1x8xf32>
      %246 = vector.shape_cast %245 : vector<1x1x8xf32> to vector<1x8xf32>
      %247 = vector.broadcast %246 : vector<1x8xf32> to vector<32x8xf32>
      %248 = arith.addf %244, %247 : vector<32x8xf32>
      %c0_171 = arith.constant 0 : index
      %c0_172 = arith.constant 0 : index
      %c0_173 = arith.constant 0 : index
      %249 = vector.load %arg21[%c0_171, %c0_172, %c0_173] : memref<4x32x8xf32, #tpu.memory_space<vmem>>, vector<1x32x8xf32>
      %250 = vector.shape_cast %249 : vector<1x32x8xf32> to vector<32x8xf32>
      %cst_174 = arith.constant dense<0.000000e+00> : vector<32x8xf32>
      %251 = tpu.matmul %240, %250, %cst_174 {dimension_numbers = #tpu.dot_dimension_numbers<[1], [0], [0], [1], [0, 0, 1, 1], [], []>} : vector<32x32xf32>, vector<32x8xf32>, vector<32x8xf32> -> vector<32x8xf32>
      %c0_175 = arith.constant 0 : index
      %c0_176 = arith.constant 0 : index
      %c0_177 = arith.constant 0 : index
      %252 = vector.load %arg24[%c0_175, %c0_176, %c0_177] : memref<4x1x8xf32, #tpu.memory_space<vmem>>, vector<1x1x8xf32>
      %253 = vector.shape_cast %252 : vector<1x1x8xf32> to vector<1x8xf32>
      %254 = vector.broadcast %253 : vector<1x8xf32> to vector<32x8xf32>
      %255 = arith.addf %251, %254 : vector<32x8xf32>
      %c0_178 = arith.constant 0 : index
      %c0_179 = arith.constant 0 : index
      %c0_180 = arith.constant 0 : index
      %256 = vector.load %arg22[%c0_178, %c0_179, %c0_180] : memref<4x32x8xf32, #tpu.memory_space<vmem>>, vector<1x32x8xf32>
      %257 = vector.shape_cast %256 : vector<1x32x8xf32> to vector<32x8xf32>
      %cst_181 = arith.constant dense<0.000000e+00> : vector<32x8xf32>
      %258 = tpu.matmul %240, %257, %cst_181 {dimension_numbers = #tpu.dot_dimension_numbers<[1], [0], [0], [1], [0, 0, 1, 1], [], []>} : vector<32x32xf32>, vector<32x8xf32>, vector<32x8xf32> -> vector<32x8xf32>
      %c0_182 = arith.constant 0 : index
      %c0_183 = arith.constant 0 : index
      %c0_184 = arith.constant 0 : index
      %259 = vector.load %arg25[%c0_182, %c0_183, %c0_184] : memref<4x1x8xf32, #tpu.memory_space<vmem>>, vector<1x1x8xf32>
      %260 = vector.shape_cast %259 : vector<1x1x8xf32> to vector<1x8xf32>
      %261 = vector.broadcast %260 : vector<1x8xf32> to vector<32x8xf32>
      %262 = arith.addf %258, %261 : vector<32x8xf32>
      %cst_185 = arith.constant dense<0.000000e+00> : vector<32x32xf32>
      %263 = tpu.matmul %248, %255, %cst_185 {dimension_numbers = #tpu.dot_dimension_numbers<[1], [1], [0], [0], [0, 0, 1, 0], [], []>} : vector<32x8xf32>, vector<32x8xf32>, vector<32x32xf32> -> vector<32x32xf32>
      %cst_186 = arith.constant 0.353553385 : f32
      %264 = vector.broadcast %cst_186 : f32 to vector<32x32xf32>
      %265 = arith.mulf %263, %264 : vector<32x32xf32>
      %266 = arith.addf %265, %14 : vector<32x32xf32>
      %cst_187 = arith.constant dense<0xFF800000> : vector<32xf32>
      %267 = vector.multi_reduction <maximumf>, %266, %cst_187 [1] : vector<32x32xf32> to vector<32xf32>
      %268 = vector.shape_cast %267 : vector<32xf32> to vector<32x1xf32>
      %269 = vector.broadcast %268 : vector<32x1xf32> to vector<32x32xf32>
      %270 = arith.subf %266, %269 : vector<32x32xf32>
      %271 = math.exp %270 : vector<32x32xf32>
      %cst_188 = arith.constant dense<0.000000e+00> : vector<32xf32>
      %272 = vector.multi_reduction <add>, %271, %cst_188 [1] : vector<32x32xf32> to vector<32xf32>
      %273 = vector.shape_cast %272 : vector<32xf32> to vector<32x1xf32>
      %274 = tpu.reciprocal %273 {approx = true} : vector<32x1xf32> -> vector<32x1xf32>
      %275 = vector.broadcast %274 : vector<32x1xf32> to vector<32x32xf32>
      %276 = arith.mulf %271, %275 : vector<32x32xf32>
      %cst_189 = arith.constant dense<0.000000e+00> : vector<32x8xf32>
      %277 = tpu.matmul %276, %262, %cst_189 {dimension_numbers = #tpu.dot_dimension_numbers<[1], [0], [0], [1], [0, 0, 1, 1], [], []>} : vector<32x32xf32>, vector<32x8xf32>, vector<32x8xf32> -> vector<32x8xf32>
      %c0_190 = arith.constant 0 : index
      %c0_191 = arith.constant 0 : index
      %c0_192 = arith.constant 0 : index
      %278 = vector.load %arg26[%c0_190, %c0_191, %c0_192] : memref<4x8x32xf32, #tpu.memory_space<vmem>>, vector<1x8x32xf32>
      %279 = vector.shape_cast %278 : vector<1x8x32xf32> to vector<8x32xf32>
      %cst_193 = arith.constant dense<0.000000e+00> : vector<32x32xf32>
      %280 = tpu.matmul %277, %279, %cst_193 {dimension_numbers = #tpu.dot_dimension_numbers<[1], [0], [0], [1], [0, 0, 1, 1], [], []>} : vector<32x8xf32>, vector<8x32xf32>, vector<32x32xf32> -> vector<32x32xf32>
      %281 = arith.addf %241, %280 : vector<32x32xf32>
      %c1_194 = arith.constant 1 : index
      %c0_195 = arith.constant 0 : index
      %c0_196 = arith.constant 0 : index
      %282 = vector.load %arg20[%c1_194, %c0_195, %c0_196] : memref<4x32x8xf32, #tpu.memory_space<vmem>>, vector<1x32x8xf32>
      %283 = vector.shape_cast %282 : vector<1x32x8xf32> to vector<32x8xf32>
      %cst_197 = arith.constant dense<0.000000e+00> : vector<32x8xf32>
      %284 = tpu.matmul %240, %283, %cst_197 {dimension_numbers = #tpu.dot_dimension_numbers<[1], [0], [0], [1], [0, 0, 1, 1], [], []>} : vector<32x32xf32>, vector<32x8xf32>, vector<32x8xf32> -> vector<32x8xf32>
      %c1_198 = arith.constant 1 : index
      %c0_199 = arith.constant 0 : index
      %c0_200 = arith.constant 0 : index
      %285 = vector.load %arg23[%c1_198, %c0_199, %c0_200] : memref<4x1x8xf32, #tpu.memory_space<vmem>>, vector<1x1x8xf32>
      %286 = vector.shape_cast %285 : vector<1x1x8xf32> to vector<1x8xf32>
      %287 = vector.broadcast %286 : vector<1x8xf32> to vector<32x8xf32>
      %288 = arith.addf %284, %287 : vector<32x8xf32>
      %c1_201 = arith.constant 1 : index
      %c0_202 = arith.constant 0 : index
      %c0_203 = arith.constant 0 : index
      %289 = vector.load %arg21[%c1_201, %c0_202, %c0_203] : memref<4x32x8xf32, #tpu.memory_space<vmem>>, vector<1x32x8xf32>
      %290 = vector.shape_cast %289 : vector<1x32x8xf32> to vector<32x8xf32>
      %cst_204 = arith.constant dense<0.000000e+00> : vector<32x8xf32>
      %291 = tpu.matmul %240, %290, %cst_204 {dimension_numbers = #tpu.dot_dimension_numbers<[1], [0], [0], [1], [0, 0, 1, 1], [], []>} : vector<32x32xf32>, vector<32x8xf32>, vector<32x8xf32> -> vector<32x8xf32>
      %c1_205 = arith.constant 1 : index
      %c0_206 = arith.constant 0 : index
      %c0_207 = arith.constant 0 : index
      %292 = vector.load %arg24[%c1_205, %c0_206, %c0_207] : memref<4x1x8xf32, #tpu.memory_space<vmem>>, vector<1x1x8xf32>
      %293 = vector.shape_cast %292 : vector<1x1x8xf32> to vector<1x8xf32>
      %294 = vector.broadcast %293 : vector<1x8xf32> to vector<32x8xf32>
      %295 = arith.addf %291, %294 : vector<32x8xf32>
      %c1_208 = arith.constant 1 : index
      %c0_209 = arith.constant 0 : index
      %c0_210 = arith.constant 0 : index
      %296 = vector.load %arg22[%c1_208, %c0_209, %c0_210] : memref<4x32x8xf32, #tpu.memory_space<vmem>>, vector<1x32x8xf32>
      %297 = vector.shape_cast %296 : vector<1x32x8xf32> to vector<32x8xf32>
      %cst_211 = arith.constant dense<0.000000e+00> : vector<32x8xf32>
      %298 = tpu.matmul %240, %297, %cst_211 {dimension_numbers = #tpu.dot_dimension_numbers<[1], [0], [0], [1], [0, 0, 1, 1], [], []>} : vector<32x32xf32>, vector<32x8xf32>, vector<32x8xf32> -> vector<32x8xf32>
      %c1_212 = arith.constant 1 : index
      %c0_213 = arith.constant 0 : index
      %c0_214 = arith.constant 0 : index
      %299 = vector.load %arg25[%c1_212, %c0_213, %c0_214] : memref<4x1x8xf32, #tpu.memory_space<vmem>>, vector<1x1x8xf32>
      %300 = vector.shape_cast %299 : vector<1x1x8xf32> to vector<1x8xf32>
      %301 = vector.broadcast %300 : vector<1x8xf32> to vector<32x8xf32>
      %302 = arith.addf %298, %301 : vector<32x8xf32>
      %cst_215 = arith.constant dense<0.000000e+00> : vector<32x32xf32>
      %303 = tpu.matmul %288, %295, %cst_215 {dimension_numbers = #tpu.dot_dimension_numbers<[1], [1], [0], [0], [0, 0, 1, 0], [], []>} : vector<32x8xf32>, vector<32x8xf32>, vector<32x32xf32> -> vector<32x32xf32>
      %cst_216 = arith.constant 0.353553385 : f32
      %304 = vector.broadcast %cst_216 : f32 to vector<32x32xf32>
      %305 = arith.mulf %303, %304 : vector<32x32xf32>
      %306 = arith.addf %305, %14 : vector<32x32xf32>
      %cst_217 = arith.constant dense<0xFF800000> : vector<32xf32>
      %307 = vector.multi_reduction <maximumf>, %306, %cst_217 [1] : vector<32x32xf32> to vector<32xf32>
      %308 = vector.shape_cast %307 : vector<32xf32> to vector<32x1xf32>
      %309 = vector.broadcast %308 : vector<32x1xf32> to vector<32x32xf32>
      %310 = arith.subf %306, %309 : vector<32x32xf32>
      %311 = math.exp %310 : vector<32x32xf32>
      %cst_218 = arith.constant dense<0.000000e+00> : vector<32xf32>
      %312 = vector.multi_reduction <add>, %311, %cst_218 [1] : vector<32x32xf32> to vector<32xf32>
      %313 = vector.shape_cast %312 : vector<32xf32> to vector<32x1xf32>
      %314 = tpu.reciprocal %313 {approx = true} : vector<32x1xf32> -> vector<32x1xf32>
      %315 = vector.broadcast %314 : vector<32x1xf32> to vector<32x32xf32>
      %316 = arith.mulf %311, %315 : vector<32x32xf32>
      %cst_219 = arith.constant dense<0.000000e+00> : vector<32x8xf32>
      %317 = tpu.matmul %316, %302, %cst_219 {dimension_numbers = #tpu.dot_dimension_numbers<[1], [0], [0], [1], [0, 0, 1, 1], [], []>} : vector<32x32xf32>, vector<32x8xf32>, vector<32x8xf32> -> vector<32x8xf32>
      %c1_220 = arith.constant 1 : index
      %c0_221 = arith.constant 0 : index
      %c0_222 = arith.constant 0 : index
      %318 = vector.load %arg26[%c1_220, %c0_221, %c0_222] : memref<4x8x32xf32, #tpu.memory_space<vmem>>, vector<1x8x32xf32>
      %319 = vector.shape_cast %318 : vector<1x8x32xf32> to vector<8x32xf32>
      %cst_223 = arith.constant dense<0.000000e+00> : vector<32x32xf32>
      %320 = tpu.matmul %317, %319, %cst_223 {dimension_numbers = #tpu.dot_dimension_numbers<[1], [0], [0], [1], [0, 0, 1, 1], [], []>} : vector<32x8xf32>, vector<8x32xf32>, vector<32x32xf32> -> vector<32x32xf32>
      %321 = arith.addf %281, %320 : vector<32x32xf32>
      %c2_224 = arith.constant 2 : index
      %c0_225 = arith.constant 0 : index
      %c0_226 = arith.constant 0 : index
      %322 = vector.load %arg20[%c2_224, %c0_225, %c0_226] : memref<4x32x8xf32, #tpu.memory_space<vmem>>, vector<1x32x8xf32>
      %323 = vector.shape_cast %322 : vector<1x32x8xf32> to vector<32x8xf32>
      %cst_227 = arith.constant dense<0.000000e+00> : vector<32x8xf32>
      %324 = tpu.matmul %240, %323, %cst_227 {dimension_numbers = #tpu.dot_dimension_numbers<[1], [0], [0], [1], [0, 0, 1, 1], [], []>} : vector<32x32xf32>, vector<32x8xf32>, vector<32x8xf32> -> vector<32x8xf32>
      %c2_228 = arith.constant 2 : index
      %c0_229 = arith.constant 0 : index
      %c0_230 = arith.constant 0 : index
      %325 = vector.load %arg23[%c2_228, %c0_229, %c0_230] : memref<4x1x8xf32, #tpu.memory_space<vmem>>, vector<1x1x8xf32>
      %326 = vector.shape_cast %325 : vector<1x1x8xf32> to vector<1x8xf32>
      %327 = vector.broadcast %326 : vector<1x8xf32> to vector<32x8xf32>
      %328 = arith.addf %324, %327 : vector<32x8xf32>
      %c2_231 = arith.constant 2 : index
      %c0_232 = arith.constant 0 : index
      %c0_233 = arith.constant 0 : index
      %329 = vector.load %arg21[%c2_231, %c0_232, %c0_233] : memref<4x32x8xf32, #tpu.memory_space<vmem>>, vector<1x32x8xf32>
      %330 = vector.shape_cast %329 : vector<1x32x8xf32> to vector<32x8xf32>
      %cst_234 = arith.constant dense<0.000000e+00> : vector<32x8xf32>
      %331 = tpu.matmul %240, %330, %cst_234 {dimension_numbers = #tpu.dot_dimension_numbers<[1], [0], [0], [1], [0, 0, 1, 1], [], []>} : vector<32x32xf32>, vector<32x8xf32>, vector<32x8xf32> -> vector<32x8xf32>
      %c2_235 = arith.constant 2 : index
      %c0_236 = arith.constant 0 : index
      %c0_237 = arith.constant 0 : index
      %332 = vector.load %arg24[%c2_235, %c0_236, %c0_237] : memref<4x1x8xf32, #tpu.memory_space<vmem>>, vector<1x1x8xf32>
      %333 = vector.shape_cast %332 : vector<1x1x8xf32> to vector<1x8xf32>
      %334 = vector.broadcast %333 : vector<1x8xf32> to vector<32x8xf32>
      %335 = arith.addf %331, %334 : vector<32x8xf32>
      %c2_238 = arith.constant 2 : index
      %c0_239 = arith.constant 0 : index
      %c0_240 = arith.constant 0 : index
      %336 = vector.load %arg22[%c2_238, %c0_239, %c0_240] : memref<4x32x8xf32, #tpu.memory_space<vmem>>, vector<1x32x8xf32>
      %337 = vector.shape_cast %336 : vector<1x32x8xf32> to vector<32x8xf32>
      %cst_241 = arith.constant dense<0.000000e+00> : vector<32x8xf32>
      %338 = tpu.matmul %240, %337, %cst_241 {dimension_numbers = #tpu.dot_dimension_numbers<[1], [0], [0], [1], [0, 0, 1, 1], [], []>} : vector<32x32xf32>, vector<32x8xf32>, vector<32x8xf32> -> vector<32x8xf32>
      %c2_242 = arith.constant 2 : index
      %c0_243 = arith.constant 0 : index
      %c0_244 = arith.constant 0 : index
      %339 = vector.load %arg25[%c2_242, %c0_243, %c0_244] : memref<4x1x8xf32, #tpu.memory_space<vmem>>, vector<1x1x8xf32>
      %340 = vector.shape_cast %339 : vector<1x1x8xf32> to vector<1x8xf32>
      %341 = vector.broadcast %340 : vector<1x8xf32> to vector<32x8xf32>
      %342 = arith.addf %338, %341 : vector<32x8xf32>
      %cst_245 = arith.constant dense<0.000000e+00> : vector<32x32xf32>
      %343 = tpu.matmul %328, %335, %cst_245 {dimension_numbers = #tpu.dot_dimension_numbers<[1], [1], [0], [0], [0, 0, 1, 0], [], []>} : vector<32x8xf32>, vector<32x8xf32>, vector<32x32xf32> -> vector<32x32xf32>
      %cst_246 = arith.constant 0.353553385 : f32
      %344 = vector.broadcast %cst_246 : f32 to vector<32x32xf32>
      %345 = arith.mulf %343, %344 : vector<32x32xf32>
      %346 = arith.addf %345, %14 : vector<32x32xf32>
      %cst_247 = arith.constant dense<0xFF800000> : vector<32xf32>
      %347 = vector.multi_reduction <maximumf>, %346, %cst_247 [1] : vector<32x32xf32> to vector<32xf32>
      %348 = vector.shape_cast %347 : vector<32xf32> to vector<32x1xf32>
      %349 = vector.broadcast %348 : vector<32x1xf32> to vector<32x32xf32>
      %350 = arith.subf %346, %349 : vector<32x32xf32>
      %351 = math.exp %350 : vector<32x32xf32>
      %cst_248 = arith.constant dense<0.000000e+00> : vector<32xf32>
      %352 = vector.multi_reduction <add>, %351, %cst_248 [1] : vector<32x32xf32> to vector<32xf32>
      %353 = vector.shape_cast %352 : vector<32xf32> to vector<32x1xf32>
      %354 = tpu.reciprocal %353 {approx = true} : vector<32x1xf32> -> vector<32x1xf32>
      %355 = vector.broadcast %354 : vector<32x1xf32> to vector<32x32xf32>
      %356 = arith.mulf %351, %355 : vector<32x32xf32>
      %cst_249 = arith.constant dense<0.000000e+00> : vector<32x8xf32>
      %357 = tpu.matmul %356, %342, %cst_249 {dimension_numbers = #tpu.dot_dimension_numbers<[1], [0], [0], [1], [0, 0, 1, 1], [], []>} : vector<32x32xf32>, vector<32x8xf32>, vector<32x8xf32> -> vector<32x8xf32>
      %c2_250 = arith.constant 2 : index
      %c0_251 = arith.constant 0 : index
      %c0_252 = arith.constant 0 : index
      %358 = vector.load %arg26[%c2_250, %c0_251, %c0_252] : memref<4x8x32xf32, #tpu.memory_space<vmem>>, vector<1x8x32xf32>
      %359 = vector.shape_cast %358 : vector<1x8x32xf32> to vector<8x32xf32>
      %cst_253 = arith.constant dense<0.000000e+00> : vector<32x32xf32>
      %360 = tpu.matmul %357, %359, %cst_253 {dimension_numbers = #tpu.dot_dimension_numbers<[1], [0], [0], [1], [0, 0, 1, 1], [], []>} : vector<32x8xf32>, vector<8x32xf32>, vector<32x32xf32> -> vector<32x32xf32>
      %361 = arith.addf %321, %360 : vector<32x32xf32>
      %c3_254 = arith.constant 3 : index
      %c0_255 = arith.constant 0 : index
      %c0_256 = arith.constant 0 : index
      %362 = vector.load %arg20[%c3_254, %c0_255, %c0_256] : memref<4x32x8xf32, #tpu.memory_space<vmem>>, vector<1x32x8xf32>
      %363 = vector.shape_cast %362 : vector<1x32x8xf32> to vector<32x8xf32>
      %cst_257 = arith.constant dense<0.000000e+00> : vector<32x8xf32>
      %364 = tpu.matmul %240, %363, %cst_257 {dimension_numbers = #tpu.dot_dimension_numbers<[1], [0], [0], [1], [0, 0, 1, 1], [], []>} : vector<32x32xf32>, vector<32x8xf32>, vector<32x8xf32> -> vector<32x8xf32>
      %c3_258 = arith.constant 3 : index
      %c0_259 = arith.constant 0 : index
      %c0_260 = arith.constant 0 : index
      %365 = vector.load %arg23[%c3_258, %c0_259, %c0_260] : memref<4x1x8xf32, #tpu.memory_space<vmem>>, vector<1x1x8xf32>
      %366 = vector.shape_cast %365 : vector<1x1x8xf32> to vector<1x8xf32>
      %367 = vector.broadcast %366 : vector<1x8xf32> to vector<32x8xf32>
      %368 = arith.addf %364, %367 : vector<32x8xf32>
      %c3_261 = arith.constant 3 : index
      %c0_262 = arith.constant 0 : index
      %c0_263 = arith.constant 0 : index
      %369 = vector.load %arg21[%c3_261, %c0_262, %c0_263] : memref<4x32x8xf32, #tpu.memory_space<vmem>>, vector<1x32x8xf32>
      %370 = vector.shape_cast %369 : vector<1x32x8xf32> to vector<32x8xf32>
      %cst_264 = arith.constant dense<0.000000e+00> : vector<32x8xf32>
      %371 = tpu.matmul %240, %370, %cst_264 {dimension_numbers = #tpu.dot_dimension_numbers<[1], [0], [0], [1], [0, 0, 1, 1], [], []>} : vector<32x32xf32>, vector<32x8xf32>, vector<32x8xf32> -> vector<32x8xf32>
      %c3_265 = arith.constant 3 : index
      %c0_266 = arith.constant 0 : index
      %c0_267 = arith.constant 0 : index
      %372 = vector.load %arg24[%c3_265, %c0_266, %c0_267] : memref<4x1x8xf32, #tpu.memory_space<vmem>>, vector<1x1x8xf32>
      %373 = vector.shape_cast %372 : vector<1x1x8xf32> to vector<1x8xf32>
      %374 = vector.broadcast %373 : vector<1x8xf32> to vector<32x8xf32>
      %375 = arith.addf %371, %374 : vector<32x8xf32>
      %c3_268 = arith.constant 3 : index
      %c0_269 = arith.constant 0 : index
      %c0_270 = arith.constant 0 : index
      %376 = vector.load %arg22[%c3_268, %c0_269, %c0_270] : memref<4x32x8xf32, #tpu.memory_space<vmem>>, vector<1x32x8xf32>
      %377 = vector.shape_cast %376 : vector<1x32x8xf32> to vector<32x8xf32>
      %cst_271 = arith.constant dense<0.000000e+00> : vector<32x8xf32>
      %378 = tpu.matmul %240, %377, %cst_271 {dimension_numbers = #tpu.dot_dimension_numbers<[1], [0], [0], [1], [0, 0, 1, 1], [], []>} : vector<32x32xf32>, vector<32x8xf32>, vector<32x8xf32> -> vector<32x8xf32>
      %c3_272 = arith.constant 3 : index
      %c0_273 = arith.constant 0 : index
      %c0_274 = arith.constant 0 : index
      %379 = vector.load %arg25[%c3_272, %c0_273, %c0_274] : memref<4x1x8xf32, #tpu.memory_space<vmem>>, vector<1x1x8xf32>
      %380 = vector.shape_cast %379 : vector<1x1x8xf32> to vector<1x8xf32>
      %381 = vector.broadcast %380 : vector<1x8xf32> to vector<32x8xf32>
      %382 = arith.addf %378, %381 : vector<32x8xf32>
      %cst_275 = arith.constant dense<0.000000e+00> : vector<32x32xf32>
      %383 = tpu.matmul %368, %375, %cst_275 {dimension_numbers = #tpu.dot_dimension_numbers<[1], [1], [0], [0], [0, 0, 1, 0], [], []>} : vector<32x8xf32>, vector<32x8xf32>, vector<32x32xf32> -> vector<32x32xf32>
      %cst_276 = arith.constant 0.353553385 : f32
      %384 = vector.broadcast %cst_276 : f32 to vector<32x32xf32>
      %385 = arith.mulf %383, %384 : vector<32x32xf32>
      %386 = arith.addf %385, %14 : vector<32x32xf32>
      %cst_277 = arith.constant dense<0xFF800000> : vector<32xf32>
      %387 = vector.multi_reduction <maximumf>, %386, %cst_277 [1] : vector<32x32xf32> to vector<32xf32>
      %388 = vector.shape_cast %387 : vector<32xf32> to vector<32x1xf32>
      %389 = vector.broadcast %388 : vector<32x1xf32> to vector<32x32xf32>
      %390 = arith.subf %386, %389 : vector<32x32xf32>
      %391 = math.exp %390 : vector<32x32xf32>
      %cst_278 = arith.constant dense<0.000000e+00> : vector<32xf32>
      %392 = vector.multi_reduction <add>, %391, %cst_278 [1] : vector<32x32xf32> to vector<32xf32>
      %393 = vector.shape_cast %392 : vector<32xf32> to vector<32x1xf32>
      %394 = tpu.reciprocal %393 {approx = true} : vector<32x1xf32> -> vector<32x1xf32>
      %395 = vector.broadcast %394 : vector<32x1xf32> to vector<32x32xf32>
      %396 = arith.mulf %391, %395 : vector<32x32xf32>
      %cst_279 = arith.constant dense<0.000000e+00> : vector<32x8xf32>
      %397 = tpu.matmul %396, %382, %cst_279 {dimension_numbers = #tpu.dot_dimension_numbers<[1], [0], [0], [1], [0, 0, 1, 1], [], []>} : vector<32x32xf32>, vector<32x8xf32>, vector<32x8xf32> -> vector<32x8xf32>
      %c3_280 = arith.constant 3 : index
      %c0_281 = arith.constant 0 : index
      %c0_282 = arith.constant 0 : index
      %398 = vector.load %arg26[%c3_280, %c0_281, %c0_282] : memref<4x8x32xf32, #tpu.memory_space<vmem>>, vector<1x8x32xf32>
      %399 = vector.shape_cast %398 : vector<1x8x32xf32> to vector<8x32xf32>
      %cst_283 = arith.constant dense<0.000000e+00> : vector<32x32xf32>
      %400 = tpu.matmul %397, %399, %cst_283 {dimension_numbers = #tpu.dot_dimension_numbers<[1], [0], [0], [1], [0, 0, 1, 1], [], []>} : vector<32x8xf32>, vector<8x32xf32>, vector<32x32xf32> -> vector<32x32xf32>
      %401 = arith.addf %361, %400 : vector<32x32xf32>
      %c0_284 = arith.constant 0 : index
      %c0_285 = arith.constant 0 : index
      %402 = vector.load %arg27[%c0_284, %c0_285] : memref<1x32xf32, #tpu.memory_space<vmem>>, vector<1x32xf32>
      %403 = vector.broadcast %402 : vector<1x32xf32> to vector<32x32xf32>
      %404 = arith.addf %401, %403 : vector<32x32xf32>
      %405 = arith.addf %240, %404 : vector<32x32xf32>
      %c0_286 = arith.constant 0 : index
      %c0_287 = arith.constant 0 : index
      %406 = vector.load %arg28[%c0_286, %c0_287] : memref<1x32xf32, #tpu.memory_space<vmem>>, vector<1x32xf32>
      %c0_288 = arith.constant 0 : index
      %c0_289 = arith.constant 0 : index
      %407 = vector.load %arg29[%c0_288, %c0_289] : memref<1x32xf32, #tpu.memory_space<vmem>>, vector<1x32xf32>
      %cst_290 = arith.constant dense<0.000000e+00> : vector<32xf32>
      %408 = vector.multi_reduction <add>, %405, %cst_290 [1] : vector<32x32xf32> to vector<32xf32>
      %409 = vector.shape_cast %408 : vector<32xf32> to vector<32x1xf32>
      %cst_291 = arith.constant 3.200000e+01 : f32
      %410 = vector.broadcast %cst_291 : f32 to vector<32x1xf32>
      %411 = arith.divf %409, %410 : vector<32x1xf32>
      %412 = vector.broadcast %411 : vector<32x1xf32> to vector<32x32xf32>
      %413 = arith.subf %405, %412 : vector<32x32xf32>
      %414 = arith.mulf %413, %413 : vector<32x32xf32>
      %cst_292 = arith.constant dense<0.000000e+00> : vector<32xf32>
      %415 = vector.multi_reduction <add>, %414, %cst_292 [1] : vector<32x32xf32> to vector<32xf32>
      %416 = vector.shape_cast %415 : vector<32xf32> to vector<32x1xf32>
      %cst_293 = arith.constant 3.200000e+01 : f32
      %417 = vector.broadcast %cst_293 : f32 to vector<32x1xf32>
      %418 = arith.divf %416, %417 : vector<32x1xf32>
      %419 = vector.broadcast %411 : vector<32x1xf32> to vector<32x32xf32>
      %420 = arith.subf %405, %419 : vector<32x32xf32>
      %cst_294 = arith.constant 9.99999974E-6 : f32
      %421 = vector.broadcast %cst_294 : f32 to vector<32x1xf32>
      %422 = arith.addf %418, %421 : vector<32x1xf32>
      %423 = math.rsqrt %422 : vector<32x1xf32>
      %424 = vector.broadcast %423 : vector<32x1xf32> to vector<32x32xf32>
      %425 = arith.mulf %420, %424 : vector<32x32xf32>
      %426 = vector.broadcast %406 : vector<1x32xf32> to vector<32x32xf32>
      %427 = arith.mulf %425, %426 : vector<32x32xf32>
      %428 = vector.broadcast %407 : vector<1x32xf32> to vector<32x32xf32>
      %429 = arith.addf %427, %428 : vector<32x32xf32>
      %c0_295 = arith.constant 0 : index
      %c0_296 = arith.constant 0 : index
      %430 = vector.load %arg30[%c0_295, %c0_296] : memref<32x64xf32, #tpu.memory_space<vmem>>, vector<32x64xf32>
      %cst_297 = arith.constant dense<0.000000e+00> : vector<32x64xf32>
      %431 = tpu.matmul %429, %430, %cst_297 {dimension_numbers = #tpu.dot_dimension_numbers<[1], [0], [0], [1], [0, 0, 1, 1], [], []>} : vector<32x32xf32>, vector<32x64xf32>, vector<32x64xf32> -> vector<32x64xf32>
      %c0_298 = arith.constant 0 : index
      %c0_299 = arith.constant 0 : index
      %432 = vector.load %arg31[%c0_298, %c0_299] : memref<1x64xf32, #tpu.memory_space<vmem>>, vector<1x64xf32>
      %433 = vector.broadcast %432 : vector<1x64xf32> to vector<32x64xf32>
      %434 = arith.addf %431, %433 : vector<32x64xf32>
      %cst_300 = arith.constant 0.000000e+00 : f32
      %435 = vector.broadcast %cst_300 : f32 to vector<32x64xf32>
      %436 = arith.maximumf %434, %435 : vector<32x64xf32>
      %c0_301 = arith.constant 0 : index
      %c0_302 = arith.constant 0 : index
      %437 = vector.load %arg32[%c0_301, %c0_302] : memref<64x32xf32, #tpu.memory_space<vmem>>, vector<64x32xf32>
      %cst_303 = arith.constant dense<0.000000e+00> : vector<32x32xf32>
      %438 = tpu.matmul %436, %437, %cst_303 {dimension_numbers = #tpu.dot_dimension_numbers<[1], [0], [0], [1], [0, 0, 1, 1], [], []>} : vector<32x64xf32>, vector<64x32xf32>, vector<32x32xf32> -> vector<32x32xf32>
      %c0_304 = arith.constant 0 : index
      %c0_305 = arith.constant 0 : index
      %439 = vector.load %arg33[%c0_304, %c0_305] : memref<1x32xf32, #tpu.memory_space<vmem>>, vector<1x32xf32>
      %440 = vector.broadcast %439 : vector<1x32xf32> to vector<32x32xf32>
      %441 = arith.addf %438, %440 : vector<32x32xf32>
      %442 = arith.addf %429, %441 : vector<32x32xf32>
      %c0_306 = arith.constant 0 : index
      %c0_307 = arith.constant 0 : index
      %443 = vector.load %arg34[%c0_306, %c0_307] : memref<1x32xf32, #tpu.memory_space<vmem>>, vector<1x32xf32>
      %c0_308 = arith.constant 0 : index
      %c0_309 = arith.constant 0 : index
      %444 = vector.load %arg35[%c0_308, %c0_309] : memref<1x32xf32, #tpu.memory_space<vmem>>, vector<1x32xf32>
      %cst_310 = arith.constant dense<0.000000e+00> : vector<32xf32>
      %445 = vector.multi_reduction <add>, %442, %cst_310 [1] : vector<32x32xf32> to vector<32xf32>
      %446 = vector.shape_cast %445 : vector<32xf32> to vector<32x1xf32>
      %cst_311 = arith.constant 3.200000e+01 : f32
      %447 = vector.broadcast %cst_311 : f32 to vector<32x1xf32>
      %448 = arith.divf %446, %447 : vector<32x1xf32>
      %449 = vector.broadcast %448 : vector<32x1xf32> to vector<32x32xf32>
      %450 = arith.subf %442, %449 : vector<32x32xf32>
      %451 = arith.mulf %450, %450 : vector<32x32xf32>
      %cst_312 = arith.constant dense<0.000000e+00> : vector<32xf32>
      %452 = vector.multi_reduction <add>, %451, %cst_312 [1] : vector<32x32xf32> to vector<32xf32>
      %453 = vector.shape_cast %452 : vector<32xf32> to vector<32x1xf32>
      %cst_313 = arith.constant 3.200000e+01 : f32
      %454 = vector.broadcast %cst_313 : f32 to vector<32x1xf32>
      %455 = arith.divf %453, %454 : vector<32x1xf32>
      %456 = vector.broadcast %448 : vector<32x1xf32> to vector<32x32xf32>
      %457 = arith.subf %442, %456 : vector<32x32xf32>
      %cst_314 = arith.constant 9.99999974E-6 : f32
      %458 = vector.broadcast %cst_314 : f32 to vector<32x1xf32>
      %459 = arith.addf %455, %458 : vector<32x1xf32>
      %460 = math.rsqrt %459 : vector<32x1xf32>
      %461 = vector.broadcast %460 : vector<32x1xf32> to vector<32x32xf32>
      %462 = arith.mulf %457, %461 : vector<32x32xf32>
      %463 = vector.broadcast %443 : vector<1x32xf32> to vector<32x32xf32>
      %464 = arith.mulf %462, %463 : vector<32x32xf32>
      %465 = vector.broadcast %444 : vector<1x32xf32> to vector<32x32xf32>
      %466 = arith.addf %464, %465 : vector<32x32xf32>
      %467 = arith.truncf %466 : vector<32x32xf32> to vector<32x32xbf16>
      %c0_315 = arith.constant 0 : index
      %c0_316 = arith.constant 0 : index
      %468 = vector.load %arg39[%c0_315, %c0_316] : memref<32x32xbf16, #tpu.memory_space<vmem>>, vector<32x32xbf16>
      tpu.vector_store %arg39[%c0_315, %c0_316], %467 {strides = array<i32>} : memref<32x32xbf16, #tpu.memory_space<vmem>>, vector<32x32xbf16>,
    } else {
    }
    %c0 = arith.constant 0 : index
    %c0_1 = arith.constant 0 : index
    %3 = vector.load %arg39[%c0, %c0_1] : memref<32x32xbf16, #tpu.memory_space<vmem>>, vector<32x32xbf16>
    %c0_2 = arith.constant 0 : index
    %c0_3 = arith.constant 0 : index
    %4 = vector.load %arg36[%c0_2, %c0_3] : memref<32x10240xbf16, #tpu.memory_space<vmem>>, vector<32x10240xbf16>
    %cst = arith.constant dense<0.000000e+00> : vector<32x10240xf32>
    %5 = tpu.matmul %3, %4, %cst {dimension_numbers = #tpu.dot_dimension_numbers<[1], [0], [0], [1], [0, 0, 1, 1], [], []>} : vector<32x32xbf16>, vector<32x10240xbf16>, vector<32x10240xf32> -> vector<32x10240xf32>
    %c0_4 = arith.constant 0 : index
    %c0_5 = arith.constant 0 : index
    %6 = vector.load %arg37[%c0_4, %c0_5] : memref<1x10240xf32, #tpu.memory_space<vmem>>, vector<1x10240xf32>
    %7 = vector.broadcast %6 : vector<1x10240xf32> to vector<32x10240xf32>
    %8 = arith.addf %5, %7 : vector<32x10240xf32>
    %9 = arith.truncf %8 : vector<32x10240xf32> to vector<32x10240xbf16>
    %c0_6 = arith.constant 0 : index
    %c0_7 = arith.constant 0 : index
    %10 = vector.load %arg38[%c0_6, %c0_7] : memref<32x10240xbf16, #tpu.memory_space<vmem>>, vector<32x10240xbf16>
    tpu.vector_store %arg38[%c0_6, %c0_7], %9 {strides = array<i32>} : memref<32x10240xbf16, #tpu.memory_space<vmem>>, vector<32x10240xbf16>,
    return
  }
  func.func @transform_0(%arg0: i32) -> (i32, i32) {
    %c0_i32 = arith.constant 0 : i32
    %c0_i32_0 = arith.constant 0 : i32
    %c0_i32_1 = arith.constant 0 : i32
    return %c0_i32, %c0_i32_0 : i32, i32
  }
  func.func @transform_1(%arg0: i32) -> (i32, i32) {
    %c0_i32 = arith.constant 0 : i32
    %c0_i32_0 = arith.constant 0 : i32
    %c0_i32_1 = arith.constant 0 : i32
    return %c0_i32, %c0_i32_0 : i32, i32
  }
  func.func @transform_2(%arg0: i32) -> (i32, i32) {
    %c0_i32 = arith.constant 0 : i32
    %c0_i32_0 = arith.constant 0 : i32
    %c0_i32_1 = arith.constant 0 : i32
    return %c0_i32, %c0_i32_0 : i32, i32
  }
  func.func @transform_3(%arg0: i32) -> (i32, i32, i32) {
    %c0_i32 = arith.constant 0 : i32
    %c0_i32_0 = arith.constant 0 : i32
    %c0_i32_1 = arith.constant 0 : i32
    %c0_i32_2 = arith.constant 0 : i32
    return %c0_i32, %c0_i32_0, %c0_i32_1 : i32, i32, i32
  }
  func.func @transform_4(%arg0: i32) -> (i32, i32, i32) {
    %c0_i32 = arith.constant 0 : i32
    %c0_i32_0 = arith.constant 0 : i32
    %c0_i32_1 = arith.constant 0 : i32
    %c0_i32_2 = arith.constant 0 : i32
    return %c0_i32, %c0_i32_0, %c0_i32_1 : i32, i32, i32
  }
  func.func @transform_5(%arg0: i32) -> (i32, i32, i32) {
    %c0_i32 = arith.constant 0 : i32
    %c0_i32_0 = arith.constant 0 : i32
    %c0_i32_1 = arith.constant 0 : i32
    %c0_i32_2 = arith.constant 0 : i32
    return %c0_i32, %c0_i32_0, %c0_i32_1 : i32, i32, i32
  }
  func.func @transform_6(%arg0: i32) -> (i32, i32, i32) {
    %c0_i32 = arith.constant 0 : i32
    %c0_i32_0 = arith.constant 0 : i32
    %c0_i32_1 = arith.constant 0 : i32
    %c0_i32_2 = arith.constant 0 : i32
    return %c0_i32, %c0_i32_0, %c0_i32_1 : i32, i32, i32
  }
  func.func @transform_7(%arg0: i32) -> (i32, i32, i32) {
    %c0_i32 = arith.constant 0 : i32
    %c0_i32_0 = arith.constant 0 : i32
    %c0_i32_1 = arith.constant 0 : i32
    %c0_i32_2 = arith.constant 0 : i32
    return %c0_i32, %c0_i32_0, %c0_i32_1 : i32, i32, i32
  }
  func.func @transform_8(%arg0: i32) -> (i32, i32, i32) {
    %c0_i32 = arith.constant 0 : i32
    %c0_i32_0 = arith.constant 0 : i32
    %c0_i32_1 = arith.constant 0 : i32
    %c0_i32_2 = arith.constant 0 : i32
    return %c0_i32, %c0_i32_0, %c0_i32_1 : i32, i32, i32
  }
  func.func @transform_9(%arg0: i32) -> (i32, i32, i32) {
    %c0_i32 = arith.constant 0 : i32
    %c0_i32_0 = arith.constant 0 : i32
    %c0_i32_1 = arith.constant 0 : i32
    %c0_i32_2 = arith.constant 0 : i32
    return %c0_i32, %c0_i32_0, %c0_i32_1 : i32, i32, i32
  }
  func.func @transform_10(%arg0: i32) -> (i32, i32) {
    %c0_i32 = arith.constant 0 : i32
    %c0_i32_0 = arith.constant 0 : i32
    %c0_i32_1 = arith.constant 0 : i32
    return %c0_i32, %c0_i32_0 : i32, i32
  }
  func.func @transform_11(%arg0: i32) -> (i32, i32) {
    %c0_i32 = arith.constant 0 : i32
    %c0_i32_0 = arith.constant 0 : i32
    %c0_i32_1 = arith.constant 0 : i32
    return %c0_i32, %c0_i32_0 : i32, i32
  }
  func.func @transform_12(%arg0: i32) -> (i32, i32) {
    %c0_i32 = arith.constant 0 : i32
    %c0_i32_0 = arith.constant 0 : i32
    %c0_i32_1 = arith.constant 0 : i32
    return %c0_i32, %c0_i32_0 : i32, i32
  }
  func.func @transform_13(%arg0: i32) -> (i32, i32) {
    %c0_i32 = arith.constant 0 : i32
    %c0_i32_0 = arith.constant 0 : i32
    %c0_i32_1 = arith.constant 0 : i32
    return %c0_i32, %c0_i32_0 : i32, i32
  }
  func.func @transform_14(%arg0: i32) -> (i32, i32) {
    %c0_i32 = arith.constant 0 : i32
    %c0_i32_0 = arith.constant 0 : i32
    %c0_i32_1 = arith.constant 0 : i32
    return %c0_i32, %c0_i32_0 : i32, i32
  }
  func.func @transform_15(%arg0: i32) -> (i32, i32) {
    %c0_i32 = arith.constant 0 : i32
    %c0_i32_0 = arith.constant 0 : i32
    %c0_i32_1 = arith.constant 0 : i32
    return %c0_i32, %c0_i32_0 : i32, i32
  }
  func.func @transform_16(%arg0: i32) -> (i32, i32) {
    %c0_i32 = arith.constant 0 : i32
    %c0_i32_0 = arith.constant 0 : i32
    %c0_i32_1 = arith.constant 0 : i32
    return %c0_i32, %c0_i32_0 : i32, i32
  }
  func.func @transform_17(%arg0: i32) -> (i32, i32) {
    %c0_i32 = arith.constant 0 : i32
    %c0_i32_0 = arith.constant 0 : i32
    %c0_i32_1 = arith.constant 0 : i32
    return %c0_i32, %c0_i32_0 : i32, i32
  }
  func.func @transform_18(%arg0: i32) -> (i32, i32) {
    %c0_i32 = arith.constant 0 : i32
    %c0_i32_0 = arith.constant 0 : i32
    %c0_i32_1 = arith.constant 0 : i32
    return %c0_i32, %c0_i32_0 : i32, i32
  }
  func.func @transform_19(%arg0: i32) -> (i32, i32, i32) {
    %c0_i32 = arith.constant 0 : i32
    %c0_i32_0 = arith.constant 0 : i32
    %c0_i32_1 = arith.constant 0 : i32
    %c0_i32_2 = arith.constant 0 : i32
    return %c0_i32, %c0_i32_0, %c0_i32_1 : i32, i32, i32
  }
  func.func @transform_20(%arg0: i32) -> (i32, i32, i32) {
    %c0_i32 = arith.constant 0 : i32
    %c0_i32_0 = arith.constant 0 : i32
    %c0_i32_1 = arith.constant 0 : i32
    %c0_i32_2 = arith.constant 0 : i32
    return %c0_i32, %c0_i32_0, %c0_i32_1 : i32, i32, i32
  }
  func.func @transform_21(%arg0: i32) -> (i32, i32, i32) {
    %c0_i32 = arith.constant 0 : i32
    %c0_i32_0 = arith.constant 0 : i32
    %c0_i32_1 = arith.constant 0 : i32
    %c0_i32_2 = arith.constant 0 : i32
    return %c0_i32, %c0_i32_0, %c0_i32_1 : i32, i32, i32
  }
  func.func @transform_22(%arg0: i32) -> (i32, i32, i32) {
    %c0_i32 = arith.constant 0 : i32
    %c0_i32_0 = arith.constant 0 : i32
    %c0_i32_1 = arith.constant 0 : i32
    %c0_i32_2 = arith.constant 0 : i32
    return %c0_i32, %c0_i32_0, %c0_i32_1 : i32, i32, i32
  }
  func.func @transform_23(%arg0: i32) -> (i32, i32, i32) {
    %c0_i32 = arith.constant 0 : i32
    %c0_i32_0 = arith.constant 0 : i32
    %c0_i32_1 = arith.constant 0 : i32
    %c0_i32_2 = arith.constant 0 : i32
    return %c0_i32, %c0_i32_0, %c0_i32_1 : i32, i32, i32
  }
  func.func @transform_24(%arg0: i32) -> (i32, i32, i32) {
    %c0_i32 = arith.constant 0 : i32
    %c0_i32_0 = arith.constant 0 : i32
    %c0_i32_1 = arith.constant 0 : i32
    %c0_i32_2 = arith.constant 0 : i32
    return %c0_i32, %c0_i32_0, %c0_i32_1 : i32, i32, i32
  }
  func.func @transform_25(%arg0: i32) -> (i32, i32, i32) {
    %c0_i32 = arith.constant 0 : i32
    %c0_i32_0 = arith.constant 0 : i32
    %c0_i32_1 = arith.constant 0 : i32
    %c0_i32_2 = arith.constant 0 : i32
    return %c0_i32, %c0_i32_0, %c0_i32_1 : i32, i32, i32
  }
  func.func @transform_26(%arg0: i32) -> (i32, i32) {
    %c0_i32 = arith.constant 0 : i32
    %c0_i32_0 = arith.constant 0 : i32
    %c0_i32_1 = arith.constant 0 : i32
    return %c0_i32, %c0_i32_0 : i32, i32
  }
  func.func @transform_27(%arg0: i32) -> (i32, i32) {
    %c0_i32 = arith.constant 0 : i32
    %c0_i32_0 = arith.constant 0 : i32
    %c0_i32_1 = arith.constant 0 : i32
    return %c0_i32, %c0_i32_0 : i32, i32
  }
  func.func @transform_28(%arg0: i32) -> (i32, i32) {
    %c0_i32 = arith.constant 0 : i32
    %c0_i32_0 = arith.constant 0 : i32
    %c0_i32_1 = arith.constant 0 : i32
    return %c0_i32, %c0_i32_0 : i32, i32
  }
  func.func @transform_29(%arg0: i32) -> (i32, i32) {
    %c0_i32 = arith.constant 0 : i32
    %c0_i32_0 = arith.constant 0 : i32
    %c0_i32_1 = arith.constant 0 : i32
    return %c0_i32, %c0_i32_0 : i32, i32
  }
  func.func @transform_30(%arg0: i32) -> (i32, i32) {
    %c0_i32 = arith.constant 0 : i32
    %c0_i32_0 = arith.constant 0 : i32
    %c0_i32_1 = arith.constant 0 : i32
    return %c0_i32, %c0_i32_0 : i32, i32
  }
  func.func @transform_31(%arg0: i32) -> (i32, i32) {
    %c0_i32 = arith.constant 0 : i32
    %c0_i32_0 = arith.constant 0 : i32
    %c0_i32_1 = arith.constant 0 : i32
    return %c0_i32, %c0_i32_0 : i32, i32
  }
  func.func @transform_32(%arg0: i32) -> (i32, i32) {
    %c0_i32 = arith.constant 0 : i32
    %c0_i32_0 = arith.constant 0 : i32
    %c0_i32_1 = arith.constant 0 : i32
    return %c0_i32, %c0_i32_0 : i32, i32
  }
  func.func @transform_33(%arg0: i32) -> (i32, i32) {
    %c0_i32 = arith.constant 0 : i32
    %c0_i32_0 = arith.constant 0 : i32
    %c0_i32_1 = arith.constant 0 : i32
    return %c0_i32, %c0_i32_0 : i32, i32
  }
  func.func @transform_34(%arg0: i32) -> (i32, i32) {
    %c0_i32 = arith.constant 0 : i32
    %c0_i32_0 = arith.constant 0 : i32
    %c0_i32_1 = arith.constant 0 : i32
    return %c0_i32, %c0_i32_0 : i32, i32
  }
  func.func @transform_35(%arg0: i32) -> (i32, i32) {
    %c0_i32 = arith.constant 0 : i32
    %c0_i32_0 = arith.constant 0 : i32
    return %c0_i32, %arg0 : i32, i32
  }
  func.func @transform_36(%arg0: i32) -> (i32, i32) {
    %c0_i32 = arith.constant 0 : i32
    %c0_i32_0 = arith.constant 0 : i32
    return %c0_i32, %arg0 : i32, i32
  }
  func.func @transform_37(%arg0: i32) -> (i32, i32) {
    %c0_i32 = arith.constant 0 : i32
    %c0_i32_0 = arith.constant 0 : i32
    return %c0_i32, %arg0 : i32, i32
  }
}

</mosaic_0001>

<bundles_post_ra>
// kernel: tile.8
= control target key start
LH: loop header
LB: loop body
LE: loop exit
PB: predicated region body
PF: predicated region fallthrough
CT: control target
= control target key end

     0   :  { %2 = vsyncpa [#allocation1], 0  ;;  %s147_s8 = smov [#allocation0]   ;;  %s257_s0 = inlined_call_operand.hbm [shape: f32[4,4], index: 0, kind: input, shape index: {}]   ;;  %s258_s1 = inlined_call_operand.vmem [shape: f32[8,4,8,4], index: 1, kind: output, shape index: {}]  }
   0x1   :  { %s8_s0 = sshll.u32 %s257_s0, 4  ;;  %s10_s9 = sshll.u32 %s147_s8, 4  ;;  %s9_s0 = int_to_ptr.hbm [resolvable:$true] %s8_s0  ;;  %s11_s9 = int_to_ptr.vmem [resolvable:$true] %s10_s9 }
   0x2   :  { %13 = dma.hbm_to_vmem [thread:$0]  %s9_s0, 64, %s11_s9, [#allocation1]  }
   0x3   :  { %145 = dma.done.wait [#allocation1], 64  }
   0x4   :  { %146 = vsyncadd [#allocation1], 4294967232  ;;  %v18_v0 = vld [vmem:[#allocation0] ss:$0 sm:$0xff]  ;;  %v35_v1 = vld [vmem:[#allocation0 + $0x1] ss:$0 sm:$0xff] }
   0x5   :  { %19 = vst [vmem:[%s258_s1] sm:$0xff] %v18_v0  ;;  %v53_v2 = vld [vmem:[#allocation0 + $0x2] ss:$0 sm:$0xff]  ;;  %v71_v3 = vld [vmem:[#allocation0 + $0x3] ss:$0 sm:$0xff] }
   0x6   :  { %89 = vst [vmem:[%s258_s1 + $0x20] sm:$0xff] %v18_v0 }
   0x7   :  { %90 = vst [vmem:[%s258_s1 + $0x40] sm:$0xff] %v18_v0 }
   0x8   :  { %91 = vst [vmem:[%s258_s1 + $0x60] sm:$0xff] %v18_v0 }
   0x9   :  { %92 = vst [vmem:[%s258_s1 + $0x80] sm:$0xff] %v18_v0 }
   0xa   :  { %93 = vst [vmem:[%s258_s1 + $0xa0] sm:$0xff] %v18_v0 }
   0xb   :  { %94 = vst [vmem:[%s258_s1 + $0xc0] sm:$0xff] %v18_v0 }
   0xc   :  { %95 = vst [vmem:[%s258_s1 + $0xe0] sm:$0xff] %v18_v0 }
   0xd   :  { %96 = vst [vmem:[%s258_s1 + $0x8] sm:$0xff] %v35_v1 }
   0xe   :  { %97 = vst [vmem:[%s258_s1 + $0x28] sm:$0xff] %v35_v1 }
   0xf   :  { %98 = vst [vmem:[%s258_s1 + $0x48] sm:$0xff] %v35_v1 }
  0x10   :  { %99 = vst [vmem:[%s258_s1 + $0x68] sm:$0xff] %v35_v1 }
  0x11   :  { %100 = vst [vmem:[%s258_s1 + $0x88] sm:$0xff] %v35_v1 }
  0x12   :  { %101 = vst [vmem:[%s258_s1 + $0xa8] sm:$0xff] %v35_v1 }
  0x13   :  { %102 = vst [vmem:[%s258_s1 + $0xc8] sm:$0xff] %v35_v1 }
  0x14   :  { %103 = vst [vmem:[%s258_s1 + $0xe8] sm:$0xff] %v35_v1 }
  0x15   :  { %104 = vst [vmem:[%s258_s1 + $0x10] sm:$0xff] %v53_v2 }
  0x16   :  { %105 = vst [vmem:[%s258_s1 + $0x30] sm:$0xff] %v53_v2 }
  0x17   :  { %106 = vst [vmem:[%s258_s1 + $0x50] sm:$0xff] %v53_v2 }
  0x18   :  { %107 = vst [vmem:[%s258_s1 + $0x70] sm:$0xff] %v53_v2 }
  0x19   :  { %108 = vst [vmem:[%s258_s1 + $0x90] sm:$0xff] %v53_v2 }
  0x1a   :  { %109 = vst [vmem:[%s258_s1 + $0xb0] sm:$0xff] %v53_v2 }
  0x1b   :  { %110 = vst [vmem:[%s258_s1 + $0xd0] sm:$0xff] %v53_v2 }
  0x1c   :  { %111 = vst [vmem:[%s258_s1 + $0xf0] sm:$0xff] %v53_v2 }
  0x1d   :  { %112 = vst [vmem:[%s258_s1 + $0x18] sm:$0xff] %v71_v3 }
  0x1e   :  { %113 = vst [vmem:[%s258_s1 + $0x38] sm:$0xff] %v71_v3 }
  0x1f   :  { %114 = vst [vmem:[%s258_s1 + $0x58] sm:$0xff] %v71_v3 }
  0x20   :  { %115 = vst [vmem:[%s258_s1 + $0x78] sm:$0xff] %v71_v3 }
  0x21   :  { %116 = vst [vmem:[%s258_s1 + $0x98] sm:$0xff] %v71_v3 }
  0x22   :  { %117 = vst [vmem:[%s258_s1 + $0xb8] sm:$0xff] %v71_v3 }
  0x23   :  { %118 = vst [vmem:[%s258_s1 + $0xd8] sm:$0xff] %v71_v3 }
  0x24   :  { %119 = vst [vmem:[%s258_s1 + $0xf8] sm:$0xff] %v71_v3 }
  0x25   :  { %88 = vsyncpa [#allocation1], 1 }

// kernel: tile.9
= control target key start
LH: loop header
LB: loop body
LE: loop exit
PB: predicated region body
PF: predicated region fallthrough
CT: control target
= control target key end

     0   :  { %vm4_vm0 = vcmask 1047556   ;;  %s429_s14 = smov 28   ;;  %s430_s27 = smov 24   ;;  %vm6_vm1 = vcmask 31744   ;;  %vm43_vm2 = vcmask 261344   ;;  %vm86_vm3 = vcmask 228544   ;;  %s782_s0 = inlined_call_operand.vmem [shape: f32[8,4,8,4], index: 0, kind: input, shape index: {}]   ;;  %s783_s1 = inlined_call_operand.vmem [shape: f32[32,32], index: 1, kind: output, shape index: {}]  }
   0x1   :  { %v345_v0 = vld [vmem:[%s782_s0 + $0x7] ss:$8 sm:$0xf]   ;;  %v356_v11 = vld [vmem:[%s782_s0 + $0x6] ss:$8 sm:$0xf]  }
   0x2   :  { %v346_v1 = vld [vmem:[%s782_s0 + $0x7] ss:$8 sm:$0xf0]   ;;  %v357_v13 = vld [vmem:[%s782_s0 + $0x6] ss:$8 sm:$0xf0]  }
   0x3   :  { %v40_v2 = vsel %vm4_vm0, %v346_v1, %v345_v0  ;;  %v350_v3 = vld [vmem:[%s782_s0 + $0x87] ss:$8 sm:$0xf]   ;;  %v83_v14 = vsel %vm4_vm0, %v357_v13, %v356_v11  ;;  %v361_v15 = vld [vmem:[%s782_s0 + $0x86] ss:$8 sm:$0xf]  }
   0x4   :  { %v351_v4 = vld [vmem:[%s782_s0 + $0x87] ss:$8 sm:$0xf0]   ;;  %41 = vrot.lane.b32.xlu0 %v40_v2, %s429_s14  ;;  %84 = vrot.lane.b32.xlu2 %v83_v14, %s430_s27  ;;  %v362_v16 = vld [vmem:[%s782_s0 + $0x86] ss:$8 sm:$0xf0]  }
   0x5   :  { %v61_v5 = vsel %vm4_vm0, %v351_v4, %v350_v3  ;;  %v347_v6 = vld [vmem:[%s782_s0 + $0x47] ss:$8 sm:$0xf]   ;;  %v358_v17 = vld [vmem:[%s782_s0 + $0x46] ss:$8 sm:$0xf]   ;;  %v104_v21 = vsel %vm4_vm0, %v362_v16, %v361_v15 }
   0x6   :  { %62 = vrot.lane.b32.xlu1 %v61_v5, %s429_s14  ;;  %v348_v7 = vld [vmem:[%s782_s0 + $0x47] ss:$8 sm:$0xf0]   ;;  %v359_v18 = vld [vmem:[%s782_s0 + $0x46] ss:$8 sm:$0xf0]  }
   0x7   :  { %v353_v8 = vld [vmem:[%s782_s0 + $0xc7] ss:$8 sm:$0xf]   ;;  %v50_v10 = vsel %vm4_vm0, %v348_v7, %v347_v6  ;;  %v364_v19 = vld [vmem:[%s782_s0 + $0xc6] ss:$8 sm:$0xf]   ;;  %v93_v22 = vsel %vm4_vm0, %v359_v18, %v358_v17 }
   0x8   :  { %v354_v9 = vld [vmem:[%s782_s0 + $0xc7] ss:$8 sm:$0xf0]   ;;  %v365_v20 = vld [vmem:[%s782_s0 + $0xc6] ss:$8 sm:$0xf0]  }
   0x9   :  { %v72_v12 = vsel %vm4_vm0, %v354_v9, %v353_v8  ;;  %v115_v23 = vsel %vm4_vm0, %v365_v20, %v364_v19  ;;  %v369_v24 = vld [vmem:[%s782_s0 + $0x45] ss:$8 sm:$0xf]   ;;  %s431_s23 = smov 20   ;;  %s432_s7 = smov 16   ;;  %vm129_vm4 = vcmask 195744  }
   0xa   :  { %v370_v25 = vld [vmem:[%s782_s0 + $0x45] ss:$8 sm:$0xf0]   ;;  %v378_v33 = vld [vmem:[%s782_s0 + $0x4] ss:$8 sm:$0xf]  }
   0xb   :  { %v367_v26 = vld [vmem:[%s782_s0 + $0x5] ss:$8 sm:$0xf]   ;;  %v136_v30 = vsel %vm4_vm0, %v370_v25, %v369_v24  ;;  %v379_v34 = vld [vmem:[%s782_s0 + $0x4] ss:$8 sm:$0xf0]  }
   0xc   :  { %51 = vrot.lane.b32.xlu0 %v50_v10, %s429_s14  ;;  %94 = vrot.lane.b32.xlu2 %v93_v22, %s430_s27  ;;  %v368_v27 = vld [vmem:[%s782_s0 + $0x5] ss:$8 sm:$0xf0]   ;;  %v380_v37 = vld [vmem:[%s782_s0 + $0x44] ss:$8 sm:$0xf]   ;;  %v169_v39 = vsel %vm4_vm0, %v379_v34, %v378_v33 }
   0xd   :  { %v372_v28 = vld [vmem:[%s782_s0 + $0x85] ss:$8 sm:$0xf]   ;;  %v126_v31 = vsel %vm4_vm0, %v368_v27, %v367_v26  ;;  %v381_v38 = vld [vmem:[%s782_s0 + $0x44] ss:$8 sm:$0xf0]  }
   0xe   :  { %73 = vrot.lane.b32.xlu1 %v72_v12, %s429_s14  ;;  %v373_v29 = vld [vmem:[%s782_s0 + $0x85] ss:$8 sm:$0xf0]   ;;  %v179_v41 = vsel %vm4_vm0, %v381_v38, %v380_v37  ;;  %v386_v42 = vld [vmem:[%s782_s0 + $0xc4] ss:$8 sm:$0xf]  }
   0xf   :  { %v147_v32 = vsel %vm4_vm0, %v373_v29, %v372_v28  ;;  %v375_v35 = vld [vmem:[%s782_s0 + $0xc5] ss:$8 sm:$0xf]   ;;  %v387_v43 = vld [vmem:[%s782_s0 + $0xc4] ss:$8 sm:$0xf0]  }
  0x10   :  { %v376_v36 = vld [vmem:[%s782_s0 + $0xc5] ss:$8 sm:$0xf0]   ;;  %v383_v44 = vld [vmem:[%s782_s0 + $0x84] ss:$8 sm:$0xf]   ;;  %v201_v48 = vsel %vm4_vm0, %v387_v43, %v386_v42 }
  0x11   :  { %v158_v40 = vsel %vm4_vm0, %v376_v36, %v375_v35  ;;  %v384_v45 = vld [vmem:[%s782_s0 + $0x84] ss:$8 sm:$0xf0]   ;;  %v389_v46 = vld [vmem:[%s782_s0 + $0x3] ss:$8 sm:$0xf]  }
  0x12   :  { %v390_v47 = vld [vmem:[%s782_s0 + $0x3] ss:$8 sm:$0xf0]   ;;  %v190_v49 = vsel %vm4_vm0, %v384_v45, %v383_v44  ;;  %s433_s20 = smov 12   ;;  %s434_s16 = smov 8   ;;  %vm172_vm5 = vcmask 162944  }
  0x13   :  { %v212_v50 = vsel %vm4_vm0, %v390_v47, %v389_v46  ;;  %v394_v51 = vld [vmem:[%s782_s0 + $0x83] ss:$8 sm:$0xf]   ;;  %v402_v60 = vld [vmem:[%s782_s0 + $0x42] ss:$8 sm:$0xf]  }
  0x14   :  { %105 = vrot.lane.b32.xlu0 %v104_v21, %s430_s27  ;;  %127 = vrot.lane.b32.xlu2 %v126_v31, %s431_s23  ;;  %v395_v52 = vld [vmem:[%s782_s0 + $0x83] ss:$8 sm:$0xf0]   ;;  %v403_v61 = vld [vmem:[%s782_s0 + $0x42] ss:$8 sm:$0xf0]  }
  0x15   :  { %v391_v53 = vld [vmem:[%s782_s0 + $0x43] ss:$8 sm:$0xf]   ;;  %v233_v57 = vsel %vm4_vm0, %v395_v52, %v394_v51  ;;  %v400_v62 = vld [vmem:[%s782_s0 + $0x2] ss:$8 sm:$0xf]   ;;  %v265_v2 = vsel %vm4_vm0, %v403_v61, %v402_v60 }
  0x16   :  { %116 = vrot.lane.b32.xlu1 %v115_v23, %s430_s27  ;;  %v392_v54 = vld [vmem:[%s782_s0 + $0x43] ss:$8 sm:$0xf0]   ;;  %v401_v63 = vld [vmem:[%s782_s0 + $0x2] ss:$8 sm:$0xf0]  }
  0x17   :  { %v397_v55 = vld [vmem:[%s782_s0 + $0xc3] ss:$8 sm:$0xf]   ;;  %v222_v58 = vsel %vm4_vm0, %v392_v54, %v391_v53  ;;  %v405_v0 = vld [vmem:[%s782_s0 + $0x82] ss:$8 sm:$0xf]   ;;  %v255_v3 = vsel %vm4_vm0, %v401_v63, %v400_v62 }
  0x18   :  { %v398_v56 = vld [vmem:[%s782_s0 + $0xc3] ss:$8 sm:$0xf0]   ;;  %v406_v1 = vld [vmem:[%s782_s0 + $0x82] ss:$8 sm:$0xf0]  }
  0x19   :  { %v244_v59 = vsel %vm4_vm0, %v398_v56, %v397_v55  ;;  %v276_v4 = vsel %vm4_vm0, %v406_v1, %v405_v0  ;;  %v411_v5 = vld [vmem:[%s782_s0 + $0x1] ss:$8 sm:$0xf]   ;;  %v408_v7 = vld [vmem:[%s782_s0 + $0xc2] ss:$8 sm:$0xf]  }
  0x1a   :  { %v412_v6 = vld [vmem:[%s782_s0 + $0x1] ss:$8 sm:$0xf0]   ;;  %v409_v8 = vld [vmem:[%s782_s0 + $0xc2] ss:$8 sm:$0xf0]  }
  0x1b   :  { %v413_v9 = vld [vmem:[%s782_s0 + $0x41] ss:$8 sm:$0xf]   ;;  %v298_v11 = vsel %vm4_vm0, %v412_v6, %v411_v5  ;;  %v287_v12 = vsel %vm4_vm0, %v409_v8, %v408_v7  ;;  %s435_s29 = smov 4   ;;  %vm215_vm6 = vcmask 130144   ;;  %vm258_vm7 = vcmask 97344  }
  0x1c   :  { %137 = vrot.lane.b32.xlu0 %v136_v30, %s431_s23  ;;  %159 = vrot.lane.b32.xlu2 %v158_v40, %s431_s23  ;;  %v414_v10 = vld [vmem:[%s782_s0 + $0x41] ss:$8 sm:$0xf0]   ;;  %v2_v20 = vld [vmem:[%s782_s0] ss:$8 sm:$0xf]  }
  0x1d   :  { %v308_v13 = vsel %vm4_vm0, %v414_v10, %v413_v9  ;;  %v419_v14 = vld [vmem:[%s782_s0 + $0xc1] ss:$8 sm:$0xf]   ;;  %v3_v21 = vld [vmem:[%s782_s0] ss:$8 sm:$0xf0]  }
  0x1e   :  { %148 = vrot.lane.b32.xlu1 %v147_v32, %s431_s23  ;;  %v420_v15 = vld [vmem:[%s782_s0 + $0xc1] ss:$8 sm:$0xf0]   ;;  %v5_v22 = vsel %vm4_vm0, %v3_v21, %v2_v20  ;;  %v339_v23 = vld [vmem:[%s782_s0 + $0x80] ss:$8 sm:$0xf]  }
  0x1f   :  { %v416_v16 = vld [vmem:[%s782_s0 + $0x81] ss:$8 sm:$0xf]   ;;  %v330_v18 = vsel %vm4_vm0, %v420_v15, %v419_v14  ;;  %7 = vst.msk [vmem:[%s783_s1] sm:$0xff] %vm6_vm1, %v5_v22   ;;  %vm301_vm8 = vcmask 64544  }
  0x20   :  { %v417_v17 = vld [vmem:[%s782_s0 + $0x81] ss:$8 sm:$0xf0]   ;;  %v340_v24 = vld [vmem:[%s782_s0 + $0x80] ss:$8 sm:$0xf0]  }
  0x21   :  { %v319_v19 = vsel %vm4_vm0, %v417_v17, %v416_v16  ;;  %v22_v25 = vsel %vm4_vm0, %v340_v24, %v339_v23  ;;  %v336_v26 = vld [vmem:[%s782_s0 + $0x40] ss:$8 sm:$0xf]  }
  0x22   :  { %341 = vst.msk [vmem:[%s783_s1 + $0x10] sm:$0xff] %vm6_vm1, %v22_v25   ;;  %v337_v27 = vld [vmem:[%s782_s0 + $0x40] ss:$8 sm:$0xf0]  }
  0x23   :  { %v13_v28 = vsel %vm4_vm0, %v337_v27, %v336_v26  ;;  %v342_v29 = vld [vmem:[%s782_s0 + $0xc0] ss:$8 sm:$0xf]  }
  0x24   :  { %170 = vrot.lane.b32.xlu0 %v169_v39, %s432_s7  ;;  %191 = vrot.lane.b32.xlu2 %v190_v49, %s432_s7  ;;  %338 = vst.msk [vmem:[%s783_s1 + $0x8] sm:$0xff] %vm6_vm1, %v13_v28   ;;  %v343_v30 = vld [vmem:[%s782_s0 + $0xc0] ss:$8 sm:$0xf0]  }
  0x25   :  { %v31_v31 = vsel %vm4_vm0, %v343_v30, %v342_v29 }
  0x26   :  { %180 = vrot.lane.b32.xlu1 %v179_v41, %s432_s7  ;;  %344 = vst.msk [vmem:[%s783_s1 + $0x18] sm:$0xff] %vm6_vm1, %v31_v31  }
  0x2c   :  { %202 = vrot.lane.b32.xlu0 %v201_v48, %s432_s7  ;;  %223 = vrot.lane.b32.xlu2 %v222_v58, %s433_s20 }
  0x2e   :  { %213 = vrot.lane.b32.xlu1 %v212_v50, %s433_s20 }
  0x34   :  { %234 = vrot.lane.b32.xlu0 %v233_v57, %s433_s20  ;;  %256 = vrot.lane.b32.xlu2 %v255_v3, %s434_s16 }
  0x36   :  { %245 = vrot.lane.b32.xlu1 %v244_v59, %s433_s20 }
  0x3c   :  { %266 = vrot.lane.b32.xlu0 %v265_v2, %s434_s16  ;;  %288 = vrot.lane.b32.xlu2 %v287_v12, %s434_s16 }
  0x3e   :  { %277 = vrot.lane.b32.xlu1 %v276_v4, %s434_s16 }
  0x44   :  { %299 = vrot.lane.b32.xlu0 %v298_v11, %s435_s29  ;;  %320 = vrot.lane.b32.xlu2 %v319_v19, %s435_s29 }
  0x46   :  { %309 = vrot.lane.b32.xlu1 %v308_v13, %s435_s29 }
  0x4c   :  { %331 = vrot.lane.b32.xlu0 %v330_v18, %s435_s29 }
  0x5e   :  { %v85_v32 = vpop.permute.xlu2 %84  }
  0x66   :  { %v95_v33 = vpop.permute.xlu2 %94  }
  0x6e   :  { %v128_v35 = vpop.permute.xlu2 %127  }
  0x76   :  { %v42_v34 = vpop.permute.xlu0 %41   ;;  %v160_v38 = vpop.permute.xlu2 %159  }
  0x77   :  { %44 = vst.msk [vmem:[%s783_s1] sm:$0xff] %vm43_vm2, %v42_v34  }
  0x78   :  { %v63_v36 = vpop.permute.xlu1 %62   ;;  %87 = vst.msk [vmem:[%s783_s1] sm:$0xff] %vm86_vm3, %v85_v32  }
  0x79   :  { %352 = vst.msk [vmem:[%s783_s1 + $0x10] sm:$0xff] %vm43_vm2, %v63_v36  }
  0x7a   :  { %130 = vst.msk [vmem:[%s783_s1] sm:$0xff] %vm129_vm4, %v128_v35  }
  0x7e   :  { %v52_v37 = vpop.permute.xlu0 %51   ;;  %v192_v41 = vpop.permute.xlu2 %191  }
  0x7f   :  { %349 = vst.msk [vmem:[%s783_s1 + $0x8] sm:$0xff] %vm43_vm2, %v52_v37  }
  0x80   :  { %v74_v39 = vpop.permute.xlu1 %73   ;;  %360 = vst.msk [vmem:[%s783_s1 + $0x8] sm:$0xff] %vm86_vm3, %v95_v33  }
  0x81   :  { %355 = vst.msk [vmem:[%s783_s1 + $0x18] sm:$0xff] %vm43_vm2, %v74_v39  }
  0x86   :  { %v106_v40 = vpop.permute.xlu0 %105   ;;  %v224_v44 = vpop.permute.xlu2 %223  }
  0x87   :  { %363 = vst.msk [vmem:[%s783_s1 + $0x10] sm:$0xff] %vm86_vm3, %v106_v40  }
  0x88   :  { %v117_v42 = vpop.permute.xlu1 %116  }
  0x89   :  { %366 = vst.msk [vmem:[%s783_s1 + $0x18] sm:$0xff] %vm86_vm3, %v117_v42  }
  0x8a   :  { %377 = vst.msk [vmem:[%s783_s1 + $0x18] sm:$0xff] %vm129_vm4, %v160_v38  }
  0x8e   :  { %v138_v43 = vpop.permute.xlu0 %137   ;;  %v257_v47 = vpop.permute.xlu2 %256  }
  0x8f   :  { %371 = vst.msk [vmem:[%s783_s1 + $0x8] sm:$0xff] %vm129_vm4, %v138_v43  }
  0x90   :  { %v149_v45 = vpop.permute.xlu1 %148  }
  0x91   :  { %374 = vst.msk [vmem:[%s783_s1 + $0x10] sm:$0xff] %vm129_vm4, %v149_v45  }
  0x92   :  { %385 = vst.msk [vmem:[%s783_s1 + $0x10] sm:$0xff] %vm172_vm5, %v192_v41  }
  0x96   :  { %v171_v46 = vpop.permute.xlu0 %170   ;;  %v289_v50 = vpop.permute.xlu2 %288  }
  0x97   :  { %173 = vst.msk [vmem:[%s783_s1] sm:$0xff] %vm172_vm5, %v171_v46  }
  0x98   :  { %v181_v48 = vpop.permute.xlu1 %180  }
  0x99   :  { %382 = vst.msk [vmem:[%s783_s1 + $0x8] sm:$0xff] %vm172_vm5, %v181_v48  }
  0x9a   :  { %393 = vst.msk [vmem:[%s783_s1 + $0x8] sm:$0xff] %vm215_vm6, %v224_v44  }
  0x9e   :  { %v203_v49 = vpop.permute.xlu0 %202   ;;  %v321_v53 = vpop.permute.xlu2 %320  }
  0x9f   :  { %388 = vst.msk [vmem:[%s783_s1 + $0x18] sm:$0xff] %vm172_vm5, %v203_v49  }
  0xa0   :  { %v214_v51 = vpop.permute.xlu1 %213  }
  0xa1   :  { %216 = vst.msk [vmem:[%s783_s1] sm:$0xff] %vm215_vm6, %v214_v51  }
  0xa2   :  { %259 = vst.msk [vmem:[%s783_s1] sm:$0xff] %vm258_vm7, %v257_v47  }
  0xa6   :  { %v235_v52 = vpop.permute.xlu0 %234  }
  0xa7   :  { %396 = vst.msk [vmem:[%s783_s1 + $0x10] sm:$0xff] %vm215_vm6, %v235_v52  }
  0xa8   :  { %v246_v54 = vpop.permute.xlu1 %245  }
  0xa9   :  { %399 = vst.msk [vmem:[%s783_s1 + $0x18] sm:$0xff] %vm215_vm6, %v246_v54  }
  0xaa   :  { %410 = vst.msk [vmem:[%s783_s1 + $0x18] sm:$0xff] %vm258_vm7, %v289_v50  }
  0xae   :  { %v267_v55 = vpop.permute.xlu0 %266  }
  0xaf   :  { %404 = vst.msk [vmem:[%s783_s1 + $0x8] sm:$0xff] %vm258_vm7, %v267_v55  }
  0xb0   :  { %v278_v56 = vpop.permute.xlu1 %277  }
  0xb1   :  { %407 = vst.msk [vmem:[%s783_s1 + $0x10] sm:$0xff] %vm258_vm7, %v278_v56  }
  0xb2   :  { %418 = vst.msk [vmem:[%s783_s1 + $0x10] sm:$0xff] %vm301_vm8, %v321_v53  }
  0xb6   :  { %v300_v57 = vpop.permute.xlu0 %299  }
  0xb7   :  { %302 = vst.msk [vmem:[%s783_s1] sm:$0xff] %vm301_vm8, %v300_v57  }
  0xb8   :  { %v310_v58 = vpop.permute.xlu1 %309  }
  0xb9   :  { %415 = vst.msk [vmem:[%s783_s1 + $0x8] sm:$0xff] %vm301_vm8, %v310_v58  }
  0xbe   :  { %v332_v59 = vpop.permute.xlu0 %331  }
  0xbf   :  { %421 = vst.msk [vmem:[%s783_s1 + $0x18] sm:$0xff] %vm301_vm8, %v332_v59  }

// kernel: transformer_model_forward.1
= control target key start
LH: loop header
LB: loop body
LE: loop exit
PB: predicated region body
PF: predicated region fallthrough
CT: control target
= control target key end

     0   :  { %s11510_s6 = smov 1   ;;  %s11511_s10 = smov 2   ;;  %s14682_s0 = inlined_call_operand.smem [shape: u32[38], index: -1, kind: input, shape index: {}] }
   0x1   :  { %s11591_s5 = sld [smem:[%s14682_s0]]   ;;  %s11512_s14 = smov 3  }
   0x2   :  { %s11596_s9 = sld [smem:[%s14682_s0 + %s11510_s6]]   ;;  %s11513_s18 = smov 4  }
   0x3   :  { %s11601_s13 = sld [smem:[%s14682_s0 + %s11511_s10]]   ;;  %s11514_s22 = smov 5  }
   0x4   :  { %s11606_s17 = sld [smem:[%s14682_s0 + %s11512_s14]]   ;;  %s11515_s26 = smov 6  }
   0x5   :  { %s11611_s21 = sld [smem:[%s14682_s0 + %s11513_s18]]   ;;  %s11516_s30 = smov 7  }
   0x6   :  { %s11616_s25 = sld [smem:[%s14682_s0 + %s11514_s22]]   ;;  %s11517_s4 = smov 8  }
   0x7   :  { %14746 = sst [smem:[#allocation61_spill]] %s11591_s5  ;;  %s11518_s10 = smov 9  }
   0x8   :  { %14747 = sst [smem:[#allocation62_spill]] %s11596_s9  ;;  %s11519_s15 = smov 10  }
   0x9   :  { %14748 = sst [smem:[#allocation63_spill]] %s11601_s13  ;;  %s11520_s20 = smov 11  }
   0xa   :  { %14749 = sst [smem:[#allocation64_spill]] %s11606_s17  ;;  %s11522_s1 = smov 13  }
   0xb   :  { %14750 = sst [smem:[#allocation65_spill]] %s11611_s21  ;;  %s11523_s7 = smov 14  }
   0xc   :  { %14751 = sst [smem:[#allocation66_spill]] %s11616_s25  ;;  %s11525_s22 = smov 16  }
   0xd   :  { %s11621_s29 = sld [smem:[%s14682_s0 + %s11515_s26]]   ;;  %s11521_s26 = smov 12  }
   0xe   :  { %s11626_s3 = sld [smem:[%s14682_s0 + %s11516_s30]]   ;;  %s11526_s28 = smov 17  }
   0xf   :  { %s11631_s8 = sld [smem:[%s14682_s0 + %s11517_s4]]  }
  0x10   :  { %s11636_s14 = sld [smem:[%s14682_s0 + %s11518_s10]]  }
  0x11   :  { %s11641_s19 = sld [smem:[%s14682_s0 + %s11519_s15]]   ;;  %s11524_s15 = smov 15  }
  0x12   :  { %s11646_s24 = sld [smem:[%s14682_s0 + %s11520_s20]]  }
  0x13   :  { %s11651_s30 = sld [smem:[%s14682_s0 + %s11521_s26]]  }
  0x14   :  { %14752 = sst [smem:[#allocation67_spill]] %s11626_s3 }
  0x15   :  { %14753 = sst [smem:[#allocation68_spill]] %s11631_s8 }
  0x16   :  { %14754 = sst [smem:[#allocation69_spill]] %s11636_s14 }
  0x17   :  { %14755 = sst [smem:[#allocation70_spill]] %s11641_s19 }
  0x18   :  { %s11656_s6 = sld [smem:[%s14682_s0 + %s11522_s1]]  }
  0x19   :  { %14756 = sst [smem:[#allocation71_spill]] %s11651_s30 }
  0x1a   :  { %s11661_s12 = sld [smem:[%s14682_s0 + %s11523_s7]]   ;;  %s11527_s7 = smov 18  }
  0x1b   :  { %s11666_s20 = sld [smem:[%s14682_s0 + %s11524_s15]]   ;;  %s11528_s15 = smov 19  }
  0x1c   :  { %s11671_s27 = sld [smem:[%s14682_s0 + %s11525_s22]]   ;;  %s11529_s22 = smov 20  }
  0x1d   :  { %s11676_s4 = sld [smem:[%s14682_s0 + %s11526_s28]]   ;;  %s11530_s28 = smov 21  }
  0x1e   :  { %14757 = sst [smem:[#allocation72_spill]] %s11656_s6 }
  0x1f   :  { %s11681_s13 = sld [smem:[%s14682_s0 + %s11527_s7]]   ;;  %s11531_s7 = smov 22  }
  0x20   :  { %14758 = sst [smem:[#allocation73_spill]] %s11661_s12 }
  0x21   :  { %14759 = sst [smem:[#allocation74_spill]] %s11666_s20 }
  0x22   :  { %s11686_s20 = sld [smem:[%s14682_s0 + %s11528_s15]]   ;;  %s11532_s15 = smov 23  }
  0x23   :  { %14760 = sst [smem:[#allocation75_spill]] %s11676_s4 }
  0x24   :  { %s11691_s25 = sld [smem:[%s14682_s0 + %s11529_s22]]   ;;  %s11533_s22 = smov 24  }
  0x25   :  { %14761 = sst [smem:[#allocation76_spill]] %s11681_s13 }
  0x26   :  { %s11696_s17 = sld [smem:[%s14682_s0 + %s11530_s28]]   ;;  %s11534_s28 = smov 25  }
  0x27   :  { %s11701_s21 = sld [smem:[%s14682_s0 + %s11531_s7]]   ;;  %s11535_s7 = smov 26  }
  0x28   :  { %14762 = sst [smem:[#allocation77_spill]] %s11686_s20 }
  0x29   :  { %s11706_s20 = sld [smem:[%s14682_s0 + %s11532_s15]]   ;;  %s11536_s15 = smov 27  }
  0x2a   :  { %14763 = sst [smem:[#allocation78_spill]] %s11691_s25 }
  0x2b   :  { %s11711_s25 = sld [smem:[%s14682_s0 + %s11533_s22]]   ;;  %s11537_s22 = smov 28  }
  0x2c   :  { %14764 = sst [smem:[#allocation79_spill]] %s11696_s17 }
  0x2d   :  { %14765 = sst [smem:[#allocation80_spill]] %s11701_s21 }
  0x2e   :  { %s11716_s17 = sld [smem:[%s14682_s0 + %s11534_s28]]   ;;  %s11538_s28 = smov 29  }
  0x2f   :  { %s11721_s21 = sld [smem:[%s14682_s0 + %s11535_s7]]   ;;  %s11539_s7 = smov 30  }
  0x30   :  { %s11726_s4 = sld [smem:[%s14682_s0 + %s11536_s15]]   ;;  %s11540_s15 = smov 31  }
  0x31   :  { %14766 = sst [smem:[#allocation81_spill]] %s11711_s25 }
  0x32   :  { %s11731_s25 = sld [smem:[%s14682_s0 + %s11537_s22]]   ;;  %s11541_s22 = smov 32  }
  0x33   :  { %s11736_s12 = sld [smem:[%s14682_s0 + %s11538_s28]]   ;;  %s11542_s28 = smov 33  }
  0x34   :  { %14767 = sst [smem:[#allocation82_spill]] %s11716_s17 }
  0x35   :  { %14768 = sst [smem:[#allocation83_spill]] %s11721_s21 }
  0x36   :  { %14769 = sst [smem:[#allocation84_spill]] %s11726_s4 }
  0x37   :  { %s11741_s21 = sld [smem:[%s14682_s0 + %s11539_s7]]   ;;  %s11543_s7 = smov 34  }
  0x38   :  { %14770 = sst [smem:[#allocation85_spill]] %s11731_s25 }
  0x39   :  { %14771 = sst [smem:[#allocation86_spill]] %s11736_s12 }
  0x3a   :  { %s11746_s30 = sld [smem:[%s14682_s0 + %s11540_s15]]   ;;  %s11544_s15 = smov 35  }
  0x3b   :  { %s11751_s25 = sld [smem:[%s14682_s0 + %s11541_s22]]   ;;  %s11545_s22 = smov 36  }
  0x3c   :  { %s11756_s19 = sld [smem:[%s14682_s0 + %s11542_s28]]   ;;  %s11546_s28 = smov 37  }
  0x3d   :  { %14772 = sst [smem:[#allocation87_spill]] %s11741_s21 }
  0x3e   :  { %s11761_s21 = sld [smem:[%s14682_s0 + %s11543_s7]]  }
  0x3f   :  { %s11771_s8 = sld [smem:[%s14682_s0 + %s11545_s22]]  }
  0x40   :  { %14773 = sst [smem:[#allocation88_spill]] %s11746_s30 }
  0x41   :  { %s11766_s30 = sld [smem:[%s14682_s0 + %s11544_s15]]  }
  0x42   :  { %14774 = sst [smem:[#allocation89_spill]] %s11756_s19 }
  0x43   :  { %s11776_s19 = sld [smem:[%s14682_s0 + %s11546_s28]]  }
  0x45   :  { %14775 = sst [smem:[#allocation90_spill]] %s11771_s8 }
  0x49   :  { %14776 = sst [smem:[#allocation91_spill]] %s11776_s19 }
  0x4a   :  { %80 = vsyncpa [#allocation4], 0 }
  0x4b   :  { %81 = vsyncpa [#allocation6], 0 }
  0x4c   :  { %82 = vsyncpa [#allocation9], 0 }
  0x4d   :  { %83 = vsyncpa [#allocation12], 0 }
  0x4e   :  { %84 = vsyncpa [#allocation15], 0 }
  0x4f   :  { %85 = vsyncpa [#allocation18], 0 }
  0x50   :  { %86 = vsyncpa [#allocation21], 0 }
  0x51   :  { %87 = vsyncpa [#allocation24], 0 }
  0x52   :  { %88 = vsyncpa [#allocation27], 0 }
  0x53   :  { %89 = vsyncpa [#allocation30], 0 }
  0x54   :  { %90 = vsyncpa [#allocation33], 0 }
  0x55   :  { %91 = vsyncpa [#allocation36], 0 }
  0x56   :  { %92 = vsyncpa [#allocation39], 0 }
  0x57   :  { %93 = vsyncpa [#allocation42], 0  ;;  %s11778_s7 = smov 0   ;;  %s11780_s10 = smov 0  }
  0x58   :  { %s11782_s0 = smov 0   ;;  %s11784_s11 = smov 0  }
  0x59 LB: > { %s14777_s17 = sld [smem:[#allocation82_spill]]  ;;  %s11797_s15 = sadd.s32 4294967295, %s11444_s11   ;;  %s11436_s10 = sphi %s11780_s10, %s14850_s10   ;;  %s11432_s7 = sphi %s11778_s7, %s14848_s7   ;;  %s11444_s11 = sphi %s11784_s11, %s14847_s11   ;;  %s11440_s0 = sphi %s11782_s0, %s14851_s0  }
  0x5a   : > { %s14778_s8 = sld [smem:[#allocation90_spill]]  ;;  %s11800_s16 = sadd.s32 1, %s11444_s11  }
  0x5b   : > { %s14779_s14 = sld [smem:[#allocation69_spill]]  ;;  %s838_s18 = ssub.s32 %s11444_s11, %s11800_s16 }
  0x5c   : > { %s14780_s13 = sld [smem:[#allocation76_spill]]  ;;  %s841_s22 = sadd.s32 1, %s11440_s0 }
  0x5d   : > { %s14781_s12 = sld [smem:[#allocation86_spill]]  ;;  %p839_p0 = scmp.eq.s32.totalorder %s838_s18, 0 }
  0x5e   : > { %s14782_s5 = sld [smem:[#allocation61_spill]]  ;;  %p848_p1 = scmp.ne.s32.totalorder %s11440_s0, %s11436_s10 }
  0x5f   : > { %s14783_s4 = sld [smem:[#allocation84_spill]]  ;;  %p849_p2 = scmp.eq.s32.totalorder %s11444_s11, 0 }
  0x60   : > { %s14784_s6 = sld [smem:[#allocation72_spill]]  ;;  %p854_p3 = scmp.ne.s32.totalorder %s11436_s10, %s11432_s7 }
  0x61   : > { %s14785_s3 = sld [smem:[#allocation67_spill]]  ;;  %p11812_p4 = por %p849_p2, %p848_p1 }
  0x62   : > { %s14786_s9 = sld [smem:[#allocation62_spill]]  ;;  %p855_p5 = scmp.eq.s32.totalorder %s11797_s15, 0 }
  0x63   : > { %14787 = sst [smem:[#allocation92_spill]] %s11436_s10  ;;  %p904_p6 = scmp.eq.s32.totalorder %s11797_s15, 2 }
  0x64   : > { %14788 = sst [smem:[#allocation93_spill]] %s11800_s16  ;;  %p8515_p7 = scmp.ge.s32.totalorder %s11444_s11, 1 }
  0x65   : > { %s11810_s23 = scalar_select %p839_p0, %s11440_s0, %s841_s22  }
  0x66   : > { %p11821_p8 = por %p855_p5, %p854_p3  ;;  %p917_p9 = scmp.lt.s32.totalorder %s11444_s11, 4 }
  0x67   : > { %14789 = sst [smem:[#allocation94_spill]] %s11810_s23  ;;  %p11826_p10 = por %p904_p6, %p848_p1 }
  0x68   : > { %s14791_s28 = scalar_select %p11821_p8, 1, 0 }
  0x69   : > { %s14793_s1 = scalar_select %p11826_p10, 1, 0 }
  0x6a   : > { %14792 = sst [smem:[#allocation95_spill]] %s14791_s28  ;;  %p11830_p11 = pnand %p8515_p7, %p917_p9 }
  0x6b   : > { %14794 = sst [smem:[#allocation96_spill]] %s14793_s1  ;;  %s942_s7 = sshll.u32 (!%p11830_p11), %s14786_s9, 4  ;;  %s943_s7 = int_to_ptr.hbm [resolvable:$true] %s942_s7 }
  0x6c   : > { %s14795_s2 = scalar_select %p11830_p11, 1, 0 }
  0x6d   : > { %921 = sbr.rel (%p11830_p11) target bundleno = 452 (0x1c4), region = 12  ;;  %s11547_s18 = smov (!%p11830_p11), [#allocation5]  }
  0x6e   : > { %14796 = sst [smem:[#allocation97_spill]] %s14795_s2  ;;  %s944_s22 = sshll.u32 (!%p11830_p11), %s11547_s18, 4  ;;  %s945_s22 = int_to_ptr.vmem [resolvable:$true] %s944_s22 }
  0x6f   : > { %s10502_s23 = sshra.s32 (!%p11830_p11), %s943_s7, 4  ;;  %s10508_s19 = scalar_lea.hbm (!%p11830_p11), %s14786_s9, 32  ;;  %s10503_s23 = int_to_ptr.hbm [resolvable:$true] %s10502_s23 }
  0x70   : > { %s10504_s16 = scalar_lea.hbm (!%p11830_p11), %s10503_s23, 32  ;;  %p10509_p1 = scmp.lt.s32.totalorder (!%p11830_p11), %s10503_s23, %s14786_s9 }
  0x71   : > { %p10505_p12 = scmp.ne.s32.totalorder (!%p11830_p11), %s10503_s23, %s10504_s16  ;;  %p10510_p2 = scmp.lt.s32.totalorder (!%p11830_p11), %s10508_s19, %s10504_s16 }
  0x73   : > { %p10506_p13 = pnand %p10505_p12, %p855_p5  ;;  %p10511_p3 = por %p10510_p2, %p10509_p1 }
  0x75   : > { %p10507_p0 = pneg %p10506_p13 }
  0x77   : > { %p10512_p6 = pnand %p10511_p3, %p10507_p0 }
  0x79   : > { %10515 = shalt.err (!%p10512_p6)
}
  0x7a   : > { %s14711_s1 = smov 128   ;;  %s14713_s18 = smov 8  }
  0x7b   : > { %9896 = dma.hbm_to_vmem [thread:$0]  (%p855_p5), %s943_s7, 512, %s945_s22, [#allocation6], %s14711_s1, %s14711_s1, %s14713_s18  }
  0x7c   : > { %s982_s28 = sshll.u32 %s14785_s3, 4  ;;  %s11550_s23 = smov [#allocation8]   ;;  %s983_s28 = int_to_ptr.hbm [resolvable:$true] %s982_s28 }
  0x7d   : > { %s984_s19 = sshll.u32 %s11550_s23, 4  ;;  %s1010_s16 = sshll.u32 %s14779_s14, 4  ;;  %s985_s19 = int_to_ptr.vmem [resolvable:$true] %s984_s19  ;;  %s11848_s16 = int_to_ptr.hbm [resolvable:$true] %s1010_s16 }
  0x7e   : > { %s10530_s9 = sshra.s32 %s983_s28, 4  ;;  %s10536_s2 = scalar_lea.hbm %s14785_s3, 4  ;;  %s10531_s9 = int_to_ptr.hbm [resolvable:$true] %s10530_s9 }
  0x7f   : > { %s10532_s10 = scalar_lea.hbm %s10531_s9, 4  ;;  %p10537_p13 = scmp.lt.s32.totalorder %s10531_s9, %s14785_s3 }
  0x80   : > { %p10533_p7 = scmp.ne.s32.totalorder %s10531_s9, %s10532_s10  ;;  %p10538_p0 = scmp.lt.s32.totalorder %s10536_s2, %s10532_s10 }
  0x82   : > { %p10534_p9 = pnand %p10533_p7, %p855_p5  ;;  %p10539_p1 = por %p10538_p0, %p10537_p13 }
  0x84   : > { %p10535_p12 = pneg %p10534_p9 }
  0x86   : > { %p10540_p2 = pnand %p10539_p1, %p10535_p12 }
  0x88   : > { %10543 = shalt.err (!%p10540_p2)
}
  0x89   : > { %s14715_s7 = smov 16   ;;  %s14717_s22 = smov 1  }
  0x8a   : > { %9900 = dma.hbm_to_vmem [thread:$0]  (%p855_p5), %s983_s28, 64, %s985_s19, [#allocation9], %s14715_s7, %s14715_s7, %s14717_s22  }
  0x8b   : > { %s1037_s23 = sshll.u32 %s11646_s24, 4  ;;  %s11553_s1 = smov [#allocation11]   ;;  %s11860_s23 = int_to_ptr.hbm [resolvable:$true] %s1037_s23 }
  0x8c   : > { %s1012_s9 = sshll.u32 %s11553_s1, 4  ;;  %s10558_s10 = sshra.s32 %s11848_s16, 4  ;;  %s1013_s9 = int_to_ptr.vmem [resolvable:$true] %s1012_s9  ;;  %s10559_s10 = int_to_ptr.hbm [resolvable:$true] %s10558_s10 }
  0x8d   : > { %s10560_s2 = scalar_lea.hbm %s10559_s10, 32  ;;  %s10564_s18 = scalar_lea.hbm %s14779_s14, 32 }
  0x8e   : > { %p10561_p3 = scmp.ne.s32.totalorder %s10559_s10, %s10560_s2  ;;  %p10565_p9 = scmp.lt.s32.totalorder %s10559_s10, %s14779_s14 }
  0x8f   : > { %p10566_p12 = scmp.lt.s32.totalorder %s10564_s18, %s10560_s2 }
  0x90   : > { %p10562_p6 = pnand %p10561_p3, %p855_p5 }
  0x91   : > { %p10567_p13 = por %p10566_p12, %p10565_p9 }
  0x92   : > { %p10563_p7 = pneg %p10562_p6 }
  0x94   : > { %p10568_p0 = pnand %p10567_p13, %p10563_p7 }
  0x96   : > { %10571 = shalt.err (!%p10568_p0)
}
  0x97   : > { %s14797_s28 = smov 8   ;;  %s14798_s1 = smov 128  }
  0x98   : > { %9904 = dma.hbm_to_vmem [thread:$0]  (%p855_p5), %s11848_s16, 512, %s1013_s9, [#allocation12], %s14798_s1, %s14798_s1, %s14797_s28  }
  0x99   : > { %s11554_s19 = smov [#allocation14]   ;;  %s1060_s22 = sshll.u32 %s14784_s6, 4  ;;  %s11874_s22 = int_to_ptr.hbm [resolvable:$true] %s1060_s22 }
  0x9a   : > { %s1039_s7 = sshll.u32 %s11554_s19, 4  ;;  %s10586_s18 = sshra.s32 %s11860_s23, 4  ;;  %s1040_s7 = int_to_ptr.vmem [resolvable:$true] %s1039_s7  ;;  %s10587_s18 = int_to_ptr.hbm [resolvable:$true] %s10586_s18 }
  0x9b   : > { %s10588_s10 = scalar_lea.hbm %s10587_s18, 1  ;;  %s10592_s2 = scalar_lea.hbm %s11646_s24, 1 }
  0x9c   : > { %p10589_p1 = scmp.ne.s32.totalorder %s10587_s18, %s10588_s10  ;;  %p10593_p6 = scmp.lt.s32.totalorder %s10587_s18, %s11646_s24 }
  0x9d   : > { %p10594_p7 = scmp.lt.s32.totalorder %s10592_s2, %s10588_s10 }
  0x9e   : > { %p10590_p2 = pnand %p10589_p1, %p855_p5 }
  0x9f   : > { %p10595_p9 = por %p10594_p7, %p10593_p6 }
  0xa0   : > { %p10591_p3 = pneg %p10590_p2 }
  0xa2   : > { %p10596_p12 = pnand %p10595_p9, %p10591_p3 }
  0xa4   : > { %10599 = shalt.err (!%p10596_p12)
}
  0xa5   : > { %9908 = dma.hbm_to_vmem [thread:$0]  (%p855_p5), %s11860_s23, 16, %s1040_s7, [#allocation15]  }
  0xa6   : > { %s1090_s16 = sshll.u32 %s11671_s27, 4  ;;  %s11555_s9 = smov [#allocation17]   ;;  %s11885_s16 = int_to_ptr.hbm [resolvable:$true] %s1090_s16 }
  0xa7   : > { %s1062_s19 = sshll.u32 %s11555_s9, 4  ;;  %s10614_s18 = sshra.s32 %s11874_s22, 4  ;;  %s1063_s19 = int_to_ptr.vmem [resolvable:$true] %s1062_s19  ;;  %s10615_s18 = int_to_ptr.hbm [resolvable:$true] %s10614_s18 }
  0xa8   : > { %s10616_s10 = scalar_lea.hbm %s10615_s18, 32  ;;  %s10620_s2 = scalar_lea.hbm %s14784_s6, 32 }
  0xa9   : > { %p10617_p13 = scmp.ne.s32.totalorder %s10615_s18, %s10616_s10  ;;  %p10621_p2 = scmp.lt.s32.totalorder %s10615_s18, %s14784_s6 }
  0xaa   : > { %p10622_p3 = scmp.lt.s32.totalorder %s10620_s2, %s10616_s10 }
  0xab   : > { %p10618_p0 = pnand %p10617_p13, %p855_p5 }
  0xac   : > { %p10623_p6 = por %p10622_p3, %p10621_p2 }
  0xad   : > { %p10619_p1 = pneg %p10618_p0 }
  0xaf   : > { %p10624_p7 = pnand %p10623_p6, %p10619_p1 }
  0xb1   : > { %10627 = shalt.err (!%p10624_p7)
}
  0xb2   : > { %9912 = dma.hbm_to_vmem [thread:$0]  (%p855_p5), %s11874_s22, 512, %s1063_s19, [#allocation18], %s14798_s1, %s14798_s1, %s14797_s28  }
  0xb3   : > { %s11556_s7 = smov [#allocation20]   ;;  %s1114_s9 = sshll.u32 %s14780_s13, 4  ;;  %s11899_s9 = int_to_ptr.hbm [resolvable:$true] %s1114_s9 }
  0xb4   : > { %s1092_s23 = sshll.u32 %s11556_s7, 4  ;;  %s10642_s18 = sshra.s32 %s11885_s16, 4  ;;  %s1093_s23 = int_to_ptr.vmem [resolvable:$true] %s1092_s23  ;;  %s10643_s18 = int_to_ptr.hbm [resolvable:$true] %s10642_s18 }
  0xb5   : > { %s10644_s10 = scalar_lea.hbm %s10643_s18, 1  ;;  %s10648_s2 = scalar_lea.hbm %s11671_s27, 1 }
  0xb6   : > { %p10645_p9 = scmp.ne.s32.totalorder %s10643_s18, %s10644_s10  ;;  %p10649_p0 = scmp.lt.s32.totalorder %s10643_s18, %s11671_s27 }
  0xb7   : > { %p10650_p1 = scmp.lt.s32.totalorder %s10648_s2, %s10644_s10 }
  0xb8   : > { %p10646_p12 = pnand %p10645_p9, %p855_p5 }
  0xb9   : > { %p10651_p2 = por %p10650_p1, %p10649_p0 }
  0xba   : > { %p10647_p13 = pneg %p10646_p12 }
  0xbc   : > { %p10652_p3 = pnand %p10651_p2, %p10647_p13 }
  0xbe   : > { %10655 = shalt.err (!%p10652_p3)
}
  0xbf   : > { %9916 = dma.hbm_to_vmem [thread:$0]  (%p855_p5), %s11885_s16, 16, %s1093_s23, [#allocation21]  }
  0xc0   : > { %s1148_s22 = sshll.u32 %s11706_s20, 4  ;;  %s11557_s19 = smov [#allocation23]   ;;  %s11910_s22 = int_to_ptr.hbm [resolvable:$true] %s1148_s22 }
  0xc1   : > { %s1116_s7 = sshll.u32 %s11557_s19, 4  ;;  %s10670_s18 = sshra.s32 %s11899_s9, 4  ;;  %s1117_s7 = int_to_ptr.vmem [resolvable:$true] %s1116_s7  ;;  %s10671_s18 = int_to_ptr.hbm [resolvable:$true] %s10670_s18 }
  0xc2   : > { %s10672_s10 = scalar_lea.hbm %s10671_s18, 1  ;;  %s10676_s2 = scalar_lea.hbm %s14780_s13, 1 }
  0xc3   : > { %p10673_p6 = scmp.ne.s32.totalorder %s10671_s18, %s10672_s10  ;;  %p10677_p12 = scmp.lt.s32.totalorder %s10671_s18, %s14780_s13 }
  0xc4   : > { %p10678_p13 = scmp.lt.s32.totalorder %s10676_s2, %s10672_s10 }
  0xc5   : > { %p10674_p7 = pnand %p10673_p6, %p855_p5 }
  0xc6   : > { %p10679_p0 = por %p10678_p13, %p10677_p12 }
  0xc7   : > { %p10675_p9 = pneg %p10674_p7 }
  0xc9   : > { %p10680_p1 = pnand %p10679_p0, %p10675_p9 }
  0xcb   : > { %10683 = shalt.err (!%p10680_p1)
}
  0xcc   : > { %9920 = dma.hbm_to_vmem [thread:$0]  (%p855_p5), %s11899_s9, 16, %s1117_s7, [#allocation24]  }
  0xcd   : > { %s11558_s16 = smov [#allocation26]   ;;  %s1176_s19 = sshll.u32 %s14777_s17, 4  ;;  %s11921_s19 = int_to_ptr.hbm [resolvable:$true] %s1176_s19 }
  0xce   : > { %s1150_s23 = sshll.u32 %s11558_s16, 4  ;;  %s10698_s18 = sshra.s32 %s11910_s22, 4  ;;  %s1151_s23 = int_to_ptr.vmem [resolvable:$true] %s1150_s23  ;;  %s10699_s18 = int_to_ptr.hbm [resolvable:$true] %s10698_s18 }
  0xcf   : > { %s10700_s10 = scalar_lea.hbm %s10699_s18, 4  ;;  %s10704_s2 = scalar_lea.hbm %s11706_s20, 4 }
  0xd0   : > { %p10701_p2 = scmp.ne.s32.totalorder %s10699_s18, %s10700_s10  ;;  %p10705_p7 = scmp.lt.s32.totalorder %s10699_s18, %s11706_s20 }
  0xd1   : > { %p10706_p9 = scmp.lt.s32.totalorder %s10704_s2, %s10700_s10 }
  0xd2   : > { %p10702_p3 = pnand %p10701_p2, %p855_p5 }
  0xd3   : > { %p10707_p12 = por %p10706_p9, %p10705_p7 }
  0xd4   : > { %p10703_p6 = pneg %p10702_p3 }
  0xd6   : > { %p10708_p13 = pnand %p10707_p12, %p10703_p6 }
  0xd8   : > { %10711 = shalt.err (!%p10708_p13)
}
  0xd9   : > { %s14799_s9 = smov 1   ;;  %s14800_s7 = smov 16  }
  0xda   : > { %9924 = dma.hbm_to_vmem [thread:$0]  (%p855_p5), %s11910_s22, 64, %s1151_s23, [#allocation27], %s14800_s7, %s14800_s7, %s14799_s9  }
  0xdb   : > { %s1203_s16 = sshll.u32 %s14783_s4, 4  ;;  %s11559_s3 = smov [#allocation29]   ;;  %s11935_s16 = int_to_ptr.hbm [resolvable:$true] %s1203_s16 }
  0xdc   : > { %s1178_s6 = sshll.u32 %s11559_s3, 4  ;;  %s10726_s18 = sshra.s32 %s11921_s19, 4  ;;  %s1179_s6 = int_to_ptr.vmem [resolvable:$true] %s1178_s6  ;;  %s10727_s18 = int_to_ptr.hbm [resolvable:$true] %s10726_s18 }
  0xdd   : > { %s10728_s10 = scalar_lea.hbm %s10727_s18, 32  ;;  %s10732_s2 = scalar_lea.hbm %s14777_s17, 32 }
  0xde   : > { %p10729_p0 = scmp.ne.s32.totalorder %s10727_s18, %s10728_s10  ;;  %p10733_p3 = scmp.lt.s32.totalorder %s10727_s18, %s14777_s17 }
  0xdf   : > { %p10734_p6 = scmp.lt.s32.totalorder %s10732_s2, %s10728_s10 }
  0xe0   : > { %p10730_p1 = pnand %p10729_p0, %p855_p5 }
  0xe1   : > { %p10735_p7 = por %p10734_p6, %p10733_p3 }
  0xe2   : > { %p10731_p2 = pneg %p10730_p1 }
  0xe4   : > { %p10736_p9 = pnand %p10735_p7, %p10731_p2 }
  0xe6   : > { %10739 = shalt.err (!%p10736_p9)
}
  0xe7   : > { %9928 = dma.hbm_to_vmem [thread:$0]  (%p855_p5), %s11921_s19, 512, %s1179_s6, [#allocation30], %s14798_s1, %s14798_s1, %s14797_s28  }
  0xe8   : > { %s11560_s3 = smov [#allocation32]   ;;  %s1226_s23 = sshll.u32 %s14781_s12, 4  ;;  %s11949_s23 = int_to_ptr.hbm [resolvable:$true] %s1226_s23 }
  0xe9   : > { %s1205_s22 = sshll.u32 %s11560_s3, 4  ;;  %s10754_s18 = sshra.s32 %s11935_s16, 4  ;;  %s1206_s22 = int_to_ptr.vmem [resolvable:$true] %s1205_s22  ;;  %s10755_s18 = int_to_ptr.hbm [resolvable:$true] %s10754_s18 }
  0xea   : > { %s10756_s10 = scalar_lea.hbm %s10755_s18, 1  ;;  %s10760_s2 = scalar_lea.hbm %s14783_s4, 1 }
  0xeb   : > { %p10757_p12 = scmp.ne.s32.totalorder %s10755_s18, %s10756_s10  ;;  %p10761_p1 = scmp.lt.s32.totalorder %s10755_s18, %s14783_s4 }
  0xec   : > { %p10762_p2 = scmp.lt.s32.totalorder %s10760_s2, %s10756_s10 }
  0xed   : > { %p10758_p13 = pnand %p10757_p12, %p855_p5 }
  0xee   : > { %p10763_p3 = por %p10762_p2, %p10761_p1 }
  0xef   : > { %p10759_p0 = pneg %p10758_p13 }
  0xf1   : > { %p10764_p6 = pnand %p10763_p3, %p10759_p0 }
  0xf3   : > { %10767 = shalt.err (!%p10764_p6)
}
  0xf4   : > { %9932 = dma.hbm_to_vmem [thread:$0]  (%p855_p5), %s11935_s16, 16, %s1206_s22, [#allocation33]  }
  0xf5   : > { %s1256_s6 = sshll.u32 %s11751_s25, 4  ;;  %s11561_s19 = smov [#allocation35]   ;;  %s11960_s6 = int_to_ptr.hbm [resolvable:$true] %s1256_s6 }
  0xf6   : > { %s1228_s3 = sshll.u32 %s11561_s19, 4  ;;  %s10782_s18 = sshra.s32 %s11949_s23, 4  ;;  %s1229_s3 = int_to_ptr.vmem [resolvable:$true] %s1228_s3  ;;  %s10783_s18 = int_to_ptr.hbm [resolvable:$true] %s10782_s18 }
  0xf7   : > { %s10784_s10 = scalar_lea.hbm %s10783_s18, 32  ;;  %s10788_s2 = scalar_lea.hbm %s14781_s12, 32 }
  0xf8   : > { %p10785_p7 = scmp.ne.s32.totalorder %s10783_s18, %s10784_s10  ;;  %p10789_p13 = scmp.lt.s32.totalorder %s10783_s18, %s14781_s12 }
  0xf9   : > { %p10790_p0 = scmp.lt.s32.totalorder %s10788_s2, %s10784_s10 }
  0xfa   : > { %p10786_p9 = pnand %p10785_p7, %p855_p5 }
  0xfb   : > { %p10791_p1 = por %p10790_p0, %p10789_p13 }
  0xfc   : > { %p10787_p12 = pneg %p10786_p9 }
  0xfe   : > { %p10792_p2 = pnand %p10791_p1, %p10787_p12 }
 0x100   : > { %10795 = shalt.err (!%p10792_p2)
}
 0x101   : > { %9936 = dma.hbm_to_vmem [thread:$0]  (%p855_p5), %s11949_s23, 512, %s1229_s3, [#allocation36], %s14798_s1, %s14798_s1, %s14797_s28  }
 0x102   : > { %s11562_s16 = smov [#allocation38]   ;;  %s928_s19 = sshll.u32 %s14782_s5, 4  ;;  %s929_s19 = int_to_ptr.hbm [resolvable:$true] %s928_s19 }
 0x103   : > { %s1258_s22 = sshll.u32 %s11562_s16, 4  ;;  %s10810_s18 = sshra.s32 %s11960_s6, 4  ;;  %s1259_s22 = int_to_ptr.vmem [resolvable:$true] %s1258_s22  ;;  %s10811_s18 = int_to_ptr.hbm [resolvable:$true] %s10810_s18 }
 0x104   : > { %s10812_s10 = scalar_lea.hbm %s10811_s18, 1  ;;  %s10816_s2 = scalar_lea.hbm %s11751_s25, 1 }
 0x105   : > { %p10813_p3 = scmp.ne.s32.totalorder %s10811_s18, %s10812_s10  ;;  %p10817_p9 = scmp.lt.s32.totalorder %s10811_s18, %s11751_s25 }
 0x106   : > { %p10818_p12 = scmp.lt.s32.totalorder %s10816_s2, %s10812_s10 }
 0x107   : > { %p10814_p6 = pnand %p10813_p3, %p855_p5 }
 0x108   : > { %p10819_p13 = por %p10818_p12, %p10817_p9 }
 0x109   : > { %p10815_p7 = pneg %p10814_p6 }
 0x10b   : > { %p10820_p0 = pnand %p10819_p13, %p10815_p7 }
 0x10d   : > { %10823 = shalt.err (!%p10820_p0)
}
 0x10e   : > { %9940 = dma.hbm_to_vmem [thread:$0]  (%p855_p5), %s11960_s6, 16, %s1259_s22, [#allocation39]  }
 0x10f   : > { %s11563_s23 = smov [#allocation3]   ;;  %s968_s16 = sshll.u32 %s11621_s29, 4  ;;  %s11983_s16 = int_to_ptr.hbm [resolvable:$true] %s968_s16 }
 0x110   : > { %s930_s3 = sshll.u32 %s11563_s23, 4  ;;  %s10838_s18 = sshra.s32 %s929_s19, 4  ;;  %s931_s3 = int_to_ptr.vmem [resolvable:$true] %s930_s3  ;;  %s10839_s18 = int_to_ptr.hbm [resolvable:$true] %s10838_s18 }
 0x111   : > { %s10840_s10 = scalar_lea.hbm %s10839_s18, 32  ;;  %s10844_s2 = scalar_lea.hbm %s14782_s5, 32 }
 0x112   : > { %p10841_p1 = scmp.ne.s32.totalorder %s10839_s18, %s10840_s10  ;;  %p10845_p6 = scmp.lt.s32.totalorder %s10839_s18, %s14782_s5 }
 0x113   : > { %p10846_p7 = scmp.lt.s32.totalorder %s10844_s2, %s10840_s10 }
 0x114   : > { %p10842_p2 = pnand %p10841_p1, %p855_p5 }
 0x115   : > { %p10847_p9 = por %p10846_p7, %p10845_p6 }
 0x116   : > { %p10843_p3 = pneg %p10842_p2 }
 0x118   : > { %p10848_p12 = pnand %p10847_p9, %p10843_p3 }
 0x11a   : > { %10851 = shalt.err (!%p10848_p12)
}
 0x11b   : > { %s14801_s6 = sld [smem:[#allocation68_spill]]  ;;  %s11564_s23 = smov [#allocation7]  }
 0x11c   : > { %9894 = dma.hbm_to_vmem [thread:$0]  (%p855_p5), %s929_s19, 512, %s931_s3, [#allocation4], %s14798_s1, %s14798_s1, %s14797_s28  }
 0x11d   : > { %s970_s4 = sshll.u32 %s11564_s23, 4  ;;  %s10866_s18 = sshra.s32 %s11983_s16, 4  ;;  %s971_s4 = int_to_ptr.vmem [resolvable:$true] %s970_s4  ;;  %s10867_s18 = int_to_ptr.hbm [resolvable:$true] %s10866_s18 }
 0x11e   : > { %s10868_s10 = scalar_lea.hbm %s10867_s18, 4  ;;  %s10872_s2 = scalar_lea.hbm %s11621_s29, 4 }
 0x11f   : > { %p10869_p13 = scmp.ne.s32.totalorder %s10867_s18, %s10868_s10  ;;  %p10873_p2 = scmp.lt.s32.totalorder %s10867_s18, %s11621_s29 }
 0x120   : > { %p10874_p3 = scmp.lt.s32.totalorder %s10872_s2, %s10868_s10 }
 0x121   : > { %s996_s22 = sshll.u32 %s14801_s6, 4  ;;  %p10870_p0 = pnand %p10869_p13, %p855_p5  ;;  %s11995_s22 = int_to_ptr.hbm [resolvable:$true] %s996_s22 }
 0x122   : > { %p10875_p6 = por %p10874_p3, %p10873_p2 }
 0x123   : > { %p10871_p1 = pneg %p10870_p0 }
 0x125   : > { %p10876_p7 = pnand %p10875_p6, %p10871_p1 }
 0x127   : > { %10879 = shalt.err (!%p10876_p7)
}
 0x128   : > { %s14802_s28 = sld [smem:[#allocation70_spill]]  ;;  %s11565_s1 = smov [#allocation10]  }
 0x129   : > { %9898 = dma.hbm_to_vmem [thread:$0]  (%p855_p5), %s11983_s16, 64, %s971_s4, [#allocation6], %s14800_s7, %s14800_s7, %s14799_s9  }
 0x12a   : > { %s998_s19 = sshll.u32 %s11565_s1, 4  ;;  %s10894_s23 = sshra.s32 %s11995_s22, 4  ;;  %s999_s19 = int_to_ptr.vmem [resolvable:$true] %s998_s19  ;;  %s10895_s23 = int_to_ptr.hbm [resolvable:$true] %s10894_s23 }
 0x12b   : > { %s10896_s18 = scalar_lea.hbm %s10895_s23, 4  ;;  %s10900_s10 = scalar_lea.hbm %s14801_s6, 4 }
 0x12c   : > { %p10897_p9 = scmp.ne.s32.totalorder %s10895_s23, %s10896_s18  ;;  %p10901_p0 = scmp.lt.s32.totalorder %s10895_s23, %s14801_s6 }
 0x12d   : > { %p10902_p1 = scmp.lt.s32.totalorder %s10900_s10, %s10896_s18 }
 0x12e   : > { %s1025_s3 = sshll.u32 %s14802_s28, 4  ;;  %p10898_p12 = pnand %p10897_p9, %p855_p5  ;;  %s12009_s3 = int_to_ptr.hbm [resolvable:$true] %s1025_s3 }
 0x12f   : > { %p10903_p2 = por %p10902_p1, %p10901_p0 }
 0x130   : > { %p10899_p13 = pneg %p10898_p12 }
 0x132   : > { %p10904_p3 = pnand %p10903_p2, %p10899_p13 }
 0x134   : > { %10907 = shalt.err (!%p10904_p3)
}
 0x135   : > { %s14803_s4 = sld [smem:[#allocation71_spill]]  ;;  %s11566_s2 = smov [#allocation13]  }
 0x136   : > { %9902 = dma.hbm_to_vmem [thread:$0]  (%p855_p5), %s11995_s22, 64, %s999_s19, [#allocation9], %s14800_s7, %s14800_s7, %s14799_s9  }
 0x137   : > { %s1027_s1 = sshll.u32 %s11566_s2, 4  ;;  %s10922_s23 = sshra.s32 %s12009_s3, 4  ;;  %s1028_s1 = int_to_ptr.vmem [resolvable:$true] %s1027_s1  ;;  %s10923_s23 = int_to_ptr.hbm [resolvable:$true] %s10922_s23 }
 0x138   : > { %s10924_s18 = scalar_lea.hbm %s10923_s23, 1  ;;  %s10928_s10 = scalar_lea.hbm %s14802_s28, 1 }
 0x139   : > { %p10925_p6 = scmp.ne.s32.totalorder %s10923_s23, %s10924_s18  ;;  %p10929_p12 = scmp.lt.s32.totalorder %s10923_s23, %s14802_s28 }
 0x13a   : > { %p10930_p13 = scmp.lt.s32.totalorder %s10928_s10, %s10924_s18 }
 0x13b   : > { %s1049_s16 = sshll.u32 %s14803_s4, 4  ;;  %p10926_p7 = pnand %p10925_p6, %p855_p5  ;;  %s12023_s16 = int_to_ptr.hbm [resolvable:$true] %s1049_s16 }
 0x13c   : > { %p10931_p0 = por %p10930_p13, %p10929_p12 }
 0x13d   : > { %p10927_p9 = pneg %p10926_p7 }
 0x13f   : > { %p10932_p1 = pnand %p10931_p0, %p10927_p9 }
 0x141   : > { %10935 = shalt.err (!%p10932_p1)
}
 0x142   : > { %s14804_s22 = sld [smem:[#allocation73_spill]]  ;;  %s11567_s19 = smov [#allocation16]  }
 0x143   : > { %9906 = dma.hbm_to_vmem [thread:$0]  (%p855_p5), %s12009_s3, 16, %s1028_s1, [#allocation12]  }
 0x144   : > { %s1051_s2 = sshll.u32 %s11567_s19, 4  ;;  %s10950_s23 = sshra.s32 %s12023_s16, 4  ;;  %s1052_s2 = int_to_ptr.vmem [resolvable:$true] %s1051_s2  ;;  %s10951_s23 = int_to_ptr.hbm [resolvable:$true] %s10950_s23 }
 0x145   : > { %s10952_s18 = scalar_lea.hbm %s10951_s23, 1  ;;  %s10956_s10 = scalar_lea.hbm %s14803_s4, 1 }
 0x146   : > { %p10953_p2 = scmp.ne.s32.totalorder %s10951_s23, %s10952_s18  ;;  %p10957_p7 = scmp.lt.s32.totalorder %s10951_s23, %s14803_s4 }
 0x147   : > { %p10958_p9 = scmp.lt.s32.totalorder %s10956_s10, %s10952_s18 }
 0x148   : > { %s1075_s5 = sshll.u32 %s14804_s22, 4  ;;  %p10954_p3 = pnand %p10953_p2, %p855_p5  ;;  %s12034_s5 = int_to_ptr.hbm [resolvable:$true] %s1075_s5 }
 0x149   : > { %p10959_p12 = por %p10958_p9, %p10957_p7 }
 0x14a   : > { %p10955_p6 = pneg %p10954_p3 }
 0x14c   : > { %p10960_p13 = pnand %p10959_p12, %p10955_p6 }
 0x14e   : > { %10963 = shalt.err (!%p10960_p13)
}
 0x14f   : > { %s14805_s3 = sld [smem:[#allocation75_spill]]  ;;  %s11568_s19 = smov [#allocation19]  }
 0x150   : > { %9910 = dma.hbm_to_vmem [thread:$0]  (%p855_p5), %s12023_s16, 16, %s1052_s2, [#allocation15]  }
 0x151   : > { %s1077_s6 = sshll.u32 %s11568_s19, 4  ;;  %s10978_s23 = sshra.s32 %s12034_s5, 4  ;;  %s1078_s6 = int_to_ptr.vmem [resolvable:$true] %s1077_s6  ;;  %s10979_s23 = int_to_ptr.hbm [resolvable:$true] %s10978_s23 }
 0x152   : > { %s10980_s18 = scalar_lea.hbm %s10979_s23, 1  ;;  %s10984_s10 = scalar_lea.hbm %s14804_s22, 1 }
 0x153   : > { %p10981_p0 = scmp.ne.s32.totalorder %s10979_s23, %s10980_s18  ;;  %p10985_p3 = scmp.lt.s32.totalorder %s10979_s23, %s14804_s22 }
 0x154   : > { %p10986_p6 = scmp.lt.s32.totalorder %s10984_s10, %s10980_s18 }
 0x155   : > { %s1102_s1 = sshll.u32 %s14805_s3, 4  ;;  %p10982_p1 = pnand %p10981_p0, %p855_p5  ;;  %s12045_s1 = int_to_ptr.hbm [resolvable:$true] %s1102_s1 }
 0x156   : > { %p10987_p7 = por %p10986_p6, %p10985_p3 }
 0x157   : > { %p10983_p2 = pneg %p10982_p1 }
 0x159   : > { %p10988_p9 = pnand %p10987_p7, %p10983_p2 }
 0x15b   : > { %10991 = shalt.err (!%p10988_p9)
}
 0x15c   : > { %s14806_s16 = sld [smem:[#allocation80_spill]]  ;;  %s11569_s2 = smov [#allocation22]  }
 0x15d   : > { %9914 = dma.hbm_to_vmem [thread:$0]  (%p855_p5), %s12034_s5, 16, %s1078_s6, [#allocation18]  }
 0x15e   : > { %s1104_s19 = sshll.u32 %s11569_s2, 4  ;;  %s11006_s23 = sshra.s32 %s12045_s1, 4  ;;  %s1105_s19 = int_to_ptr.vmem [resolvable:$true] %s1104_s19  ;;  %s11007_s23 = int_to_ptr.hbm [resolvable:$true] %s11006_s23 }
 0x15f   : > { %s11008_s18 = scalar_lea.hbm %s11007_s23, 1  ;;  %s11012_s10 = scalar_lea.hbm %s14805_s3, 1 }
 0x160   : > { %p11009_p12 = scmp.ne.s32.totalorder %s11007_s23, %s11008_s18  ;;  %p11013_p1 = scmp.lt.s32.totalorder %s11007_s23, %s14805_s3 }
 0x161   : > { %p11014_p2 = scmp.lt.s32.totalorder %s11012_s10, %s11008_s18 }
 0x162   : > { %s1134_s4 = sshll.u32 %s14806_s16, 4  ;;  %p11010_p13 = pnand %p11009_p12, %p855_p5  ;;  %s12056_s4 = int_to_ptr.hbm [resolvable:$true] %s1134_s4 }
 0x163   : > { %p11015_p3 = por %p11014_p2, %p11013_p1 }
 0x164   : > { %p11011_p0 = pneg %p11010_p13 }
 0x166   : > { %p11016_p6 = pnand %p11015_p3, %p11011_p0 }
 0x168   : > { %11019 = shalt.err (!%p11016_p6)
}
 0x169   : > { %s14807_s5 = sld [smem:[#allocation81_spill]]  ;;  %s11570_s2 = smov [#allocation25]  }
 0x16a   : > { %9918 = dma.hbm_to_vmem [thread:$0]  (%p855_p5), %s12045_s1, 16, %s1105_s19, [#allocation21]  }
 0x16b   : > { %s1136_s12 = sshll.u32 %s11570_s2, 4  ;;  %s11034_s23 = sshra.s32 %s12056_s4, 4  ;;  %s1137_s12 = int_to_ptr.vmem [resolvable:$true] %s1136_s12  ;;  %s11035_s23 = int_to_ptr.hbm [resolvable:$true] %s11034_s23 }
 0x16c   : > { %s11036_s18 = scalar_lea.hbm %s11035_s23, 4  ;;  %s11040_s10 = scalar_lea.hbm %s14806_s16, 4 }
 0x16d   : > { %p11037_p7 = scmp.ne.s32.totalorder %s11035_s23, %s11036_s18  ;;  %p11041_p13 = scmp.lt.s32.totalorder %s11035_s23, %s14806_s16 }
 0x16e   : > { %p11042_p0 = scmp.lt.s32.totalorder %s11040_s10, %s11036_s18 }
 0x16f   : > { %s1162_s6 = sshll.u32 %s14807_s5, 4  ;;  %p11038_p9 = pnand %p11037_p7, %p855_p5  ;;  %s12067_s6 = int_to_ptr.hbm [resolvable:$true] %s1162_s6 }
 0x170   : > { %p11043_p1 = por %p11042_p0, %p11041_p13 }
 0x171   : > { %p11039_p12 = pneg %p11038_p9 }
 0x173   : > { %p11044_p2 = pnand %p11043_p1, %p11039_p12 }
 0x175   : > { %11047 = shalt.err (!%p11044_p2)
}
 0x176   : > { %s14808_s1 = sld [smem:[#allocation83_spill]]  ;;  %s11571_s19 = smov [#allocation28]  }
 0x177   : > { %9922 = dma.hbm_to_vmem [thread:$0]  (%p855_p5), %s12056_s4, 64, %s1137_s12, [#allocation24], %s14800_s7, %s14800_s7, %s14799_s9  }
 0x178   : > { %s1164_s2 = sshll.u32 %s11571_s19, 4  ;;  %s11062_s23 = sshra.s32 %s12067_s6, 4  ;;  %s1165_s2 = int_to_ptr.vmem [resolvable:$true] %s1164_s2  ;;  %s11063_s23 = int_to_ptr.hbm [resolvable:$true] %s11062_s23 }
 0x179   : > { %s11064_s18 = scalar_lea.hbm %s11063_s23, 4  ;;  %s11068_s10 = scalar_lea.hbm %s14807_s5, 4 }
 0x17a   : > { %p11065_p3 = scmp.ne.s32.totalorder %s11063_s23, %s11064_s18  ;;  %p11069_p9 = scmp.lt.s32.totalorder %s11063_s23, %s14807_s5 }
 0x17b   : > { %p11070_p12 = scmp.lt.s32.totalorder %s11068_s10, %s11064_s18 }
 0x17c   : > { %s1191_s3 = sshll.u32 %s14808_s1, 4  ;;  %p11066_p6 = pnand %p11065_p3, %p855_p5  ;;  %s12081_s3 = int_to_ptr.hbm [resolvable:$true] %s1191_s3 }
 0x17d   : > { %p11071_p13 = por %p11070_p12, %p11069_p9 }
 0x17e   : > { %p11067_p7 = pneg %p11066_p6 }
 0x180   : > { %p11072_p0 = pnand %p11071_p13, %p11067_p7 }
 0x182   : > { %11075 = shalt.err (!%p11072_p0)
}
 0x183   : > { %s14809_s12 = sld [smem:[#allocation85_spill]]  ;;  %s11572_s19 = smov [#allocation31]  }
 0x184   : > { %9926 = dma.hbm_to_vmem [thread:$0]  (%p855_p5), %s12067_s6, 64, %s1165_s2, [#allocation27], %s14800_s7, %s14800_s7, %s14799_s9  }
 0x185   : > { %s1193_s13 = sshll.u32 %s11572_s19, 4  ;;  %s11090_s23 = sshra.s32 %s12081_s3, 4  ;;  %s1194_s13 = int_to_ptr.vmem [resolvable:$true] %s1193_s13  ;;  %s11091_s23 = int_to_ptr.hbm [resolvable:$true] %s11090_s23 }
 0x186   : > { %s11092_s18 = scalar_lea.hbm %s11091_s23, 1  ;;  %s11096_s10 = scalar_lea.hbm %s14808_s1, 1 }
 0x187   : > { %p11093_p1 = scmp.ne.s32.totalorder %s11091_s23, %s11092_s18  ;;  %p11097_p6 = scmp.lt.s32.totalorder %s11091_s23, %s14808_s1 }
 0x188   : > { %p11098_p7 = scmp.lt.s32.totalorder %s11096_s10, %s11092_s18 }
 0x189   : > { %s1215_s4 = sshll.u32 %s14809_s12, 4  ;;  %p11094_p2 = pnand %p11093_p1, %p855_p5  ;;  %s12095_s4 = int_to_ptr.hbm [resolvable:$true] %s1215_s4 }
 0x18a   : > { %p11099_p9 = por %p11098_p7, %p11097_p6 }
 0x18b   : > { %p11095_p3 = pneg %p11094_p2 }
 0x18d   : > { %p11100_p12 = pnand %p11099_p9, %p11095_p3 }
 0x18f   : > { %11103 = shalt.err (!%p11100_p12)
}
 0x190   : > { %s14810_s9 = sld [smem:[#allocation87_spill]]  ;;  %s11573_s7 = smov [#allocation34]  }
 0x191   : > { %9930 = dma.hbm_to_vmem [thread:$0]  (%p855_p5), %s12081_s3, 16, %s1194_s13, [#allocation30]  }
 0x192   : > { %s1217_s6 = sshll.u32 %s11573_s7, 4  ;;  %s11118_s19 = sshra.s32 %s12095_s4, 4  ;;  %s1218_s6 = int_to_ptr.vmem [resolvable:$true] %s1217_s6  ;;  %s11119_s19 = int_to_ptr.hbm [resolvable:$true] %s11118_s19 }
 0x193   : > { %s11120_s23 = scalar_lea.hbm %s11119_s19, 1  ;;  %s11124_s18 = scalar_lea.hbm %s14809_s12, 1 }
 0x194   : > { %p11121_p13 = scmp.ne.s32.totalorder %s11119_s19, %s11120_s23  ;;  %p11125_p2 = scmp.lt.s32.totalorder %s11119_s19, %s14809_s12 }
 0x195   : > { %p11126_p3 = scmp.lt.s32.totalorder %s11124_s18, %s11120_s23 }
 0x196   : > { %s1241_s2 = sshll.u32 %s14810_s9, 4  ;;  %p11122_p0 = pnand %p11121_p13, %p855_p5  ;;  %s12106_s2 = int_to_ptr.hbm [resolvable:$true] %s1241_s2 }
 0x197   : > { %p11127_p6 = por %p11126_p3, %p11125_p2 }
 0x198   : > { %p11123_p1 = pneg %p11122_p0 }
 0x19a   : > { %p11128_p7 = pnand %p11127_p6, %p11123_p1 }
 0x19c   : > { %11131 = shalt.err (!%p11128_p7)
}
 0x19d   : > { %s14811_s13 = sld [smem:[#allocation89_spill]]  ;;  %s11574_s10 = smov [#allocation37]  }
 0x19e   : > { %9934 = dma.hbm_to_vmem [thread:$0]  (%p855_p5), %s12095_s4, 16, %s1218_s6, [#allocation33]  }
 0x19f   : > { %s1243_s7 = sshll.u32 %s11574_s10, 4  ;;  %s11146_s19 = sshra.s32 %s12106_s2, 4  ;;  %s1244_s7 = int_to_ptr.vmem [resolvable:$true] %s1243_s7  ;;  %s11147_s19 = int_to_ptr.hbm [resolvable:$true] %s11146_s19 }
 0x1a0   : > { %s11148_s23 = scalar_lea.hbm %s11147_s19, 1  ;;  %s11152_s18 = scalar_lea.hbm %s14810_s9, 1 }
 0x1a1   : > { %p11149_p9 = scmp.ne.s32.totalorder %s11147_s19, %s11148_s23  ;;  %p11153_p0 = scmp.lt.s32.totalorder %s11147_s19, %s14810_s9 }
 0x1a2   : > { %p11154_p1 = scmp.lt.s32.totalorder %s11152_s18, %s11148_s23 }
 0x1a3   : > { %s1268_s3 = sshll.u32 %s14811_s13, 4  ;;  %p11150_p12 = pnand %p11149_p9, %p855_p5  ;;  %s12117_s3 = int_to_ptr.hbm [resolvable:$true] %s1268_s3 }
 0x1a4   : > { %p11155_p2 = por %p11154_p1, %p11153_p0 }
 0x1a5   : > { %p11151_p13 = pneg %p11150_p12 }
 0x1a7   : > { %p11156_p3 = pnand %p11155_p2, %p11151_p13 }
 0x1a9   : > { %11159 = shalt.err (!%p11156_p3)
}
 0x1aa   : > { %9938 = dma.hbm_to_vmem [thread:$0]  (%p855_p5), %s12106_s2, 16, %s1244_s7, [#allocation36]  }
 0x1ab   : > { %s11575_s4 = smov [#allocation40]   ;;  %s1280_s10 = sshll.u32 %s11761_s21, 4  ;;  %s1281_s10 = int_to_ptr.hbm [resolvable:$true] %s1280_s10 }
 0x1ac   : > { %s1270_s6 = sshll.u32 %s11575_s4, 4  ;;  %s11174_s1 = sshra.s32 %s12117_s3, 4  ;;  %s1271_s6 = int_to_ptr.vmem [resolvable:$true] %s1270_s6  ;;  %s11175_s1 = int_to_ptr.hbm [resolvable:$true] %s11174_s1 }
 0x1ad   : > { %s11176_s19 = scalar_lea.hbm %s11175_s1, 1  ;;  %s11180_s23 = scalar_lea.hbm %s14811_s13, 1 }
 0x1ae   : > { %p11177_p6 = scmp.ne.s32.totalorder %s11175_s1, %s11176_s19  ;;  %p11181_p12 = scmp.lt.s32.totalorder %s11175_s1, %s14811_s13 }
 0x1af   : > { %p11182_p13 = scmp.lt.s32.totalorder %s11180_s23, %s11176_s19 }
 0x1b0   : > { %p11178_p7 = pnand %p11177_p6, %p855_p5 }
 0x1b1   : > { %p11183_p0 = por %p11182_p13, %p11181_p12 }
 0x1b2   : > { %p11179_p9 = pneg %p11178_p7 }
 0x1b4   : > { %p11184_p1 = pnand %p11183_p0, %p11179_p9 }
 0x1b6   : > { %11187 = shalt.err (!%p11184_p1)
}
 0x1b7   : > { %9942 = dma.hbm_to_vmem [thread:$0]  (%p855_p5), %s12117_s3, 16, %s1271_s6, [#allocation39]  }
 0x1b8   : > { %s11576_s2 = smov [#allocation41]   ;;  %s11202_s18 = sshra.s32 %s1281_s10, 4  ;;  %s11203_s18 = int_to_ptr.hbm [resolvable:$true] %s11202_s18 }
 0x1b9   : > { %s1282_s7 = sshll.u32 %s11576_s2, 4  ;;  %s11204_s4 = scalar_lea.hbm %s11203_s18, 1  ;;  %s1283_s7 = int_to_ptr.vmem [resolvable:$true] %s1282_s7 }
 0x1ba   : > { %p11205_p2 = scmp.ne.s32.totalorder %s11203_s18, %s11204_s4  ;;  %s11208_s1 = scalar_lea.hbm %s11761_s21, 1 }
 0x1bb   : > { %p11209_p7 = scmp.lt.s32.totalorder %s11203_s18, %s11761_s21  ;;  %p11210_p9 = scmp.lt.s32.totalorder %s11208_s1, %s11204_s4 }
 0x1bc   : > { %p11206_p3 = pnand %p11205_p2, %p855_p5 }
 0x1bd   : > { %p11211_p12 = por %p11210_p9, %p11209_p7 }
 0x1be   : > { %p11207_p6 = pneg %p11206_p3 }
 0x1c0   : > { %p11212_p13 = pnand %p11211_p12, %p11207_p6 }
 0x1c2   : > { %11215 = shalt.err (!%p11212_p13)
}
 0x1c3   : > { %9944 = dma.hbm_to_vmem [thread:$0]  (%p855_p5), %s1281_s10, 16, %s1283_s7, [#allocation42]  }
 0x1c4 PF: > { %p10034_p0 = scmp.lt.s32.totalorder %s11444_s11, 3  ;;  %s1293_s3 = sand.u32 1, %s11444_s11  }
 0x1c5   : > { %s14730_s6 = sand.u32 1, %s11440_s0   ;;  %s9721_s23 = smul.u32 320, %s11444_s11 }
 0x1c6   : > { %s9889_s19 = smul.u32 1280, %s14730_s6  ;;  %p12150_p1 = pnand %p10034_p0, %p11812_p4 }
 0x1c7   : > { %s1302_s10 = scalar_lea.hbm %s11766_s30, %s9721_s23  ;;  %s12155_s1 = scalar_lea.sflag [#allocation4], %s1293_s3 }
 0x1c8   : > { %s1297_s7 = scalar_lea.vmem [#allocation43], %s9889_s19  ;;  %s1303_s4 = sshll.u32 %s1302_s10, 4  ;;  %s1304_s4 = int_to_ptr.hbm [resolvable:$true] %s1303_s4 }
 0x1c9   : > { %s1305_s18 = sshll.u32 %s1297_s7, 4  ;;  %s11230_s5 = sshra.s32 %s1304_s4, 4  ;;  %s1306_s18 = int_to_ptr.vmem [resolvable:$true] %s1305_s18  ;;  %s11231_s5 = int_to_ptr.hbm [resolvable:$true] %s11230_s5 }
 0x1ca   : > { %s11232_s6 = scalar_lea.hbm %s11231_s5, 1280  ;;  %p11234_p4 = pneg %p12150_p1 }
 0x1cb   : > { %p11233_p2 = scmp.ne.s32.totalorder %s11231_s5, %s11232_s6  ;;  %s11237_s26 = scalar_lea.hbm %s11766_s30, 3840 }
 0x1cc   : > { %p11238_p7 = scmp.lt.s32.totalorder %s11231_s5, %s11766_s30  ;;  %p11239_p9 = scmp.lt.s32.totalorder %s11237_s26, %s11232_s6 }
 0x1cd   : > { %p11235_p3 = pnand %p11234_p4, %p11233_p2 }
 0x1ce   : > { %p11240_p12 = por %p11239_p9, %p11238_p7 }
 0x1cf   : > { %p11236_p6 = pneg %p11235_p3 }
 0x1d1   : > { %p11241_p13 = pnand %p11240_p12, %p11236_p6 }
 0x1d3   : > { %11244 = shalt.err (!%p11241_p13)
}
 0x1d4   : > { %s11577_s19 = smov 15360   ;;  %s11578_s3 = smov 5120  }
 0x1d5   : > { %s11579_s23 = smov 320   ;;  %s14813_s10 = sand.u32 1, %s11440_s0  }
 0x1d6   : > { %10004 = dma.hbm_to_vmem [thread:$0]  (!%p12150_p1), %s1304_s4, 20480, %s1306_s18, %s12155_s1, %s11577_s19, %s11578_s3, %s11579_s23  }
 0x1d7   : > { %s9890_s7 = smul.u32 80, %s14813_s10  ;;  %s11267_s16 = scalar_lea.hbm %s14778_s8, 240 }
 0x1d8   : > { %s1320_s5 = smul.u32 80, %s11444_s11 }
 0x1d9   : > { %s1319_s26 = scalar_lea.vmem [#allocation44], %s9890_s7 }
 0x1da   : > { %s1323_s6 = scalar_lea.hbm %s14778_s8, %s1320_s5  ;;  %s1327_s9 = sshll.u32 %s1319_s26, 4  ;;  %s1328_s9 = int_to_ptr.vmem [resolvable:$true] %s1327_s9 }
 0x1db   : > { %s1325_s12 = sshll.u32 %s1323_s6, 4  ;;  %s1326_s12 = int_to_ptr.hbm [resolvable:$true] %s1325_s12 }
 0x1dc   : > { %s11260_s13 = sshra.s32 %s1326_s12, 4  ;;  %s11261_s13 = int_to_ptr.hbm [resolvable:$true] %s11260_s13 }
 0x1dd   : > { %s11262_s14 = scalar_lea.hbm %s11261_s13, 80  ;;  %p11268_p6 = scmp.lt.s32.totalorder %s11261_s13, %s14778_s8 }
 0x1de   : > { %p11263_p0 = scmp.ne.s32.totalorder %s11261_s13, %s11262_s14  ;;  %p11269_p7 = scmp.lt.s32.totalorder %s11267_s16, %s11262_s14 }
 0x1e0   : > { %p11265_p2 = pnand %p11263_p0, %p11234_p4  ;;  %p11270_p9 = por %p11269_p7, %p11268_p6 }
 0x1e2   : > { %p11266_p3 = pneg %p11265_p2 }
 0x1e4   : > { %p11271_p12 = pnand %p11270_p9, %p11266_p3 }
 0x1e6   : > { %11274 = shalt.err (!%p11271_p12)
}
 0x1e7   : > { %10007 = dma.hbm_to_vmem [thread:$0]  (!%p12150_p1), %s1326_s12, 1280, %s1328_s9, %s12155_s1  }
 0x1e8   : > { %1336 = sbr.rel (%p11830_p11) target bundleno = 7867 (0x1ebb), region = 168  ;;  %p8545_p13 = scmp.ne.s32.totalorder (!%p11830_p11), %s11797_s15, 0 }
 0x1ed   : > { %11371 = dma.done.wait (%p855_p5), [#allocation4], 512  }
 0x1ee   : > { %11373 = vsyncadd (%p855_p5), [#allocation4], 4294966784 }
 0x1ef   : > { %11375 = dma.done.wait (%p855_p5), [#allocation6], 576  }
 0x1f0   : > { %11377 = vsyncadd (%p855_p5), [#allocation6], 4294966720 }
 0x1f1   : > { %11379 = dma.done.wait (%p855_p5), [#allocation9], 128  }
 0x1f2   : > { %11381 = vsyncadd (%p855_p5), [#allocation9], 4294967168 }
 0x1f3   : > { %11383 = dma.done.wait (%p855_p5), [#allocation12], 528  }
 0x1f4   : > { %11385 = vsyncadd (%p855_p5), [#allocation12], 4294966768 }
 0x1f5   : > { %11387 = dma.done.wait (%p855_p5), [#allocation15], 32  }
 0x1f6   : > { %11389 = vsyncadd (%p855_p5), [#allocation15], 4294967264 }
 0x1f7   : > { %11391 = dma.done.wait (%p855_p5), [#allocation18], 528  }
 0x1f8   : > { %11393 = vsyncadd (%p855_p5), [#allocation18], 4294966768 }
 0x1f9   : > { %11395 = dma.done.wait (%p855_p5), [#allocation21], 32  }
 0x1fa   : > { %11397 = vsyncadd (%p855_p5), [#allocation21], 4294967264 }
 0x1fb   : > { %11399 = dma.done.wait (%p855_p5), [#allocation24], 80  }
 0x1fc   : > { %11401 = vsyncadd (%p855_p5), [#allocation24], 4294967216 }
 0x1fd   : > { %11403 = dma.done.wait (%p855_p5), [#allocation27], 128  }
 0x1fe   : > { %11405 = vsyncadd (%p855_p5), [#allocation27], 4294967168 }
 0x1ff   : > { %11407 = dma.done.wait (%p855_p5), [#allocation30], 528  }
 0x200   : > { %11409 = vsyncadd (%p855_p5), [#allocation30], 4294966768 }
 0x201   : > { %11411 = dma.done.wait (%p855_p5), [#allocation33], 32  }
 0x202   : > { %11413 = vsyncadd (%p855_p5), [#allocation33], 4294967264 }
 0x203   : > { %11415 = dma.done.wait (%p855_p5), [#allocation36], 528  }
 0x204   : > { %11417 = vsyncadd (%p855_p5), [#allocation36], 4294966768 }
 0x205   : > { %11419 = dma.done.wait (%p855_p5), [#allocation39], 32  }
 0x206   : > { %11421 = vsyncadd (%p855_p5), [#allocation39], 4294967264 }
 0x207   : > { %11423 = dma.done.wait (%p855_p5), [#allocation42], 16  }
 0x208   : > { %11425 = vsyncadd (%p855_p5), [#allocation42], 4294967280  ;;  %s14815_s14 = sld [smem:[#allocation92_spill]]  ;;  %s1468_s12 = sand.u32 1, %s11797_s15  }
 0x209   : > { %s1469_s2 = scalar_lea.sflag [#allocation4], %s1468_s12 }
 0x20e   : > { %s1470_s9 = sand.u32 1, %s14815_s14  }
 0x20f   : > { %s9891_s13 = smul.u32 1280, %s1470_s9 }
 0x211   : > { %s12240_s18 = scalar_lea.vmem [#allocation43], %s9891_s13 }
 0x212   : > { %11427 = dma.done.wait (%p11821_p8), %s1469_s2, 21760  }
 0x213   : > { %11429 = vsyncadd (%p11821_p8), %s1469_s2, 4294945536  ;;  %s9892_s4 = smul.u32 80, %s1470_s9  ;;  %s12248_s19 = scalar_lea.vmem [#allocation45], %s9891_s13  }
 0x214   : > { %1589 = sbr.rel (%p8545_p13) target bundleno = 6931 (0x1b13), region = 284  ;;  %s14817_s3 = sld [smem:[#allocation65_spill]] (!%p8545_p13) }
 0x215   : > { %s12246_s1 = scalar_lea.vmem [#allocation44], %s9892_s4  ;;  %s14818_s23 = sld [smem:[#allocation64_spill]] (!%p8545_p13) }
 0x216   : > { %s14819_s10 = sld [smem:[#allocation66_spill]] (!%p8545_p13) }
 0x217   : > { %s14821_s7 = sld [smem:[#allocation63_spill]] (!%p8545_p13) }
 0x218   : > { %s14823_s26 = sld [smem:[#allocation74_spill]] (!%p8545_p13) }
 0x219   : > { %v1590_v2 = vld [vmem:[#allocation3] sm:$0xff]  ;;  %vm1614_vm0 = vcmask 261120   ;;  %v1591_v11 = vld [vmem:[#allocation3 + $0x8] sm:$0xff]  ;;  %v1592_v14 = vld [vmem:[#allocation3 + $0x10] sm:$0xff]  ;;  %vm1730_vm1 = vcmask 64512   ;;  %vm3033_vm15 = vcmask 523264  }
 0x21a   : > { %v1659_v0 = vld [vmem:[%s14817_s3 + $0x18] sm:$0xff]  ;;  %v1658_v1 = vld [vmem:[%s14817_s3 + $0x10] sm:$0xff]  ;;  %v1657_v4 = vld [vmem:[%s14817_s3 + $0x8] sm:$0xff]  ;;  %s14824_s11 = sld [smem:[#allocation78_spill]] }
 0x21b   : > { %1676 = vmatpush.msra.mxu1 %v1659_v0  ;;  %v1594_v3 = vld [vmem:[#allocation5] sm:$0xff]  ;;  %v1656_v5 = vld [vmem:[%s14817_s3] sm:$0xff]  ;;  %v1609_v7 = vld [vmem:[%s14818_s23 + $0x18] sm:$0xff]  ;;  %s14826_s16 = sld [smem:[#allocation77_spill]] }
 0x21c   : > { %v12256_v6 = vadd.f32 %v1594_v3, %v1590_v2  ;;  %v1608_v8 = vld [vmem:[%s14818_s23 + $0x10] sm:$0xff]  ;;  %1639 = vmatpush.msra.mxu0 %v1609_v7  ;;  %v1607_v9 = vld [vmem:[%s14818_s23 + $0x8] sm:$0xff]  ;;  %v1606_v10 = vld [vmem:[%s14818_s23] sm:$0xff]  ;;  %s14820_s5 = smov %s14819_s10  ;;  %s14827_s12 = sld [smem:[#allocation79_spill]] }
 0x21d   : > { %1677 = vmatpush.msra.mxu1 %v1658_v1  ;;  %v1595_v12 = vld [vmem:[#allocation5 + $0x8] sm:$0xff]  ;;  %v1596_v15 = vld [vmem:[#allocation5 + $0x10] sm:$0xff]  ;;  %v1593_v17 = vld [vmem:[#allocation3 + $0x18] sm:$0xff]  ;;  %s14822_s6 = smov %s14821_s7  ;;  %s14828_s9 = sld [smem:[#allocation88_spill]] }
 0x21e   : > { %1640 = vmatpush.msra.mxu0 %v1608_v8  ;;  %v12264_v13 = vadd.f32 %v1595_v12, %v1591_v11  ;;  %v12270_v16 = vadd.f32 %v1596_v15, %v1592_v14  ;;  %v1597_v18 = vld [vmem:[#allocation5 + $0x18] sm:$0xff]  ;;  %v10294_v23 = vld [vmem:[#allocation8] ss:$0 sm:$0xff]  ;;  %v10295_v29 = vld [vmem:[#allocation7] ss:$0 sm:$0xff] }
 0x21f   : > { %1678 = vmatpush.msra.mxu1 %v1657_v4  ;;  %v12276_v19 = vadd.f32 %v1597_v18, %v1593_v17  ;;  %v1696_v38 = vld [vmem:[%s14819_s10 + $0x18] sm:$0xff]  ;;  %v1695_v39 = vld [vmem:[%s14820_s5 + $0x10] sm:$0xff]  ;;  %v12295_v41 = vld [vmem:[%s14821_s7] sm:$0xff] }
 0x220   : > { %1641 = vmatpush.msra.mxu0 %v1607_v9  ;;  %1713 = vmatpush.msra.mxu2 %v1696_v38  ;;  %v1694_v42 = vld [vmem:[%s14820_s5 + $0x8] sm:$0xff]  ;;  %v1693_v44 = vld [vmem:[%s14820_s5] sm:$0xff]  ;;  %v8607_v46 = vld [vmem:[%s14817_s3 + $0x38] sm:$0xff]  ;;  %s14825_s14 = smov %s14824_s11 }
 0x221   : > { %1679 = vmatpush.msra.mxu1 %v1656_v5  ;;  %v8606_v48 = vld [vmem:[%s14817_s3 + $0x30] sm:$0xff]  ;;  %v12306_v50 = vld [vmem:[%s14822_s6 + $0x8] sm:$0xff]  ;;  %v8604_v53 = vld [vmem:[%s14817_s3 + $0x20] sm:$0xff] }
 0x222   : > { %8576 = vmatmul.msk.f32.vlgmr.msra.gmra.mxu1 %vm1614_vm0, %v12256_v6  ;;  %1642 = vmatpush.msra.mxu0 %v1606_v10  ;;  %v8605_v51 = vld [vmem:[%s14817_s3 + $0x28] sm:$0xff]  ;;  %v12315_v57 = vld [vmem:[%s14822_s6 + $0x10] sm:$0xff]  ;;  %v12322_v62 = vld [vmem:[%s14822_s6 + $0x18] sm:$0xff] }
 0x223   : > { %8572 = vmatmul.msk.f32.vlgmr.msra.gmra.mxu0 %vm1614_vm0, %v12256_v6  ;;  %1714 = vmatpush.msra.mxu2 %v1695_v39  ;;  %v8599_v2 = vld [vmem:[%s14818_s23 + $0x38] sm:$0xff]  ;;  %v8598_v3 = vld [vmem:[%s14818_s23 + $0x30] sm:$0xff]  ;;  %v8597_v8 = vld [vmem:[%s14818_s23 + $0x28] sm:$0xff] }
 0x224   : > { %1900 = vmatpush.msrb.mxu1 %v8599_v2  ;;  %v8596_v9 = vld [vmem:[%s14818_s23 + $0x20] sm:$0xff]  ;;  %v8615_v2 = vld [vmem:[%s14820_s5 + $0x38] sm:$0xff] }
 0x225   : > { %1715 = vmatpush.msra.mxu2 %v1694_v42 }
 0x226   : > { %1901 = vmatpush.msrb.mxu1 %v8598_v3  ;;  %v8614_v3 = vld [vmem:[%s14820_s5 + $0x30] sm:$0xff] }
 0x227   : > { %1716 = vmatpush.msra.mxu2 %v1693_v44 }
 0x228   : > { %8580 = vmatmul.msk.f32.vlgmr.msra.gmra.mxu2 %vm1614_vm0, %v12256_v6  ;;  %1902 = vmatpush.msrb.mxu1 %v8597_v8 }
 0x229   : > { %1939 = vmatpush.msrb.mxu2 %v8607_v46 }
 0x22a   : > { %8577 = vmatmul.msk.f32.gmra.mxu1 %vm1614_vm0, %v12264_v13 }
 0x22b   : > { %8573 = vmatmul.msk.f32.gmra.mxu0 %vm1614_vm0, %v12264_v13  ;;  %1940 = vmatpush.msrb.mxu2 %v8606_v48 }
 0x22c   : > { %1903 = vmatpush.msrb.mxu1 %v8596_v9 }
 0x22d   : > { %1941 = vmatpush.msrb.mxu2 %v8605_v51 }
 0x22f   : > { %1942 = vmatpush.msrb.mxu2 %v8604_v53 }
 0x230   : > { %8581 = vmatmul.msk.f32.gmra.mxu2 %vm1614_vm0, %v12264_v13 }
 0x232   : > { %8578 = vmatmul.msk.f32.gmra.mxu1 %vm1614_vm0, %v12270_v16 }
 0x233   : > { %8574 = vmatmul.msk.f32.gmra.mxu0 %vm1614_vm0, %v12270_v16 }
 0x238   : > { %8582 = vmatmul.msk.f32.gmra.mxu2 %vm1614_vm0, %v12270_v16 }
 0x23a   : > { %8579 = vmatmul.msk.f32.gmra.mxu1 %vm1614_vm0, %v12276_v19 }
 0x23b   : > { %8575 = vmatmul.msk.f32.gmra.mxu0 %vm1614_vm0, %v12276_v19 }
 0x240   : > { %8583 = vmatmul.msk.f32.gmra.mxu2 %vm1614_vm0, %v12276_v19 }
 0x242   : > { %8600 = vmatmul.msk.f32.vlgmr.msrb.gmra.mxu1 %vm1614_vm0, %v12256_v6 }
 0x248   : > { %8608 = vmatmul.msk.f32.vlgmr.msrb.gmra.mxu2 %vm1614_vm0, %v12256_v6 }
 0x24a   : > { %8601 = vmatmul.msk.f32.gmra.mxu1 %vm1614_vm0, %v12264_v13 }
 0x250   : > { %8609 = vmatmul.msk.f32.gmra.mxu2 %vm1614_vm0, %v12264_v13 }
 0x252   : > { %8602 = vmatmul.msk.f32.gmra.mxu1 %vm1614_vm0, %v12270_v16 }
 0x258   : > { %8610 = vmatmul.msk.f32.gmra.mxu2 %vm1614_vm0, %v12270_v16 }
 0x25a   : > { %8603 = vmatmul.msk.f32.gmra.mxu1 %vm1614_vm0, %v12276_v19 }
 0x260   : > { %8611 = vmatmul.msk.f32.gmra.mxu2 %vm1614_vm0, %v12276_v19 }
 0x29f   : > { %v1681_v20 = vpop.f32.mrf.mxu1 }
 0x2a0   : > { %v1644_v27 = vpop.f32.mrf.mxu0  ;;  %v1682_v30 = vadd.f32 %v10294_v23, %v1681_v20 }
 0x2a1   : > { %v1645_v31 = vadd.f32 %v10295_v29, %v1644_v27 }
 0x2a7   : > { %v1684_v21 = vpop.f32.mrf.mxu1 }
 0x2a8   : > { %v1685_v28 = vadd.f32 %v10294_v23, %v1684_v21  ;;  %v1647_v32 = vpop.f32.mrf.mxu0 }
 0x2a9   : > { %v1648_v33 = vadd.f32 %v10295_v29, %v1647_v32 }
 0x2ab   : > { %v1718_v18 = vpop.f32.mrf.mxu2 }
 0x2af   : > { %v1687_v22 = vpop.f32.mrf.mxu1 }
 0x2b0   : > { %v1688_v26 = vadd.f32 %v10294_v23, %v1687_v22  ;;  %v1650_v34 = vpop.f32.mrf.mxu0 }
 0x2b1   : > { %v1651_v35 = vadd.f32 %v10295_v29, %v1650_v34 }
 0x2b7   : > { %v1690_v24 = vpop.f32.mrf.mxu1 }
 0x2b8   : > { %v1691_v25 = vadd.f32 %v10294_v23, %v1690_v24  ;;  %v1653_v36 = vpop.f32.mrf.mxu0 }
 0x2b9   : > { %v1654_v37 = vadd.f32 %v10295_v29, %v1653_v36 }
 0x2ba   : > { %8584 = vmatpush.xpose.msk.msra.mxu3 %vm1730_vm1, %v1691_v25  ;;  %v1721_v25 = vpop.f32.mrf.mxu2 }
 0x2be   : > { %8585 = vmatpush.xpose.msk.msra.mxu3 %vm1730_vm1, %v1688_v26 }
 0x2c2   : > { %8586 = vmatpush.xpose.msk.msra.mxu3 %vm1730_vm1, %v1685_v28 }
 0x2c6   : > { %8587 = vmatpush.xpose.msk.msra.mxu3 %vm1730_vm1, %v1682_v30  ;;  %v1724_v30 = vpop.f32.mrf.mxu2 }
 0x2c9   : > { %8588 = vmatmul.msk.f32.vlgmr.msra.gmra.mxu3 %vm1730_vm1, %v1645_v31 }
 0x2ca   : > { %1978 = vmatpush.msrb.mxu3 %v8615_v2 }
 0x2cc   : > { %1979 = vmatpush.msrb.mxu3 %v8614_v3 }
 0x2ce   : > { %v1727_v34 = vpop.f32.mrf.mxu2 }
 0x2d1   : > { %8589 = vmatmul.msk.f32.gmra.mxu3 %vm1730_vm1, %v1648_v33  ;;  %v10297_v33 = vld [vmem:[#allocation10] ss:$0 sm:$0xff] }
 0x2d2   : > { %v1725_v36 = vadd.f32 %v10297_v33, %v1724_v30  ;;  %v1719_v38 = vadd.f32 %v10297_v33, %v1718_v18 }
 0x2d6   : > { %v1944_v39 = vpop.f32.mrf.mxu2 }
 0x2d9   : > { %8590 = vmatmul.msk.f32.gmra.mxu3 %vm1730_vm1, %v1651_v35  ;;  %v1728_v35 = vadd.f32 %v10297_v33, %v1727_v34 }
 0x2db   : > { %1860 = vmatpush.msrb.mxu0 %v1728_v35 }
 0x2dd   : > { %1861 = vmatpush.msrb.mxu0 %v1725_v36 }
 0x2e1   : > { %8591 = vmatmul.msk.f32.gmra.mxu3 %vm1730_vm1, %v1654_v37  ;;  %v1722_v37 = vadd.f32 %v10297_v33, %v1721_v25 }
 0x2e3   : > { %1862 = vmatpush.msrb.mxu0 %v1722_v37 }
 0x2e5   : > { %1863 = vmatpush.msrb.mxu0 %v1719_v38 }
 0x34c   : > { %v1772_v40 = vpop.f32.mrf.mxu3 }
 0x34d   : > { %v1784_v43 = vmul.f32 0.35355338, %v1772_v40  ;;  %v1947_v40 = vpop.f32.mrf.mxu2 }
 0x34f   : > { %v1788_v45 = vadd.f32 %v1784_v43, %v12295_v41  ;;  %v10296_v43 = vld [vmem:[#allocation8 + $0x1] ss:$0 sm:$0xff] }
 0x350   : > { %v1945_v48 = vadd.f32 %v10296_v43, %v1944_v39 }
 0x351   : > { %v1792_v47 = vsel %vm1614_vm0, %v1788_v45, -inf }
 0x352   : > { %1793 = vmax.xlane.f32.xlu0 %v1792_v47  ;;  %v1948_v47 = vadd.f32 %v10296_v43, %v1947_v40  ;;  %v10299_v40 = vld [vmem:[#allocation10 + $0x1] ss:$0 sm:$0xff] }
 0x354   : > { %v1775_v49 = vpop.f32.mrf.mxu3 }
 0x355   : > { %v1785_v52 = vmul.f32 0.35355338, %v1775_v49  ;;  %v1950_v42 = vpop.f32.mrf.mxu2 }
 0x356   : > { %v1951_v46 = vadd.f32 %v10296_v43, %v1950_v42 }
 0x357   : > { %v1789_v54 = vadd.f32 %v1785_v52, %v12306_v50 }
 0x359   : > { %v1795_v55 = vsel %vm1614_vm0, %v1789_v54, -inf }
 0x35a   : > { %1796 = vmax.xlane.f32.xlu0 %v1795_v55 }
 0x35c   : > { %v1778_v56 = vpop.f32.mrf.mxu3 }
 0x35d   : > { %v1786_v58 = vmul.f32 0.35355338, %v1778_v56  ;;  %v1953_v44 = vpop.f32.mrf.mxu2 }
 0x35f   : > { %v1790_v59 = vadd.f32 %v1786_v58, %v12315_v57 }
 0x361   : > { %v1798_v60 = vsel %vm1614_vm0, %v1790_v59, -inf }
 0x362   : > { %1799 = vmax.xlane.f32.xlu1 %v1798_v60 }
 0x364   : > { %v1781_v61 = vpop.f32.mrf.mxu3 }
 0x365   : > { %v1787_v63 = vmul.f32 0.35355338, %v1781_v61  ;;  %v1905_v61 = vpop.f32.mrf.mxu1 }
 0x367   : > { %v1791_v0 = vadd.f32 %v1787_v63, %v12322_v62 }
 0x369   : > { %v1801_v1 = vsel %vm1614_vm0, %v1791_v0, -inf }
 0x36a   : > { %1802 = vmax.xlane.f32.xlu1 %v1801_v1  ;;  %v10298_v1 = vld [vmem:[#allocation7 + $0x1] ss:$0 sm:$0xff] }
 0x36d   : > { %v1908_v8 = vpop.f32.mrf.mxu1 }
 0x36e   : > { %v1909_v9 = vadd.f32 %v10298_v1, %v1908_v8  ;;  %v8651_v8 = vld [vmem:[%s14817_s3 + $0x58] sm:$0xff] }
 0x3c5   : > { %v1794_v4 = vpop.xlane.xlu0 %1793 }
 0x3c6   : > { %v1804_v5 = vsub.f32 %v1788_v45, %v1794_v4  ;;  %v1954_v45 = vadd.f32 %v10296_v43, %v1953_v44  ;;  %v8613_v4 = vld [vmem:[%s14820_s5 + $0x28] sm:$0xff] }
 0x3c7   : > { %1980 = vmatpush.msrb.mxu3 %v8613_v4 }
 0x3c8   : > { %v1808_v7 = vmul.f32 1.442695, %v1804_v5  ;;  %8620 = vmatpush.xpose.msk.msra.mxu0 %vm1730_vm1, %v1954_v45  ;;  %v1906_v5 = vadd.f32 %v10298_v1, %v1905_v61 }
 0x3ca   : > { %10332 = vpow2.f32 %v1808_v7  ;;  %v8612_v7 = vld [vmem:[%s14820_s5 + $0x20] sm:$0xff] }
 0x3cb   : > { %1981 = vmatpush.msrb.mxu3 %v8612_v7 }
 0x3cc   : > { %8621 = vmatpush.xpose.msk.msra.mxu0 %vm1730_vm1, %v1951_v46  ;;  %8616 = vmatmul.msk.f32.vlgmr.msrb.gmra.mxu3 %vm1614_vm0, %v12256_v6 }
 0x3cd   : > { %v1797_v10 = vpop.xlane.xlu0 %1796 }
 0x3ce   : > { %v1805_v11 = vsub.f32 %v1789_v54, %v1797_v10  ;;  %v1911_v10 = vpop.f32.mrf.mxu1 }
 0x3d0   : > { %v10333_v12 = vpop.eup %10332  ;;  %v1810_v14 = vmul.f32 1.442695, %v1805_v11  ;;  %8622 = vmatpush.xpose.msk.msra.mxu0 %vm1730_vm1, %v1948_v47  ;;  %v1912_v11 = vadd.f32 %v10298_v1, %v1911_v10  ;;  %v8650_v10 = vld [vmem:[%s14817_s3 + $0x50] sm:$0xff] }
 0x3d1   : > { %v1816_v15 = vsel %vm1614_vm0, %v10333_v12, 0.0 }
 0x3d2   : > { %10334 = vpow2.f32 %v1810_v14  ;;  %1817 = vadd.xlane.f32.xlu2 %v1816_v15  ;;  %v1877_v15 = vld [vmem:[#allocation11] sm:$0xff] }
 0x3d3   : > { %2211 = vmatpush.msra.mxu3 %v1877_v15 }
 0x3d4   : > { %8623 = vmatpush.xpose.msk.msra.mxu0 %vm1730_vm1, %v1945_v48  ;;  %8617 = vmatmul.msk.f32.gmra.mxu3 %vm1614_vm0, %v12264_v13 }
 0x3d5   : > { %v1800_v17 = vpop.xlane.xlu1 %1799 }
 0x3d6   : > { %v1806_v20 = vsub.f32 %v1790_v59, %v1800_v17 }
 0x3d8   : > { %v10335_v21 = vpop.eup %10334  ;;  %v1812_v22 = vmul.f32 1.442695, %v1806_v20 }
 0x3d9   : > { %v1819_v23 = vsel %vm1614_vm0, %v10335_v21, 0.0 }
 0x3da   : > { %10336 = vpow2.f32 %v1812_v22  ;;  %1820 = vadd.xlane.f32.xlu2 %v1819_v23 }
 0x3dc   : > { %8618 = vmatmul.msk.f32.gmra.mxu3 %vm1614_vm0, %v12270_v16 }
 0x3dd   : > { %v1803_v24 = vpop.xlane.xlu1 %1802 }
 0x3de   : > { %v1807_v26 = vsub.f32 %v1791_v0, %v1803_v24 }
 0x3e0   : > { %v10337_v27 = vpop.eup %10336  ;;  %v1814_v28 = vmul.f32 1.442695, %v1807_v26 }
 0x3e1   : > { %v1822_v29 = vsel %vm1614_vm0, %v10337_v27, 0.0 }
 0x3e2   : > { %10338 = vpow2.f32 %v1814_v28  ;;  %1823 = vadd.xlane.f32.xlu0 %v1822_v29 }
 0x3e4   : > { %8619 = vmatmul.msk.f32.gmra.mxu3 %vm1614_vm0, %v12276_v19 }
 0x3e8   : > { %v10339_v31 = vpop.eup %10338 }
 0x3e9   : > { %v1825_v32 = vsel %vm1614_vm0, %v10339_v31, 0.0 }
 0x3ea   : > { %1826 = vadd.xlane.f32.xlu1 %v1825_v32 }
 0x445   : > { %v1818_v49 = vpop.xlane.xlu2 %1817 }
 0x446   : > { %10340 = vrcp.f32 %v1818_v49 }
 0x44c   : > { %v10341_v51 = vpop.eup %10340 }
 0x44d   : > { %v1821_v52 = vpop.xlane.xlu2 %1820  ;;  %v1832_v53 = vmul.f32 %v10341_v51, %v10333_v12  ;;  %v1914_v12 = vpop.f32.mrf.mxu1 }
 0x44e   : > { %10342 = vrcp.f32 %v1821_v52  ;;  %v1915_v14 = vadd.f32 %v10298_v1, %v1914_v12  ;;  %v8648_v12 = vld [vmem:[%s14817_s3 + $0x40] sm:$0xff] }
 0x44f   : > { %8592 = vmatmul.msk.f32.vlgmr.msrb.gmra.mxu0 %vm1614_vm0, %v1832_v53  ;;  %v1983_v26 = vpop.f32.mrf.mxu3 }
 0x450   : > { %v1984_v47 = vadd.f32 %v10299_v40, %v1983_v26 }
 0x454   : > { %v10343_v54 = vpop.eup %10342 }
 0x455   : > { %v1824_v55 = vpop.xlane.xlu0 %1823  ;;  %v1833_v56 = vmul.f32 %v10343_v54, %v10335_v21 }
 0x456   : > { %10344 = vrcp.f32 %v1824_v55 }
 0x457   : > { %8593 = vmatmul.msk.f32.gmra.mxu0 %vm1614_vm0, %v1833_v56 }
 0x45c   : > { %v10345_v58 = vpop.eup %10344 }
 0x45d   : > { %v1827_v59 = vpop.xlane.xlu1 %1826  ;;  %v1834_v60 = vmul.f32 %v10345_v58, %v10337_v27 }
 0x45e   : > { %10346 = vrcp.f32 %v1827_v59 }
 0x45f   : > { %8594 = vmatmul.msk.f32.gmra.mxu0 %vm1614_vm0, %v1834_v60 }
 0x464   : > { %v10347_v63 = vpop.eup %10346 }
 0x465   : > { %v1835_v0 = vmul.f32 %v10347_v63, %v10339_v31  ;;  %v1986_v31 = vpop.f32.mrf.mxu3 }
 0x466   : > { %v1987_v46 = vadd.f32 %v10299_v40, %v1986_v31  ;;  %v2142_v31 = vld [vmem:[#allocation11 + $0x8] sm:$0xff] }
 0x467   : > { %8595 = vmatmul.msk.f32.gmra.mxu0 %vm1614_vm0, %v1835_v0  ;;  %2170 = vmatpush.msra.mxu2 %v2142_v31 }
 0x46d   : > { %v1989_v36 = vpop.f32.mrf.mxu3 }
 0x46e   : > { %v1990_v44 = vadd.f32 %v10299_v40, %v1989_v36 }
 0x46f   : > { %8624 = vmatmul.msk.f32.vlgmr.msra.gmra.mxu0 %vm1730_vm1, %v1906_v5 }
 0x475   : > { %v1992_v43 = vpop.f32.mrf.mxu3 }
 0x476   : > { %v1993_v45 = vadd.f32 %v10299_v40, %v1992_v43 }
 0x477   : > { %8625 = vmatmul.msk.f32.gmra.mxu0 %vm1730_vm1, %v1909_v9 }
 0x478   : > { %2124 = vmatpush.msra.mxu1 %v1993_v45 }
 0x47a   : > { %2125 = vmatpush.msra.mxu1 %v1990_v44 }
 0x47c   : > { %2126 = vmatpush.msra.mxu1 %v1987_v46  ;;  %v10301_v46 = vld [vmem:[#allocation7 + $0x2] ss:$0 sm:$0xff] }
 0x47e   : > { %2127 = vmatpush.msra.mxu1 %v1984_v47 }
 0x47f   : > { %8626 = vmatmul.msk.f32.gmra.mxu0 %vm1730_vm1, %v1912_v11  ;;  %v8649_v11 = vld [vmem:[%s14817_s3 + $0x48] sm:$0xff] }
 0x480   : > { %2286 = vmatpush.msrb.mxu1 %v8651_v8 }
 0x482   : > { %2287 = vmatpush.msrb.mxu1 %v8650_v10 }
 0x484   : > { %2288 = vmatpush.msrb.mxu1 %v8649_v11 }
 0x486   : > { %2289 = vmatpush.msrb.mxu1 %v8648_v12 }
 0x487   : > { %8627 = vmatmul.msk.f32.gmra.mxu0 %vm1730_vm1, %v1915_v14 }
 0x4cc   : > { %v1865_v17 = vpop.f32.mrf.mxu0 }
 0x4cd   : > { %8636 = vmatmul.msk.f32.vlgmr.msra.gmra.mxu3 %vm1730_vm1, %v1865_v17 }
 0x4d4   : > { %v1868_v18 = vpop.f32.mrf.mxu0 }
 0x4d5   : > { %8637 = vmatmul.msk.f32.gmra.mxu3 %vm1730_vm1, %v1868_v18 }
 0x4dc   : > { %v1871_v20 = vpop.f32.mrf.mxu0 }
 0x4dd   : > { %8638 = vmatmul.msk.f32.gmra.mxu3 %vm1730_vm1, %v1871_v20 }
 0x4e4   : > { %v1874_v21 = vpop.f32.mrf.mxu0 }
 0x4e5   : > { %8639 = vmatmul.msk.f32.gmra.mxu3 %vm1730_vm1, %v1874_v21 }
 0x4ec   : > { %v2036_v22 = vpop.f32.mrf.mxu0 }
 0x4ed   : > { %v2048_v23 = vmul.f32 0.35355338, %v2036_v22 }
 0x4ef   : > { %v2052_v24 = vadd.f32 %v2048_v23, %v12295_v41 }
 0x4f1   : > { %v2056_v25 = vsel %vm1614_vm0, %v2052_v24, -inf }
 0x4f2   : > { %2057 = vmax.xlane.f32.xlu2 %v2056_v25  ;;  %v8643_v25 = vld [vmem:[%s14818_s23 + $0x58] sm:$0xff] }
 0x4f3   : > { %2247 = vmatpush.msrb.mxu0 %v8643_v25 }
 0x4f4   : > { %v2039_v27 = vpop.f32.mrf.mxu0 }
 0x4f5   : > { %v2049_v28 = vmul.f32 0.35355338, %v2039_v27 }
 0x4f7   : > { %v2053_v29 = vadd.f32 %v2049_v28, %v12306_v50  ;;  %v8642_v28 = vld [vmem:[%s14818_s23 + $0x50] sm:$0xff] }
 0x4f8   : > { %2248 = vmatpush.msrb.mxu0 %v8642_v28  ;;  %v8691_v28 = vld [vmem:[%s14817_s3 + $0x78] sm:$0xff] }
 0x4f9   : > { %v2059_v30 = vsel %vm1614_vm0, %v2053_v29, -inf }
 0x4fa   : > { %2060 = vmax.xlane.f32.xlu0 %v2059_v30  ;;  %v8640_v30 = vld [vmem:[%s14818_s23 + $0x40] sm:$0xff] }
 0x4fc   : > { %v2042_v32 = vpop.f32.mrf.mxu0 }
 0x4fd   : > { %v2050_v33 = vmul.f32 0.35355338, %v2042_v32 }
 0x4ff   : > { %v2054_v34 = vadd.f32 %v2050_v33, %v12315_v57 }
 0x501   : > { %v2062_v35 = vsel %vm1614_vm0, %v2054_v34, -inf }
 0x502   : > { %2063 = vmax.xlane.f32.xlu1 %v2062_v35 }
 0x504   : > { %v2045_v37 = vpop.f32.mrf.mxu0 }
 0x505   : > { %v2051_v38 = vmul.f32 0.35355338, %v2045_v37 }
 0x507   : > { %v2055_v39 = vadd.f32 %v2051_v38, %v12322_v62 }
 0x509   : > { %v2065_v42 = vsel %vm1614_vm0, %v2055_v39, -inf }
 0x50a   : > { %2066 = vmax.xlane.f32.xlu2 %v2065_v42 }
 0x565   : > { %v2058_v48 = vpop.xlane.xlu2 %2057 }
 0x566   : > { %v2068_v49 = vsub.f32 %v2052_v24, %v2058_v48 }
 0x568   : > { %v2072_v51 = vmul.f32 1.442695, %v2068_v49 }
 0x56a   : > { %10348 = vpow2.f32 %v2072_v51 }
 0x56d   : > { %v2061_v52 = vpop.xlane.xlu0 %2060 }
 0x56e   : > { %v2069_v53 = vsub.f32 %v2053_v29, %v2061_v52  ;;  %v8641_v29 = vld [vmem:[%s14818_s23 + $0x48] sm:$0xff] }
 0x56f   : > { %2249 = vmatpush.msrb.mxu0 %v8641_v29  ;;  %v8690_v29 = vld [vmem:[%s14817_s3 + $0x70] sm:$0xff] }
 0x570   : > { %v10349_v54 = vpop.eup %10348  ;;  %v2074_v55 = vmul.f32 1.442695, %v2069_v53 }
 0x571   : > { %v2080_v56 = vsel %vm1614_vm0, %v10349_v54, 0.0  ;;  %2250 = vmatpush.msrb.mxu0 %v8640_v30  ;;  %v8689_v30 = vld [vmem:[%s14817_s3 + $0x68] sm:$0xff] }
 0x572   : > { %10350 = vpow2.f32 %v2074_v55  ;;  %2081 = vadd.xlane.f32.xlu0 %v2080_v56  ;;  %8644 = vmatmul.msk.f32.vlgmr.msrb.gmra.mxu0 %vm1614_vm0, %v12256_v6  ;;  %v12432_v56 = vpop.f32.mrf.mxu3 }
 0x575   : > { %v2064_v58 = vpop.xlane.xlu1 %2063 }
 0x576   : > { %v2070_v59 = vsub.f32 %v2054_v34, %v2064_v58 }
 0x578   : > { %v10351_v60 = vpop.eup %10350  ;;  %v2076_v61 = vmul.f32 1.442695, %v2070_v59 }
 0x579   : > { %v2083_v63 = vsel %vm1614_vm0, %v10351_v60, 0.0 }
 0x57a   : > { %10352 = vpow2.f32 %v2076_v61  ;;  %2084 = vadd.xlane.f32.xlu1 %v2083_v63  ;;  %8645 = vmatmul.msk.f32.gmra.mxu0 %vm1614_vm0, %v12264_v13  ;;  %v12434_v58 = vpop.f32.mrf.mxu3  ;;  %v8659_v61 = vld [vmem:[%s14820_s5 + $0x58] sm:$0xff]  ;;  %v8658_v63 = vld [vmem:[%s14820_s5 + $0x50] sm:$0xff] }
 0x57b   : > { %2325 = vmatpush.msrb.mxu2 %v8659_v61 }
 0x57d   : > { %v2067_v0 = vpop.xlane.xlu2 %2066  ;;  %2326 = vmatpush.msrb.mxu2 %v8658_v63 }
 0x57e   : > { %v2071_v1 = vsub.f32 %v2055_v39, %v2067_v0  ;;  %v10300_v39 = vld [vmem:[#allocation8 + $0x2] ss:$0 sm:$0xff] }
 0x580   : > { %v10353_v2 = vpop.eup %10352  ;;  %v2078_v3 = vmul.f32 1.442695, %v2071_v1  ;;  %v8657_v1 = vld [vmem:[%s14820_s5 + $0x48] sm:$0xff] }
 0x581   : > { %v2086_v4 = vsel %vm1614_vm0, %v10353_v2, 0.0  ;;  %2327 = vmatpush.msrb.mxu2 %v8657_v1 }
 0x582   : > { %10354 = vpow2.f32 %v2078_v3  ;;  %2087 = vadd.xlane.f32.xlu2 %v2086_v4  ;;  %8646 = vmatmul.msk.f32.gmra.mxu0 %vm1614_vm0, %v12270_v16  ;;  %v12436_v59 = vpop.f32.mrf.mxu3  ;;  %v8656_v3 = vld [vmem:[%s14820_s5 + $0x40] sm:$0xff] }
 0x583   : > { %2328 = vmatpush.msrb.mxu2 %v8656_v3  ;;  %v8683_v3 = vld [vmem:[%s14818_s23 + $0x78] sm:$0xff] }
 0x588   : > { %v10355_v5 = vpop.eup %10354 }
 0x589   : > { %v2089_v7 = vsel %vm1614_vm0, %v10355_v5, 0.0 }
 0x58a   : > { %2090 = vadd.xlane.f32.xlu0 %v2089_v7  ;;  %8647 = vmatmul.msk.f32.gmra.mxu0 %vm1614_vm0, %v12276_v19 }
 0x5e5   : > { %v2082_v9 = vpop.xlane.xlu0 %2081 }
 0x5e6   : > { %10356 = vrcp.f32 %v2082_v9 }
 0x5ec   : > { %v10357_v14 = vpop.eup %10356 }
 0x5ed   : > { %v2096_v15 = vmul.f32 %v10357_v14, %v10349_v54  ;;  %v2085_v17 = vpop.xlane.xlu1 %2084 }
 0x5ee   : > { %10358 = vrcp.f32 %v2085_v17 }
 0x5ef   : > { %8628 = vmatmul.msk.f32.vlgmr.msra.gmra.mxu1 %vm1614_vm0, %v2096_v15  ;;  %v2252_v44 = vpop.f32.mrf.mxu0 }
 0x5f0   : > { %v2253_v48 = vadd.f32 %v10301_v46, %v2252_v44 }
 0x5f4   : > { %v10359_v18 = vpop.eup %10358 }
 0x5f5   : > { %v2088_v20 = vpop.xlane.xlu2 %2087  ;;  %v2097_v21 = vmul.f32 %v10359_v18, %v10351_v60  ;;  %v12438_v60 = vpop.f32.mrf.mxu3 }
 0x5f6   : > { %10360 = vrcp.f32 %v2088_v20 }
 0x5f7   : > { %8629 = vmatmul.msk.f32.gmra.mxu1 %vm1614_vm0, %v2097_v21  ;;  %v2255_v49 = vpop.f32.mrf.mxu0 }
 0x5f8   : > { %v2256_v51 = vadd.f32 %v10301_v46, %v2255_v49 }
 0x5fc   : > { %v10361_v22 = vpop.eup %10360 }
 0x5fd   : > { %v2091_v23 = vpop.xlane.xlu0 %2090  ;;  %v2098_v24 = vmul.f32 %v10361_v22, %v10353_v2 }
 0x5fe   : > { %10362 = vrcp.f32 %v2091_v23 }
 0x5ff   : > { %8630 = vmatmul.msk.f32.gmra.mxu1 %vm1614_vm0, %v2098_v24  ;;  %v2258_v52 = vpop.f32.mrf.mxu0 }
 0x600   : > { %v2259_v53 = vadd.f32 %v10301_v46, %v2258_v52 }
 0x604   : > { %v10363_v26 = vpop.eup %10362 }
 0x605   : > { %v2099_v27 = vmul.f32 %v10363_v26, %v10355_v5 }
 0x607   : > { %8631 = vmatmul.msk.f32.gmra.mxu1 %vm1614_vm0, %v2099_v27  ;;  %v2261_v54 = vpop.f32.mrf.mxu0 }
 0x608   : > { %v2262_v55 = vadd.f32 %v10301_v46, %v2261_v54 }
 0x60f   : > { %8652 = vmatmul.msk.f32.vlgmr.msrb.gmra.mxu1 %vm1614_vm0, %v12256_v6 }
 0x617   : > { %8653 = vmatmul.msk.f32.gmra.mxu1 %vm1614_vm0, %v12264_v13 }
 0x61f   : > { %8654 = vmatmul.msk.f32.gmra.mxu1 %vm1614_vm0, %v12270_v16 }
 0x627   : > { %8655 = vmatmul.msk.f32.gmra.mxu1 %vm1614_vm0, %v12276_v19 }
 0x66c   : > { %v2129_v32 = vpop.f32.mrf.mxu1 }
 0x66d   : > { %8632 = vmatmul.msk.f32.vlgmr.msra.gmra.mxu2 %vm1730_vm1, %v2129_v32 }
 0x66e   : > { %2557 = vmatpush.msra.mxu2 %v8683_v3  ;;  %v8696_v3 = vld [vmem:[%s14820_s5 + $0x60] sm:$0xff] }
 0x674   : > { %v2132_v33 = vpop.f32.mrf.mxu1 }
 0x675   : > { %8633 = vmatmul.msk.f32.gmra.mxu2 %vm1730_vm1, %v2132_v33 }
 0x67c   : > { %v2135_v34 = vpop.f32.mrf.mxu1 }
 0x67d   : > { %8634 = vmatmul.msk.f32.gmra.mxu2 %vm1730_vm1, %v2135_v34  ;;  %v8688_v34 = vld [vmem:[%s14817_s3 + $0x60] sm:$0xff] }
 0x684   : > { %v2138_v35 = vpop.f32.mrf.mxu1 }
 0x685   : > { %8635 = vmatmul.msk.f32.gmra.mxu2 %vm1730_vm1, %v2138_v35 }
 0x68c   : > { %v2291_v36 = vpop.f32.mrf.mxu1 }
 0x68d   : > { %v2292_v47 = vadd.f32 %v10300_v39, %v2291_v36  ;;  %8660 = vmatmul.msk.f32.vlgmr.msrb.gmra.mxu2 %vm1614_vm0, %v12256_v6 }
 0x694   : > { %v2294_v37 = vpop.f32.mrf.mxu1 }
 0x695   : > { %v2295_v45 = vadd.f32 %v10300_v39, %v2294_v37  ;;  %8661 = vmatmul.msk.f32.gmra.mxu2 %vm1614_vm0, %v12264_v13 }
 0x69c   : > { %v2297_v38 = vpop.f32.mrf.mxu1 }
 0x69d   : > { %v2298_v43 = vadd.f32 %v10300_v39, %v2297_v38  ;;  %8662 = vmatmul.msk.f32.gmra.mxu2 %vm1614_vm0, %v12270_v16 }
 0x6a4   : > { %v2300_v40 = vpop.f32.mrf.mxu1 }
 0x6a5   : > { %v2301_v42 = vadd.f32 %v10300_v39, %v2300_v40  ;;  %8663 = vmatmul.msk.f32.gmra.mxu2 %vm1614_vm0, %v12276_v19 }
 0x6a7   : > { %8664 = vmatpush.xpose.msk.msrb.mxu3 %vm1730_vm1, %v2301_v42 }
 0x6ab   : > { %8665 = vmatpush.xpose.msk.msrb.mxu3 %vm1730_vm1, %v2298_v43 }
 0x6af   : > { %8666 = vmatpush.xpose.msk.msrb.mxu3 %vm1730_vm1, %v2295_v45 }
 0x6b3   : > { %8667 = vmatpush.xpose.msk.msrb.mxu3 %vm1730_vm1, %v2292_v47 }
 0x6b6   : > { %8668 = vmatmul.msk.f32.vlgmr.msrb.gmra.mxu3 %vm1730_vm1, %v2253_v48 }
 0x6b7   : > { %2596 = vmatpush.msra.mxu3 %v8691_v28 }
 0x6b9   : > { %2597 = vmatpush.msra.mxu3 %v8690_v29 }
 0x6bb   : > { %2598 = vmatpush.msra.mxu3 %v8689_v30  ;;  %v10303_v30 = vld [vmem:[#allocation8 + $0x3] ss:$0 sm:$0xff] }
 0x6bd   : > { %2599 = vmatpush.msra.mxu3 %v8688_v34 }
 0x6be   : > { %8669 = vmatmul.msk.f32.gmra.mxu3 %vm1730_vm1, %v2256_v51 }
 0x6c6   : > { %8670 = vmatmul.msk.f32.gmra.mxu3 %vm1730_vm1, %v2259_v53 }
 0x6ce   : > { %8671 = vmatmul.msk.f32.gmra.mxu3 %vm1730_vm1, %v2262_v55  ;;  %v10302_v55 = vld [vmem:[#allocation10 + $0x2] ss:$0 sm:$0xff] }
 0x6d6   : > { %8692 = vmatmul.msk.f32.vlgmr.msra.gmra.mxu3 %vm1614_vm0, %v12256_v6 }
 0x6de   : > { %8693 = vmatmul.msk.f32.gmra.mxu3 %vm1614_vm0, %v12264_v13 }
 0x6e6   : > { %8694 = vmatmul.msk.f32.gmra.mxu3 %vm1614_vm0, %v12270_v16 }
 0x6ee   : > { %8695 = vmatmul.msk.f32.gmra.mxu3 %vm1614_vm0, %v12276_v19 }
 0x6f0   : > { %v12460_v22 = vpop.f32.mrf.mxu2 }
 0x6f8   : > { %v12462_v23 = vpop.f32.mrf.mxu2 }
 0x700   : > { %v12464_v24 = vpop.f32.mrf.mxu2 }
 0x708   : > { %v12469_v31 = vpop.f32.mrf.mxu2 }
 0x710   : > { %v2330_v39 = vpop.f32.mrf.mxu2 }
 0x718   : > { %v2333_v46 = vpop.f32.mrf.mxu2 }
 0x719   : > { %v2334_v1 = vadd.f32 %v10302_v55, %v2333_v46 }
 0x720   : > { %v2336_v52 = vpop.f32.mrf.mxu2 }
 0x721   : > { %v2337_v63 = vadd.f32 %v10302_v55, %v2336_v52 }
 0x728   : > { %v2339_v61 = vpop.f32.mrf.mxu2 }
 0x739   : > { %v2383_v0 = vpop.f32.mrf.mxu3 }
 0x73a   : > { %v2395_v2 = vmul.f32 0.35355338, %v2383_v0  ;;  %v2340_v0 = vadd.f32 %v10302_v55, %v2339_v61  ;;  %v8699_v61 = vld [vmem:[%s14820_s5 + $0x78] sm:$0xff] }
 0x73c   : > { %v2399_v4 = vadd.f32 %v2395_v2, %v12295_v41  ;;  %2471 = vmatpush.msra.mxu0 %v2340_v0  ;;  %v2331_v2 = vadd.f32 %v10302_v55, %v2330_v39 }
 0x73e   : > { %v2403_v5 = vsel %vm1614_vm0, %v2399_v4, -inf  ;;  %2472 = vmatpush.msra.mxu0 %v2337_v63  ;;  %v8698_v63 = vld [vmem:[%s14820_s5 + $0x70] sm:$0xff] }
 0x73f   : > { %2404 = vmax.xlane.f32.xlu1 %v2403_v5  ;;  %v8681_v5 = vld [vmem:[%s14818_s23 + $0x68] sm:$0xff] }
 0x740   : > { %2473 = vmatpush.msra.mxu0 %v2334_v1  ;;  %v8697_v1 = vld [vmem:[%s14820_s5 + $0x68] sm:$0xff] }
 0x741   : > { %v2386_v7 = vpop.f32.mrf.mxu3 }
 0x742   : > { %v2396_v8 = vmul.f32 0.35355338, %v2386_v7  ;;  %2474 = vmatpush.msra.mxu0 %v2331_v2  ;;  %v8680_v7 = vld [vmem:[%s14818_s23 + $0x60] sm:$0xff] }
 0x744   : > { %v2400_v9 = vadd.f32 %v2396_v8, %v12306_v50  ;;  %2635 = vmatpush.msrb.mxu0 %v8699_v61 }
 0x746   : > { %v2406_v10 = vsel %vm1614_vm0, %v2400_v9, -inf  ;;  %2636 = vmatpush.msrb.mxu0 %v8698_v63 }
 0x747   : > { %2407 = vmax.xlane.f32.xlu2 %v2406_v10 }
 0x748   : > { %2637 = vmatpush.msrb.mxu0 %v8697_v1 }
 0x749   : > { %v2389_v11 = vpop.f32.mrf.mxu3 }
 0x74a   : > { %v2397_v12 = vmul.f32 0.35355338, %v2389_v11  ;;  %2638 = vmatpush.msrb.mxu0 %v8696_v3 }
 0x74c   : > { %v2401_v14 = vadd.f32 %v2397_v12, %v12315_v57  ;;  %v2489_v12 = vld [vmem:[#allocation11 + $0x10] sm:$0xff] }
 0x74d   : > { %2517 = vmatpush.msra.mxu1 %v2489_v12 }
 0x74e   : > { %v2409_v15 = vsel %vm1614_vm0, %v2401_v14, -inf }
 0x74f   : > { %2410 = vmax.xlane.f32.xlu0 %v2409_v15 }
 0x751   : > { %v2392_v17 = vpop.f32.mrf.mxu3 }
 0x752   : > { %v2398_v18 = vmul.f32 0.35355338, %v2392_v17 }
 0x754   : > { %v2402_v20 = vadd.f32 %v2398_v18, %v12322_v62 }
 0x756   : > { %v2412_v21 = vsel %vm1614_vm0, %v2402_v20, -inf }
 0x757   : > { %2413 = vmax.xlane.f32.xlu1 %v2412_v21 }
 0x759   : > { %v2601_v18 = vpop.f32.mrf.mxu3 }
 0x7b2   : > { %v2405_v25 = vpop.xlane.xlu1 %2404 }
 0x7b3   : > { %v2415_v26 = vsub.f32 %v2399_v4, %v2405_v25  ;;  %v8682_v4 = vld [vmem:[%s14818_s23 + $0x70] sm:$0xff] }
 0x7b4   : > { %2558 = vmatpush.msra.mxu2 %v8682_v4 }
 0x7b5   : > { %v2419_v27 = vmul.f32 1.442695, %v2415_v26  ;;  %v2604_v26 = vpop.f32.mrf.mxu3 }
 0x7b6   : > { %2559 = vmatpush.msra.mxu2 %v8681_v5 }
 0x7b7   : > { %10364 = vpow2.f32 %v2419_v27 }
 0x7b8   : > { %2560 = vmatpush.msra.mxu2 %v8680_v7 }
 0x7b9   : > { %8684 = vmatmul.msk.f32.vlgmr.msra.gmra.mxu2 %vm1614_vm0, %v12256_v6 }
 0x7ba   : > { %v2408_v32 = vpop.xlane.xlu2 %2407 }
 0x7bb   : > { %v2416_v33 = vsub.f32 %v2400_v9, %v2408_v32 }
 0x7bd   : > { %v10365_v35 = vpop.eup %10364  ;;  %v2421_v36 = vmul.f32 1.442695, %v2416_v33  ;;  %v2607_v29 = vpop.f32.mrf.mxu3 }
 0x7be   : > { %v2427_v37 = vsel %vm1614_vm0, %v10365_v35, 0.0  ;;  %v2608_v34 = vadd.f32 %v10303_v30, %v2607_v29 }
 0x7bf   : > { %10366 = vpow2.f32 %v2421_v36  ;;  %2428 = vadd.xlane.f32.xlu2 %v2427_v37  ;;  %v2602_v36 = vadd.f32 %v10303_v30, %v2601_v18 }
 0x7c1   : > { %8685 = vmatmul.msk.f32.gmra.mxu2 %vm1614_vm0, %v12264_v13 }
 0x7c2   : > { %v2411_v38 = vpop.xlane.xlu0 %2410 }
 0x7c3   : > { %v2417_v40 = vsub.f32 %v2401_v14, %v2411_v38 }
 0x7c5   : > { %v10367_v42 = vpop.eup %10366  ;;  %v2423_v43 = vmul.f32 1.442695, %v2417_v40  ;;  %v2610_v32 = vpop.f32.mrf.mxu3 }
 0x7c6   : > { %v2430_v44 = vsel %vm1614_vm0, %v10367_v42, 0.0  ;;  %v2611_v33 = vadd.f32 %v10303_v30, %v2610_v32 }
 0x7c7   : > { %10368 = vpow2.f32 %v2423_v43  ;;  %2431 = vadd.xlane.f32.xlu0 %v2430_v44  ;;  %v10304_v43 = vld [vmem:[#allocation7 + $0x3] ss:$0 sm:$0xff] }
 0x7c8   : > { %8704 = vmatpush.xpose.msk.msrb.mxu1 %vm1730_vm1, %v2611_v33 }
 0x7c9   : > { %8686 = vmatmul.msk.f32.gmra.mxu2 %vm1614_vm0, %v12270_v16 }
 0x7ca   : > { %v2414_v45 = vpop.xlane.xlu1 %2413 }
 0x7cb   : > { %v2418_v47 = vsub.f32 %v2402_v20, %v2414_v45 }
 0x7cc   : > { %8705 = vmatpush.xpose.msk.msrb.mxu1 %vm1730_vm1, %v2608_v34 }
 0x7cd   : > { %v10369_v48 = vpop.eup %10368  ;;  %v2425_v49 = vmul.f32 1.442695, %v2418_v47 }
 0x7ce   : > { %v2433_v51 = vsel %vm1614_vm0, %v10369_v48, 0.0 }
 0x7cf   : > { %10370 = vpow2.f32 %v2425_v49  ;;  %2434 = vadd.xlane.f32.xlu1 %v2433_v51 }
 0x7d1   : > { %8687 = vmatmul.msk.f32.gmra.mxu2 %vm1614_vm0, %v12276_v19 }
 0x7d5   : > { %v10371_v53 = vpop.eup %10370 }
 0x7d6   : > { %v2436_v54 = vsel %vm1614_vm0, %v10371_v53, 0.0 }
 0x7d7   : > { %2437 = vadd.xlane.f32.xlu2 %v2436_v54 }
 0x832   : > { %v2429_v8 = vpop.xlane.xlu2 %2428 }
 0x833   : > { %10372 = vrcp.f32 %v2429_v8 }
 0x839   : > { %v10373_v9 = vpop.eup %10372 }
 0x83a   : > { %v2443_v10 = vmul.f32 %v10373_v9, %v10365_v35  ;;  %v2432_v11 = vpop.xlane.xlu0 %2431  ;;  %v2605_v35 = vadd.f32 %v10303_v30, %v2604_v26 }
 0x83b   : > { %10374 = vrcp.f32 %v2432_v11 }
 0x83c   : > { %8672 = vmatmul.msk.f32.vlgmr.msra.gmra.mxu0 %vm1614_vm0, %v2443_v10  ;;  %8706 = vmatpush.xpose.msk.msrb.mxu1 %vm1730_vm1, %v2605_v35  ;;  %v2562_v40 = vpop.f32.mrf.mxu2 }
 0x83d   : > { %v2563_v44 = vadd.f32 %v10304_v43, %v2562_v40 }
 0x840   : > { %8707 = vmatpush.xpose.msk.msrb.mxu1 %vm1730_vm1, %v2602_v36 }
 0x841   : > { %v10375_v14 = vpop.eup %10374 }
 0x842   : > { %v2435_v15 = vpop.xlane.xlu1 %2434  ;;  %v2444_v17 = vmul.f32 %v10375_v14, %v10367_v42 }
 0x843   : > { %10376 = vrcp.f32 %v2435_v15 }
 0x844   : > { %8673 = vmatmul.msk.f32.gmra.mxu0 %vm1614_vm0, %v2444_v17  ;;  %v2565_v45 = vpop.f32.mrf.mxu2 }
 0x845   : > { %v2566_v46 = vadd.f32 %v10304_v43, %v2565_v45 }
 0x849   : > { %v10377_v20 = vpop.eup %10376 }
 0x84a   : > { %v2438_v21 = vpop.xlane.xlu2 %2437  ;;  %v2445_v25 = vmul.f32 %v10377_v20, %v10369_v48 }
 0x84b   : > { %10378 = vrcp.f32 %v2438_v21 }
 0x84c   : > { %8674 = vmatmul.msk.f32.gmra.mxu0 %vm1614_vm0, %v2445_v25  ;;  %v2568_v47 = vpop.f32.mrf.mxu2 }
 0x84d   : > { %v2569_v48 = vadd.f32 %v10304_v43, %v2568_v47 }
 0x851   : > { %v10379_v27 = vpop.eup %10378 }
 0x852   : > { %v2446_v28 = vmul.f32 %v10379_v27, %v10371_v53 }
 0x854   : > { %8675 = vmatmul.msk.f32.gmra.mxu0 %vm1614_vm0, %v2446_v28  ;;  %v2571_v49 = vpop.f32.mrf.mxu2 }
 0x855   : > { %v2572_v51 = vadd.f32 %v10304_v43, %v2571_v49 }
 0x85c   : > { %8700 = vmatmul.msk.f32.vlgmr.msrb.gmra.mxu0 %vm1614_vm0, %v12256_v6 }
 0x864   : > { %8701 = vmatmul.msk.f32.gmra.mxu0 %vm1614_vm0, %v12264_v13 }
 0x86c   : > { %8702 = vmatmul.msk.f32.gmra.mxu0 %vm1614_vm0, %v12270_v16 }
 0x874   : > { %8703 = vmatmul.msk.f32.gmra.mxu0 %vm1614_vm0, %v12276_v19 }
 0x8b9   : > { %v2476_v37 = vpop.f32.mrf.mxu0 }
 0x8ba   : > { %8676 = vmatmul.msk.f32.vlgmr.msra.gmra.mxu1 %vm1730_vm1, %v2476_v37 }
 0x8c1   : > { %v2479_v38 = vpop.f32.mrf.mxu0 }
 0x8c2   : > { %8677 = vmatmul.msk.f32.gmra.mxu1 %vm1730_vm1, %v2479_v38 }
 0x8c9   : > { %v2482_v39 = vpop.f32.mrf.mxu0 }
 0x8ca   : > { %8678 = vmatmul.msk.f32.gmra.mxu1 %vm1730_vm1, %v2482_v39 }
 0x8d1   : > { %v2485_v42 = vpop.f32.mrf.mxu0 }
 0x8d2   : > { %8679 = vmatmul.msk.f32.gmra.mxu1 %vm1730_vm1, %v2485_v42 }
 0x8d9   : > { %v2640_v27 = vpop.f32.mrf.mxu0 }
 0x8da   : > { %8708 = vmatmul.msk.f32.vlgmr.msrb.gmra.mxu1 %vm1730_vm1, %v2563_v44  ;;  %v10305_v44 = vld [vmem:[#allocation10 + $0x3] ss:$0 sm:$0xff] }
 0x8db   : > { %v2641_v61 = vadd.f32 %v10305_v44, %v2640_v27 }
 0x8e1   : > { %v2643_v33 = vpop.f32.mrf.mxu0 }
 0x8e2   : > { %8709 = vmatmul.msk.f32.gmra.mxu1 %vm1730_vm1, %v2566_v46 }
 0x8e9   : > { %v2646_v39 = vpop.f32.mrf.mxu0 }
 0x8ea   : > { %8710 = vmatmul.msk.f32.gmra.mxu1 %vm1730_vm1, %v2569_v48  ;;  %v2647_v47 = vadd.f32 %v10305_v44, %v2646_v39 }
 0x8f1   : > { %v2649_v45 = vpop.f32.mrf.mxu0 }
 0x8f2   : > { %8711 = vmatmul.msk.f32.gmra.mxu1 %vm1730_vm1, %v2572_v51  ;;  %v2650_v48 = vadd.f32 %v10305_v44, %v2649_v45  ;;  %v2644_v51 = vadd.f32 %v10305_v44, %v2643_v33 }
 0x8f4   : > { %2781 = vmatpush.msrb.mxu2 %v2650_v48 }
 0x8f6   : > { %2782 = vmatpush.msrb.mxu2 %v2647_v47 }
 0x8f8   : > { %2783 = vmatpush.msrb.mxu2 %v2644_v51 }
 0x8fa   : > { %2784 = vmatpush.msrb.mxu2 %v2641_v61 }
 0x937   : > { %v12512_v52 = vpop.f32.mrf.mxu1 }
 0x93f   : > { %v12514_v53 = vpop.f32.mrf.mxu1 }
 0x947   : > { %v12516_v54 = vpop.f32.mrf.mxu1 }
 0x94f   : > { %v12518_v55 = vpop.f32.mrf.mxu1 }
 0x957   : > { %v2693_v0 = vpop.f32.mrf.mxu1 }
 0x958   : > { %v2705_v2 = vmul.f32 0.35355338, %v2693_v0  ;;  %v2799_v0 = vld [vmem:[#allocation11 + $0x18] sm:$0xff] }
 0x959   : > { %2827 = vmatpush.msrb.mxu3 %v2799_v0 }
 0x95a   : > { %v2709_v4 = vadd.f32 %v2705_v2, %v12295_v41 }
 0x95c   : > { %v2713_v5 = vsel %vm1614_vm0, %v2709_v4, -inf }
 0x95d   : > { %2714 = vmax.xlane.f32.xlu0 %v2713_v5 }
 0x95f   : > { %v2696_v7 = vpop.f32.mrf.mxu1 }
 0x960   : > { %v2706_v8 = vmul.f32 0.35355338, %v2696_v7 }
 0x962   : > { %v2710_v9 = vadd.f32 %v2706_v8, %v12306_v50 }
 0x964   : > { %v2716_v10 = vsel %vm1614_vm0, %v2710_v9, -inf }
 0x965   : > { %2717 = vmax.xlane.f32.xlu1 %v2716_v10 }
 0x967   : > { %v2699_v11 = vpop.f32.mrf.mxu1 }
 0x968   : > { %v2707_v41 = vmul.f32 0.35355338, %v2699_v11 }
 0x96a   : > { %v2711_v12 = vadd.f32 %v2707_v41, %v12315_v57 }
 0x96c   : > { %v2719_v14 = vsel %vm1614_vm0, %v2711_v12, -inf }
 0x96d   : > { %2720 = vmax.xlane.f32.xlu2 %v2719_v14 }
 0x96f   : > { %v2702_v15 = vpop.f32.mrf.mxu1 }
 0x970   : > { %v2708_v17 = vmul.f32 0.35355338, %v2702_v15 }
 0x972   : > { %v2712_v50 = vadd.f32 %v2708_v17, %v12322_v62 }
 0x974   : > { %v2722_v18 = vsel %vm1614_vm0, %v2712_v50, -inf }
 0x975   : > { %2723 = vmax.xlane.f32.xlu0 %v2722_v18 }
 0x9d0   : > { %v2715_v20 = vpop.xlane.xlu0 %2714 }
 0x9d1   : > { %v2725_v21 = vsub.f32 %v2709_v4, %v2715_v20  ;;  %v10306_v20 = vld [vmem:[#allocation13] ss:$0 sm:$0xff] }
 0x9d3   : > { %v2729_v25 = vmul.f32 1.442695, %v2725_v21 }
 0x9d5   : > { %10380 = vpow2.f32 %v2729_v25 }
 0x9d8   : > { %v2718_v57 = vpop.xlane.xlu1 %2717 }
 0x9d9   : > { %v2726_v26 = vsub.f32 %v2710_v9, %v2718_v57 }
 0x9db   : > { %v10381_v28 = vpop.eup %10380  ;;  %v2731_v29 = vmul.f32 1.442695, %v2726_v26  ;;  %v2217_v26 = vadd.f32 %v12434_v58, %v12462_v23 }
 0x9dc   : > { %v2737_v30 = vsel %vm1614_vm0, %v10381_v28, 0.0 }
 0x9dd   : > { %10382 = vpow2.f32 %v2731_v29  ;;  %2738 = vadd.xlane.f32.xlu1 %v2737_v30 }
 0x9e0   : > { %v2721_v62 = vpop.xlane.xlu2 %2720 }
 0x9e1   : > { %v2727_v32 = vsub.f32 %v2711_v12, %v2721_v62 }
 0x9e3   : > { %v10383_v34 = vpop.eup %10382  ;;  %v2733_v35 = vmul.f32 1.442695, %v2727_v32 }
 0x9e4   : > { %v2740_v36 = vsel %vm1614_vm0, %v10383_v34, 0.0 }
 0x9e5   : > { %10384 = vpow2.f32 %v2733_v35  ;;  %2741 = vadd.xlane.f32.xlu2 %v2740_v36 }
 0x9e8   : > { %v2724_v37 = vpop.xlane.xlu0 %2723 }
 0x9e9   : > { %v2728_v38 = vsub.f32 %v2712_v50, %v2724_v37  ;;  %v2214_v50 = vadd.f32 %v12432_v56, %v12460_v22  ;;  %v2220_v56 = vadd.f32 %v12436_v59, %v12464_v24 }
 0x9eb   : > { %v10385_v40 = vpop.eup %10384  ;;  %v2735_v42 = vmul.f32 1.442695, %v2728_v38  ;;  %v2531_v18 = vadd.f32 %v12512_v52, %v2214_v50  ;;  %v2533_v52 = vadd.f32 %v12516_v54, %v2220_v56  ;;  %v11580_v38 = vmov 32.0  }
 0x9ec   : > { %v2743_v43 = vsel %vm1614_vm0, %v10385_v40, 0.0 }
 0x9ed   : > { %10386 = vpow2.f32 %v2735_v42  ;;  %2744 = vadd.xlane.f32.xlu0 %v2743_v43 }
 0x9f3   : > { %v10387_v46 = vpop.eup %10386 }
 0x9f4   : > { %v2746_v49 = vsel %vm1614_vm0, %v10387_v46, 0.0 }
 0x9f5   : > { %2747 = vadd.xlane.f32.xlu1 %v2746_v49 }
 0xa50   : > { %v2739_v63 = vpop.xlane.xlu1 %2738 }
 0xa51   : > { %10388 = vrcp.f32 %v2739_v63 }
 0xa57   : > { %v10389_v1 = vpop.eup %10388 }
 0xa58   : > { %v2753_v2 = vmul.f32 %v10389_v1, %v10381_v28  ;;  %v2742_v3 = vpop.xlane.xlu2 %2741  ;;  %v2532_v28 = vadd.f32 %v12514_v53, %v2217_v26  ;;  %v2223_v53 = vadd.f32 %v12438_v60, %v12469_v31 }
 0xa59   : > { %10390 = vrcp.f32 %v2742_v3 }
 0xa5a   : > { %8712 = vmatmul.msk.f32.vlgmr.msrb.gmra.mxu2 %vm1614_vm0, %v2753_v2  ;;  %v2534_v35 = vadd.f32 %v12518_v55, %v2223_v53  ;;  %v3026_v53 = vld [vmem:[%s14823_s26 + $0x28] sm:$0xff] }
 0xa5f   : > { %v10391_v4 = vpop.eup %10390 }
 0xa60   : > { %v2745_v5 = vpop.xlane.xlu0 %2744  ;;  %v2754_v7 = vmul.f32 %v10391_v4, %v10383_v34 }
 0xa61   : > { %10392 = vrcp.f32 %v2745_v5 }
 0xa62   : > { %8713 = vmatmul.msk.f32.gmra.mxu2 %vm1614_vm0, %v2754_v7 }
 0xa67   : > { %v10393_v8 = vpop.eup %10392 }
 0xa68   : > { %v2748_v9 = vpop.xlane.xlu1 %2747  ;;  %v2755_v10 = vmul.f32 %v10393_v8, %v10385_v40 }
 0xa69   : > { %10394 = vrcp.f32 %v2748_v9  ;;  %v2971_v9 = vld [vmem:[#allocation17 + $0x18] sm:$0xff] }
 0xa6a   : > { %8714 = vmatmul.msk.f32.gmra.mxu2 %vm1614_vm0, %v2755_v10  ;;  %10396 = vrcp.f32 %v11580_v38  ;;  %3000 = vmatpush.msra.mxu0 %v2971_v9  ;;  %v2970_v10 = vld [vmem:[#allocation17 + $0x10] sm:$0xff] }
 0xa6c   : > { %3001 = vmatpush.msra.mxu0 %v2970_v10 }
 0xa6f   : > { %v10395_v11 = vpop.eup %10394 }
 0xa70   : > { %v2756_v41 = vmul.f32 %v10395_v11, %v10387_v46  ;;  %v10397_v39 = vpop.eup %10396  ;;  %v2969_v11 = vld [vmem:[#allocation17 + $0x8] sm:$0xff] }
 0xa71   : > { %v2872_v40 = vmul.f32 32.0, %v10397_v39  ;;  %vm2876_vm2 = vweird.f32 %v10397_v39  ;;  %3002 = vmatpush.msra.mxu0 %v2969_v11  ;;  %v3022_v11 = vld [vmem:[%s14823_s26 + $0x8] sm:$0xff] }
 0xa72   : > { %8715 = vmatmul.msk.f32.gmra.mxu2 %vm1614_vm0, %v2756_v41  ;;  %v2968_v41 = vld [vmem:[#allocation17] sm:$0xff] }
 0xa73   : > { %v2873_v60 = vsub.f32 1.0, %v2872_v40  ;;  %3003 = vmatpush.msra.mxu0 %v2968_v41  ;;  %v3021_v41 = vld [vmem:[%s14823_s26] sm:$0xff] }
 0xa75   : > { %v2874_v31 = vmul.f32 %v10397_v39, %v2873_v60 }
 0xadd   : > { %v2786_v12 = vpop.f32.mrf.mxu2 }
 0xade   : > { %8716 = vmatmul.msk.f32.vlgmr.msrb.gmra.mxu3 %vm1730_vm1, %v2786_v12 }
 0xae5   : > { %v2789_v14 = vpop.f32.mrf.mxu2 }
 0xae6   : > { %8717 = vmatmul.msk.f32.gmra.mxu3 %vm1730_vm1, %v2789_v14 }
 0xaed   : > { %v2792_v15 = vpop.f32.mrf.mxu2 }
 0xaee   : > { %8718 = vmatmul.msk.f32.gmra.mxu3 %vm1730_vm1, %v2792_v15 }
 0xaf5   : > { %v2795_v17 = vpop.f32.mrf.mxu2 }
 0xaf6   : > { %8719 = vmatmul.msk.f32.gmra.mxu3 %vm1730_vm1, %v2795_v17 }
 0xb61   : > { %v2829_v21 = vpop.f32.mrf.mxu3 }
 0xb62   : > { %v2841_v25 = vadd.f32 %v2829_v21, %v2531_v18 }
 0xb64   : > { %v2849_v57 = vadd.f32 %v10306_v20, %v2841_v25 }
 0xb66   : > { %v2853_v27 = vadd.f32 %v2849_v57, %v12256_v6 }
 0xb68   : > { %v2859_v29 = vsel %vm1614_vm0, %v2853_v27, 0.0 }
 0xb69   : > { %2860 = vadd.xlane.f32.xlu2 %v2859_v29  ;;  %v2832_v30 = vpop.f32.mrf.mxu3 }
 0xb6a   : > { %v2842_v62 = vadd.f32 %v2832_v30, %v2532_v28 }
 0xb6c   : > { %v2850_v32 = vadd.f32 %v10306_v20, %v2842_v62  ;;  %v12597_v62 = vld [vmem:[#allocation14] ss:$0 sm:$0xff] }
 0xb6e   : > { %v2854_v22 = vadd.f32 %v2850_v32, %v12264_v13 }
 0xb70   : > { %v2862_v33 = vsel %vm1614_vm0, %v2854_v22, 0.0 }
 0xb71   : > { %2863 = vadd.xlane.f32.xlu0 %v2862_v33  ;;  %v2835_v58 = vpop.f32.mrf.mxu3 }
 0xb72   : > { %v2843_v6 = vadd.f32 %v2835_v58, %v2533_v52  ;;  %v3027_v52 = vld [vmem:[%s14823_s26 + $0x30] sm:$0xff] }
 0xb74   : > { %v2851_v23 = vadd.f32 %v10306_v20, %v2843_v6  ;;  %v10308_v6 = vld [vmem:[#allocation16] ss:$0 sm:$0xff] }
 0xb76   : > { %v2855_v34 = vadd.f32 %v2851_v23, %v12270_v16  ;;  %v2875_v16 = vadd.f32 %v10397_v39, %v2874_v31 }
 0xb78   : > { %v2865_v36 = vsel %vm1614_vm0, %v2855_v34, 0.0  ;;  %v12572_v55 = vsel %vm2876_vm2, %v10397_v39, %v2875_v16  ;;  %v3024_v39 = vld [vmem:[%s14823_s26 + $0x18] sm:$0xff] }
 0xb79   : > { %2866 = vadd.xlane.f32.xlu1 %v2865_v36  ;;  %v2838_v59 = vpop.f32.mrf.mxu3 }
 0xb7a   : > { %v2844_v13 = vadd.f32 %v2838_v59, %v2534_v35 }
 0xb7c   : > { %v2852_v24 = vadd.f32 %v10306_v20, %v2844_v13  ;;  %v3025_v13 = vld [vmem:[%s14823_s26 + $0x20] sm:$0xff] }
 0xb7e   : > { %v2856_v54 = vadd.f32 %v2852_v24, %v12276_v19 }
 0xb80   : > { %v2868_v37 = vsel %vm1614_vm0, %v2856_v54, 0.0 }
 0xb81   : > { %2869 = vadd.xlane.f32.xlu2 %v2868_v37 }
 0xbdc   : > { %v2861_v42 = vpop.xlane.xlu2 %2860 }
 0xbdd   : > { %v2878_v43 = vmul.f32 %v12572_v55, %v2861_v42 }
 0xbdf   : > { %v2882_v44 = vsub.f32 %v2853_v27, %v2878_v43 }
 0xbe1   : > { %v2886_v45 = vmul.f32 %v2882_v44, %v2882_v44 }
 0xbe3   : > { %v2890_v19 = vsel %vm1614_vm0, %v2886_v45, 0.0 }
 0xbe4   : > { %2891 = vadd.xlane.f32.xlu0 %v2890_v19  ;;  %v2864_v46 = vpop.xlane.xlu0 %2863 }
 0xbe5   : > { %v2879_v47 = vmul.f32 %v12572_v55, %v2864_v46 }
 0xbe7   : > { %v12577_v48 = vsub.f32 %v2854_v22, %v2879_v47  ;;  %v3028_v22 = vld [vmem:[%s14823_s26 + $0x38] sm:$0xff] }
 0xbe8   : > { %3054 = vmatpush.msra.mxu1 %v3028_v22 }
 0xbe9   : > { %v2887_v49 = vmul.f32 %v12577_v48, %v12577_v48 }
 0xbea   : > { %3055 = vmatpush.msra.mxu1 %v3027_v52 }
 0xbeb   : > { %v2893_v51 = vsel %vm1614_vm0, %v2887_v49, 0.0 }
 0xbec   : > { %v2867_v61 = vpop.xlane.xlu1 %2866  ;;  %2894 = vadd.xlane.f32.xlu1 %v2893_v51  ;;  %3056 = vmatpush.msra.mxu1 %v3026_v53 }
 0xbed   : > { %v2880_v63 = vmul.f32 %v12572_v55, %v2867_v61 }
 0xbee   : > { %3057 = vmatpush.msra.mxu1 %v3025_v13 }
 0xbef   : > { %v12583_v0 = vsub.f32 %v2855_v34, %v2880_v63 }
 0xbf0   : > { %3058 = vmatpush.msra.mxu1 %v3024_v39 }
 0xbf1   : > { %v2888_v1 = vmul.f32 %v12583_v0, %v12583_v0 }
 0xbf3   : > { %v2896_v2 = vsel %vm1614_vm0, %v2888_v1, 0.0 }
 0xbf4   : > { %2897 = vadd.xlane.f32.xlu2 %v2896_v2  ;;  %v2870_v3 = vpop.xlane.xlu2 %2869 }
 0xbf5   : > { %v2881_v4 = vmul.f32 %v12572_v55, %v2870_v3 }
 0xbf7   : > { %v12589_v5 = vsub.f32 %v2856_v54, %v2881_v4 }
 0xbf9   : > { %v2889_v7 = vmul.f32 %v12589_v5, %v12589_v5 }
 0xbfb   : > { %v2899_v8 = vsel %vm1614_vm0, %v2889_v7, 0.0 }
 0xbfc   : > { %2900 = vadd.xlane.f32.xlu0 %v2899_v8 }
 0xc57   : > { %v2892_v12 = vpop.xlane.xlu0 %2891 }
 0xc58   : > { %v2902_v14 = vmul.f32 %v2892_v12, %v12572_v55  ;;  %v10309_v12 = vld [vmem:[#allocation19] ss:$0 sm:$0xff] }
 0xc5a   : > { %v2906_v15 = vadd.f32 1e-05, %v2902_v14 }
 0xc5c   : > { %10398 = vrsqrt.f32 %v2906_v15  ;;  %vm2916_vm4 = vweird.f32 %v2906_v15 }
 0xc5f   : > { %v2895_v17 = vpop.xlane.xlu1 %2894 }
 0xc60   : > { %v2903_v50 = vmul.f32 %v2895_v17, %v12572_v55 }
 0xc62   : > { %v10399_v18 = vpop.eup %10398  ;;  %v2907_v20 = vadd.f32 1e-05, %v2903_v50 }
 0xc63   : > { %v2911_v21 = vmul.f32 %v10399_v18, %v2906_v15  ;;  %vm2917_vm3 = vweird.f32 %v10399_v18 }
 0xc64   : > { %10400 = vrsqrt.f32 %v2907_v20  ;;  %vm2918_vm5 = vmor %vm2916_vm4, %vm2917_vm3  ;;  %vm2926_vm7 = vweird.f32 %v2907_v20 }
 0xc65   : > { %v2912_v25 = vmul.f32 %v10399_v18, %v2911_v21 }
 0xc67   : > { %v2913_v57 = vmul.f32 0.5, %v2912_v25  ;;  %v2898_v26 = vpop.xlane.xlu2 %2897 }
 0xc68   : > { %v2904_v27 = vmul.f32 %v2898_v26, %v12572_v55 }
 0xc69   : > { %v2914_v28 = vsub.f32 1.5, %v2913_v57 }
 0xc6a   : > { %v10401_v29 = vpop.eup %10400  ;;  %v2908_v30 = vadd.f32 1e-05, %v2904_v27 }
 0xc6b   : > { %v2915_v32 = vmul.f32 %v10399_v18, %v2914_v28  ;;  %v2921_v56 = vmul.f32 %v10401_v29, %v2907_v20  ;;  %vm2927_vm6 = vweird.f32 %v10401_v29  ;;  %v10310_v28 = vld [vmem:[#allocation20] ss:$0 sm:$0xff] }
 0xc6c   : > { %10402 = vrsqrt.f32 %v2908_v30  ;;  %vm2928_vm8 = vmor %vm2926_vm7, %vm2927_vm6  ;;  %vm2936_vm10 = vweird.f32 %v2908_v30 }
 0xc6d   : > { %v2919_v33 = vsel %vm2918_vm5, %v10399_v18, %v2915_v32  ;;  %v2922_v58 = vmul.f32 %v10401_v29, %v2921_v56 }
 0xc6e   : > { %v2950_v23 = vmul.f32 %v2919_v33, %v2882_v44 }
 0xc6f   : > { %v2923_v34 = vmul.f32 0.5, %v2922_v58  ;;  %v2901_v35 = vpop.xlane.xlu0 %2900 }
 0xc70   : > { %v2957_v36 = vmul.f32 %v12597_v62, %v2950_v23  ;;  %v2905_v59 = vmul.f32 %v2901_v35, %v12572_v55 }
 0xc71   : > { %v2924_v24 = vsub.f32 1.5, %v2923_v34 }
 0xc72   : > { %v10403_v54 = vpop.eup %10402  ;;  %v12605_v37 = vadd.f32 %v10308_v6, %v2957_v36  ;;  %v2909_v38 = vadd.f32 1e-05, %v2905_v59 }
 0xc73   : > { %v2925_v40 = vmul.f32 %v10401_v29, %v2924_v24  ;;  %v2931_v60 = vmul.f32 %v10403_v54, %v2908_v30  ;;  %vm2937_vm9 = vweird.f32 %v10403_v54 }
 0xc74   : > { %10404 = vrsqrt.f32 %v2909_v38  ;;  %8720 = vmatmul.msk.f32.vlgmr.msra.gmra.mxu0 %vm1614_vm0, %v12605_v37  ;;  %vm2938_vm11 = vmor %vm2936_vm10, %vm2937_vm9  ;;  %vm2946_vm13 = vweird.f32 %v2909_v38 }
 0xc75   : > { %v2929_v31 = vsel %vm2928_vm8, %v10401_v29, %v2925_v40  ;;  %v2932_v16 = vmul.f32 %v10403_v54, %v2931_v60 }
 0xc76   : > { %v2951_v42 = vmul.f32 %v2929_v31, %v12577_v48 }
 0xc77   : > { %v2933_v43 = vmul.f32 0.5, %v2932_v16 }
 0xc78   : > { %v2958_v44 = vmul.f32 %v12597_v62, %v2951_v42 }
 0xc79   : > { %v2934_v45 = vsub.f32 1.5, %v2933_v43 }
 0xc7a   : > { %v10405_v19 = vpop.eup %10404  ;;  %v2965_v46 = vadd.f32 %v10308_v6, %v2958_v44 }
 0xc7b   : > { %v2935_v47 = vmul.f32 %v10403_v54, %v2934_v45  ;;  %v2941_v49 = vmul.f32 %v10405_v19, %v2909_v38  ;;  %vm2947_vm12 = vweird.f32 %v10405_v19 }
 0xc7c   : > { %8721 = vmatmul.msk.f32.gmra.mxu0 %vm1614_vm0, %v2965_v46  ;;  %vm2948_vm14 = vmor %vm2946_vm13, %vm2947_vm12 }
 0xc7d   : > { %v2939_v51 = vsel %vm2938_vm11, %v10403_v54, %v2935_v47  ;;  %v2942_v61 = vmul.f32 %v10405_v19, %v2941_v49 }
 0xc7e   : > { %v2952_v63 = vmul.f32 %v2939_v51, %v12583_v0  ;;  %v3023_v0 = vld [vmem:[%s14823_s26 + $0x10] sm:$0xff] }
 0xc7f   : > { %v2943_v1 = vmul.f32 0.5, %v2942_v61  ;;  %3059 = vmatpush.msra.mxu1 %v3023_v0  ;;  %v3232_v0 = vld [vmem:[%s14825_s14] sm:$0xff] }
 0xc80   : > { %v2959_v48 = vmul.f32 %v12597_v62, %v2952_v63  ;;  %v3235_v63 = vld [vmem:[%s14824_s11 + $0x18] sm:$0xff] }
 0xc81   : > { %v2944_v2 = vsub.f32 1.5, %v2943_v1  ;;  %3060 = vmatpush.msra.mxu1 %v3022_v11  ;;  %v3186_v1 = vld [vmem:[%s14826_s16 + $0x18] sm:$0xff]  ;;  %3252 = vmatpush.msra.mxu3 %v3235_v63  ;;  %v3269_v11 = vld [vmem:[%s14827_s12] sm:$0xff] }
 0xc82   : > { %v2966_v3 = vadd.f32 %v10308_v6, %v2959_v48  ;;  %v3272_v48 = vld [vmem:[%s14827_s12 + $0x18] sm:$0xff]  ;;  %3215 = vmatpush.msra.mxu2 %v3186_v1 }
 0xc83   : > { %v2945_v4 = vmul.f32 %v10405_v19, %v2944_v2  ;;  %3061 = vmatpush.msra.mxu1 %v3021_v41  ;;  %v3234_v2 = vld [vmem:[%s14825_s14 + $0x10] sm:$0xff]  ;;  %3289 = vmatpush.msrb.mxu0 %v3272_v48 }
 0xc84   : > { %8722 = vmatmul.msk.f32.gmra.mxu0 %vm1614_vm0, %v2966_v3  ;;  %3253 = vmatpush.msra.mxu3 %v3234_v2 }
 0xc85   : > { %v2949_v7 = vsel %vm2948_vm14, %v10405_v19, %v2945_v4  ;;  %v3271_v4 = vld [vmem:[%s14827_s12 + $0x10] sm:$0xff] }
 0xc86   : > { %v2953_v8 = vmul.f32 %v2949_v7, %v12589_v5  ;;  %3290 = vmatpush.msrb.mxu0 %v3271_v4  ;;  %v3184_v7 = vld [vmem:[%s14826_s16 + $0x8] sm:$0xff] }
 0xc88   : > { %v2960_v9 = vmul.f32 %v12597_v62, %v2953_v8  ;;  %v3233_v8 = vld [vmem:[%s14825_s14 + $0x8] sm:$0xff] }
 0xc89   : > { %3254 = vmatpush.msra.mxu3 %v3233_v8 }
 0xc8a   : > { %v2967_v10 = vadd.f32 %v10308_v6, %v2960_v9  ;;  %v3270_v9 = vld [vmem:[%s14827_s12 + $0x8] sm:$0xff] }
 0xc8b   : > { %3291 = vmatpush.msrb.mxu0 %v3270_v9  ;;  %3255 = vmatpush.msra.mxu3 %v3232_v0 }
 0xc8c   : > { %8723 = vmatmul.msk.f32.gmra.mxu0 %vm1614_vm0, %v2967_v10 }
 0xc8d   : > { %3292 = vmatpush.msrb.mxu0 %v3269_v11 }
 0xcf1   : > { %v3005_v14 = vpop.f32.mrf.mxu0 }
 0xcf2   : > { %v3006_v15 = vadd.f32 %v10309_v12, %v3005_v14 }
 0xcf4   : > { %v3017_v17 = vmax.f32 %v3006_v15, 0.0 }
 0xcf6   : > { %8724 = vmatmul.msk.f32.vlgmr.msra.gmra.mxu1 %vm3033_vm15, %v3017_v17 }
 0xcf9   : > { %v3008_v50 = vpop.f32.mrf.mxu0 }
 0xcfa   : > { %v3009_v5 = vadd.f32 %v10309_v12, %v3008_v50 }
 0xcfc   : > { %v3018_v18 = vmax.f32 %v3009_v5, 0.0 }
 0xcfe   : > { %8725 = vmatmul.msk.f32.gmra.mxu1 %vm3033_vm15, %v3018_v18 }
 0xd01   : > { %v3011_v20 = vpop.f32.mrf.mxu0 }
 0xd02   : > { %v3012_v21 = vadd.f32 %v10309_v12, %v3011_v20 }
 0xd04   : > { %v3019_v25 = vmax.f32 %v3012_v21, 0.0 }
 0xd06   : > { %8726 = vmatmul.msk.f32.gmra.mxu1 %vm3033_vm15, %v3019_v25 }
 0xd09   : > { %v3014_v57 = vpop.f32.mrf.mxu0 }
 0xd0a   : > { %v3015_v26 = vadd.f32 %v10309_v12, %v3014_v57 }
 0xd0c   : > { %v3020_v27 = vmax.f32 %v3015_v26, 0.0 }
 0xd0e   : > { %8727 = vmatmul.msk.f32.gmra.mxu1 %vm3033_vm15, %v3020_v27 }
 0xd73   : > { %v3063_v29 = vpop.f32.mrf.mxu1 }
 0xd74   : > { %v3064_v30 = vadd.f32 %v10310_v28, %v3063_v29 }
 0xd76   : > { %v3075_v62 = vadd.f32 %v3064_v30, %v12605_v37 }
 0xd78   : > { %v3081_v32 = vsel %vm1614_vm0, %v3075_v62, 0.0 }
 0xd79   : > { %3082 = vadd.xlane.f32.xlu1 %v3081_v32 }
 0xd7b   : > { %v3066_v56 = vpop.f32.mrf.mxu1 }
 0xd7c   : > { %v3067_v22 = vadd.f32 %v10310_v28, %v3066_v56 }
 0xd7e   : > { %v3076_v52 = vadd.f32 %v3067_v22, %v2965_v46  ;;  %v8755_v22 = vld [vmem:[%s14826_s16 + $0x38] sm:$0xff] }
 0xd7f   : > { %3475 = vmatpush.msrb.mxu3 %v8755_v22 }
 0xd80   : > { %v3084_v33 = vsel %vm1614_vm0, %v3076_v52, 0.0 }
 0xd81   : > { %3085 = vadd.xlane.f32.xlu2 %v3084_v33  ;;  %v8754_v33 = vld [vmem:[%s14826_s16 + $0x30] sm:$0xff] }
 0xd82   : > { %3476 = vmatpush.msrb.mxu3 %v8754_v33 }
 0xd83   : > { %v3069_v58 = vpop.f32.mrf.mxu1 }
 0xd84   : > { %v3070_v6 = vadd.f32 %v10310_v28, %v3069_v58  ;;  %v12675_v58 = vld [vmem:[#allocation23] ss:$0 sm:$0xff] }
 0xd86   : > { %v3077_v23 = vadd.f32 %v3070_v6, %v2966_v3  ;;  %v3185_v3 = vld [vmem:[%s14826_s16 + $0x10] sm:$0xff] }
 0xd87   : > { %3216 = vmatpush.msra.mxu2 %v3185_v3 }
 0xd88   : > { %v3087_v53 = vsel %vm1614_vm0, %v3077_v23, 0.0 }
 0xd89   : > { %3088 = vadd.xlane.f32.xlu0 %v3087_v53  ;;  %3217 = vmatpush.msra.mxu2 %v3184_v7 }
 0xd8b   : > { %v3072_v34 = vpop.f32.mrf.mxu1 }
 0xd8c   : > { %v3073_v35 = vadd.f32 %v10310_v28, %v3072_v34 }
 0xd8e   : > { %v3078_v36 = vadd.f32 %v3073_v35, %v2967_v10  ;;  %v3183_v10 = vld [vmem:[%s14826_s16] sm:$0xff]  ;;  %v8753_v35 = vld [vmem:[%s14826_s16 + $0x28] sm:$0xff] }
 0xd8f   : > { %3218 = vmatpush.msra.mxu2 %v3183_v10  ;;  %3477 = vmatpush.msrb.mxu3 %v8753_v35 }
 0xd90   : > { %v3090_v59 = vsel %vm1614_vm0, %v3078_v36, 0.0 }
 0xd91   : > { %3091 = vadd.xlane.f32.xlu1 %v3090_v59 }
 0xdec   : > { %v3083_v13 = vpop.xlane.xlu1 %3082 }
 0xded   : > { %v3093_v24 = vmul.f32 %v3083_v13, %v12572_v55 }
 0xdef   : > { %v12632_v54 = vsub.f32 %v3075_v62, %v3093_v24  ;;  %v12670_v62 = vld [vmem:[#allocation22] ss:$0 sm:$0xff] }
 0xdf1   : > { %v3101_v37 = vmul.f32 %v12632_v54, %v12632_v54 }
 0xdf3   : > { %v3105_v38 = vsel %vm1614_vm0, %v3101_v37, 0.0 }
 0xdf4   : > { %3106 = vadd.xlane.f32.xlu2 %v3105_v38  ;;  %v3086_v39 = vpop.xlane.xlu2 %3085 }
 0xdf5   : > { %v3094_v40 = vmul.f32 %v3086_v39, %v12572_v55  ;;  %v8752_v39 = vld [vmem:[%s14826_s16 + $0x20] sm:$0xff] }
 0xdf6   : > { %3478 = vmatpush.msrb.mxu3 %v8752_v39 }
 0xdf7   : > { %v12638_v60 = vsub.f32 %v3076_v52, %v3094_v40  ;;  %v8763_v52 = vld [vmem:[%s14825_s14 + $0x38] sm:$0xff] }
 0xdf8   : > { %3514 = vmatpush.msra.mxu0 %v8763_v52  ;;  %v8771_v52 = vld [vmem:[%s14827_s12 + $0x38] sm:$0xff] }
 0xdf9   : > { %v3102_v31 = vmul.f32 %v12638_v60, %v12638_v60 }
 0xdfb   : > { %v3108_v16 = vsel %vm1614_vm0, %v3102_v31, 0.0 }
 0xdfc   : > { %v3089_v42 = vpop.xlane.xlu0 %3088  ;;  %3109 = vadd.xlane.f32.xlu0 %v3108_v16  ;;  %v8760_v16 = vld [vmem:[%s14825_s14 + $0x20] sm:$0xff] }
 0xdfd   : > { %v3095_v43 = vmul.f32 %v3089_v42, %v12572_v55 }
 0xdff   : > { %v12644_v44 = vsub.f32 %v3077_v23, %v3095_v43  ;;  %v8762_v23 = vld [vmem:[%s14825_s14 + $0x30] sm:$0xff] }
 0xe00   : > { %3515 = vmatpush.msra.mxu0 %v8762_v23  ;;  %v8769_v23 = vld [vmem:[%s14827_s12 + $0x28] sm:$0xff] }
 0xe01   : > { %v3103_v45 = vmul.f32 %v12644_v44, %v12644_v44 }
 0xe03   : > { %v3111_v19 = vsel %vm1614_vm0, %v3103_v45, 0.0 }
 0xe04   : > { %v3092_v46 = vpop.xlane.xlu1 %3091  ;;  %3112 = vadd.xlane.f32.xlu1 %v3111_v19 }
 0xe05   : > { %v3096_v47 = vmul.f32 %v3092_v46, %v12572_v55 }
 0xe07   : > { %v12650_v49 = vsub.f32 %v3078_v36, %v3096_v47  ;;  %v8761_v36 = vld [vmem:[%s14825_s14 + $0x28] sm:$0xff] }
 0xe08   : > { %3516 = vmatpush.msra.mxu0 %v8761_v36  ;;  %v10316_v36 = vld [vmem:[#allocation26 + $0x1] ss:$0 sm:$0xff] }
 0xe09   : > { %v3104_v51 = vmul.f32 %v12650_v49, %v12650_v49 }
 0xe0a   : > { %3517 = vmatpush.msra.mxu0 %v8760_v16 }
 0xe0b   : > { %v3114_v61 = vsel %vm1614_vm0, %v3104_v51, 0.0 }
 0xe0c   : > { %3115 = vadd.xlane.f32.xlu2 %v3114_v61 }
 0xe67   : > { %v3107_v41 = vpop.xlane.xlu2 %3106 }
 0xe68   : > { %v3117_v12 = vmul.f32 %v3107_v41, %v12572_v55 }
 0xe6a   : > { %v3121_v14 = vadd.f32 1e-05, %v3117_v12 }
 0xe6c   : > { %10406 = vrsqrt.f32 %v3121_v14  ;;  %vm3131_vm3 = vweird.f32 %v3121_v14 }
 0xe6f   : > { %v3110_v15 = vpop.xlane.xlu0 %3109 }
 0xe70   : > { %v3118_v17 = vmul.f32 %v3110_v15, %v12572_v55 }
 0xe72   : > { %v10407_v50 = vpop.eup %10406  ;;  %v3122_v5 = vadd.f32 1e-05, %v3118_v17 }
 0xe73   : > { %v3126_v18 = vmul.f32 %v10407_v50, %v3121_v14  ;;  %vm3132_vm2 = vweird.f32 %v10407_v50 }
 0xe74   : > { %10408 = vrsqrt.f32 %v3122_v5  ;;  %vm3133_vm4 = vmor %vm3131_vm3, %vm3132_vm2  ;;  %vm3141_vm6 = vweird.f32 %v3122_v5 }
 0xe75   : > { %v3127_v20 = vmul.f32 %v10407_v50, %v3126_v18 }
 0xe77   : > { %v3128_v21 = vmul.f32 0.5, %v3127_v20  ;;  %v3113_v25 = vpop.xlane.xlu1 %3112 }
 0xe78   : > { %v3119_v57 = vmul.f32 %v3113_v25, %v12572_v55 }
 0xe79   : > { %v3129_v26 = vsub.f32 1.5, %v3128_v21  ;;  %v10315_v21 = vld [vmem:[#allocation26] ss:$0 sm:$0xff] }
 0xe7a   : > { %v10409_v27 = vpop.eup %10408  ;;  %v3123_v28 = vadd.f32 1e-05, %v3119_v57 }
 0xe7b   : > { %v3130_v29 = vmul.f32 %v10407_v50, %v3129_v26  ;;  %v3136_v30 = vmul.f32 %v10409_v27, %v3122_v5  ;;  %vm3142_vm5 = vweird.f32 %v10409_v27 }
 0xe7c   : > { %10410 = vrsqrt.f32 %v3123_v28  ;;  %vm3143_vm7 = vmor %vm3141_vm6, %vm3142_vm5  ;;  %vm3151_vm9 = vweird.f32 %v3123_v28 }
 0xe7d   : > { %v3134_v32 = vsel %vm3133_vm4, %v10407_v50, %v3130_v29  ;;  %v3137_v56 = vmul.f32 %v10409_v27, %v3136_v30  ;;  %v10313_v50 = vld [vmem:[#allocation28] ss:$0 sm:$0xff] }
 0xe7e   : > { %v3165_v6 = vmul.f32 %v3134_v32, %v12632_v54 }
 0xe7f   : > { %v3138_v53 = vmul.f32 0.5, %v3137_v56  ;;  %v3116_v34 = vpop.xlane.xlu2 %3115  ;;  %v10314_v56 = vld [vmem:[#allocation25] ss:$0 sm:$0xff] }
 0xe80   : > { %v3172_v59 = vmul.f32 %v12670_v62, %v3165_v6  ;;  %v3120_v13 = vmul.f32 %v3116_v34, %v12572_v55  ;;  %v8768_v34 = vld [vmem:[%s14827_s12 + $0x20] sm:$0xff] }
 0xe81   : > { %v3139_v24 = vsub.f32 1.5, %v3138_v53 }
 0xe82   : > { %v10411_v37 = vpop.eup %10410  ;;  %v12684_v54 = vadd.f32 %v12675_v58, %v3172_v59  ;;  %v3124_v38 = vadd.f32 1e-05, %v3120_v13 }
 0xe83   : > { %v3140_v40 = vmul.f32 %v10409_v27, %v3139_v24  ;;  %v3146_v31 = vmul.f32 %v10411_v37, %v3123_v28  ;;  %vm3152_vm8 = vweird.f32 %v10411_v37 }
 0xe84   : > { %10412 = vrsqrt.f32 %v3124_v38  ;;  %8728 = vmatmul.msk.f32.vlgmr.msra.gmra.mxu2 %vm1614_vm0, %v12684_v54  ;;  %8732 = vmatmul.msk.f32.vlgmr.msra.gmra.mxu3 %vm1614_vm0, %v12684_v54  ;;  %vm3153_vm10 = vmor %vm3151_vm9, %vm3152_vm8  ;;  %vm3161_vm12 = vweird.f32 %v3124_v38 }
 0xe85   : > { %v3144_v42 = vsel %vm3143_vm7, %v10409_v27, %v3140_v40  ;;  %v3147_v43 = vmul.f32 %v10411_v37, %v3146_v31  ;;  %8736 = vmatmul.msk.f32.vlgmr.msrb.gmra.mxu0 %vm1614_vm0, %v12684_v54 }
 0xe86   : > { %v3166_v45 = vmul.f32 %v3144_v42, %v12638_v60 }
 0xe87   : > { %v3148_v19 = vmul.f32 0.5, %v3147_v43 }
 0xe88   : > { %v3173_v46 = vmul.f32 %v12670_v62, %v3166_v45  ;;  %v12768_v45 = vld [vmem:[%s14822_s6] sm:$0xff] }
 0xe89   : > { %v3149_v47 = vsub.f32 1.5, %v3148_v19 }
 0xe8a   : > { %v10413_v51 = vpop.eup %10412  ;;  %v12697_v61 = vadd.f32 %v12675_v58, %v3173_v46 }
 0xe8b   : > { %v3150_v63 = vmul.f32 %v10411_v37, %v3149_v47  ;;  %v3156_v1 = vmul.f32 %v10413_v51, %v3124_v38  ;;  %vm3162_vm11 = vweird.f32 %v10413_v51 }
 0xe8c   : > { %8729 = vmatmul.msk.f32.gmra.mxu2 %vm1614_vm0, %v12697_v61  ;;  %8733 = vmatmul.msk.f32.gmra.mxu3 %vm1614_vm0, %v12697_v61  ;;  %vm3163_vm13 = vmor %vm3161_vm12, %vm3162_vm11 }
 0xe8d   : > { %v3154_v60 = vsel %vm3153_vm10, %v10411_v37, %v3150_v63  ;;  %v3157_v48 = vmul.f32 %v10413_v51, %v3156_v1  ;;  %8737 = vmatmul.msk.f32.gmra.mxu0 %vm1614_vm0, %v12697_v61  ;;  %v12773_v63 = vld [vmem:[%s14822_s6 + $0x8] sm:$0xff] }
 0xe8e   : > { %v3167_v2 = vmul.f32 %v3154_v60, %v12644_v44 }
 0xe8f   : > { %v3158_v3 = vmul.f32 0.5, %v3157_v48 }
 0xe90   : > { %v3174_v4 = vmul.f32 %v12670_v62, %v3167_v2 }
 0xe91   : > { %v3159_v7 = vsub.f32 1.5, %v3158_v3  ;;  %v12778_v3 = vld [vmem:[%s14822_s6 + $0x10] sm:$0xff] }
 0xe92   : > { %v12708_v8 = vadd.f32 %v12675_v58, %v3174_v4 }
 0xe93   : > { %v3160_v9 = vmul.f32 %v10413_v51, %v3159_v7 }
 0xe94   : > { %8730 = vmatmul.msk.f32.gmra.mxu2 %vm1614_vm0, %v12708_v8  ;;  %8734 = vmatmul.msk.f32.gmra.mxu3 %vm1614_vm0, %v12708_v8 }
 0xe95   : > { %v3164_v10 = vsel %vm3163_vm13, %v10413_v51, %v3160_v9  ;;  %8738 = vmatmul.msk.f32.gmra.mxu0 %vm1614_vm0, %v12708_v8 }
 0xe96   : > { %v3168_v44 = vmul.f32 %v3164_v10, %v12650_v49 }
 0xe98   : > { %v3175_v0 = vmul.f32 %v12670_v62, %v3168_v44  ;;  %v12783_v44 = vld [vmem:[%s14822_s6 + $0x18] sm:$0xff] }
 0xe9a   : > { %v12719_v11 = vadd.f32 %v12675_v58, %v3175_v0  ;;  %v8770_v58 = vld [vmem:[%s14827_s12 + $0x30] sm:$0xff] }
 0xe9c   : > { %8731 = vmatmul.msk.f32.gmra.mxu2 %vm1614_vm0, %v12719_v11  ;;  %8735 = vmatmul.msk.f32.gmra.mxu3 %vm1614_vm0, %v12719_v11 }
 0xe9d   : > { %8739 = vmatmul.msk.f32.gmra.mxu0 %vm1614_vm0, %v12719_v11 }
 0xea4   : > { %8756 = vmatmul.msk.f32.vlgmr.msrb.gmra.mxu3 %vm1614_vm0, %v12684_v54 }
 0xea5   : > { %8764 = vmatmul.msk.f32.vlgmr.msra.gmra.mxu0 %vm1614_vm0, %v12684_v54 }
 0xeac   : > { %8757 = vmatmul.msk.f32.gmra.mxu3 %vm1614_vm0, %v12697_v61 }
 0xead   : > { %8765 = vmatmul.msk.f32.gmra.mxu0 %vm1614_vm0, %v12697_v61 }
 0xeb4   : > { %8758 = vmatmul.msk.f32.gmra.mxu3 %vm1614_vm0, %v12708_v8 }
 0xeb5   : > { %8766 = vmatmul.msk.f32.gmra.mxu0 %vm1614_vm0, %v12708_v8 }
 0xebc   : > { %8759 = vmatmul.msk.f32.gmra.mxu3 %vm1614_vm0, %v12719_v11 }
 0xebd   : > { %8767 = vmatmul.msk.f32.gmra.mxu0 %vm1614_vm0, %v12719_v11 }
 0xf02   : > { %v3294_v49 = vpop.f32.mrf.mxu0 }
 0xf03   : > { %v3295_v27 = vadd.f32 %v10313_v50, %v3294_v49 }
 0xf07   : > { %v3257_v41 = vpop.f32.mrf.mxu3  ;;  %v3220_v30 = vpop.f32.mrf.mxu2 }
 0xf08   : > { %v3258_v22 = vadd.f32 %v10315_v21, %v3257_v41  ;;  %v3221_v33 = vadd.f32 %v10314_v56, %v3220_v30 }
 0xf0a   : > { %v3297_v12 = vpop.f32.mrf.mxu0 }
 0xf0b   : > { %v3298_v25 = vadd.f32 %v10313_v50, %v3297_v12 }
 0xf0f   : > { %v3260_v14 = vpop.f32.mrf.mxu3  ;;  %v3223_v6 = vpop.f32.mrf.mxu2 }
 0xf10   : > { %v3261_v62 = vadd.f32 %v10315_v21, %v3260_v14  ;;  %v3224_v35 = vadd.f32 %v10314_v56, %v3223_v6 }
 0xf12   : > { %v3300_v15 = vpop.f32.mrf.mxu0 }
 0xf13   : > { %v3301_v20 = vadd.f32 %v10313_v50, %v3300_v15  ;;  %v10318_v15 = vld [vmem:[#allocation28 + $0x1] ss:$0 sm:$0xff] }
 0xf17   : > { %v3263_v17 = vpop.f32.mrf.mxu3  ;;  %v3226_v59 = vpop.f32.mrf.mxu2 }
 0xf18   : > { %v3264_v29 = vadd.f32 %v10315_v21, %v3263_v17  ;;  %v3227_v37 = vadd.f32 %v10314_v56, %v3226_v59 }
 0xf1a   : > { %v3303_v5 = vpop.f32.mrf.mxu0 }
 0xf1b   : > { %v3304_v18 = vadd.f32 %v10313_v50, %v3303_v5 }
 0xf1d   : > { %3435 = vmatpush.msrb.mxu2 %v3304_v18 }
 0xf1f   : > { %3436 = vmatpush.msrb.mxu2 %v3301_v20  ;;  %v3266_v57 = vpop.f32.mrf.mxu3  ;;  %v3229_v40 = vpop.f32.mrf.mxu2 }
 0xf20   : > { %v3267_v26 = vadd.f32 %v10315_v21, %v3266_v57  ;;  %v3230_v31 = vadd.f32 %v10314_v56, %v3229_v40 }
 0xf21   : > { %3437 = vmatpush.msrb.mxu2 %v3298_v25 }
 0xf22   : > { %v3519_v28 = vpop.f32.mrf.mxu0  ;;  %8740 = vmatpush.xpose.msk.msrb.mxu1 %vm1730_vm1, %v3267_v26 }
 0xf23   : > { %3438 = vmatpush.msrb.mxu2 %v3295_v27  ;;  %v3520_v16 = vadd.f32 %v10316_v36, %v3519_v28 }
 0xf26   : > { %8741 = vmatpush.xpose.msk.msrb.mxu1 %vm1730_vm1, %v3264_v29 }
 0xf2a   : > { %v3522_v32 = vpop.f32.mrf.mxu0  ;;  %8742 = vmatpush.xpose.msk.msrb.mxu1 %vm1730_vm1, %v3261_v62 }
 0xf2b   : > { %v3523_v39 = vadd.f32 %v10316_v36, %v3522_v32 }
 0xf2e   : > { %8743 = vmatpush.xpose.msk.msrb.mxu1 %vm1730_vm1, %v3258_v22 }
 0xf31   : > { %8744 = vmatmul.msk.f32.vlgmr.msrb.gmra.mxu1 %vm1730_vm1, %v3221_v33 }
 0xf32   : > { %3553 = vmatpush.msra.mxu1 %v8771_v52  ;;  %v3525_v53 = vpop.f32.mrf.mxu0 }
 0xf33   : > { %v3526_v38 = vadd.f32 %v10316_v36, %v3525_v53 }
 0xf34   : > { %3554 = vmatpush.msra.mxu1 %v8770_v58 }
 0xf36   : > { %3555 = vmatpush.msra.mxu1 %v8769_v23 }
 0xf38   : > { %3556 = vmatpush.msra.mxu1 %v8768_v34 }
 0xf39   : > { %8745 = vmatmul.msk.f32.gmra.mxu1 %vm1730_vm1, %v3224_v35 }
 0xf3a   : > { %v3528_v13 = vpop.f32.mrf.mxu0 }
 0xf3b   : > { %v3529_v24 = vadd.f32 %v10316_v36, %v3528_v13 }
 0xf3d   : > { %8776 = vmatpush.xpose.msk.msra.mxu2 %vm1730_vm1, %v3529_v24 }
 0xf41   : > { %8777 = vmatpush.xpose.msk.msra.mxu2 %vm1730_vm1, %v3526_v38  ;;  %8746 = vmatmul.msk.f32.gmra.mxu1 %vm1730_vm1, %v3227_v37 }
 0xf45   : > { %8778 = vmatpush.xpose.msk.msra.mxu2 %vm1730_vm1, %v3523_v39 }
 0xf49   : > { %8779 = vmatpush.xpose.msk.msra.mxu2 %vm1730_vm1, %v3520_v16  ;;  %8747 = vmatmul.msk.f32.gmra.mxu1 %vm1730_vm1, %v3230_v31 }
 0xf51   : > { %8772 = vmatmul.msk.f32.vlgmr.msra.gmra.mxu1 %vm1614_vm0, %v12684_v54 }
 0xf59   : > { %8773 = vmatmul.msk.f32.gmra.mxu1 %vm1614_vm0, %v12697_v61 }
 0xf61   : > { %8774 = vmatmul.msk.f32.gmra.mxu1 %vm1614_vm0, %v12708_v8 }
 0xf69   : > { %8775 = vmatmul.msk.f32.gmra.mxu1 %vm1614_vm0, %v12719_v11 }
 0xfae   : > { %v3347_v42 = vpop.f32.mrf.mxu1 }
 0xfaf   : > { %v3359_v43 = vmul.f32 0.35355338, %v3347_v42 }
 0xfb1   : > { %v3363_v19 = vadd.f32 %v12768_v45, %v3359_v43  ;;  %v3480_v43 = vpop.f32.mrf.mxu3 }
 0xfb3   : > { %v3367_v46 = vsel %vm1614_vm0, %v3363_v19, -inf }
 0xfb4   : > { %3368 = vmax.xlane.f32.xlu0 %v3367_v46  ;;  %v8799_v46 = vld [vmem:[%s14826_s16 + $0x58] sm:$0xff] }
 0xfb6   : > { %v3350_v47 = vpop.f32.mrf.mxu1 }
 0xfb7   : > { %v3360_v51 = vmul.f32 0.35355338, %v3350_v47  ;;  %v8798_v47 = vld [vmem:[%s14826_s16 + $0x50] sm:$0xff] }
 0xfb9   : > { %v3364_v1 = vadd.f32 %v12773_v63, %v3360_v51  ;;  %v10317_v51 = vld [vmem:[#allocation25 + $0x1] ss:$0 sm:$0xff] }
 0xfbb   : > { %v3370_v60 = vsel %vm1614_vm0, %v3364_v1, -inf }
 0xfbc   : > { %3371 = vmax.xlane.f32.xlu1 %v3370_v60  ;;  %v8796_v60 = vld [vmem:[%s14826_s16 + $0x40] sm:$0xff] }
 0xfbe   : > { %v3353_v48 = vpop.f32.mrf.mxu1 }
 0xfbf   : > { %v3361_v2 = vmul.f32 0.35355338, %v3353_v48  ;;  %v3481_v48 = vadd.f32 %v10317_v51, %v3480_v43  ;;  %v8807_v43 = vld [vmem:[%s14825_s14 + $0x58] sm:$0xff] }
 0xfc1   : > { %v3365_v4 = vadd.f32 %v12778_v3, %v3361_v2  ;;  %v3483_v2 = vpop.f32.mrf.mxu3 }
 0xfc3   : > { %v3373_v7 = vsel %vm1614_vm0, %v3365_v4, -inf }
 0xfc4   : > { %3374 = vmax.xlane.f32.xlu2 %v3373_v7 }
 0xfc6   : > { %v3356_v9 = vpop.f32.mrf.mxu1 }
 0xfc7   : > { %v3362_v10 = vmul.f32 0.35355338, %v3356_v9 }
 0xfc9   : > { %v3366_v0 = vadd.f32 %v12783_v44, %v3362_v10  ;;  %v3486_v7 = vpop.f32.mrf.mxu3 }
 0xfca   : > { %v3487_v9 = vadd.f32 %v10317_v51, %v3486_v7 }
 0xfcb   : > { %v3376_v49 = vsel %vm1614_vm0, %v3366_v0, -inf }
 0xfcc   : > { %3377 = vmax.xlane.f32.xlu0 %v3376_v49  ;;  %v3452_v49 = vld [vmem:[#allocation29] sm:$0xff] }
 0xfcd   : > { %3786 = vmatpush.msrb.mxu1 %v3452_v49 }
 0xfce   : > { %v3558_v41 = vpop.f32.mrf.mxu1 }
 0xfcf   : > { %v3559_v20 = vadd.f32 %v10318_v15, %v3558_v41 }
 0xfd1   : > { %v3489_v10 = vpop.f32.mrf.mxu3 }
 0xfd6   : > { %v3561_v12 = vpop.f32.mrf.mxu1 }
 0xfd7   : > { %v3562_v18 = vadd.f32 %v10318_v15, %v3561_v12 }
 0xfde   : > { %v3564_v14 = vpop.f32.mrf.mxu1 }
 0xfdf   : > { %v3565_v5 = vadd.f32 %v10318_v15, %v3564_v14 }
 0xfe6   : > { %v3567_v17 = vpop.f32.mrf.mxu1 }
 0xfe7   : > { %v3568_v50 = vadd.f32 %v10318_v15, %v3567_v17 }
 0xfe9   : > { %3699 = vmatpush.msra.mxu3 %v3568_v50 }
 0xfeb   : > { %3700 = vmatpush.msra.mxu3 %v3565_v5 }
 0xfed   : > { %3701 = vmatpush.msra.mxu3 %v3562_v18 }
 0xfef   : > { %3702 = vmatpush.msra.mxu3 %v3559_v20 }
 0xff1   : > { %3861 = vmatpush.msrb.mxu3 %v8807_v43 }
0x1027   : > { %v3369_v21 = vpop.xlane.xlu0 %3368 }
0x1028   : > { %v3379_v25 = vsub.f32 %v3363_v19, %v3369_v21 }
0x102a   : > { %v3383_v57 = vmul.f32 1.442695, %v3379_v25 }
0x102c   : > { %10414 = vpow2.f32 %v3383_v57 }
0x102f   : > { %v3372_v26 = vpop.xlane.xlu1 %3371 }
0x1030   : > { %v3380_v27 = vsub.f32 %v3364_v1, %v3372_v26  ;;  %v8797_v1 = vld [vmem:[%s14826_s16 + $0x48] sm:$0xff] }
0x1032   : > { %v10415_v28 = vpop.eup %10414  ;;  %v3385_v29 = vmul.f32 1.442695, %v3380_v27 }
0x1033   : > { %v3391_v30 = vsel %vm1614_vm0, %v10415_v28, 0.0 }
0x1034   : > { %10416 = vpow2.f32 %v3385_v29  ;;  %3392 = vadd.xlane.f32.xlu1 %v3391_v30 }
0x1037   : > { %v3375_v62 = vpop.xlane.xlu2 %3374 }
0x1038   : > { %v3381_v32 = vsub.f32 %v3365_v4, %v3375_v62  ;;  %v3484_v4 = vadd.f32 %v10317_v51, %v3483_v2 }
0x103a   : > { %v10417_v56 = vpop.eup %10416  ;;  %v3387_v22 = vmul.f32 1.442695, %v3381_v32 }
0x103b   : > { %v3394_v52 = vsel %vm1614_vm0, %v10417_v56, 0.0 }
0x103c   : > { %10418 = vpow2.f32 %v3387_v22  ;;  %3395 = vadd.xlane.f32.xlu2 %v3394_v52 }
0x103f   : > { %v3378_v33 = vpop.xlane.xlu0 %3377 }
0x1040   : > { %v3382_v58 = vsub.f32 %v3366_v0, %v3378_v33  ;;  %v3490_v0 = vadd.f32 %v10317_v51, %v3489_v10  ;;  %v8804_v51 = vld [vmem:[%s14825_s14 + $0x40] sm:$0xff] }
0x1042   : > { %v10419_v6 = vpop.eup %10418  ;;  %v3389_v23 = vmul.f32 1.442695, %v3382_v58 }
0x1043   : > { %v3397_v53 = vsel %vm1614_vm0, %v10419_v6, 0.0 }
0x1044   : > { %10420 = vpow2.f32 %v3389_v23  ;;  %3398 = vadd.xlane.f32.xlu0 %v3397_v53 }
0x104a   : > { %v10421_v34 = vpop.eup %10420 }
0x104b   : > { %v3400_v35 = vsel %vm1614_vm0, %v10421_v34, 0.0 }
0x104c   : > { %3401 = vadd.xlane.f32.xlu1 %v3400_v35 }
0x10a7   : > { %v3393_v36 = vpop.xlane.xlu1 %3392 }
0x10a8   : > { %10422 = vrcp.f32 %v3393_v36 }
0x10ae   : > { %v10423_v59 = vpop.eup %10422 }
0x10af   : > { %v3407_v13 = vmul.f32 %v10423_v59, %v10415_v28  ;;  %v3396_v24 = vpop.xlane.xlu2 %3395 }
0x10b0   : > { %10424 = vrcp.f32 %v3396_v24 }
0x10b1   : > { %8748 = vmatmul.msk.f32.vlgmr.msrb.gmra.mxu2 %vm1614_vm0, %v3407_v13 }
0x10b2   : > { %3822 = vmatpush.msrb.mxu2 %v8799_v46  ;;  %v8806_v46 = vld [vmem:[%s14825_s14 + $0x50] sm:$0xff] }
0x10b3   : > { %3862 = vmatpush.msrb.mxu3 %v8806_v46 }
0x10b4   : > { %3823 = vmatpush.msrb.mxu2 %v8798_v47  ;;  %v8805_v47 = vld [vmem:[%s14825_s14 + $0x48] sm:$0xff] }
0x10b5   : > { %3863 = vmatpush.msrb.mxu3 %v8805_v47 }
0x10b6   : > { %v10425_v37 = vpop.eup %10424  ;;  %3824 = vmatpush.msrb.mxu2 %v8797_v1 }
0x10b7   : > { %v3399_v38 = vpop.xlane.xlu0 %3398  ;;  %v3408_v39 = vmul.f32 %v10425_v37, %v10417_v56  ;;  %3864 = vmatpush.msrb.mxu3 %v8804_v51 }
0x10b8   : > { %10426 = vrcp.f32 %v3399_v38  ;;  %3825 = vmatpush.msrb.mxu2 %v8796_v60 }
0x10b9   : > { %8749 = vmatmul.msk.f32.gmra.mxu2 %vm1614_vm0, %v3408_v39 }
0x10be   : > { %v10427_v40 = vpop.eup %10426 }
0x10bf   : > { %v3402_v31 = vpop.xlane.xlu1 %3401  ;;  %v3409_v16 = vmul.f32 %v10427_v40, %v10419_v6 }
0x10c0   : > { %10428 = vrcp.f32 %v3402_v31 }
0x10c1   : > { %8750 = vmatmul.msk.f32.gmra.mxu2 %vm1614_vm0, %v3409_v16 }
0x10c6   : > { %v10429_v42 = vpop.eup %10428 }
0x10c7   : > { %v3410_v19 = vmul.f32 %v10429_v42, %v10421_v34 }
0x10c9   : > { %8751 = vmatmul.msk.f32.gmra.mxu2 %vm1614_vm0, %v3410_v19 }
0x10d1   : > { %8780 = vmatmul.msk.f32.vlgmr.msra.gmra.mxu2 %vm1730_vm1, %v3481_v48 }
0x10d9   : > { %8781 = vmatmul.msk.f32.gmra.mxu2 %vm1730_vm1, %v3484_v4 }
0x10e1   : > { %8782 = vmatmul.msk.f32.gmra.mxu2 %vm1730_vm1, %v3487_v9 }
0x10e9   : > { %8783 = vmatmul.msk.f32.gmra.mxu2 %vm1730_vm1, %v3490_v0 }
0x10f1   : > { %8800 = vmatmul.msk.f32.vlgmr.msrb.gmra.mxu2 %vm1614_vm0, %v12684_v54 }
0x10f9   : > { %8801 = vmatmul.msk.f32.gmra.mxu2 %vm1614_vm0, %v12697_v61 }
0x1101   : > { %8802 = vmatmul.msk.f32.gmra.mxu2 %vm1614_vm0, %v12708_v8 }
0x1109   : > { %8803 = vmatmul.msk.f32.gmra.mxu2 %vm1614_vm0, %v12719_v11 }
0x1134   : > { %v3440_v41 = vpop.f32.mrf.mxu2 }
0x1135   : > { %8792 = vmatmul.msk.f32.vlgmr.msrb.gmra.mxu1 %vm1730_vm1, %v3440_v41 }
0x113c   : > { %v3443_v12 = vpop.f32.mrf.mxu2 }
0x113d   : > { %8793 = vmatmul.msk.f32.gmra.mxu1 %vm1730_vm1, %v3443_v12  ;;  %v3717_v12 = vld [vmem:[#allocation29 + $0x8] sm:$0xff] }
0x113e   : > { %3745 = vmatpush.msrb.mxu0 %v3717_v12 }
0x1144   : > { %v3446_v14 = vpop.f32.mrf.mxu2 }
0x1145   : > { %8794 = vmatmul.msk.f32.gmra.mxu1 %vm1730_vm1, %v3446_v14  ;;  %v8815_v14 = vld [vmem:[%s14827_s12 + $0x58] sm:$0xff] }
0x1146   : > { %3900 = vmatpush.msra.mxu0 %v8815_v14 }
0x114c   : > { %v3449_v15 = vpop.f32.mrf.mxu2 }
0x114d   : > { %8795 = vmatmul.msk.f32.gmra.mxu1 %vm1730_vm1, %v3449_v15  ;;  %v8814_v15 = vld [vmem:[%s14827_s12 + $0x50] sm:$0xff] }
0x114e   : > { %3901 = vmatpush.msra.mxu0 %v8814_v15 }
0x1154   : > { %v3611_v17 = vpop.f32.mrf.mxu2 }
0x1155   : > { %v3623_v50 = vmul.f32 0.35355338, %v3611_v17  ;;  %v8813_v17 = vld [vmem:[%s14827_s12 + $0x48] sm:$0xff] }
0x1156   : > { %3902 = vmatpush.msra.mxu0 %v8813_v17 }
0x1157   : > { %v3627_v5 = vadd.f32 %v12768_v45, %v3623_v50 }
0x1159   : > { %v3631_v18 = vsel %vm1614_vm0, %v3627_v5, -inf }
0x115a   : > { %3632 = vmax.xlane.f32.xlu2 %v3631_v18 }
0x115c   : > { %v3614_v20 = vpop.f32.mrf.mxu2 }
0x115d   : > { %v3624_v21 = vmul.f32 0.35355338, %v3614_v20 }
0x115f   : > { %v3628_v25 = vadd.f32 %v12773_v63, %v3624_v21 }
0x1161   : > { %v3634_v57 = vsel %vm1614_vm0, %v3628_v25, -inf }
0x1162   : > { %3635 = vmax.xlane.f32.xlu0 %v3634_v57  ;;  %v8838_v57 = vld [vmem:[%s14826_s16 + $0x70] sm:$0xff] }
0x1164   : > { %v3617_v26 = vpop.f32.mrf.mxu2 }
0x1165   : > { %v3625_v27 = vmul.f32 0.35355338, %v3617_v26  ;;  %v8837_v26 = vld [vmem:[%s14826_s16 + $0x68] sm:$0xff] }
0x1167   : > { %v3629_v28 = vadd.f32 %v12778_v3, %v3625_v27  ;;  %v8836_v27 = vld [vmem:[%s14826_s16 + $0x60] sm:$0xff] }
0x1169   : > { %v3637_v29 = vsel %vm1614_vm0, %v3629_v28, -inf }
0x116a   : > { %3638 = vmax.xlane.f32.xlu1 %v3637_v29 }
0x116c   : > { %v3620_v30 = vpop.f32.mrf.mxu2 }
0x116d   : > { %v3626_v62 = vmul.f32 0.35355338, %v3620_v30 }
0x116f   : > { %v3630_v32 = vadd.f32 %v12783_v44, %v3626_v62  ;;  %v10320_v62 = vld [vmem:[#allocation26 + $0x2] ss:$0 sm:$0xff] }
0x1171   : > { %v3640_v56 = vsel %vm1614_vm0, %v3630_v32, -inf }
0x1172   : > { %3641 = vmax.xlane.f32.xlu2 %v3640_v56 }
0x11cd   : > { %v3633_v22 = vpop.xlane.xlu2 %3632 }
0x11ce   : > { %v3643_v52 = vsub.f32 %v3627_v5, %v3633_v22  ;;  %v8812_v5 = vld [vmem:[%s14827_s12 + $0x40] sm:$0xff] }
0x11cf   : > { %3903 = vmatpush.msra.mxu0 %v8812_v5 }
0x11d0   : > { %v3647_v33 = vmul.f32 1.442695, %v3643_v52  ;;  %v3827_v52 = vpop.f32.mrf.mxu2 }
0x11d2   : > { %10430 = vpow2.f32 %v3647_v33 }
0x11d5   : > { %v3636_v58 = vpop.xlane.xlu0 %3635 }
0x11d6   : > { %v3644_v6 = vsub.f32 %v3628_v25, %v3636_v58  ;;  %v8839_v25 = vld [vmem:[%s14826_s16 + $0x78] sm:$0xff]  ;;  %v10319_v58 = vld [vmem:[#allocation25 + $0x2] ss:$0 sm:$0xff] }
0x11d8   : > { %v10431_v23 = vpop.eup %10430  ;;  %v3649_v53 = vmul.f32 1.442695, %v3644_v6 }
0x11d9   : > { %v3655_v34 = vsel %vm1614_vm0, %v10431_v23, 0.0 }
0x11da   : > { %10432 = vpow2.f32 %v3649_v53  ;;  %3656 = vadd.xlane.f32.xlu0 %v3655_v34  ;;  %v3828_v53 = vadd.f32 %v10319_v58, %v3827_v52  ;;  %v8846_v34 = vld [vmem:[%s14825_s14 + $0x70] sm:$0xff] }
0x11dd   : > { %v3639_v35 = vpop.xlane.xlu1 %3638 }
0x11de   : > { %v3645_v36 = vsub.f32 %v3629_v28, %v3639_v35  ;;  %v3830_v35 = vpop.f32.mrf.mxu2 }
0x11e0   : > { %v10433_v59 = vpop.eup %10432  ;;  %v3651_v13 = vmul.f32 1.442695, %v3645_v36  ;;  %v8845_v36 = vld [vmem:[%s14825_s14 + $0x68] sm:$0xff] }
0x11e1   : > { %v3658_v24 = vsel %vm1614_vm0, %v10433_v59, 0.0 }
0x11e2   : > { %10434 = vpow2.f32 %v3651_v13  ;;  %3659 = vadd.xlane.f32.xlu1 %v3658_v24  ;;  %v3831_v13 = vadd.f32 %v10319_v58, %v3830_v35 }
0x11e5   : > { %v3642_v37 = vpop.xlane.xlu2 %3641 }
0x11e6   : > { %v3646_v38 = vsub.f32 %v3630_v32, %v3642_v37  ;;  %v3833_v24 = vpop.f32.mrf.mxu2 }
0x11e7   : > { %v3834_v37 = vadd.f32 %v10319_v58, %v3833_v24 }
0x11e8   : > { %v10435_v39 = vpop.eup %10434  ;;  %v3653_v40 = vmul.f32 1.442695, %v3646_v38 }
0x11e9   : > { %v3661_v31 = vsel %vm1614_vm0, %v10435_v39, 0.0 }
0x11ea   : > { %10436 = vpow2.f32 %v3653_v40  ;;  %3662 = vadd.xlane.f32.xlu2 %v3661_v31  ;;  %v12887_v40 = vpop.f32.mrf.mxu1 }
0x11ee   : > { %v3836_v38 = vpop.f32.mrf.mxu2 }
0x11f0   : > { %v10437_v16 = vpop.eup %10436 }
0x11f1   : > { %v3664_v42 = vsel %vm1614_vm0, %v10437_v16, 0.0 }
0x11f2   : > { %3665 = vadd.xlane.f32.xlu0 %v3664_v42 }
0x124d   : > { %v3657_v19 = vpop.xlane.xlu0 %3656 }
0x124e   : > { %10438 = vrcp.f32 %v3657_v19 }
0x1254   : > { %v10439_v1 = vpop.eup %10438 }
0x1255   : > { %v3671_v60 = vmul.f32 %v10439_v1, %v10431_v23  ;;  %v3660_v48 = vpop.xlane.xlu1 %3659  ;;  %v8847_v23 = vld [vmem:[%s14825_s14 + $0x78] sm:$0xff] }
0x1256   : > { %10440 = vrcp.f32 %v3660_v48 }
0x1257   : > { %8784 = vmatmul.msk.f32.vlgmr.msra.gmra.mxu3 %vm1614_vm0, %v3671_v60 }
0x125c   : > { %v10441_v2 = vpop.eup %10440 }
0x125d   : > { %v3663_v4 = vpop.xlane.xlu2 %3662  ;;  %v3672_v7 = vmul.f32 %v10441_v2, %v10433_v59  ;;  %v8844_v59 = vld [vmem:[%s14825_s14 + $0x60] sm:$0xff]  ;;  %v10321_v2 = vld [vmem:[#allocation28 + $0x2] ss:$0 sm:$0xff] }
0x125e   : > { %10442 = vrcp.f32 %v3663_v4 }
0x125f   : > { %8785 = vmatmul.msk.f32.gmra.mxu3 %vm1614_vm0, %v3672_v7 }
0x1264   : > { %v10443_v9 = vpop.eup %10442 }
0x1265   : > { %v3666_v10 = vpop.xlane.xlu0 %3665  ;;  %v3673_v0 = vmul.f32 %v10443_v9, %v10435_v39  ;;  %v3837_v39 = vadd.f32 %v10319_v58, %v3836_v38 }
0x1266   : > { %10444 = vrcp.f32 %v3666_v10 }
0x1267   : > { %8786 = vmatmul.msk.f32.gmra.mxu3 %vm1614_vm0, %v3673_v0 }
0x126c   : > { %v10445_v49 = vpop.eup %10444 }
0x126d   : > { %v3674_v41 = vmul.f32 %v10445_v49, %v10437_v16  ;;  %v12893_v16 = vpop.f32.mrf.mxu1 }
0x126f   : > { %8787 = vmatmul.msk.f32.gmra.mxu3 %vm1614_vm0, %v3674_v41 }
0x1275   : > { %v12899_v43 = vpop.f32.mrf.mxu1 }
0x1277   : > { %8808 = vmatmul.msk.f32.vlgmr.msrb.gmra.mxu3 %vm1614_vm0, %v12684_v54 }
0x127d   : > { %v3797_v46 = vpop.f32.mrf.mxu1 }
0x127f   : > { %8809 = vmatmul.msk.f32.gmra.mxu3 %vm1614_vm0, %v12697_v61 }
0x1287   : > { %8810 = vmatmul.msk.f32.gmra.mxu3 %vm1614_vm0, %v12708_v8 }
0x128f   : > { %8811 = vmatmul.msk.f32.gmra.mxu3 %vm1614_vm0, %v12719_v11 }
0x12da   : > { %v3704_v50 = vpop.f32.mrf.mxu3 }
0x12db   : > { %8788 = vmatmul.msk.f32.vlgmr.msrb.gmra.mxu0 %vm1730_vm1, %v3704_v50 }
0x12dc   : > { %4132 = vmatpush.msrb.mxu0 %v8839_v25 }
0x12de   : > { %4133 = vmatpush.msrb.mxu0 %v8838_v57 }
0x12e0   : > { %4134 = vmatpush.msrb.mxu0 %v8837_v26 }
0x12e2   : > { %v3707_v18 = vpop.f32.mrf.mxu3  ;;  %4135 = vmatpush.msrb.mxu0 %v8836_v27  ;;  %v4064_v27 = vld [vmem:[#allocation29 + $0x10] sm:$0xff] }
0x12e3   : > { %8789 = vmatmul.msk.f32.gmra.mxu0 %vm1730_vm1, %v3707_v18  ;;  %4092 = vmatpush.msra.mxu3 %v4064_v27 }
0x12ea   : > { %v3710_v20 = vpop.f32.mrf.mxu3 }
0x12eb   : > { %8790 = vmatmul.msk.f32.gmra.mxu0 %vm1730_vm1, %v3710_v20 }
0x12f2   : > { %v3713_v21 = vpop.f32.mrf.mxu3 }
0x12f3   : > { %8791 = vmatmul.msk.f32.gmra.mxu0 %vm1730_vm1, %v3713_v21 }
0x12fa   : > { %v3866_v28 = vpop.f32.mrf.mxu3 }
0x12fb   : > { %8816 = vmatmul.msk.f32.vlgmr.msra.gmra.mxu0 %vm1614_vm0, %v12684_v54  ;;  %v3867_v6 = vadd.f32 %v10320_v62, %v3866_v28 }
0x1302   : > { %v3869_v29 = vpop.f32.mrf.mxu3 }
0x1303   : > { %8817 = vmatmul.msk.f32.gmra.mxu0 %vm1614_vm0, %v12697_v61  ;;  %v3870_v33 = vadd.f32 %v10320_v62, %v3869_v29 }
0x130a   : > { %v3872_v30 = vpop.f32.mrf.mxu3 }
0x130b   : > { %8818 = vmatmul.msk.f32.gmra.mxu0 %vm1614_vm0, %v12708_v8  ;;  %v3873_v22 = vadd.f32 %v10320_v62, %v3872_v30 }
0x1312   : > { %v3875_v32 = vpop.f32.mrf.mxu3 }
0x1313   : > { %v3876_v56 = vadd.f32 %v10320_v62, %v3875_v32  ;;  %8819 = vmatmul.msk.f32.gmra.mxu0 %vm1614_vm0, %v12719_v11 }
0x1315   : > { %8820 = vmatpush.xpose.msk.msra.mxu1 %vm1730_vm1, %v3876_v56  ;;  %v10323_v56 = vld [vmem:[#allocation26 + $0x3] ss:$0 sm:$0xff] }
0x1319   : > { %8821 = vmatpush.xpose.msk.msra.mxu1 %vm1730_vm1, %v3873_v22 }
0x131b   : > { %8840 = vmatmul.msk.f32.vlgmr.msrb.gmra.mxu0 %vm1614_vm0, %v12684_v54 }
0x131d   : > { %8822 = vmatpush.xpose.msk.msra.mxu1 %vm1730_vm1, %v3870_v33 }
0x1321   : > { %8823 = vmatpush.xpose.msk.msra.mxu1 %vm1730_vm1, %v3867_v6 }
0x1323   : > { %8841 = vmatmul.msk.f32.gmra.mxu0 %vm1614_vm0, %v12697_v61 }
0x1324   : > { %8824 = vmatmul.msk.f32.vlgmr.msra.gmra.mxu1 %vm1730_vm1, %v3828_v53 }
0x1325   : > { %4171 = vmatpush.msrb.mxu1 %v8847_v23 }
0x1327   : > { %4172 = vmatpush.msrb.mxu1 %v8846_v34 }
0x1329   : > { %4173 = vmatpush.msrb.mxu1 %v8845_v36 }
0x132b   : > { %4174 = vmatpush.msrb.mxu1 %v8844_v59  ;;  %8842 = vmatmul.msk.f32.gmra.mxu0 %vm1614_vm0, %v12708_v8 }
0x132c   : > { %8825 = vmatmul.msk.f32.gmra.mxu1 %vm1730_vm1, %v3831_v13 }
0x1333   : > { %8843 = vmatmul.msk.f32.gmra.mxu0 %vm1614_vm0, %v12719_v11 }
0x1334   : > { %8826 = vmatmul.msk.f32.gmra.mxu1 %vm1730_vm1, %v3834_v37 }
0x133c   : > { %8827 = vmatmul.msk.f32.gmra.mxu1 %vm1730_vm1, %v3837_v39 }
0x1344   : > { %8848 = vmatmul.msk.f32.vlgmr.msrb.gmra.mxu1 %vm1614_vm0, %v12684_v54 }
0x134c   : > { %8849 = vmatmul.msk.f32.gmra.mxu1 %vm1614_vm0, %v12697_v61 }
0x1354   : > { %8850 = vmatmul.msk.f32.gmra.mxu1 %vm1614_vm0, %v12708_v8 }
0x1358   : > { %v12891_v31 = vpop.f32.mrf.mxu0 }
0x135c   : > { %8851 = vmatmul.msk.f32.gmra.mxu1 %vm1614_vm0, %v12719_v11 }
0x1360   : > { %v12897_v42 = vpop.f32.mrf.mxu0 }
0x1368   : > { %v12901_v19 = vpop.f32.mrf.mxu0 }
0x1370   : > { %v3756_v47 = vpop.f32.mrf.mxu0 }
0x1371   : > { %v12903_v51 = vadd.f32 %v3797_v46, %v3756_v47 }
0x1378   : > { %v3905_v1 = vpop.f32.mrf.mxu0 }
0x1379   : > { %v3906_v0 = vadd.f32 %v10321_v2, %v3905_v1 }
0x1380   : > { %v3908_v60 = vpop.f32.mrf.mxu0 }
0x1381   : > { %v3909_v10 = vadd.f32 %v10321_v2, %v3908_v60 }
0x1388   : > { %v3911_v48 = vpop.f32.mrf.mxu0 }
0x1389   : > { %v3912_v9 = vadd.f32 %v10321_v2, %v3911_v48 }
0x1390   : > { %v3914_v4 = vpop.f32.mrf.mxu0 }
0x1391   : > { %v3915_v7 = vadd.f32 %v10321_v2, %v3914_v4 }
0x1393   : > { %4046 = vmatpush.msra.mxu2 %v3915_v7 }
0x1395   : > { %4047 = vmatpush.msra.mxu2 %v3912_v9 }
0x1397   : > { %4048 = vmatpush.msra.mxu2 %v3909_v10 }
0x1399   : > { %4049 = vmatpush.msra.mxu2 %v3906_v0  ;;  %v8855_v0 = vld [vmem:[%s14827_s12 + $0x78] sm:$0xff] }
0x139b   : > { %4210 = vmatpush.msrb.mxu2 %v8855_v0 }
0x13a1   : > { %v3958_v49 = vpop.f32.mrf.mxu1 }
0x13a2   : > { %v3970_v41 = vmul.f32 0.35355338, %v3958_v49  ;;  %v8854_v49 = vld [vmem:[%s14827_s12 + $0x70] sm:$0xff] }
0x13a3   : > { %4211 = vmatpush.msrb.mxu2 %v8854_v49 }
0x13a4   : > { %v3974_v12 = vadd.f32 %v12768_v45, %v3970_v41  ;;  %v8853_v41 = vld [vmem:[%s14827_s12 + $0x68] sm:$0xff] }
0x13a5   : > { %4212 = vmatpush.msrb.mxu2 %v8853_v41 }
0x13a6   : > { %v3978_v14 = vsel %vm1614_vm0, %v3974_v12, -inf }
0x13a7   : > { %3979 = vmax.xlane.f32.xlu1 %v3978_v14 }
0x13a9   : > { %v3961_v15 = vpop.f32.mrf.mxu1 }
0x13aa   : > { %v3971_v17 = vmul.f32 0.35355338, %v3961_v15 }
0x13ac   : > { %v3975_v50 = vadd.f32 %v12773_v63, %v3971_v17 }
0x13ae   : > { %v3981_v5 = vsel %vm1614_vm0, %v3975_v50, -inf }
0x13af   : > { %3982 = vmax.xlane.f32.xlu2 %v3981_v5 }
0x13b1   : > { %v3964_v18 = vpop.f32.mrf.mxu1 }
0x13b2   : > { %v3972_v20 = vmul.f32 0.35355338, %v3964_v18 }
0x13b4   : > { %v3976_v21 = vadd.f32 %v12778_v3, %v3972_v20 }
0x13b6   : > { %v3984_v25 = vsel %vm1614_vm0, %v3976_v21, -inf }
0x13b7   : > { %3985 = vmax.xlane.f32.xlu0 %v3984_v25 }
0x13b9   : > { %v3967_v57 = vpop.f32.mrf.mxu1 }
0x13ba   : > { %v3973_v26 = vmul.f32 0.35355338, %v3967_v57 }
0x13bc   : > { %v3977_v28 = vadd.f32 %v12783_v44, %v3973_v26 }
0x13be   : > { %v3987_v29 = vsel %vm1614_vm0, %v3977_v28, -inf }
0x13bf   : > { %3988 = vmax.xlane.f32.xlu1 %v3987_v29 }
0x13c1   : > { %v4176_v30 = vpop.f32.mrf.mxu1 }
0x13c2   : > { %v4177_v6 = vadd.f32 %v10323_v56, %v4176_v30  ;;  %v4137_v30 = vpop.f32.mrf.mxu0 }
0x13c9   : > { %v4179_v62 = vpop.f32.mrf.mxu1 }
0x13ca   : > { %v4180_v58 = vadd.f32 %v10323_v56, %v4179_v62 }
0x13d1   : > { %v4182_v32 = vpop.f32.mrf.mxu1 }
0x13d2   : > { %v4183_v33 = vadd.f32 %v10323_v56, %v4182_v32  ;;  %v10322_v32 = vld [vmem:[#allocation25 + $0x3] ss:$0 sm:$0xff] }
0x13d9   : > { %v4185_v22 = vpop.f32.mrf.mxu1 }
0x13da   : > { %v4186_v52 = vadd.f32 %v10323_v56, %v4185_v22  ;;  %v4138_v56 = vadd.f32 %v10322_v32, %v4137_v30  ;;  %v4140_v22 = vpop.f32.mrf.mxu0 }
0x13dc   : > { %8860 = vmatpush.xpose.msk.msrb.mxu3 %vm1730_vm1, %v4186_v52 }
0x13e0   : > { %8861 = vmatpush.xpose.msk.msrb.mxu3 %vm1730_vm1, %v4183_v33  ;;  %v4141_v33 = vadd.f32 %v10322_v32, %v4140_v22 }
0x13e4   : > { %8862 = vmatpush.xpose.msk.msrb.mxu3 %vm1730_vm1, %v4180_v58 }
0x13e8   : > { %8863 = vmatpush.xpose.msk.msrb.mxu3 %vm1730_vm1, %v4177_v6  ;;  %v4143_v6 = vpop.f32.mrf.mxu0 }
0x141a   : > { %v3980_v23 = vpop.xlane.xlu1 %3979 }
0x141b   : > { %v3990_v53 = vsub.f32 %v3974_v12, %v3980_v23  ;;  %v8852_v12 = vld [vmem:[%s14827_s12 + $0x60] sm:$0xff]  ;;  %v4144_v23 = vadd.f32 %v10322_v32, %v4143_v6  ;;  %v4374_v6 = vld [vmem:[#allocation29 + $0x18] sm:$0xff] }
0x141c   : > { %4213 = vmatpush.msrb.mxu2 %v8852_v12  ;;  %4402 = vmatpush.msra.mxu1 %v4374_v6 }
0x141d   : > { %v3994_v34 = vmul.f32 1.442695, %v3990_v53 }
0x141f   : > { %10446 = vpow2.f32 %v3994_v34  ;;  %v4146_v34 = vpop.f32.mrf.mxu0 }
0x1422   : > { %v3983_v35 = vpop.xlane.xlu2 %3982 }
0x1423   : > { %v3991_v36 = vsub.f32 %v3975_v50, %v3983_v35  ;;  %v4147_v35 = vadd.f32 %v10322_v32, %v4146_v34 }
0x1425   : > { %v10447_v59 = vpop.eup %10446  ;;  %v3996_v13 = vmul.f32 1.442695, %v3991_v36  ;;  %v10324_v36 = vld [vmem:[#allocation28 + $0x3] ss:$0 sm:$0xff] }
0x1426   : > { %v4002_v24 = vsel %vm1614_vm0, %v10447_v59, 0.0 }
0x1427   : > { %10448 = vpow2.f32 %v3996_v13  ;;  %4003 = vadd.xlane.f32.xlu2 %v4002_v24 }
0x142a   : > { %v3986_v37 = vpop.xlane.xlu0 %3985 }
0x142b   : > { %v3992_v38 = vsub.f32 %v3976_v21, %v3986_v37 }
0x142d   : > { %v10449_v39 = vpop.eup %10448  ;;  %v3998_v46 = vmul.f32 1.442695, %v3992_v38 }
0x142e   : > { %v4005_v47 = vsel %vm1614_vm0, %v10449_v39, 0.0 }
0x142f   : > { %10450 = vpow2.f32 %v3998_v46  ;;  %4006 = vadd.xlane.f32.xlu0 %v4005_v47 }
0x1432   : > { %v3989_v1 = vpop.xlane.xlu1 %3988 }
0x1433   : > { %v3993_v60 = vsub.f32 %v3977_v28, %v3989_v1  ;;  %v3792_v1 = vadd.f32 %v12893_v16, %v12897_v42 }
0x1435   : > { %v10451_v48 = vpop.eup %10450  ;;  %v4000_v2 = vmul.f32 1.442695, %v3993_v60 }
0x1436   : > { %v4008_v4 = vsel %vm1614_vm0, %v10451_v48, 0.0 }
0x1437   : > { %10452 = vpow2.f32 %v4000_v2  ;;  %4009 = vadd.xlane.f32.xlu1 %v4008_v4  ;;  %v3795_v2 = vadd.f32 %v12899_v43, %v12901_v19 }
0x143d   : > { %v10453_v7 = vpop.eup %10452 }
0x143e   : > { %v4011_v9 = vsel %vm1614_vm0, %v10453_v7, 0.0 }
0x143f   : > { %4012 = vadd.xlane.f32.xlu2 %v4011_v9 }
0x149a   : > { %v4004_v10 = vpop.xlane.xlu2 %4003 }
0x149b   : > { %10454 = vrcp.f32 %v4004_v10 }
0x14a1   : > { %v10455_v14 = vpop.eup %10454 }
0x14a2   : > { %v4018_v15 = vmul.f32 %v10455_v14, %v10447_v59  ;;  %v4007_v17 = vpop.xlane.xlu0 %4006 }
0x14a3   : > { %10456 = vrcp.f32 %v4007_v17 }
0x14a4   : > { %8828 = vmatmul.msk.f32.vlgmr.msra.gmra.mxu2 %vm1614_vm0, %v4018_v15 }
0x14a9   : > { %v10457_v50 = vpop.eup %10456 }
0x14aa   : > { %v4010_v5 = vpop.xlane.xlu1 %4009  ;;  %v4019_v18 = vmul.f32 %v10457_v50, %v10449_v39  ;;  %v3789_v39 = vadd.f32 %v12887_v40, %v12891_v31 }
0x14ab   : > { %10458 = vrcp.f32 %v4010_v5 }
0x14ac   : > { %8829 = vmatmul.msk.f32.gmra.mxu2 %vm1614_vm0, %v4019_v18 }
0x14b1   : > { %v10459_v20 = vpop.eup %10458 }
0x14b2   : > { %v4013_v21 = vpop.xlane.xlu2 %4012  ;;  %v4020_v25 = vmul.f32 %v10459_v20, %v10451_v48 }
0x14b3   : > { %10460 = vrcp.f32 %v4013_v21 }
0x14b4   : > { %8830 = vmatmul.msk.f32.gmra.mxu2 %vm1614_vm0, %v4020_v25 }
0x14b9   : > { %v10461_v57 = vpop.eup %10460 }
0x14ba   : > { %v4021_v26 = vmul.f32 %v10461_v57, %v10453_v7 }
0x14bc   : > { %8831 = vmatmul.msk.f32.gmra.mxu2 %vm1614_vm0, %v4021_v26 }
0x14c4   : > { %8856 = vmatmul.msk.f32.vlgmr.msrb.gmra.mxu2 %vm1614_vm0, %v12684_v54 }
0x14cc   : > { %8857 = vmatmul.msk.f32.gmra.mxu2 %vm1614_vm0, %v12697_v61 }
0x14d4   : > { %8858 = vmatmul.msk.f32.gmra.mxu2 %vm1614_vm0, %v12708_v8 }
0x14dc   : > { %8859 = vmatmul.msk.f32.gmra.mxu2 %vm1614_vm0, %v12719_v11 }
0x1527   : > { %v4051_v27 = vpop.f32.mrf.mxu2 }
0x1528   : > { %8832 = vmatmul.msk.f32.vlgmr.msra.gmra.mxu3 %vm1730_vm1, %v4051_v27 }
0x152f   : > { %v4054_v28 = vpop.f32.mrf.mxu2 }
0x1530   : > { %8833 = vmatmul.msk.f32.gmra.mxu3 %vm1730_vm1, %v4054_v28 }
0x1537   : > { %v4057_v29 = vpop.f32.mrf.mxu2 }
0x1538   : > { %8834 = vmatmul.msk.f32.gmra.mxu3 %vm1730_vm1, %v4057_v29 }
0x153f   : > { %v4060_v62 = vpop.f32.mrf.mxu2 }
0x1540   : > { %8835 = vmatmul.msk.f32.gmra.mxu3 %vm1730_vm1, %v4060_v62 }
0x1547   : > { %v4215_v52 = vpop.f32.mrf.mxu2 }
0x1548   : > { %8864 = vmatmul.msk.f32.vlgmr.msrb.gmra.mxu3 %vm1730_vm1, %v4138_v56  ;;  %v4216_v38 = vadd.f32 %v10324_v36, %v4215_v52 }
0x154f   : > { %v4218_v58 = vpop.f32.mrf.mxu2 }
0x1550   : > { %8865 = vmatmul.msk.f32.gmra.mxu3 %vm1730_vm1, %v4141_v33  ;;  %v4219_v37 = vadd.f32 %v10324_v36, %v4218_v58 }
0x1557   : > { %v4221_v53 = vpop.f32.mrf.mxu2 }
0x1558   : > { %8866 = vmatmul.msk.f32.gmra.mxu3 %vm1730_vm1, %v4144_v23  ;;  %v4222_v24 = vadd.f32 %v10324_v36, %v4221_v53 }
0x155f   : > { %v4224_v59 = vpop.f32.mrf.mxu2 }
0x1560   : > { %v4225_v13 = vadd.f32 %v10324_v36, %v4224_v59  ;;  %8867 = vmatmul.msk.f32.gmra.mxu3 %vm1730_vm1, %v4147_v35 }
0x1562   : > { %4356 = vmatpush.msra.mxu0 %v4225_v13 }
0x1564   : > { %4357 = vmatpush.msra.mxu0 %v4222_v24 }
0x1566   : > { %4358 = vmatpush.msra.mxu0 %v4219_v37 }
0x1568   : > { %4359 = vmatpush.msra.mxu0 %v4216_v38 }
0x15ab   : > { %v4094_v46 = vpop.f32.mrf.mxu3 }
0x15ac   : > { %v12947_v47 = vadd.f32 %v4094_v46, %v3789_v39 }
0x15b3   : > { %v4097_v60 = vpop.f32.mrf.mxu3 }
0x15b4   : > { %v12951_v48 = vadd.f32 %v4097_v60, %v3792_v1 }
0x15bb   : > { %v4100_v4 = vpop.f32.mrf.mxu3 }
0x15bc   : > { %v12955_v7 = vadd.f32 %v4100_v4, %v3795_v2  ;;  %v10325_v4 = vld [vmem:[#allocation31] ss:$0 sm:$0xff] }
0x15c3   : > { %v4103_v9 = vpop.f32.mrf.mxu3 }
0x15c4   : > { %v12958_v10 = vadd.f32 %v4103_v9, %v12903_v51 }
0x15cb   : > { %v4268_v40 = vpop.f32.mrf.mxu3 }
0x15cc   : > { %v4280_v31 = vmul.f32 0.35355338, %v4268_v40 }
0x15ce   : > { %v4284_v0 = vadd.f32 %v12768_v45, %v4280_v31 }
0x15d0   : > { %v4288_v49 = vsel %vm1614_vm0, %v4284_v0, -inf }
0x15d1   : > { %4289 = vmax.xlane.f32.xlu0 %v4288_v49 }
0x15d3   : > { %v4271_v16 = vpop.f32.mrf.mxu3 }
0x15d4   : > { %v4281_v42 = vmul.f32 0.35355338, %v4271_v16 }
0x15d6   : > { %v4285_v41 = vadd.f32 %v12773_v63, %v4281_v42 }
0x15d8   : > { %v4291_v43 = vsel %vm1614_vm0, %v4285_v41, -inf }
0x15d9   : > { %4292 = vmax.xlane.f32.xlu1 %v4291_v43 }
0x15db   : > { %v4274_v19 = vpop.f32.mrf.mxu3 }
0x15dc   : > { %v4282_v12 = vmul.f32 0.35355338, %v4274_v19 }
0x15de   : > { %v4286_v14 = vadd.f32 %v12778_v3, %v4282_v12 }
0x15e0   : > { %v4294_v51 = vsel %vm1614_vm0, %v4286_v14, -inf }
0x15e1   : > { %4295 = vmax.xlane.f32.xlu2 %v4294_v51 }
0x15e3   : > { %v4277_v15 = vpop.f32.mrf.mxu3 }
0x15e4   : > { %v4283_v17 = vmul.f32 0.35355338, %v4277_v15 }
0x15e6   : > { %v4287_v45 = vadd.f32 %v12783_v44, %v4283_v17 }
0x15e8   : > { %v4297_v50 = vsel %vm1614_vm0, %v4287_v45, -inf }
0x15e9   : > { %4298 = vmax.xlane.f32.xlu0 %v4297_v50 }
0x1644   : > { %v4290_v5 = vpop.xlane.xlu0 %4289 }
0x1645   : > { %v4300_v18 = vsub.f32 %v4284_v0, %v4290_v5 }
0x1647   : > { %v4304_v63 = vmul.f32 1.442695, %v4300_v18 }
0x1649   : > { %10462 = vpow2.f32 %v4304_v63 }
0x164c   : > { %v4293_v20 = vpop.xlane.xlu1 %4292 }
0x164d   : > { %v4301_v21 = vsub.f32 %v4285_v41, %v4293_v20 }
0x164f   : > { %v10463_v25 = vpop.eup %10462  ;;  %v4306_v57 = vmul.f32 1.442695, %v4301_v21 }
0x1650   : > { %v4312_v3 = vsel %vm1614_vm0, %v10463_v25, 0.0 }
0x1651   : > { %10464 = vpow2.f32 %v4306_v57  ;;  %4313 = vadd.xlane.f32.xlu1 %v4312_v3 }
0x1654   : > { %v4296_v26 = vpop.xlane.xlu2 %4295 }
0x1655   : > { %v4302_v27 = vsub.f32 %v4286_v14, %v4296_v26 }
0x1657   : > { %v10465_v28 = vpop.eup %10464  ;;  %v4308_v29 = vmul.f32 1.442695, %v4302_v27 }
0x1658   : > { %v4315_v44 = vsel %vm1614_vm0, %v10465_v28, 0.0 }
0x1659   : > { %10466 = vpow2.f32 %v4308_v29  ;;  %4316 = vadd.xlane.f32.xlu2 %v4315_v44 }
0x165c   : > { %v4299_v30 = vpop.xlane.xlu0 %4298 }
0x165d   : > { %v4303_v62 = vsub.f32 %v4287_v45, %v4299_v30 }
0x165f   : > { %v10467_v32 = vpop.eup %10466  ;;  %v4310_v56 = vmul.f32 1.442695, %v4303_v62 }
0x1660   : > { %v4318_v22 = vsel %vm1614_vm0, %v10467_v32, 0.0 }
0x1661   : > { %10468 = vpow2.f32 %v4310_v56  ;;  %4319 = vadd.xlane.f32.xlu0 %v4318_v22  ;;  %v4538_v56 = vld [vmem:[#allocation35 + $0x10] sm:$0xff]  ;;  %v4537_v22 = vld [vmem:[#allocation35 + $0x8] sm:$0xff] }
0x1667   : > { %v10469_v52 = vpop.eup %10468 }
0x1668   : > { %v4321_v33 = vsel %vm1614_vm0, %v10469_v52, 0.0 }
0x1669   : > { %4322 = vadd.xlane.f32.xlu1 %v4321_v33 }
0x16c4   : > { %v4314_v58 = vpop.xlane.xlu1 %4313 }
0x16c5   : > { %10470 = vrcp.f32 %v4314_v58 }
0x16cb   : > { %v10471_v23 = vpop.eup %10470 }
0x16cc   : > { %v4328_v53 = vmul.f32 %v10471_v23, %v10463_v25  ;;  %v4317_v34 = vpop.xlane.xlu2 %4316 }
0x16cd   : > { %10472 = vrcp.f32 %v4317_v34 }
0x16ce   : > { %8868 = vmatmul.msk.f32.vlgmr.msra.gmra.mxu0 %vm1614_vm0, %v4328_v53 }
0x16d3   : > { %v10473_v35 = vpop.eup %10472 }
0x16d4   : > { %v4320_v36 = vpop.xlane.xlu0 %4319  ;;  %v4329_v59 = vmul.f32 %v10473_v35, %v10465_v28 }
0x16d5   : > { %10474 = vrcp.f32 %v4320_v36 }
0x16d6   : > { %8869 = vmatmul.msk.f32.gmra.mxu0 %vm1614_vm0, %v4329_v59 }
0x16db   : > { %v10475_v13 = vpop.eup %10474 }
0x16dc   : > { %v4323_v24 = vpop.xlane.xlu1 %4322  ;;  %v4330_v37 = vmul.f32 %v10475_v13, %v10467_v32  ;;  %v4539_v32 = vld [vmem:[#allocation35 + $0x18] sm:$0xff] }
0x16dd   : > { %10476 = vrcp.f32 %v4323_v24  ;;  %4568 = vmatpush.msra.mxu2 %v4539_v32 }
0x16de   : > { %8870 = vmatmul.msk.f32.gmra.mxu0 %vm1614_vm0, %v4330_v37 }
0x16df   : > { %4569 = vmatpush.msra.mxu2 %v4538_v56 }
0x16e1   : > { %4570 = vmatpush.msra.mxu2 %v4537_v22  ;;  %v4590_v22 = vld [vmem:[%s14828_s9 + $0x8] sm:$0xff] }
0x16e3   : > { %v10477_v38 = vpop.eup %10476 }
0x16e4   : > { %v4331_v39 = vmul.f32 %v10477_v38, %v10469_v52  ;;  %v4536_v52 = vld [vmem:[#allocation35] sm:$0xff] }
0x16e5   : > { %4571 = vmatpush.msra.mxu2 %v4536_v52  ;;  %v4589_v52 = vld [vmem:[%s14828_s9] sm:$0xff] }
0x16e6   : > { %8871 = vmatmul.msk.f32.gmra.mxu0 %vm1614_vm0, %v4331_v39 }
0x174b   : > { %v4361_v46 = vpop.f32.mrf.mxu0 }
0x174c   : > { %8872 = vmatmul.msk.f32.vlgmr.msra.gmra.mxu1 %vm1730_vm1, %v4361_v46 }
0x1753   : > { %v4364_v1 = vpop.f32.mrf.mxu0 }
0x1754   : > { %8873 = vmatmul.msk.f32.gmra.mxu1 %vm1730_vm1, %v4364_v1  ;;  %v13015_v1 = vld [vmem:[#allocation32] ss:$0 sm:$0xff] }
0x175b   : > { %v4367_v60 = vpop.f32.mrf.mxu0 }
0x175c   : > { %8874 = vmatmul.msk.f32.gmra.mxu1 %vm1730_vm1, %v4367_v60 }
0x1763   : > { %v4370_v2 = vpop.f32.mrf.mxu0 }
0x1764   : > { %8875 = vmatmul.msk.f32.gmra.mxu1 %vm1730_vm1, %v4370_v2 }
0x17c9   : > { %v4404_v9 = vpop.f32.mrf.mxu1 }
0x17ca   : > { %v4416_v40 = vadd.f32 %v4404_v9, %v12947_v47  ;;  %v4595_v9 = vld [vmem:[%s14828_s9 + $0x30] sm:$0xff] }
0x17cc   : > { %v4424_v31 = vadd.f32 %v10325_v4, %v4416_v40 }
0x17ce   : > { %v4428_v0 = vadd.f32 %v4424_v31, %v12684_v54 }
0x17d0   : > { %v4434_v49 = vsel %vm1614_vm0, %v4428_v0, 0.0 }
0x17d1   : > { %4435 = vadd.xlane.f32.xlu2 %v4434_v49  ;;  %v4407_v16 = vpop.f32.mrf.mxu1 }
0x17d2   : > { %v4417_v42 = vadd.f32 %v4407_v16, %v12951_v48  ;;  %v4594_v16 = vld [vmem:[%s14828_s9 + $0x28] sm:$0xff] }
0x17d4   : > { %v4425_v41 = vadd.f32 %v10325_v4, %v4417_v42 }
0x17d6   : > { %v4429_v43 = vadd.f32 %v4425_v41, %v12697_v61 }
0x17d8   : > { %v4437_v19 = vsel %vm1614_vm0, %v4429_v43, 0.0 }
0x17d9   : > { %4438 = vadd.xlane.f32.xlu0 %v4437_v19  ;;  %v4410_v12 = vpop.f32.mrf.mxu1 }
0x17da   : > { %v4418_v14 = vadd.f32 %v4410_v12, %v12955_v7  ;;  %v4593_v12 = vld [vmem:[%s14828_s9 + $0x20] sm:$0xff] }
0x17dc   : > { %v4426_v51 = vadd.f32 %v10325_v4, %v4418_v14 }
0x17de   : > { %v4430_v47 = vadd.f32 %v4426_v51, %v12708_v8 }
0x17e0   : > { %v4440_v54 = vsel %vm1614_vm0, %v4430_v47, 0.0 }
0x17e1   : > { %4441 = vadd.xlane.f32.xlu1 %v4440_v54  ;;  %v4413_v15 = vpop.f32.mrf.mxu1 }
0x17e2   : > { %v4419_v17 = vadd.f32 %v4413_v15, %v12958_v10  ;;  %v4592_v15 = vld [vmem:[%s14828_s9 + $0x18] sm:$0xff] }
0x17e4   : > { %v4427_v45 = vadd.f32 %v10325_v4, %v4419_v17  ;;  %v4596_v4 = vld [vmem:[%s14828_s9 + $0x38] sm:$0xff] }
0x17e5   : > { %4621 = vmatpush.msra.mxu3 %v4596_v4 }
0x17e6   : > { %v4431_v48 = vadd.f32 %v4427_v45, %v12719_v11 }
0x17e7   : > { %4622 = vmatpush.msra.mxu3 %v4595_v9 }
0x17e8   : > { %v4443_v61 = vsel %vm1614_vm0, %v4431_v48, 0.0 }
0x17e9   : > { %4444 = vadd.xlane.f32.xlu2 %v4443_v61  ;;  %4623 = vmatpush.msra.mxu3 %v4594_v16 }
0x17eb   : > { %4624 = vmatpush.msra.mxu3 %v4593_v12 }
0x17ed   : > { %4625 = vmatpush.msra.mxu3 %v4592_v15 }
0x1844   : > { %v4436_v50 = vpop.xlane.xlu2 %4435 }
0x1845   : > { %v4446_v5 = vmul.f32 %v4436_v50, %v12572_v55 }
0x1847   : > { %v4450_v18 = vsub.f32 %v4428_v0, %v4446_v5  ;;  %v10327_v0 = vld [vmem:[#allocation34] ss:$0 sm:$0xff] }
0x1849   : > { %v4454_v7 = vmul.f32 %v4450_v18, %v4450_v18 }
0x184b   : > { %v4458_v63 = vsel %vm1614_vm0, %v4454_v7, 0.0 }
0x184c   : > { %4459 = vadd.xlane.f32.xlu0 %v4458_v63  ;;  %v4439_v8 = vpop.xlane.xlu0 %4438 }
0x184d   : > { %v4447_v20 = vmul.f32 %v4439_v8, %v12572_v55 }
0x184f   : > { %v12995_v21 = vsub.f32 %v4429_v43, %v4447_v20 }
0x1851   : > { %v4455_v10 = vmul.f32 %v12995_v21, %v12995_v21 }
0x1853   : > { %v4461_v11 = vsel %vm1614_vm0, %v4455_v10, 0.0 }
0x1854   : > { %v4442_v25 = vpop.xlane.xlu1 %4441  ;;  %4462 = vadd.xlane.f32.xlu1 %v4461_v11 }
0x1855   : > { %v4448_v57 = vmul.f32 %v4442_v25, %v12572_v55 }
0x1857   : > { %v13001_v3 = vsub.f32 %v4430_v47, %v4448_v57 }
0x1859   : > { %v4456_v26 = vmul.f32 %v13001_v3, %v13001_v3 }
0x185b   : > { %v4464_v27 = vsel %vm1614_vm0, %v4456_v26, 0.0 }
0x185c   : > { %4465 = vadd.xlane.f32.xlu2 %v4464_v27  ;;  %v4445_v28 = vpop.xlane.xlu2 %4444 }
0x185d   : > { %v4449_v29 = vmul.f32 %v4445_v28, %v12572_v55 }
0x185f   : > { %v13007_v44 = vsub.f32 %v4431_v48, %v4449_v29 }
0x1861   : > { %v4457_v30 = vmul.f32 %v13007_v44, %v13007_v44 }
0x1863   : > { %v4467_v62 = vsel %vm1614_vm0, %v4457_v30, 0.0 }
0x1864   : > { %4468 = vadd.xlane.f32.xlu0 %v4467_v62 }
0x18bf   : > { %v4460_v33 = vpop.xlane.xlu0 %4459 }
0x18c0   : > { %v4470_v58 = vmul.f32 %v4460_v33, %v12572_v55  ;;  %v10328_v33 = vld [vmem:[#allocation37] ss:$0 sm:$0xff] }
0x18c2   : > { %v4474_v6 = vadd.f32 1e-05, %v4470_v58 }
0x18c4   : > { %10478 = vrsqrt.f32 %v4474_v6  ;;  %vm4484_vm14 = vweird.f32 %v4474_v6 }
0x18c7   : > { %v4463_v23 = vpop.xlane.xlu1 %4462 }
0x18c8   : > { %v4471_v53 = vmul.f32 %v4463_v23, %v12572_v55 }
0x18ca   : > { %v10479_v34 = vpop.eup %10478  ;;  %v4475_v35 = vadd.f32 1e-05, %v4471_v53 }
0x18cb   : > { %v4479_v36 = vmul.f32 %v10479_v34, %v4474_v6  ;;  %vm4485_vm1 = vweird.f32 %v10479_v34 }
0x18cc   : > { %10480 = vrsqrt.f32 %v4475_v35  ;;  %vm4486_vm2 = vmor %vm4484_vm14, %vm4485_vm1  ;;  %vm4494_vm4 = vweird.f32 %v4475_v35  ;;  %vm4754_vm1 = vcmask 257024  }
0x18cd   : > { %v4480_v59 = vmul.f32 %v10479_v34, %v4479_v36 }
0x18cf   : > { %v4481_v13 = vmul.f32 0.5, %v4480_v59  ;;  %v4466_v24 = vpop.xlane.xlu2 %4465 }
0x18d0   : > { %v4472_v37 = vmul.f32 %v4466_v24, %v12572_v55 }
0x18d1   : > { %v4482_v38 = vsub.f32 1.5, %v4481_v13 }
0x18d2   : > { %v10481_v39 = vpop.eup %10480  ;;  %v4476_v46 = vadd.f32 1e-05, %v4472_v37 }
0x18d3   : > { %v4483_v60 = vmul.f32 %v10479_v34, %v4482_v38  ;;  %v4489_v2 = vmul.f32 %v10481_v39, %v4475_v35  ;;  %vm4495_vm3 = vweird.f32 %v10481_v39  ;;  %v10329_v38 = vld [vmem:[#allocation38] ss:$0 sm:$0xff] }
0x18d4   : > { %10482 = vrsqrt.f32 %v4476_v46  ;;  %vm4496_vm5 = vmor %vm4494_vm4, %vm4495_vm3  ;;  %vm4504_vm7 = vweird.f32 %v4476_v46 }
0x18d5   : > { %v4487_v40 = vsel %vm4486_vm2, %v10479_v34, %v4483_v60  ;;  %v4490_v31 = vmul.f32 %v10481_v39, %v4489_v2 }
0x18d6   : > { %v4518_v49 = vmul.f32 %v4487_v40, %v4450_v18 }
0x18d7   : > { %v4491_v42 = vmul.f32 0.5, %v4490_v31  ;;  %v4469_v41 = vpop.xlane.xlu0 %4468 }
0x18d8   : > { %v4525_v43 = vmul.f32 %v13015_v1, %v4518_v49  ;;  %v4473_v19 = vmul.f32 %v4469_v41, %v12572_v55 }
0x18d9   : > { %v4492_v14 = vsub.f32 1.5, %v4491_v42 }
0x18da   : > { %v10483_v51 = vpop.eup %10482  ;;  %v13023_v47 = vadd.f32 %v10327_v0, %v4525_v43  ;;  %v4477_v54 = vadd.f32 1e-05, %v4473_v19 }
0x18db   : > { %v4493_v17 = vmul.f32 %v10481_v39, %v4492_v14  ;;  %v4499_v45 = vmul.f32 %v10483_v51, %v4476_v46  ;;  %vm4505_vm6 = vweird.f32 %v10483_v51 }
0x18dc   : > { %10484 = vrsqrt.f32 %v4477_v54  ;;  %8876 = vmatmul.msk.f32.vlgmr.msra.gmra.mxu2 %vm1614_vm0, %v13023_v47  ;;  %vm4506_vm8 = vmor %vm4504_vm7, %vm4505_vm6  ;;  %vm4514_vm10 = vweird.f32 %v4477_v54 }
0x18dd   : > { %v4497_v48 = vsel %vm4496_vm5, %v10481_v39, %v4493_v17  ;;  %v4500_v61 = vmul.f32 %v10483_v51, %v4499_v45 }
0x18de   : > { %v4519_v50 = vmul.f32 %v4497_v48, %v12995_v21 }
0x18df   : > { %v4501_v5 = vmul.f32 0.5, %v4500_v61 }
0x18e0   : > { %v4526_v18 = vmul.f32 %v13015_v1, %v4519_v50 }
0x18e1   : > { %v4502_v7 = vsub.f32 1.5, %v4501_v5 }
0x18e2   : > { %v10485_v63 = vpop.eup %10484  ;;  %v4533_v8 = vadd.f32 %v10327_v0, %v4526_v18 }
0x18e3   : > { %v4503_v20 = vmul.f32 %v10483_v51, %v4502_v7  ;;  %v4509_v10 = vmul.f32 %v10485_v63, %v4477_v54  ;;  %vm4515_vm9 = vweird.f32 %v10485_v63 }
0x18e4   : > { %8877 = vmatmul.msk.f32.gmra.mxu2 %vm1614_vm0, %v4533_v8  ;;  %vm4516_vm11 = vmor %vm4514_vm10, %vm4515_vm9 }
0x18e5   : > { %v4507_v11 = vsel %vm4506_vm8, %v10483_v51, %v4503_v20  ;;  %v4510_v25 = vmul.f32 %v10485_v63, %v4509_v10 }
0x18e6   : > { %v4520_v57 = vmul.f32 %v4507_v11, %v13001_v3  ;;  %v4591_v3 = vld [vmem:[%s14828_s9 + $0x10] sm:$0xff] }
0x18e7   : > { %v4511_v26 = vmul.f32 0.5, %v4510_v25  ;;  %4626 = vmatpush.msra.mxu3 %v4591_v3 }
0x18e8   : > { %v4527_v21 = vmul.f32 %v13015_v1, %v4520_v57 }
0x18e9   : > { %v4512_v27 = vsub.f32 1.5, %v4511_v26  ;;  %4627 = vmatpush.msra.mxu3 %v4590_v22 }
0x18ea   : > { %v4534_v28 = vadd.f32 %v10327_v0, %v4527_v21 }
0x18eb   : > { %v4513_v29 = vmul.f32 %v10485_v63, %v4512_v27  ;;  %4628 = vmatpush.msra.mxu3 %v4589_v52 }
0x18ec   : > { %8878 = vmatmul.msk.f32.gmra.mxu2 %vm1614_vm0, %v4534_v28 }
0x18ed   : > { %v4517_v30 = vsel %vm4516_vm11, %v10485_v63, %v4513_v29 }
0x18ee   : > { %v4521_v62 = vmul.f32 %v4517_v30, %v13007_v44 }
0x18f0   : > { %v4528_v32 = vmul.f32 %v13015_v1, %v4521_v62 }
0x18f2   : > { %v4535_v56 = vadd.f32 %v10327_v0, %v4528_v32 }
0x18f4   : > { %8879 = vmatmul.msk.f32.gmra.mxu2 %vm1614_vm0, %v4535_v56 }
0x195f   : > { %v4573_v58 = vpop.f32.mrf.mxu2 }
0x1960   : > { %v4574_v6 = vadd.f32 %v10328_v33, %v4573_v58 }
0x1962   : > { %v4585_v23 = vmax.f32 %v4574_v6, 0.0 }
0x1964   : > { %8880 = vmatmul.msk.f32.vlgmr.msra.gmra.mxu3 %vm3033_vm15, %v4585_v23 }
0x1967   : > { %v4576_v53 = vpop.f32.mrf.mxu2 }
0x1968   : > { %v4577_v34 = vadd.f32 %v10328_v33, %v4576_v53  ;;  %v10330_v53 = vld [vmem:[#allocation40] ss:$0 sm:$0xff] }
0x196a   : > { %v4586_v44 = vmax.f32 %v4577_v34, 0.0 }
0x196c   : > { %8881 = vmatmul.msk.f32.gmra.mxu3 %vm3033_vm15, %v4586_v44 }
0x196f   : > { %v4579_v35 = vpop.f32.mrf.mxu2 }
0x1970   : > { %v4580_v36 = vadd.f32 %v10328_v33, %v4579_v35  ;;  %v10331_v35 = vld [vmem:[#allocation41] ss:$0 sm:$0xff] }
0x1972   : > { %v4587_v59 = vmax.f32 %v4580_v36, 0.0 }
0x1974   : > { %8882 = vmatmul.msk.f32.gmra.mxu3 %vm3033_vm15, %v4587_v59 }
0x1977   : > { %v4582_v13 = vpop.f32.mrf.mxu2 }
0x1978   : > { %v4583_v24 = vadd.f32 %v10328_v33, %v4582_v13 }
0x197a   : > { %v4588_v37 = vmax.f32 %v4583_v24, 0.0 }
0x197c   : > { %8883 = vmatmul.msk.f32.gmra.mxu3 %vm3033_vm15, %v4588_v37 }
0x19e7   : > { %v4630_v39 = vpop.f32.mrf.mxu3 }
0x19e8   : > { %v4631_v46 = vadd.f32 %v10329_v38, %v4630_v39 }
0x19ea   : > { %v4642_v1 = vadd.f32 %v4631_v46, %v13023_v47 }
0x19ec   : > { %v4648_v60 = vsel %vm1614_vm0, %v4642_v1, 0.0 }
0x19ed   : > { %4649 = vadd.xlane.f32.xlu1 %v4648_v60 }
0x19ef   : > { %v4633_v2 = vpop.f32.mrf.mxu3 }
0x19f0   : > { %v4634_v4 = vadd.f32 %v10329_v38, %v4633_v2 }
0x19f2   : > { %v4643_v9 = vadd.f32 %v4634_v4, %v4533_v8 }
0x19f4   : > { %v4651_v40 = vsel %vm1614_vm0, %v4643_v9, 0.0 }
0x19f5   : > { %4652 = vadd.xlane.f32.xlu2 %v4651_v40 }
0x19f7   : > { %v4636_v31 = vpop.f32.mrf.mxu3 }
0x19f8   : > { %v4637_v0 = vadd.f32 %v10329_v38, %v4636_v31 }
0x19fa   : > { %v4644_v49 = vadd.f32 %v4637_v0, %v4534_v28 }
0x19fc   : > { %v4654_v16 = vsel %vm1614_vm0, %v4644_v49, 0.0 }
0x19fd   : > { %4655 = vadd.xlane.f32.xlu0 %v4654_v16 }
0x19ff   : > { %v4639_v42 = vpop.f32.mrf.mxu3 }
0x1a00   : > { %v4640_v41 = vadd.f32 %v10329_v38, %v4639_v42 }
0x1a02   : > { %v4645_v43 = vadd.f32 %v4640_v41, %v4535_v56 }
0x1a04   : > { %v4657_v19 = vsel %vm1614_vm0, %v4645_v43, 0.0 }
0x1a05   : > { %4658 = vadd.xlane.f32.xlu1 %v4657_v19 }
0x1a60   : > { %v4650_v12 = vpop.xlane.xlu1 %4649 }
0x1a61   : > { %v4660_v14 = vmul.f32 %v4650_v12, %v12572_v55 }
0x1a63   : > { %v4664_v51 = vsub.f32 %v4642_v1, %v4660_v14 }
0x1a65   : > { %v4668_v47 = vmul.f32 %v4664_v51, %v4664_v51 }
0x1a67   : > { %v4672_v54 = vsel %vm1614_vm0, %v4668_v47, 0.0 }
0x1a68   : > { %4673 = vadd.xlane.f32.xlu2 %v4672_v54  ;;  %v4653_v15 = vpop.xlane.xlu2 %4652 }
0x1a69   : > { %v4661_v17 = vmul.f32 %v4653_v15, %v12572_v55 }
0x1a6b   : > { %v13052_v45 = vsub.f32 %v4643_v9, %v4661_v17 }
0x1a6d   : > { %v4669_v48 = vmul.f32 %v13052_v45, %v13052_v45 }
0x1a6f   : > { %v4675_v61 = vsel %vm1614_vm0, %v4669_v48, 0.0 }
0x1a70   : > { %v4656_v50 = vpop.xlane.xlu0 %4655  ;;  %4676 = vadd.xlane.f32.xlu0 %v4675_v61 }
0x1a71   : > { %v4662_v5 = vmul.f32 %v4656_v50, %v12572_v55 }
0x1a73   : > { %v13058_v18 = vsub.f32 %v4644_v49, %v4662_v5 }
0x1a75   : > { %v4670_v7 = vmul.f32 %v13058_v18, %v13058_v18 }
0x1a77   : > { %v4678_v63 = vsel %vm1614_vm0, %v4670_v7, 0.0 }
0x1a78   : > { %v4659_v8 = vpop.xlane.xlu1 %4658  ;;  %4679 = vadd.xlane.f32.xlu1 %v4678_v63 }
0x1a79   : > { %v4663_v20 = vmul.f32 %v4659_v8, %v12572_v55 }
0x1a7b   : > { %v13064_v10 = vsub.f32 %v4645_v43, %v4663_v20 }
0x1a7d   : > { %v4671_v11 = vmul.f32 %v13064_v10, %v13064_v10 }
0x1a7f   : > { %v4681_v25 = vsel %vm1614_vm0, %v4671_v11, 0.0 }
0x1a80   : > { %4682 = vadd.xlane.f32.xlu2 %v4681_v25 }
0x1adb   : > { %v4674_v57 = vpop.xlane.xlu2 %4673 }
0x1adc   : > { %v4684_v26 = vmul.f32 %v4674_v57, %v12572_v55 }
0x1ade   : > { %v4688_v21 = vadd.f32 1e-05, %v4684_v26 }
0x1ae0   : > { %10486 = vrsqrt.f32 %v4688_v21  ;;  %vm4698_vm15 = vweird.f32 %v4688_v21 }
0x1ae3   : > { %v4677_v27 = vpop.xlane.xlu0 %4676 }
0x1ae4   : > { %v4685_v28 = vmul.f32 %v4677_v27, %v12572_v55 }
0x1ae6   : > { %v10487_v29 = vpop.eup %10486  ;;  %v4689_v30 = vadd.f32 1e-05, %v4685_v28 }
0x1ae7   : > { %v4693_v62 = vmul.f32 %v10487_v29, %v4688_v21  ;;  %vm4699_vm0 = vweird.f32 %v10487_v29 }
0x1ae8   : > { %10488 = vrsqrt.f32 %v4689_v30  ;;  %vm4700_vm12 = vmor %vm4698_vm15, %vm4699_vm0  ;;  %vm4708_vm14 = vweird.f32 %v4689_v30 }
0x1ae9   : > { %v4694_v32 = vmul.f32 %v10487_v29, %v4693_v62 }
0x1aeb   : > { %v4695_v56 = vmul.f32 0.5, %v4694_v32  ;;  %v4680_v3 = vpop.xlane.xlu1 %4679 }
0x1aec   : > { %v4686_v22 = vmul.f32 %v4680_v3, %v12572_v55 }
0x1aed   : > { %v4696_v52 = vsub.f32 1.5, %v4695_v56 }
0x1aee   : > { %v10489_v33 = vpop.eup %10488  ;;  %v4690_v58 = vadd.f32 1e-05, %v4686_v22 }
0x1aef   : > { %v4697_v6 = vmul.f32 %v10487_v29, %v4696_v52  ;;  %v4703_v23 = vmul.f32 %v10489_v33, %v4689_v30  ;;  %vm4709_vm13 = vweird.f32 %v10489_v33 }
0x1af0   : > { %10490 = vrsqrt.f32 %v4690_v58  ;;  %vm4710_vm2 = vmor %vm4708_vm14, %vm4709_vm13  ;;  %vm4718_vm4 = vweird.f32 %v4690_v58 }
0x1af1   : > { %v4701_v34 = vsel %vm4700_vm12, %v10487_v29, %v4697_v6  ;;  %v4704_v44 = vmul.f32 %v10489_v33, %v4703_v23 }
0x1af2   : > { %v4732_v36 = vmul.f32 %v4701_v34, %v4664_v51 }
0x1af3   : > { %v4705_v59 = vmul.f32 0.5, %v4704_v44  ;;  %v4683_v13 = vpop.xlane.xlu2 %4682 }
0x1af4   : > { %v4739_v24 = vmul.f32 %v10330_v53, %v4732_v36  ;;  %v4687_v37 = vmul.f32 %v4683_v13, %v12572_v55 }
0x1af5   : > { %v4706_v38 = vsub.f32 1.5, %v4705_v59 }
0x1af6   : > { %v10491_v39 = vpop.eup %10490  ;;  %v4746_v46 = vadd.f32 %v10331_v35, %v4739_v24  ;;  %v4691_v1 = vadd.f32 1e-05, %v4687_v37 }
0x1af7   : > { %v4707_v60 = vmul.f32 %v10489_v33, %v4706_v38  ;;  %v4713_v2 = vmul.f32 %v10491_v39, %v4690_v58  ;;  %vm4719_vm3 = vweird.f32 %v10491_v39 }
0x1af8   : > { %v4750_v4 = vpack.c.bf16 %v4746_v46, %v4746_v46  ;;  %10492 = vrsqrt.f32 %v4691_v1  ;;  %vm4720_vm5 = vmor %vm4718_vm4, %vm4719_vm3  ;;  %vm4728_vm7 = vweird.f32 %v4691_v1 }
0x1af9   : > { %v4711_v9 = vsel %vm4710_vm2, %v10489_v33, %v4707_v60  ;;  %v4714_v40 = vmul.f32 %v10491_v39, %v4713_v2 }
0x1afa   : > { %4755 = vst.msk [vmem:[#allocation2] sm:$0xf] %vm4754_vm1, %v4750_v4  ;;  %v4733_v31 = vmul.f32 %v4711_v9, %v13052_v45 }
0x1afb   : > { %v4715_v0 = vmul.f32 0.5, %v4714_v40 }
0x1afc   : > { %v4740_v55 = vmul.f32 %v10330_v53, %v4733_v31 }
0x1afd   : > { %v4716_v49 = vsub.f32 1.5, %v4715_v0 }
0x1afe   : > { %v10493_v16 = vpop.eup %10492  ;;  %v4747_v42 = vadd.f32 %v10331_v35, %v4740_v55 }
0x1aff   : > { %v4717_v41 = vmul.f32 %v10491_v39, %v4716_v49  ;;  %v4723_v43 = vmul.f32 %v10493_v16, %v4691_v1  ;;  %vm4729_vm6 = vweird.f32 %v10493_v16 }
0x1b00   : > { %v4751_v19 = vpack.c.bf16 %v4747_v42, %v4747_v42  ;;  %vm4730_vm8 = vmor %vm4728_vm7, %vm4729_vm6 }
0x1b01   : > { %v4721_v12 = vsel %vm4720_vm5, %v10491_v39, %v4717_v41  ;;  %v4724_v14 = vmul.f32 %v10493_v16, %v4723_v43 }
0x1b02   : > { %4756 = vst.msk [vmem:[#allocation2 + $0x4] sm:$0xf] %vm4754_vm1, %v4751_v19  ;;  %v4734_v51 = vmul.f32 %v4721_v12, %v13058_v18 }
0x1b03   : > { %v4725_v47 = vmul.f32 0.5, %v4724_v14 }
0x1b04   : > { %v4741_v54 = vmul.f32 %v10330_v53, %v4734_v51 }
0x1b05   : > { %v4726_v15 = vsub.f32 1.5, %v4725_v47 }
0x1b06   : > { %v4748_v17 = vadd.f32 %v10331_v35, %v4741_v54 }
0x1b07   : > { %v4727_v45 = vmul.f32 %v10493_v16, %v4726_v15 }
0x1b08   : > { %v4752_v48 = vpack.c.bf16 %v4748_v17, %v4748_v17 }
0x1b09   : > { %v4731_v61 = vsel %vm4730_vm8, %v10493_v16, %v4727_v45 }
0x1b0a   : > { %4757 = vst.msk [vmem:[#allocation2 + $0x8] sm:$0xf] %vm4754_vm1, %v4752_v48  ;;  %v4735_v50 = vmul.f32 %v4731_v61, %v13064_v10 }
0x1b0c   : > { %v4742_v5 = vmul.f32 %v10330_v53, %v4735_v50 }
0x1b0e   : > { %v4749_v7 = vadd.f32 %v10331_v35, %v4742_v5 }
0x1b10   : > { %v4753_v63 = vpack.c.bf16 %v4749_v7, %v4749_v7 }
0x1b12   : > { %4758 = vst.msk [vmem:[#allocation2 + $0xc] sm:$0xf] %vm4754_vm1, %v4753_v63 }
0x1b13 PF: > { %v9214_v18 = vld [vmem:[%s12240_s18 + $0x280] sm:$0xf]  ;;  %v9804_v20 = vld [vmem:[%s12240_s18 + $0x284] sm:$0xf]  ;;  %v9222_v25 = vld [vmem:[%s12240_s18 + $0x288] sm:$0xf] }
0x1b14   : > { %v9844_v8 = vld [vmem:[%s12240_s18 + $0x3bc] sm:$0xf0]  ;;  %v9216_v11 = vld [vmem:[%s12240_s18 + $0x3c0] sm:$0xf0]  ;;  %v9845_v57 = vld [vmem:[%s12240_s18 + $0x3c4] sm:$0xf0] }
0x1b15   : > { %v9215_v10 = vor.u32 %v9844_v8, %v9214_v18  ;;  %v9219_v26 = vor.u32 %v9804_v20, %v9216_v11  ;;  %v9223_v21 = vor.u32 %v9845_v57, %v9222_v25  ;;  %v9805_v27 = vld [vmem:[%s12240_s18 + $0x28c] sm:$0xf]  ;;  %v8894_v29 = vld [vmem:[%s12240_s18] sm:$0xf]  ;;  %v9724_v32 = vld [vmem:[%s12240_s18 + $0x4] sm:$0xf] }
0x1b16   : > { %v9224_v28 = vld [vmem:[%s12240_s18 + $0x3c8] sm:$0xf0]  ;;  %v9764_v62 = vld [vmem:[%s12240_s18 + $0x13c] sm:$0xf0]  ;;  %v8896_v56 = vld [vmem:[%s12240_s18 + $0x140] sm:$0xf0] }
0x1b17   : > { %5926 = vmatpush.bf16.msra.mxu0 %v9215_v10  ;;  %v9227_v30 = vor.u32 %v9805_v27, %v9224_v28  ;;  %5945 = vmatpush.bf16.msra.mxu1 %v9219_v26  ;;  %v8895_v3 = vor.u32 %v9764_v62, %v8894_v29  ;;  %v8899_v22 = vor.u32 %v9724_v32, %v8896_v56  ;;  %v8902_v52 = vld [vmem:[%s12240_s18 + $0x8] sm:$0xf]  ;;  %v9725_v58 = vld [vmem:[%s12240_s18 + $0xc] sm:$0xf]  ;;  %v13096_v53 = vld [vmem:[#allocation2] sm:$0xff]  ;;  %vm5913_vm9 = vcmask 261120  }
0x1b18   : > { %5964 = vmatpush.bf16.msra.mxu2 %v9223_v21  ;;  %v9765_v33 = vld [vmem:[%s12240_s18 + $0x144] sm:$0xf0]  ;;  %v8904_v23 = vld [vmem:[%s12240_s18 + $0x148] sm:$0xf0]  ;;  %v9238_v34 = vld [vmem:[%s12240_s18 + $0x298] sm:$0xf] }
0x1b19   : > { %5983 = vmatpush.bf16.msra.mxu3 %v9227_v30  ;;  %v8903_v6 = vor.u32 %v9765_v33, %v8902_v52  ;;  %v8907_v44 = vor.u32 %v9725_v58, %v8904_v23  ;;  %v9847_v35 = vld [vmem:[%s12240_s18 + $0x3d4] sm:$0xf0]  ;;  %v9807_v36 = vld [vmem:[%s12240_s18 + $0x29c] sm:$0xf]  ;;  %v9230_v37 = vld [vmem:[%s12240_s18 + $0x290] sm:$0xf] }
0x1b1a   : > { %v9240_v59 = vld [vmem:[%s12240_s18 + $0x3d8] sm:$0xf0]  ;;  %v9239_v13 = vor.u32 %v9847_v35, %v9238_v34  ;;  %v9846_v38 = vld [vmem:[%s12240_s18 + $0x3cc] sm:$0xf0]  ;;  %v9806_v39 = vld [vmem:[%s12240_s18 + $0x294] sm:$0xf] }
0x1b1b   : > { %5927 = vmatpush.bf16.msra.mxu0 %v8895_v3  ;;  %v9243_v24 = vor.u32 %v9807_v36, %v9240_v59  ;;  %5946 = vmatpush.bf16.msra.mxu1 %v8899_v22  ;;  %v9231_v46 = vor.u32 %v9846_v38, %v9230_v37  ;;  %v9232_v1 = vld [vmem:[%s12240_s18 + $0x3d0] sm:$0xf0]  ;;  %v8918_v60 = vld [vmem:[%s12240_s18 + $0x18] sm:$0xf]  ;;  %v9727_v9 = vld [vmem:[%s12240_s18 + $0x1c] sm:$0xf] }
0x1b1c   : > { %5965 = vmatpush.bf16.msra.mxu2 %v8903_v6  ;;  %v9235_v2 = vor.u32 %v9806_v39, %v9232_v1  ;;  %v9767_v4 = vld [vmem:[%s12240_s18 + $0x154] sm:$0xf0]  ;;  %v8920_v40 = vld [vmem:[%s12240_s18 + $0x158] sm:$0xf0]  ;;  %v8910_v55 = vld [vmem:[%s12240_s18 + $0x10] sm:$0xf] }
0x1b1d   : > { %5984 = vmatpush.bf16.msra.mxu3 %v8907_v44  ;;  %v8919_v31 = vor.u32 %v9767_v4, %v8918_v60  ;;  %v8923_v0 = vor.u32 %v9727_v9, %v8920_v40  ;;  %v9766_v49 = vld [vmem:[%s12240_s18 + $0x14c] sm:$0xf0]  ;;  %v9726_v16 = vld [vmem:[%s12240_s18 + $0x14] sm:$0xf]  ;;  %v9254_v43 = vld [vmem:[%s12240_s18 + $0x2a8] sm:$0xf] }
0x1b1e   : > { %9532 = vmatmul.msk.bf16.vlgmr.msra.gmra.mxu0 %vm5913_vm9, %v13096_v53  ;;  %9534 = vmatmul.msk.bf16.vlgmr.msra.gmra.mxu1 %vm5913_vm9, %v13096_v53  ;;  %v8912_v42 = vld [vmem:[%s12240_s18 + $0x150] sm:$0xf0]  ;;  %v8911_v41 = vor.u32 %v9766_v49, %v8910_v55  ;;  %v9849_v19 = vld [vmem:[%s12240_s18 + $0x3e4] sm:$0xf0]  ;;  %v9809_v12 = vld [vmem:[%s12240_s18 + $0x2ac] sm:$0xf] }
0x1b1f   : > { %9536 = vmatmul.msk.bf16.vlgmr.msra.gmra.mxu2 %vm5913_vm9, %v13096_v53  ;;  %6002 = vmatpush.bf16.msrb.mxu0 %v9231_v46  ;;  %v8915_v14 = vor.u32 %v9726_v16, %v8912_v42  ;;  %v9255_v51 = vor.u32 %v9849_v19, %v9254_v43  ;;  %v9256_v47 = vld [vmem:[%s12240_s18 + $0x3e8] sm:$0xf0]  ;;  %v9246_v54 = vld [vmem:[%s12240_s18 + $0x2a0] sm:$0xf]  ;;  %v9808_v48 = vld [vmem:[%s12240_s18 + $0x2a4] sm:$0xf] }
0x1b20   : > { %6040 = vmatpush.bf16.msrb.mxu2 %v9239_v13  ;;  %9538 = vmatmul.msk.bf16.vlgmr.msra.gmra.mxu3 %vm5913_vm9, %v13096_v53  ;;  %v9848_v15 = vld [vmem:[%s12240_s18 + $0x3dc] sm:$0xf0]  ;;  %v9259_v17 = vor.u32 %v9809_v12, %v9256_v47  ;;  %v9248_v61 = vld [vmem:[%s12240_s18 + $0x3e0] sm:$0xf0]  ;;  %v8934_v7 = vld [vmem:[%s12240_s18 + $0x28] sm:$0xf] }
0x1b21   : > { %6059 = vmatpush.bf16.msrb.mxu3 %v9243_v24  ;;  %6021 = vmatpush.bf16.msrb.mxu1 %v9235_v2  ;;  %v9247_v45 = vor.u32 %v9848_v15, %v9246_v54  ;;  %v9251_v50 = vor.u32 %v9808_v48, %v9248_v61  ;;  %v13130_v5 = vld [vmem:[#allocation2 + $0x8] sm:$0xff]  ;;  %v9729_v18 = vld [vmem:[%s12240_s18 + $0x2c] sm:$0xf]  ;;  %v8926_v10 = vld [vmem:[%s12240_s18 + $0x20] sm:$0xf]  ;;  %s14830_s2 = sld [smem:[#allocation91_spill]] (%p11826_p10) }
0x1b22   : > { %v9769_v63 = vld [vmem:[%s12240_s18 + $0x164] sm:$0xf0]  ;;  %v8936_v20 = vld [vmem:[%s12240_s18 + $0x168] sm:$0xf0]  ;;  %v9768_v11 = vld [vmem:[%s12240_s18 + $0x15c] sm:$0xf0] }
0x1b23   : > { %6003 = vmatpush.bf16.msrb.mxu0 %v8911_v41  ;;  %v8935_v8 = vor.u32 %v9769_v63, %v8934_v7  ;;  %v8939_v25 = vor.u32 %v9729_v18, %v8936_v20  ;;  %v8927_v57 = vor.u32 %v9768_v11, %v8926_v10  ;;  %v9728_v26 = vld [vmem:[%s12240_s18 + $0x24] sm:$0xf]  ;;  %v9270_v28 = vld [vmem:[%s12240_s18 + $0x2b8] sm:$0xf]  ;;  %v9811_v30 = vld [vmem:[%s12240_s18 + $0x2bc] sm:$0xf] }
0x1b24   : > { %6041 = vmatpush.bf16.msrb.mxu2 %v8919_v31  ;;  %v8928_v21 = vld [vmem:[%s12240_s18 + $0x160] sm:$0xf0]  ;;  %v9851_v29 = vld [vmem:[%s12240_s18 + $0x3f4] sm:$0xf0]  ;;  %v9272_v32 = vld [vmem:[%s12240_s18 + $0x3f8] sm:$0xf0] }
0x1b25   : > { %6060 = vmatpush.bf16.msrb.mxu3 %v8923_v0  ;;  %6022 = vmatpush.bf16.msrb.mxu1 %v8915_v14  ;;  %v8931_v27 = vor.u32 %v9728_v26, %v8928_v21  ;;  %v9271_v62 = vor.u32 %v9851_v29, %v9270_v28  ;;  %v9262_v56 = vld [vmem:[%s12240_s18 + $0x2b0] sm:$0xf]  ;;  %v9275_v22 = vor.u32 %v9811_v30, %v9272_v32  ;;  %v9810_v33 = vld [vmem:[%s12240_s18 + $0x2b4] sm:$0xf]  ;;  %v8950_v23 = vld [vmem:[%s12240_s18 + $0x38] sm:$0xf] }
0x1b26   : > { %v9850_v3 = vld [vmem:[%s12240_s18 + $0x3ec] sm:$0xf0]  ;;  %v9264_v58 = vld [vmem:[%s12240_s18 + $0x3f0] sm:$0xf0]  ;;  %v9771_v34 = vld [vmem:[%s12240_s18 + $0x174] sm:$0xf0] }
0x1b27   : > { %6078 = vmatpush.bf16.msra.mxu0 %v9247_v45  ;;  %v9263_v52 = vor.u32 %v9850_v3, %v9262_v56  ;;  %v9267_v6 = vor.u32 %v9810_v33, %v9264_v58  ;;  %v9731_v44 = vld [vmem:[%s12240_s18 + $0x3c] sm:$0xf]  ;;  %v8951_v35 = vor.u32 %v9771_v34, %v8950_v23  ;;  %v8942_v59 = vld [vmem:[%s12240_s18 + $0x30] sm:$0xf]  ;;  %v9730_v38 = vld [vmem:[%s12240_s18 + $0x34] sm:$0xf] }
0x1b28   : > { %6116 = vmatpush.bf16.msra.mxu2 %v9255_v51  ;;  %v8952_v36 = vld [vmem:[%s12240_s18 + $0x178] sm:$0xf0]  ;;  %v9770_v13 = vld [vmem:[%s12240_s18 + $0x16c] sm:$0xf0]  ;;  %v8944_v39 = vld [vmem:[%s12240_s18 + $0x170] sm:$0xf0] }
0x1b29   : > { %6135 = vmatpush.bf16.msra.mxu3 %v9259_v17  ;;  %6097 = vmatpush.bf16.msra.mxu1 %v9251_v50  ;;  %v8955_v24 = vor.u32 %v9731_v44, %v8952_v36  ;;  %v8943_v37 = vor.u32 %v9770_v13, %v8942_v59  ;;  %v8947_v46 = vor.u32 %v9730_v38, %v8944_v39  ;;  %v9286_v1 = vld [vmem:[%s12240_s18 + $0x2c8] sm:$0xf]  ;;  %v9813_v2 = vld [vmem:[%s12240_s18 + $0x2cc] sm:$0xf]  ;;  %v9278_v40 = vld [vmem:[%s12240_s18 + $0x2c0] sm:$0xf] }
0x1b2a   : > { %v9853_v60 = vld [vmem:[%s12240_s18 + $0x404] sm:$0xf0]  ;;  %v9288_v9 = vld [vmem:[%s12240_s18 + $0x408] sm:$0xf0]  ;;  %v9852_v31 = vld [vmem:[%s12240_s18 + $0x3fc] sm:$0xf0] }
0x1b2b   : > { %6079 = vmatpush.bf16.msra.mxu0 %v8927_v57  ;;  %v9287_v4 = vor.u32 %v9853_v60, %v9286_v1  ;;  %v9291_v0 = vor.u32 %v9813_v2, %v9288_v9  ;;  %v9279_v55 = vor.u32 %v9852_v31, %v9278_v40  ;;  %v9812_v49 = vld [vmem:[%s12240_s18 + $0x2c4] sm:$0xf]  ;;  %v8966_v41 = vld [vmem:[%s12240_s18 + $0x48] sm:$0xf]  ;;  %v9733_v19 = vld [vmem:[%s12240_s18 + $0x4c] sm:$0xf] }
0x1b2c   : > { %6117 = vmatpush.bf16.msra.mxu2 %v8935_v8  ;;  %v9280_v16 = vld [vmem:[%s12240_s18 + $0x400] sm:$0xf0]  ;;  %v9773_v43 = vld [vmem:[%s12240_s18 + $0x184] sm:$0xf0]  ;;  %v8968_v14 = vld [vmem:[%s12240_s18 + $0x188] sm:$0xf0] }
0x1b2d   : > { %6136 = vmatpush.bf16.msra.mxu3 %v8939_v25  ;;  %6098 = vmatpush.bf16.msra.mxu1 %v8931_v27  ;;  %v9283_v42 = vor.u32 %v9812_v49, %v9280_v16  ;;  %v8967_v12 = vor.u32 %v9773_v43, %v8966_v41  ;;  %v8958_v51 = vld [vmem:[%s12240_s18 + $0x40] sm:$0xf]  ;;  %v8971_v54 = vor.u32 %v9733_v19, %v8968_v14  ;;  %v9732_v17 = vld [vmem:[%s12240_s18 + $0x44] sm:$0xf]  ;;  %v9302_v61 = vld [vmem:[%s12240_s18 + $0x2d8] sm:$0xf] }
0x1b2e   : > { %9533 = vmatmul.msk.bf16.gmra.mxu0 %vm5913_vm9, %v13130_v5  ;;  %9535 = vmatmul.msk.bf16.gmra.mxu1 %vm5913_vm9, %v13130_v5  ;;  %v9772_v47 = vld [vmem:[%s12240_s18 + $0x17c] sm:$0xf0]  ;;  %v8960_v45 = vld [vmem:[%s12240_s18 + $0x180] sm:$0xf0]  ;;  %v9855_v50 = vld [vmem:[%s12240_s18 + $0x414] sm:$0xf0] }
0x1b2f   : > { %9537 = vmatmul.msk.bf16.gmra.mxu2 %vm5913_vm9, %v13130_v5  ;;  %v8959_v15 = vor.u32 %v9772_v47, %v8958_v51  ;;  %v8963_v48 = vor.u32 %v9732_v17, %v8960_v45  ;;  %v9815_v7 = vld [vmem:[%s12240_s18 + $0x2dc] sm:$0xf]  ;;  %v9303_v63 = vor.u32 %v9855_v50, %v9302_v61  ;;  %v9294_v20 = vld [vmem:[%s12240_s18 + $0x2d0] sm:$0xf]  ;;  %v9814_v11 = vld [vmem:[%s12240_s18 + $0x2d4] sm:$0xf] }
0x1b30   : > { %9539 = vmatmul.msk.bf16.gmra.mxu3 %vm5913_vm9, %v13130_v5  ;;  %v9304_v18 = vld [vmem:[%s12240_s18 + $0x418] sm:$0xf0]  ;;  %v9854_v10 = vld [vmem:[%s12240_s18 + $0x40c] sm:$0xf0]  ;;  %v9296_v57 = vld [vmem:[%s12240_s18 + $0x410] sm:$0xf0] }
0x1b31   : > { %v9307_v8 = vor.u32 %v9815_v7, %v9304_v18  ;;  %v9295_v25 = vor.u32 %v9854_v10, %v9294_v20  ;;  %v9299_v26 = vor.u32 %v9814_v11, %v9296_v57  ;;  %v8982_v21 = vld [vmem:[%s12240_s18 + $0x58] sm:$0xf]  ;;  %v9735_v28 = vld [vmem:[%s12240_s18 + $0x5c] sm:$0xf]  ;;  %v13241_v32 = vld [vmem:[%s12246_s1] sm:$0xff]  ;;  %s9884_s4 = smul.u32 (%p11826_p10), 320, %s11797_s15 }
0x1b32   : > { %v9775_v27 = vld [vmem:[%s12240_s18 + $0x194] sm:$0xf0]  ;;  %v8984_v30 = vld [vmem:[%s12240_s18 + $0x198] sm:$0xf0]  ;;  %v13244_v56 = vperm.slane %v13241_v32, 0  ;;  %v13247_v3 = vperm.slane %v13241_v32, 1 }
0x1b33   : > { %v8983_v29 = vor.u32 %v9775_v27, %v8982_v21  ;;  %v9734_v33 = vld [vmem:[%s12240_s18 + $0x54] sm:$0xf]  ;;  %v13262_v13 = vperm.slane %v13241_v32, 2  ;;  %v9857_v38 = vld [vmem:[%s12240_s18 + $0x424] sm:$0xf0]  ;;  %s14343_s10 = scalar_lea.vmem (%p11826_p10), %s14830_s2, %s9884_s4  }
0x1b34   : > { %v9817_v39 = vld [vmem:[%s12240_s18 + $0x2ec] sm:$0xf]  ;;  %v9310_v41 = vld [vmem:[%s12240_s18 + $0x2e0] sm:$0xf]  ;;  %v9816_v14 = vld [vmem:[%s12240_s18 + $0x2e4] sm:$0xf] }
0x1b35   : > { %v9320_v60 = vld [vmem:[%s12240_s18 + $0x428] sm:$0xf0]  ;;  %v9856_v43 = vld [vmem:[%s12240_s18 + $0x41c] sm:$0xf0]  ;;  %v9312_v51 = vld [vmem:[%s12240_s18 + $0x420] sm:$0xf0] }
0x1b36   : > { %v9323_v40 = vor.u32 %v9817_v39, %v9320_v60  ;;  %v9315_v17 = vor.u32 %v9816_v14, %v9312_v51  ;;  %v8998_v18 = vld [vmem:[%s12240_s18 + $0x68] sm:$0xf]  ;;  %v9737_v11 = vld [vmem:[%s12240_s18 + $0x6c] sm:$0xf] }
0x1b3e   : > { %9540 = vmatmul.msk.bf16.vlgmr.msrb.gmra.mxu0 %vm5913_vm9, %v13096_v53  ;;  %9542 = vmatmul.msk.bf16.vlgmr.msrb.gmra.mxu1 %vm5913_vm9, %v13096_v53 }
0x1b3f   : > { %9544 = vmatmul.msk.bf16.vlgmr.msrb.gmra.mxu2 %vm5913_vm9, %v13096_v53  ;;  %6154 = vmatpush.bf16.msrb.mxu0 %v9263_v52  ;;  %v9774_v52 = vld [vmem:[%s12240_s18 + $0x18c] sm:$0xf0] }
0x1b40   : > { %9546 = vmatmul.msk.bf16.vlgmr.msrb.gmra.mxu3 %vm5913_vm9, %v13096_v53  ;;  %6192 = vmatpush.bf16.msrb.mxu2 %v9271_v62  ;;  %v8987_v62 = vor.u32 %v9735_v28, %v8984_v30 }
0x1b41   : > { %6211 = vmatpush.bf16.msrb.mxu3 %v9275_v22  ;;  %6173 = vmatpush.bf16.msrb.mxu1 %v9267_v6  ;;  %v8974_v22 = vld [vmem:[%s12240_s18 + $0x50] sm:$0xf]  ;;  %v8976_v6 = vld [vmem:[%s12240_s18 + $0x190] sm:$0xf0] }
0x1b42   : > { %v8975_v58 = vor.u32 %v9774_v52, %v8974_v22  ;;  %v8979_v34 = vor.u32 %v9734_v33, %v8976_v6  ;;  %v13308_v33 = vperm.slane %v13241_v32, 4  ;;  %v8990_v6 = vld [vmem:[%s12240_s18 + $0x60] sm:$0xf] }
0x1b43   : > { %6155 = vmatpush.bf16.msrb.mxu0 %v8943_v37  ;;  %v9318_v37 = vld [vmem:[%s12240_s18 + $0x2e8] sm:$0xf] }
0x1b44   : > { %6193 = vmatpush.bf16.msrb.mxu2 %v8951_v35  ;;  %v9319_v1 = vor.u32 %v9857_v38, %v9318_v37 }
0x1b45   : > { %6212 = vmatpush.bf16.msrb.mxu3 %v8955_v24  ;;  %6174 = vmatpush.bf16.msrb.mxu1 %v8947_v46  ;;  %v13267_v24 = vperm.slane %v13241_v32, 3 }
0x1b4e   : > { %9541 = vmatmul.msk.bf16.gmra.mxu0 %vm5913_vm9, %v13130_v5  ;;  %9543 = vmatmul.msk.bf16.gmra.mxu1 %vm5913_vm9, %v13130_v5 }
0x1b4f   : > { %9545 = vmatmul.msk.bf16.gmra.mxu2 %vm5913_vm9, %v13130_v5 }
0x1b50   : > { %9547 = vmatmul.msk.bf16.gmra.mxu3 %vm5913_vm9, %v13130_v5 }
0x1b5e   : > { %9548 = vmatmul.msk.bf16.vlgmr.msra.gmra.mxu0 %vm5913_vm9, %v13096_v53  ;;  %9550 = vmatmul.msk.bf16.vlgmr.msra.gmra.mxu1 %vm5913_vm9, %v13096_v53 }
0x1b5f   : > { %9552 = vmatmul.msk.bf16.vlgmr.msra.gmra.mxu2 %vm5913_vm9, %v13096_v53  ;;  %6230 = vmatpush.bf16.msra.mxu0 %v9279_v55 }
0x1b60   : > { %9554 = vmatmul.msk.bf16.vlgmr.msra.gmra.mxu3 %vm5913_vm9, %v13096_v53  ;;  %6268 = vmatpush.bf16.msra.mxu2 %v9287_v4 }
0x1b61   : > { %6287 = vmatpush.bf16.msra.mxu3 %v9291_v0  ;;  %6249 = vmatpush.bf16.msra.mxu1 %v9283_v42 }
0x1b63   : > { %6231 = vmatpush.bf16.msra.mxu0 %v8959_v15 }
0x1b64   : > { %6269 = vmatpush.bf16.msra.mxu2 %v8967_v12  ;;  %v9311_v12 = vor.u32 %v9856_v43, %v9310_v41 }
0x1b65   : > { %6288 = vmatpush.bf16.msra.mxu3 %v8971_v54  ;;  %6250 = vmatpush.bf16.msra.mxu1 %v8963_v48 }
0x1b6e   : > { %9549 = vmatmul.msk.bf16.gmra.mxu0 %vm5913_vm9, %v13130_v5  ;;  %9551 = vmatmul.msk.bf16.gmra.mxu1 %vm5913_vm9, %v13130_v5 }
0x1b6f   : > { %9553 = vmatmul.msk.bf16.gmra.mxu2 %vm5913_vm9, %v13130_v5 }
0x1b70   : > { %9555 = vmatmul.msk.bf16.gmra.mxu3 %vm5913_vm9, %v13130_v5 }
0x1b7e   : > { %9556 = vmatmul.msk.bf16.vlgmr.msrb.gmra.mxu0 %vm5913_vm9, %v13096_v53  ;;  %9558 = vmatmul.msk.bf16.vlgmr.msrb.gmra.mxu1 %vm5913_vm9, %v13096_v53 }
0x1b7f   : > { %9560 = vmatmul.msk.bf16.vlgmr.msrb.gmra.mxu2 %vm5913_vm9, %v13096_v53  ;;  %6306 = vmatpush.bf16.msrb.mxu0 %v9295_v25  ;;  %v9000_v25 = vld [vmem:[%s12240_s18 + $0x1a8] sm:$0xf0] }
0x1b80   : > { %9562 = vmatmul.msk.bf16.vlgmr.msrb.gmra.mxu3 %vm5913_vm9, %v13096_v53  ;;  %6344 = vmatpush.bf16.msrb.mxu2 %v9303_v63  ;;  %v9003_v27 = vor.u32 %v9737_v11, %v9000_v25 }
0x1b81   : > { %6363 = vmatpush.bf16.msrb.mxu3 %v9307_v8  ;;  %6325 = vmatpush.bf16.msrb.mxu1 %v9299_v26  ;;  %v9777_v8 = vld [vmem:[%s12240_s18 + $0x1a4] sm:$0xf0] }
0x1b82   : > { %v8999_v10 = vor.u32 %v9777_v8, %v8998_v18 }
0x1b83   : > { %6307 = vmatpush.bf16.msrb.mxu0 %v8975_v58  ;;  %v13312_v58 = vperm.slane %v13241_v32, 5 }
0x1b84   : > { %6345 = vmatpush.bf16.msrb.mxu2 %v8983_v29 }
0x1b85   : > { %6364 = vmatpush.bf16.msrb.mxu3 %v8987_v62  ;;  %6326 = vmatpush.bf16.msrb.mxu1 %v8979_v34 }
0x1b8e   : > { %9557 = vmatmul.msk.bf16.gmra.mxu0 %vm5913_vm9, %v13130_v5  ;;  %9559 = vmatmul.msk.bf16.gmra.mxu1 %vm5913_vm9, %v13130_v5 }
0x1b8f   : > { %9561 = vmatmul.msk.bf16.gmra.mxu2 %vm5913_vm9, %v13130_v5 }
0x1b90   : > { %9563 = vmatmul.msk.bf16.gmra.mxu3 %vm5913_vm9, %v13130_v5 }
0x1b9b   : > { %v5929_v23 = vpop.f32.mrf.mxu0  ;;  %v5948_v35 = vpop.f32.mrf.mxu1 }
0x1b9c   : > { %v5930_v44 = vadd.f32 %v5929_v23, %v13244_v56  ;;  %v5949_v36 = vadd.f32 %v5948_v35, %v13247_v3  ;;  %v9776_v23 = vld [vmem:[%s12240_s18 + $0x19c] sm:$0xf0]  ;;  %v8992_v35 = vld [vmem:[%s12240_s18 + $0x1a0] sm:$0xf0] }
0x1b9e   : > { %9564 = vmatmul.msk.bf16.vlgmr.msra.gmra.mxu0 %vm5913_vm9, %v13096_v53  ;;  %v7440_v59 = vpack.c.bf16 %v5949_v36, %v5930_v44  ;;  %9566 = vmatmul.msk.bf16.vlgmr.msra.gmra.mxu1 %vm5913_vm9, %v13096_v53  ;;  %v9736_v44 = vld [vmem:[%s12240_s18 + $0x64] sm:$0xf] }
0x1b9f   : > { %9568 = vmatmul.msk.bf16.vlgmr.msra.gmra.mxu2 %vm5913_vm9, %v13096_v53  ;;  %6382 = vmatpush.bf16.msra.mxu0 %v9311_v12  ;;  %v8995_v37 = vor.u32 %v9736_v44, %v8992_v35  ;;  %v13375_v44 = vld [vmem:[%s12246_s1 + $0x8] sm:$0xff] }
0x1ba0   : > { %9570 = vmatmul.msk.bf16.vlgmr.msra.gmra.mxu3 %vm5913_vm9, %v13096_v53  ;;  %7600 = vst [vmem:[%s12248_s19] sm:$0xff] %v7440_v59  ;;  %6420 = vmatpush.bf16.msra.mxu2 %v9319_v1 }
0x1ba1   : > { %6439 = vmatpush.bf16.msra.mxu3 %v9323_v40  ;;  %6401 = vmatpush.bf16.msra.mxu1 %v9315_v17  ;;  %v9859_v40 = vld [vmem:[%s12240_s18 + $0x434] sm:$0xf0] }
0x1ba2   : > { %v5967_v46 = vpop.f32.mrf.mxu2 }
0x1ba3   : > { %v5968_v2 = vadd.f32 %v5967_v46, %v13262_v13  ;;  %v5986_v4 = vpop.f32.mrf.mxu3  ;;  %v5931_v9 = vpop.f32.mrf.mxu0 }
0x1ba4   : > { %v5987_v31 = vadd.f32 %v5986_v4, %v13267_v24  ;;  %v5932_v0 = vadd.f32 %v5931_v9, %v13244_v56  ;;  %v5950_v55 = vpop.f32.mrf.mxu1  ;;  %6421 = vmatpush.bf16.msra.mxu2 %v8999_v10  ;;  %v9334_v4 = vld [vmem:[%s12240_s18 + $0x2f8] sm:$0xf] }
0x1ba5   : > { %v5951_v49 = vadd.f32 %v5950_v55, %v13247_v3  ;;  %6440 = vmatpush.bf16.msra.mxu3 %v9003_v27  ;;  %6402 = vmatpush.bf16.msra.mxu1 %v8995_v37  ;;  %v9778_v37 = vld [vmem:[%s12240_s18 + $0x1ac] sm:$0xf0] }
0x1ba6   : > { %v7441_v16 = vpack.c.bf16 %v5987_v31, %v5968_v2  ;;  %v13335_v2 = vperm.slane %v13241_v32, 7  ;;  %v9819_v31 = vld [vmem:[%s12240_s18 + $0x2fc] sm:$0xf] }
0x1ba7   : > { %v7480_v42 = vpack.c.bf16 %v5951_v49, %v5932_v0  ;;  %v9336_v0 = vld [vmem:[%s12240_s18 + $0x438] sm:$0xf0] }
0x1ba8   : > { %7601 = vst [vmem:[%s12248_s19 + $0x8] sm:$0xff] %v7441_v16  ;;  %v9339_v41 = vor.u32 %v9819_v31, %v9336_v0 }
0x1ba9   : > { %7640 = vst [vmem:[%s12248_s19 + $0x140] sm:$0xff] %v7480_v42  ;;  %v9335_v42 = vor.u32 %v9859_v40, %v9334_v4 }
0x1baa   : > { %v5969_v19 = vpop.f32.mrf.mxu2 }
0x1bab   : > { %v5970_v47 = vadd.f32 %v5969_v19, %v13262_v13  ;;  %v5988_v54 = vpop.f32.mrf.mxu3  ;;  %v5934_v15 = vpop.f32.mrf.mxu0 }
0x1bac   : > { %v5989_v45 = vadd.f32 %v5988_v54, %v13267_v24  ;;  %v5935_v48 = vadd.f32 %v5934_v15, %v13244_v56  ;;  %v5953_v61 = vpop.f32.mrf.mxu1  ;;  %v9858_v54 = vld [vmem:[%s12240_s18 + $0x42c] sm:$0xf0] }
0x1bad   : > { %v5954_v50 = vadd.f32 %v5953_v61, %v13247_v3 }
0x1bae   : > { %v7481_v7 = vpack.c.bf16 %v5989_v45, %v5970_v47  ;;  %9565 = vmatmul.msk.bf16.gmra.mxu0 %vm5913_vm9, %v13130_v5  ;;  %9567 = vmatmul.msk.bf16.gmra.mxu1 %vm5913_vm9, %v13130_v5  ;;  %v9326_v47 = vld [vmem:[%s12240_s18 + $0x2f0] sm:$0xf]  ;;  %v9818_v45 = vld [vmem:[%s12240_s18 + $0x2f4] sm:$0xf] }
0x1baf   : > { %v7520_v63 = vpack.c.bf16 %v5954_v50, %v5935_v48  ;;  %9569 = vmatmul.msk.bf16.gmra.mxu2 %vm5913_vm9, %v13130_v5  ;;  %v9327_v17 = vor.u32 %v9858_v54, %v9326_v47  ;;  %v9328_v48 = vld [vmem:[%s12240_s18 + $0x430] sm:$0xf0] }
0x1bb0   : > { %7641 = vst [vmem:[%s12248_s19 + $0x148] sm:$0xff] %v7481_v7  ;;  %9571 = vmatmul.msk.bf16.gmra.mxu3 %vm5913_vm9, %v13130_v5 }
0x1bb1   : > { %7680 = vst [vmem:[%s12248_s19 + $0x280] sm:$0xff] %v7520_v63  ;;  %v9331_v63 = vor.u32 %v9818_v45, %v9328_v48 }
0x1bb2   : > { %v5972_v20 = vpop.f32.mrf.mxu2 }
0x1bb3   : > { %v5973_v57 = vadd.f32 %v5972_v20, %v13262_v13  ;;  %v5991_v26 = vpop.f32.mrf.mxu3  ;;  %v5936_v21 = vpop.f32.mrf.mxu0 }
0x1bb4   : > { %v5992_v28 = vadd.f32 %v5991_v26, %v13267_v24  ;;  %v5937_v29 = vadd.f32 %v5936_v21, %v13244_v56  ;;  %v5955_v30 = vpop.f32.mrf.mxu1  ;;  %v8991_v56 = vor.u32 %v9776_v23, %v8990_v6  ;;  %v9779_v26 = vld [vmem:[%s12240_s18 + $0x1b4] sm:$0xf0] }
0x1bb5   : > { %v5956_v62 = vadd.f32 %v5955_v30, %v13247_v3 }
0x1bb6   : > { %v7521_v22 = vpack.c.bf16 %v5992_v28, %v5973_v57  ;;  %6383 = vmatpush.bf16.msra.mxu0 %v8991_v56  ;;  %v9014_v57 = vld [vmem:[%s12240_s18 + $0x78] sm:$0xf]  ;;  %v9739_v28 = vld [vmem:[%s12240_s18 + $0x7c] sm:$0xf] }
0x1bb7   : > { %v7560_v52 = vpack.c.bf16 %v5956_v62, %v5937_v29  ;;  %v9015_v27 = vor.u32 %v9779_v26, %v9014_v57  ;;  %v9016_v29 = vld [vmem:[%s12240_s18 + $0x1b8] sm:$0xf0] }
0x1bb8   : > { %7681 = vst [vmem:[%s12248_s19 + $0x288] sm:$0xff] %v7521_v22 }
0x1bb9   : > { %7720 = vst [vmem:[%s12248_s19 + $0x3c0] sm:$0xff] %v7560_v52  ;;  %v9019_v52 = vor.u32 %v9739_v28, %v9016_v29 }
0x1bba   : > { %v5974_v34 = vpop.f32.mrf.mxu2 }
0x1bbb   : > { %v5975_v36 = vadd.f32 %v5974_v34, %v13262_v13  ;;  %v5993_v3 = vpop.f32.mrf.mxu3  ;;  %v6005_v59 = vpop.f32.mrf.mxu0 }
0x1bbc   : > { %v5994_v38 = vadd.f32 %v5993_v3, %v13267_v24  ;;  %v6006_v39 = vadd.f32 %v6005_v59, %v13308_v33  ;;  %v6024_v46 = vpop.f32.mrf.mxu1  ;;  %v13329_v24 = vperm.slane %v13241_v32, 6  ;;  %v13379_v3 = vperm.slane %v13375_v44, 0 }
0x1bbd   : > { %v6025_v1 = vadd.f32 %v6024_v46, %v13312_v58  ;;  %v13383_v59 = vperm.slane %v13375_v44, 1  ;;  %v9738_v46 = vld [vmem:[%s12240_s18 + $0x74] sm:$0xf] }
0x1bbe   : > { %v7561_v60 = vpack.c.bf16 %v5994_v38, %v5975_v36  ;;  %9572 = vmatmul.msk.bf16.vlgmr.msrb.gmra.mxu0 %vm5913_vm9, %v13096_v53  ;;  %9574 = vmatmul.msk.bf16.vlgmr.msrb.gmra.mxu1 %vm5913_vm9, %v13096_v53 }
0x1bbf   : > { %v7442_v13 = vpack.c.bf16 %v6025_v1, %v6006_v39  ;;  %9576 = vmatmul.msk.bf16.vlgmr.msrb.gmra.mxu2 %vm5913_vm9, %v13096_v53  ;;  %6458 = vmatpush.bf16.msrb.mxu0 %v9327_v17  ;;  %v9008_v1 = vld [vmem:[%s12240_s18 + $0x1b0] sm:$0xf0] }
0x1bc0   : > { %7721 = vst [vmem:[%s12248_s19 + $0x3c8] sm:$0xff] %v7561_v60  ;;  %9578 = vmatmul.msk.bf16.vlgmr.msrb.gmra.mxu3 %vm5913_vm9, %v13096_v53  ;;  %6496 = vmatpush.bf16.msrb.mxu2 %v9335_v42  ;;  %v9011_v4 = vor.u32 %v9738_v46, %v9008_v1  ;;  %v9861_v42 = vld [vmem:[%s12240_s18 + $0x444] sm:$0xf0] }
0x1bc1   : > { %7602 = vst [vmem:[%s12248_s19 + $0x10] sm:$0xff] %v7442_v13  ;;  %6515 = vmatpush.bf16.msrb.mxu3 %v9339_v41  ;;  %6477 = vmatpush.bf16.msrb.mxu1 %v9331_v63 }
0x1bc2   : > { %v6043_v9 = vpop.f32.mrf.mxu2 }
0x1bc3   : > { %v6044_v55 = vadd.f32 %v6043_v9, %v13329_v24  ;;  %v6062_v49 = vpop.f32.mrf.mxu3  ;;  %v6007_v16 = vpop.f32.mrf.mxu0 }
0x1bc4   : > { %v6063_v32 = vadd.f32 %v6062_v49, %v13335_v2  ;;  %v6008_v43 = vadd.f32 %v6007_v16, %v13308_v33  ;;  %v6026_v19 = vpop.f32.mrf.mxu1  ;;  %6497 = vmatpush.bf16.msrb.mxu2 %v9015_v27  ;;  %v13406_v49 = vperm.slane %v13375_v44, 3  ;;  %v9350_v16 = vld [vmem:[%s12240_s18 + $0x308] sm:$0xf] }
0x1bc5   : > { %v6027_v12 = vadd.f32 %v6026_v19, %v13312_v58  ;;  %6516 = vmatpush.bf16.msrb.mxu3 %v9019_v52  ;;  %6478 = vmatpush.bf16.msrb.mxu1 %v9011_v4  ;;  %v9352_v19 = vld [vmem:[%s12240_s18 + $0x448] sm:$0xf0]  ;;  %v9022_v4 = vld [vmem:[%s12240_s18 + $0x80] sm:$0xf] }
0x1bc6   : > { %v7443_v14 = vpack.c.bf16 %v6063_v32, %v6044_v55  ;;  %v9351_v32 = vor.u32 %v9861_v42, %v9350_v16 }
0x1bc7   : > { %v7482_v51 = vpack.c.bf16 %v6027_v12, %v6008_v43  ;;  %v9821_v43 = vld [vmem:[%s12240_s18 + $0x30c] sm:$0xf] }
0x1bc8   : > { %7603 = vst [vmem:[%s12248_s19 + $0x18] sm:$0xff] %v7443_v14  ;;  %v9355_v47 = vor.u32 %v9821_v43, %v9352_v19 }
0x1bc9   : > { %7642 = vst [vmem:[%s12248_s19 + $0x150] sm:$0xff] %v7482_v51 }
0x1bca   : > { %v6045_v15 = vpop.f32.mrf.mxu2 }
0x1bcb   : > { %v6046_v61 = vadd.f32 %v6045_v15, %v13329_v24  ;;  %v6064_v50 = vpop.f32.mrf.mxu3  ;;  %v6010_v7 = vpop.f32.mrf.mxu0 }
0x1bcc   : > { %v6065_v18 = vadd.f32 %v6064_v50, %v13335_v2  ;;  %v6011_v8 = vadd.f32 %v6010_v7, %v13308_v33  ;;  %v6029_v20 = vpop.f32.mrf.mxu1  ;;  %v9342_v50 = vld [vmem:[%s12240_s18 + $0x300] sm:$0xf] }
0x1bcd   : > { %v6030_v10 = vadd.f32 %v6029_v20, %v13312_v58  ;;  %v9860_v7 = vld [vmem:[%s12240_s18 + $0x43c] sm:$0xf0]  ;;  %v9344_v20 = vld [vmem:[%s12240_s18 + $0x440] sm:$0xf0] }
0x1bce   : > { %v7483_v11 = vpack.c.bf16 %v6065_v18, %v6046_v61  ;;  %9573 = vmatmul.msk.bf16.gmra.mxu0 %vm5913_vm9, %v13130_v5  ;;  %9575 = vmatmul.msk.bf16.gmra.mxu1 %vm5913_vm9, %v13130_v5  ;;  %v9343_v18 = vor.u32 %v9860_v7, %v9342_v50 }
0x1bcf   : > { %v7522_v25 = vpack.c.bf16 %v6030_v10, %v6011_v8  ;;  %9577 = vmatmul.msk.bf16.gmra.mxu2 %vm5913_vm9, %v13130_v5  ;;  %v9820_v8 = vld [vmem:[%s12240_s18 + $0x304] sm:$0xf] }
0x1bd0   : > { %7643 = vst [vmem:[%s12248_s19 + $0x158] sm:$0xff] %v7483_v11  ;;  %9579 = vmatmul.msk.bf16.gmra.mxu3 %vm5913_vm9, %v13130_v5  ;;  %v9347_v57 = vor.u32 %v9820_v8, %v9344_v20  ;;  %v9358_v20 = vld [vmem:[%s12240_s18 + $0x310] sm:$0xf] }
0x1bd1   : > { %7682 = vst [vmem:[%s12248_s19 + $0x290] sm:$0xff] %v7522_v25 }
0x1bd2   : > { %v6048_v21 = vpop.f32.mrf.mxu2 }
0x1bd3   : > { %v6049_v30 = vadd.f32 %v6048_v21, %v13329_v24  ;;  %v6067_v62 = vpop.f32.mrf.mxu3  ;;  %v6012_v22 = vpop.f32.mrf.mxu0 }
0x1bd4   : > { %v6068_v6 = vadd.f32 %v6067_v62, %v13335_v2  ;;  %v6013_v23 = vadd.f32 %v6012_v22, %v13308_v33  ;;  %v6031_v34 = vpop.f32.mrf.mxu1  ;;  %v9006_v33 = vld [vmem:[%s12240_s18 + $0x70] sm:$0xf]  ;;  %v9030_v62 = vld [vmem:[%s12240_s18 + $0x88] sm:$0xf] }
0x1bd5   : > { %v6032_v56 = vadd.f32 %v6031_v34, %v13312_v58  ;;  %v9007_v39 = vor.u32 %v9778_v37, %v9006_v33  ;;  %v9781_v22 = vld [vmem:[%s12240_s18 + $0x1c4] sm:$0xf0]  ;;  %v9032_v34 = vld [vmem:[%s12240_s18 + $0x1c8] sm:$0xf0] }
0x1bd6   : > { %v7523_v35 = vpack.c.bf16 %v6068_v6, %v6049_v30  ;;  %v9031_v6 = vor.u32 %v9781_v22, %v9030_v62 }
0x1bd7   : > { %v7562_v36 = vpack.c.bf16 %v6032_v56, %v6013_v23  ;;  %6459 = vmatpush.bf16.msrb.mxu0 %v9007_v39  ;;  %v9741_v23 = vld [vmem:[%s12240_s18 + $0x8c] sm:$0xf] }
0x1bd8   : > { %7683 = vst [vmem:[%s12248_s19 + $0x298] sm:$0xff] %v7523_v35  ;;  %v9035_v33 = vor.u32 %v9741_v23, %v9032_v34  ;;  %v9046_v34 = vld [vmem:[%s12240_s18 + $0x98] sm:$0xf] }
0x1bd9   : > { %7722 = vst [vmem:[%s12248_s19 + $0x3d0] sm:$0xff] %v7562_v36 }
0x1bda   : > { %v6050_v38 = vpop.f32.mrf.mxu2 }
0x1bdb   : > { %v6051_v58 = vadd.f32 %v6050_v38, %v13329_v24  ;;  %v6069_v60 = vpop.f32.mrf.mxu3  ;;  %v6081_v13 = vpop.f32.mrf.mxu0 }
0x1bdc   : > { %v6070_v9 = vadd.f32 %v6069_v60, %v13335_v2  ;;  %v6082_v40 = vadd.f32 %v6081_v13, %v13379_v3  ;;  %v6100_v31 = vpop.f32.mrf.mxu1  ;;  %v13400_v2 = vperm.slane %v13375_v44, 2  ;;  %v13447_v60 = vperm.slane %v13375_v44, 4 }
0x1bdd   : > { %v6101_v0 = vadd.f32 %v6100_v31, %v13383_v59  ;;  %v13451_v13 = vperm.slane %v13375_v44, 5  ;;  %v9740_v31 = vld [vmem:[%s12240_s18 + $0x84] sm:$0xf] }
0x1bde   : > { %v7563_v55 = vpack.c.bf16 %v6070_v9, %v6051_v58  ;;  %9580 = vmatmul.msk.bf16.vlgmr.msra.gmra.mxu0 %vm5913_vm9, %v13096_v53  ;;  %9582 = vmatmul.msk.bf16.vlgmr.msra.gmra.mxu1 %vm5913_vm9, %v13096_v53  ;;  %v9780_v9 = vld [vmem:[%s12240_s18 + $0x1bc] sm:$0xf0] }
0x1bdf   : > { %v7444_v24 = vpack.c.bf16 %v6101_v0, %v6082_v40  ;;  %9584 = vmatmul.msk.bf16.vlgmr.msra.gmra.mxu2 %vm5913_vm9, %v13096_v53  ;;  %6534 = vmatpush.bf16.msra.mxu0 %v9343_v18  ;;  %v9024_v0 = vld [vmem:[%s12240_s18 + $0x1c0] sm:$0xf0] }
0x1be0   : > { %7723 = vst [vmem:[%s12248_s19 + $0x3d8] sm:$0xff] %v7563_v55  ;;  %9586 = vmatmul.msk.bf16.vlgmr.msra.gmra.mxu3 %vm5913_vm9, %v13096_v53  ;;  %6572 = vmatpush.bf16.msra.mxu2 %v9351_v32  ;;  %v9027_v16 = vor.u32 %v9740_v31, %v9024_v0 }
0x1be1   : > { %7604 = vst [vmem:[%s12248_s19 + $0x20] sm:$0xff] %v7444_v24  ;;  %6591 = vmatpush.bf16.msra.mxu3 %v9355_v47  ;;  %6553 = vmatpush.bf16.msra.mxu1 %v9347_v57  ;;  %v9863_v47 = vld [vmem:[%s12240_s18 + $0x454] sm:$0xf0]  ;;  %v9822_v57 = vld [vmem:[%s12240_s18 + $0x314] sm:$0xf] }
0x1be2   : > { %v6119_v41 = vpop.f32.mrf.mxu2 }
0x1be3   : > { %v6120_v12 = vadd.f32 %v6119_v41, %v13400_v2  ;;  %v6138_v14 = vpop.f32.mrf.mxu3  ;;  %v6083_v51 = vpop.f32.mrf.mxu0 }
0x1be4   : > { %v6139_v54 = vadd.f32 %v6138_v14, %v13406_v49  ;;  %v6084_v15 = vadd.f32 %v6083_v51, %v13379_v3  ;;  %v6102_v17 = vpop.f32.mrf.mxu1  ;;  %6573 = vmatpush.bf16.msra.mxu2 %v9031_v6  ;;  %v9366_v14 = vld [vmem:[%s12240_s18 + $0x318] sm:$0xf] }
0x1be5   : > { %v6103_v45 = vadd.f32 %v6102_v17, %v13383_v59  ;;  %6592 = vmatpush.bf16.msra.mxu3 %v9035_v33  ;;  %6554 = vmatpush.bf16.msra.mxu1 %v9027_v16  ;;  %v9743_v33 = vld [vmem:[%s12240_s18 + $0x9c] sm:$0xf] }
0x1be6   : > { %v7445_v48 = vpack.c.bf16 %v6139_v54, %v6120_v12  ;;  %v13474_v12 = vperm.slane %v13375_v44, 7  ;;  %v9823_v54 = vld [vmem:[%s12240_s18 + $0x31c] sm:$0xf] }
0x1be7   : > { %v7484_v61 = vpack.c.bf16 %v6103_v45, %v6084_v15  ;;  %v9368_v15 = vld [vmem:[%s12240_s18 + $0x458] sm:$0xf0] }
0x1be8   : > { %7605 = vst [vmem:[%s12248_s19 + $0x28] sm:$0xff] %v7445_v48 }
0x1be9   : > { %7644 = vst [vmem:[%s12248_s19 + $0x160] sm:$0xff] %v7484_v61  ;;  %v9367_v61 = vor.u32 %v9863_v47, %v9366_v14 }
0x1bea   : > { %v6121_v63 = vpop.f32.mrf.mxu2 }
0x1beb   : > { %v6122_v10 = vadd.f32 %v6121_v63, %v13400_v2  ;;  %v6140_v11 = vpop.f32.mrf.mxu3  ;;  %v6086_v25 = vpop.f32.mrf.mxu0 }
0x1bec   : > { %v6141_v26 = vadd.f32 %v6140_v11, %v13406_v49  ;;  %v6087_v21 = vadd.f32 %v6086_v25, %v13379_v3  ;;  %v6105_v27 = vpop.f32.mrf.mxu1 }
0x1bed   : > { %v6106_v28 = vadd.f32 %v6105_v27, %v13383_v59 }
0x1bee   : > { %v7485_v29 = vpack.c.bf16 %v6141_v26, %v6122_v10  ;;  %9581 = vmatmul.msk.bf16.gmra.mxu0 %vm5913_vm9, %v13130_v5  ;;  %9583 = vmatmul.msk.bf16.gmra.mxu1 %vm5913_vm9, %v13130_v5  ;;  %v9862_v10 = vld [vmem:[%s12240_s18 + $0x44c] sm:$0xf0]  ;;  %v9360_v26 = vld [vmem:[%s12240_s18 + $0x450] sm:$0xf0] }
0x1bef   : > { %v7524_v30 = vpack.c.bf16 %v6106_v28, %v6087_v21  ;;  %9585 = vmatmul.msk.bf16.gmra.mxu2 %vm5913_vm9, %v13130_v5  ;;  %v9359_v25 = vor.u32 %v9862_v10, %v9358_v20 }
0x1bf0   : > { %7645 = vst [vmem:[%s12248_s19 + $0x168] sm:$0xff] %v7485_v29  ;;  %9587 = vmatmul.msk.bf16.gmra.mxu3 %vm5913_vm9, %v13130_v5  ;;  %v9363_v29 = vor.u32 %v9822_v57, %v9360_v26 }
0x1bf1   : > { %7684 = vst [vmem:[%s12248_s19 + $0x2a0] sm:$0xff] %v7524_v30 }
0x1bf2   : > { %v6124_v52 = vpop.f32.mrf.mxu2 }
0x1bf3   : > { %v6125_v56 = vadd.f32 %v6124_v52, %v13400_v2  ;;  %v6143_v35 = vpop.f32.mrf.mxu3  ;;  %v6088_v36 = vpop.f32.mrf.mxu0 }
0x1bf4   : > { %v6144_v37 = vadd.f32 %v6143_v35, %v13406_v49  ;;  %v6089_v38 = vadd.f32 %v6088_v36, %v13379_v3  ;;  %v6107_v39 = vpop.f32.mrf.mxu1  ;;  %v9023_v3 = vor.u32 %v9780_v9, %v9022_v4 }
0x1bf5   : > { %v6108_v46 = vadd.f32 %v6107_v39, %v13383_v59 }
0x1bf6   : > { %v7525_v1 = vpack.c.bf16 %v6144_v37, %v6125_v56  ;;  %6535 = vmatpush.bf16.msra.mxu0 %v9023_v3  ;;  %v9783_v56 = vld [vmem:[%s12240_s18 + $0x1d4] sm:$0xf0]  ;;  %v9048_v37 = vld [vmem:[%s12240_s18 + $0x1d8] sm:$0xf0] }
0x1bf7   : > { %v7564_v58 = vpack.c.bf16 %v6108_v46, %v6089_v38  ;;  %v9047_v36 = vor.u32 %v9783_v56, %v9046_v34 }
0x1bf8   : > { %7685 = vst [vmem:[%s12248_s19 + $0x2a8] sm:$0xff] %v7525_v1  ;;  %v9051_v1 = vor.u32 %v9743_v33, %v9048_v37  ;;  %v13568_v37 = vld [vmem:[#allocation2 + $0x8] sm:$0xff] }
0x1bf9   : > { %7724 = vst [vmem:[%s12248_s19 + $0x3e0] sm:$0xff] %v7564_v58 }
0x1bfa   : > { %v6126_v40 = vpop.f32.mrf.mxu2 }
0x1bfb   : > { %v6127_v55 = vadd.f32 %v6126_v40, %v13400_v2  ;;  %v6145_v59 = vpop.f32.mrf.mxu3  ;;  %v6157_v24 = vpop.f32.mrf.mxu0  ;;  %v13514_v40 = vld [vmem:[%s12246_s1 + $0x10] sm:$0xff] }
0x1bfc   : > { %v6146_v42 = vadd.f32 %v6145_v59, %v13406_v49  ;;  %v6158_v41 = vadd.f32 %v6157_v24, %v13447_v60  ;;  %v6176_v32 = vpop.f32.mrf.mxu1  ;;  %v13468_v49 = vperm.slane %v13375_v44, 6  ;;  %v13518_v0 = vperm.slane %v13514_v40, 0  ;;  %v9782_v59 = vld [vmem:[%s12240_s18 + $0x1cc] sm:$0xf0] }
0x1bfd   : > { %v6177_v43 = vadd.f32 %v6176_v32, %v13451_v13 }
0x1bfe   : > { %v7565_v19 = vpack.c.bf16 %v6146_v42, %v6127_v55  ;;  %9588 = vmatmul.msk.bf16.vlgmr.msrb.gmra.mxu0 %vm5913_vm9, %v13096_v53  ;;  %9590 = vmatmul.msk.bf16.vlgmr.msrb.gmra.mxu1 %vm5913_vm9, %v13096_v53  ;;  %v13522_v55 = vperm.slane %v13514_v40, 1  ;;  %v9742_v42 = vld [vmem:[%s12240_s18 + $0x94] sm:$0xf] }
0x1bff   : > { %v7446_v2 = vpack.c.bf16 %v6177_v43, %v6158_v41  ;;  %9592 = vmatmul.msk.bf16.vlgmr.msrb.gmra.mxu2 %vm5913_vm9, %v13096_v53  ;;  %6610 = vmatpush.bf16.msrb.mxu0 %v9359_v25  ;;  %v9040_v41 = vld [vmem:[%s12240_s18 + $0x1d0] sm:$0xf0] }
0x1c00   : > { %7725 = vst [vmem:[%s12248_s19 + $0x3e8] sm:$0xff] %v7565_v19  ;;  %9594 = vmatmul.msk.bf16.vlgmr.msrb.gmra.mxu3 %vm5913_vm9, %v13096_v53  ;;  %v9371_v53 = vor.u32 %v9823_v54, %v9368_v15  ;;  %6648 = vmatpush.bf16.msrb.mxu2 %v9367_v61  ;;  %v9043_v19 = vor.u32 %v9742_v42, %v9040_v41 }
0x1c01   : > { %7606 = vst [vmem:[%s12248_s19 + $0x30] sm:$0xff] %v7446_v2  ;;  %6629 = vmatpush.bf16.msrb.mxu1 %v9363_v29 }
0x1c02   : > { %v6195_v51 = vpop.f32.mrf.mxu2  ;;  %6667 = vmatpush.bf16.msrb.mxu3 %v9371_v53 }
0x1c03   : > { %v6196_v17 = vadd.f32 %v6195_v51, %v13468_v49  ;;  %v6214_v45 = vpop.f32.mrf.mxu3  ;;  %v6159_v48 = vpop.f32.mrf.mxu0 }
0x1c04   : > { %v6215_v44 = vadd.f32 %v6214_v45, %v13474_v12  ;;  %v6160_v50 = vadd.f32 %v6159_v48, %v13447_v60  ;;  %v6178_v7 = vpop.f32.mrf.mxu1  ;;  %6649 = vmatpush.bf16.msrb.mxu2 %v9047_v36  ;;  %v9382_v45 = vld [vmem:[%s12240_s18 + $0x328] sm:$0xf] }
0x1c05   : > { %v6179_v63 = vadd.f32 %v6178_v7, %v13451_v13  ;;  %6630 = vmatpush.bf16.msrb.mxu1 %v9043_v19  ;;  %v9865_v48 = vld [vmem:[%s12240_s18 + $0x464] sm:$0xf0]  ;;  %v9054_v19 = vld [vmem:[%s12240_s18 + $0xa0] sm:$0xf] }
0x1c06   : > { %v7447_v18 = vpack.c.bf16 %v6215_v44, %v6196_v17  ;;  %6668 = vmatpush.bf16.msrb.mxu3 %v9051_v1  ;;  %v13547_v17 = vperm.slane %v13514_v40, 3  ;;  %v9383_v53 = vor.u32 %v9865_v48, %v9382_v45  ;;  %v9825_v44 = vld [vmem:[%s12240_s18 + $0x32c] sm:$0xf] }
0x1c07   : > { %v7486_v8 = vpack.c.bf16 %v6179_v63, %v6160_v50  ;;  %v9384_v50 = vld [vmem:[%s12240_s18 + $0x468] sm:$0xf0] }
0x1c08   : > { %7607 = vst [vmem:[%s12248_s19 + $0x38] sm:$0xff] %v7447_v18 }
0x1c09   : > { %7646 = vst [vmem:[%s12248_s19 + $0x170] sm:$0xff] %v7486_v8  ;;  %v9387_v8 = vor.u32 %v9825_v44, %v9384_v50 }
0x1c0a   : > { %v6197_v11 = vpop.f32.mrf.mxu2 }
0x1c0b   : > { %v6198_v21 = vadd.f32 %v6197_v11, %v13468_v49  ;;  %v6216_v27 = vpop.f32.mrf.mxu3  ;;  %v6162_v28 = vpop.f32.mrf.mxu0 }
0x1c0c   : > { %v6217_v30 = vadd.f32 %v6216_v27, %v13474_v12  ;;  %v6163_v62 = vadd.f32 %v6162_v28, %v13447_v60  ;;  %v6181_v22 = vpop.f32.mrf.mxu1  ;;  %v9864_v27 = vld [vmem:[%s12240_s18 + $0x45c] sm:$0xf0] }
0x1c0d   : > { %v6182_v52 = vadd.f32 %v6181_v22, %v13451_v13 }
0x1c0e   : > { %v7487_v6 = vpack.c.bf16 %v6217_v30, %v6198_v21  ;;  %9589 = vmatmul.msk.bf16.gmra.mxu0 %vm5913_vm9, %v13130_v5  ;;  %9591 = vmatmul.msk.bf16.gmra.mxu1 %vm5913_vm9, %v13130_v5  ;;  %v9374_v21 = vld [vmem:[%s12240_s18 + $0x320] sm:$0xf]  ;;  %v9824_v30 = vld [vmem:[%s12240_s18 + $0x324] sm:$0xf] }
0x1c0f   : > { %v7526_v23 = vpack.c.bf16 %v6182_v52, %v6163_v62  ;;  %9593 = vmatmul.msk.bf16.gmra.mxu2 %vm5913_vm9, %v13130_v5  ;;  %v9375_v29 = vor.u32 %v9864_v27, %v9374_v21  ;;  %v9376_v62 = vld [vmem:[%s12240_s18 + $0x460] sm:$0xf0] }
0x1c10   : > { %7647 = vst [vmem:[%s12248_s19 + $0x178] sm:$0xff] %v7487_v6  ;;  %9595 = vmatmul.msk.bf16.gmra.mxu3 %vm5913_vm9, %v13130_v5 }
0x1c11   : > { %7686 = vst [vmem:[%s12248_s19 + $0x2b0] sm:$0xff] %v7526_v23  ;;  %v9379_v23 = vor.u32 %v9824_v30, %v9376_v62 }
0x1c12   : > { %v6200_v35 = vpop.f32.mrf.mxu2 }
0x1c13   : > { %v6201_v38 = vadd.f32 %v6200_v35, %v13468_v49  ;;  %v6219_v39 = vpop.f32.mrf.mxu3  ;;  %v6164_v46 = vpop.f32.mrf.mxu0 }
0x1c14   : > { %v6220_v58 = vadd.f32 %v6219_v39, %v13474_v12  ;;  %v6165_v5 = vadd.f32 %v6164_v46, %v13447_v60  ;;  %v6183_v4 = vpop.f32.mrf.mxu1  ;;  %v9038_v60 = vld [vmem:[%s12240_s18 + $0x90] sm:$0xf]  ;;  %v9062_v39 = vld [vmem:[%s12240_s18 + $0xa8] sm:$0xf] }
0x1c15   : > { %v6184_v9 = vadd.f32 %v6183_v4, %v13451_v13  ;;  %v9039_v16 = vor.u32 %v9782_v59, %v9038_v60  ;;  %v9785_v46 = vld [vmem:[%s12240_s18 + $0x1e4] sm:$0xf0]  ;;  %v9064_v4 = vld [vmem:[%s12240_s18 + $0x1e8] sm:$0xf0] }
0x1c16   : > { %v7527_v3 = vpack.c.bf16 %v6220_v58, %v6201_v38  ;;  %v9063_v58 = vor.u32 %v9785_v46, %v9062_v39 }
0x1c17   : > { %v7566_v31 = vpack.c.bf16 %v6184_v9, %v6165_v5  ;;  %6611 = vmatpush.bf16.msrb.mxu0 %v9039_v16  ;;  %v9745_v5 = vld [vmem:[%s12240_s18 + $0xac] sm:$0xf] }
0x1c18   : > { %7687 = vst [vmem:[%s12248_s19 + $0x2b8] sm:$0xff] %v7527_v3  ;;  %v9067_v60 = vor.u32 %v9745_v5, %v9064_v4 }
0x1c19   : > { %7726 = vst [vmem:[%s12248_s19 + $0x3f0] sm:$0xff] %v7566_v31 }
0x1c1a   : > { %v6202_v24 = vpop.f32.mrf.mxu2 }
0x1c1b   : > { %v6203_v13 = vadd.f32 %v6202_v24, %v13468_v49  ;;  %v6221_v32 = vpop.f32.mrf.mxu3  ;;  %v6233_v43 = vpop.f32.mrf.mxu0  ;;  %v13532_v49 = vld [vmem:[#allocation2] sm:$0xff] }
0x1c1c   : > { %v6222_v2 = vadd.f32 %v6221_v32, %v13474_v12  ;;  %v6234_v14 = vadd.f32 %v6233_v43, %v13518_v0  ;;  %v6252_v51 = vpop.f32.mrf.mxu1  ;;  %v13541_v12 = vperm.slane %v13514_v40, 2  ;;  %v13590_v32 = vperm.slane %v13514_v40, 4 }
0x1c1d   : > { %v6253_v47 = vadd.f32 %v6252_v51, %v13522_v55  ;;  %v13594_v43 = vperm.slane %v13514_v40, 5  ;;  %v9744_v51 = vld [vmem:[%s12240_s18 + $0xa4] sm:$0xf] }
0x1c1e   : > { %v7567_v54 = vpack.c.bf16 %v6222_v2, %v6203_v13  ;;  %9596 = vmatmul.msk.bf16.vlgmr.msra.gmra.mxu0 %vm5913_vm9, %v13532_v49  ;;  %9598 = vmatmul.msk.bf16.vlgmr.msra.gmra.mxu1 %vm5913_vm9, %v13532_v49  ;;  %v9784_v2 = vld [vmem:[%s12240_s18 + $0x1dc] sm:$0xf0] }
0x1c1f   : > { %v7448_v15 = vpack.c.bf16 %v6253_v47, %v6234_v14  ;;  %9600 = vmatmul.msk.bf16.vlgmr.msra.gmra.mxu2 %vm5913_vm9, %v13532_v49  ;;  %6686 = vmatpush.bf16.msra.mxu0 %v9375_v29  ;;  %v9056_v47 = vld [vmem:[%s12240_s18 + $0x1e0] sm:$0xf0] }
0x1c20   : > { %7727 = vst [vmem:[%s12248_s19 + $0x3f8] sm:$0xff] %v7567_v54  ;;  %9602 = vmatmul.msk.bf16.vlgmr.msra.gmra.mxu3 %vm5913_vm9, %v13532_v49  ;;  %6724 = vmatpush.bf16.msra.mxu2 %v9383_v53  ;;  %v9059_v45 = vor.u32 %v9744_v51, %v9056_v47  ;;  %v13657_v51 = vld [vmem:[%s12246_s1 + $0x18] sm:$0xff] }
0x1c21   : > { %7608 = vst [vmem:[%s12248_s19 + $0x40] sm:$0xff] %v7448_v15  ;;  %6743 = vmatpush.bf16.msra.mxu3 %v9387_v8  ;;  %6705 = vmatpush.bf16.msra.mxu1 %v9379_v23  ;;  %v9867_v8 = vld [vmem:[%s12240_s18 + $0x474] sm:$0xf0] }
0x1c22   : > { %v6271_v61 = vpop.f32.mrf.mxu2 }
0x1c23   : > { %v6272_v7 = vadd.f32 %v6271_v61, %v13541_v12  ;;  %v6290_v63 = vpop.f32.mrf.mxu3  ;;  %v6235_v18 = vpop.f32.mrf.mxu0 }
0x1c24   : > { %v6291_v20 = vadd.f32 %v6290_v63, %v13547_v17  ;;  %v6236_v10 = vadd.f32 %v6235_v18, %v13518_v0  ;;  %v6254_v11 = vpop.f32.mrf.mxu1  ;;  %6725 = vmatpush.bf16.msra.mxu2 %v9063_v58  ;;  %v9398_v63 = vld [vmem:[%s12240_s18 + $0x338] sm:$0xf] }
0x1c25   : > { %v6255_v25 = vadd.f32 %v6254_v11, %v13522_v55  ;;  %6744 = vmatpush.bf16.msra.mxu3 %v9067_v60  ;;  %6706 = vmatpush.bf16.msra.mxu1 %v9059_v45  ;;  %v9786_v45 = vld [vmem:[%s12240_s18 + $0x1ec] sm:$0xf0] }
0x1c26   : > { %v7449_v57 = vpack.c.bf16 %v6291_v20, %v6272_v7  ;;  %v13617_v7 = vperm.slane %v13514_v40, 7  ;;  %v9827_v20 = vld [vmem:[%s12240_s18 + $0x33c] sm:$0xf] }
0x1c27   : > { %v7488_v26 = vpack.c.bf16 %v6255_v25, %v6236_v10  ;;  %v9400_v10 = vld [vmem:[%s12240_s18 + $0x478] sm:$0xf0] }
0x1c28   : > { %7609 = vst [vmem:[%s12248_s19 + $0x48] sm:$0xff] %v7449_v57  ;;  %v9403_v21 = vor.u32 %v9827_v20, %v9400_v10 }
0x1c29   : > { %7648 = vst [vmem:[%s12248_s19 + $0x180] sm:$0xff] %v7488_v26  ;;  %v9399_v26 = vor.u32 %v9867_v8, %v9398_v63 }
0x1c2a   : > { %v6273_v28 = vpop.f32.mrf.mxu2 }
0x1c2b   : > { %v6274_v22 = vadd.f32 %v6273_v28, %v13541_v12  ;;  %v6292_v52 = vpop.f32.mrf.mxu3  ;;  %v6238_v6 = vpop.f32.mrf.mxu0 }
0x1c2c   : > { %v6293_v34 = vadd.f32 %v6292_v52, %v13547_v17  ;;  %v6239_v56 = vadd.f32 %v6238_v6, %v13518_v0  ;;  %v6257_v35 = vpop.f32.mrf.mxu1  ;;  %v9866_v52 = vld [vmem:[%s12240_s18 + $0x46c] sm:$0xf0] }
0x1c2d   : > { %v6258_v36 = vadd.f32 %v6257_v35, %v13522_v55 }
0x1c2e   : > { %v7489_v33 = vpack.c.bf16 %v6293_v34, %v6274_v22  ;;  %9597 = vmatmul.msk.bf16.gmra.mxu0 %vm5913_vm9, %v13568_v37  ;;  %9599 = vmatmul.msk.bf16.gmra.mxu1 %vm5913_vm9, %v13568_v37  ;;  %v9390_v22 = vld [vmem:[%s12240_s18 + $0x330] sm:$0xf]  ;;  %v9826_v34 = vld [vmem:[%s12240_s18 + $0x334] sm:$0xf] }
0x1c2f   : > { %v7528_v38 = vpack.c.bf16 %v6258_v36, %v6239_v56  ;;  %9601 = vmatmul.msk.bf16.gmra.mxu2 %vm5913_vm9, %v13568_v37  ;;  %v9391_v23 = vor.u32 %v9866_v52, %v9390_v22  ;;  %v9392_v56 = vld [vmem:[%s12240_s18 + $0x470] sm:$0xf0] }
0x1c30   : > { %7649 = vst [vmem:[%s12248_s19 + $0x188] sm:$0xff] %v7489_v33  ;;  %9603 = vmatmul.msk.bf16.gmra.mxu3 %vm5913_vm9, %v13568_v37 }
0x1c31   : > { %7688 = vst [vmem:[%s12248_s19 + $0x2c0] sm:$0xff] %v7528_v38  ;;  %v9395_v38 = vor.u32 %v9826_v34, %v9392_v56 }
0x1c32   : > { %v6276_v1 = vpop.f32.mrf.mxu2 }
0x1c33   : > { %v6277_v9 = vadd.f32 %v6276_v1, %v13541_v12  ;;  %v6295_v3 = vpop.f32.mrf.mxu3  ;;  %v6240_v31 = vpop.f32.mrf.mxu0 }
0x1c34   : > { %v6296_v59 = vadd.f32 %v6295_v3, %v13547_v17  ;;  %v6241_v24 = vadd.f32 %v6240_v31, %v13518_v0  ;;  %v6259_v16 = vpop.f32.mrf.mxu1  ;;  %v9055_v0 = vor.u32 %v9784_v2, %v9054_v19  ;;  %v9787_v3 = vld [vmem:[%s12240_s18 + $0x1f4] sm:$0xf0] }
0x1c35   : > { %v6260_v42 = vadd.f32 %v6259_v16, %v13522_v55 }
0x1c36   : > { %v7529_v41 = vpack.c.bf16 %v6296_v59, %v6277_v9  ;;  %6687 = vmatpush.bf16.msra.mxu0 %v9055_v0  ;;  %v9078_v9 = vld [vmem:[%s12240_s18 + $0xb8] sm:$0xf]  ;;  %v9747_v59 = vld [vmem:[%s12240_s18 + $0xbc] sm:$0xf] }
0x1c37   : > { %v7568_v13 = vpack.c.bf16 %v6260_v42, %v6241_v24  ;;  %v9079_v60 = vor.u32 %v9787_v3, %v9078_v9  ;;  %v9080_v24 = vld [vmem:[%s12240_s18 + $0x1f8] sm:$0xf0] }
0x1c38   : > { %7689 = vst [vmem:[%s12248_s19 + $0x2c8] sm:$0xff] %v7529_v41 }
0x1c39   : > { %7728 = vst [vmem:[%s12248_s19 + $0x400] sm:$0xff] %v7568_v13  ;;  %v9083_v13 = vor.u32 %v9747_v59, %v9080_v24 }
0x1c3a   : > { %v6278_v14 = vpop.f32.mrf.mxu2 }
0x1c3b   : > { %v6279_v54 = vadd.f32 %v6278_v14, %v13541_v12  ;;  %v6297_v55 = vpop.f32.mrf.mxu3  ;;  %v6309_v15 = vpop.f32.mrf.mxu0 }
0x1c3c   : > { %v6298_v48 = vadd.f32 %v6297_v55, %v13547_v17  ;;  %v6310_v61 = vadd.f32 %v6309_v15, %v13590_v32  ;;  %v6328_v53 = vpop.f32.mrf.mxu1  ;;  %v13611_v17 = vperm.slane %v13514_v40, 6  ;;  %v13661_v55 = vperm.slane %v13657_v51, 0 }
0x1c3d   : > { %v6329_v44 = vadd.f32 %v6328_v53, %v13594_v43  ;;  %v13665_v15 = vperm.slane %v13657_v51, 1  ;;  %v9746_v53 = vld [vmem:[%s12240_s18 + $0xb4] sm:$0xf] }
0x1c3e   : > { %v7569_v50 = vpack.c.bf16 %v6298_v48, %v6279_v54  ;;  %9604 = vmatmul.msk.bf16.vlgmr.msrb.gmra.mxu0 %vm5913_vm9, %v13532_v49  ;;  %9606 = vmatmul.msk.bf16.vlgmr.msrb.gmra.mxu1 %vm5913_vm9, %v13532_v49 }
0x1c3f   : > { %v7450_v12 = vpack.c.bf16 %v6329_v44, %v6310_v61  ;;  %9608 = vmatmul.msk.bf16.vlgmr.msrb.gmra.mxu2 %vm5913_vm9, %v13532_v49  ;;  %6762 = vmatpush.bf16.msrb.mxu0 %v9391_v23  ;;  %v9072_v44 = vld [vmem:[%s12240_s18 + $0x1f0] sm:$0xf0] }
0x1c40   : > { %7729 = vst [vmem:[%s12248_s19 + $0x408] sm:$0xff] %v7569_v50  ;;  %9610 = vmatmul.msk.bf16.vlgmr.msrb.gmra.mxu3 %vm5913_vm9, %v13532_v49  ;;  %6800 = vmatpush.bf16.msrb.mxu2 %v9399_v26  ;;  %v9075_v63 = vor.u32 %v9746_v53, %v9072_v44  ;;  %v9869_v26 = vld [vmem:[%s12240_s18 + $0x484] sm:$0xf0] }
0x1c41   : > { %7610 = vst [vmem:[%s12248_s19 + $0x50] sm:$0xff] %v7450_v12  ;;  %6819 = vmatpush.bf16.msrb.mxu3 %v9403_v21  ;;  %6781 = vmatpush.bf16.msrb.mxu1 %v9395_v38 }
0x1c42   : > { %v6347_v18 = vpop.f32.mrf.mxu2 }
0x1c43   : > { %v6348_v11 = vadd.f32 %v6347_v18, %v13611_v17  ;;  %v6366_v25 = vpop.f32.mrf.mxu3  ;;  %v6311_v57 = vpop.f32.mrf.mxu0 }
0x1c44   : > { %v6367_v40 = vadd.f32 %v6366_v25, %v13617_v7  ;;  %v6312_v27 = vadd.f32 %v6311_v57, %v13590_v32  ;;  %v6330_v28 = vpop.f32.mrf.mxu1  ;;  %6801 = vmatpush.bf16.msrb.mxu2 %v9079_v60  ;;  %v13688_v25 = vperm.slane %v13657_v51, 3  ;;  %v9414_v57 = vld [vmem:[%s12240_s18 + $0x348] sm:$0xf] }
0x1c45   : > { %v6331_v29 = vadd.f32 %v6330_v28, %v13594_v43  ;;  %6820 = vmatpush.bf16.msrb.mxu3 %v9083_v13  ;;  %6782 = vmatpush.bf16.msrb.mxu1 %v9075_v63  ;;  %v9416_v28 = vld [vmem:[%s12240_s18 + $0x488] sm:$0xf0]  ;;  %v9086_v63 = vld [vmem:[%s12240_s18 + $0xc0] sm:$0xf] }
0x1c46   : > { %v7451_v30 = vpack.c.bf16 %v6367_v40, %v6348_v11  ;;  %v9415_v40 = vor.u32 %v9869_v26, %v9414_v57 }
0x1c47   : > { %v7490_v62 = vpack.c.bf16 %v6331_v29, %v6312_v27  ;;  %v9829_v27 = vld [vmem:[%s12240_s18 + $0x34c] sm:$0xf] }
0x1c48   : > { %7611 = vst [vmem:[%s12248_s19 + $0x58] sm:$0xff] %v7451_v30  ;;  %v9419_v22 = vor.u32 %v9829_v27, %v9416_v28 }
0x1c49   : > { %7650 = vst [vmem:[%s12248_s19 + $0x190] sm:$0xff] %v7490_v62 }
0x1c4a   : > { %v6349_v6 = vpop.f32.mrf.mxu2 }
0x1c4b   : > { %v6350_v35 = vadd.f32 %v6349_v6, %v13611_v17  ;;  %v6368_v36 = vpop.f32.mrf.mxu3  ;;  %v6314_v33 = vpop.f32.mrf.mxu0 }
0x1c4c   : > { %v6369_v39 = vadd.f32 %v6368_v36, %v13617_v7  ;;  %v6315_v46 = vadd.f32 %v6314_v33, %v13590_v32  ;;  %v6333_v1 = vpop.f32.mrf.mxu1  ;;  %v9406_v36 = vld [vmem:[%s12240_s18 + $0x340] sm:$0xf] }
0x1c4d   : > { %v6334_v58 = vadd.f32 %v6333_v1, %v13594_v43  ;;  %v9868_v33 = vld [vmem:[%s12240_s18 + $0x47c] sm:$0xf0]  ;;  %v9408_v1 = vld [vmem:[%s12240_s18 + $0x480] sm:$0xf0] }
0x1c4e   : > { %v7491_v5 = vpack.c.bf16 %v6369_v39, %v6350_v35  ;;  %9605 = vmatmul.msk.bf16.gmra.mxu0 %vm5913_vm9, %v13568_v37  ;;  %9607 = vmatmul.msk.bf16.gmra.mxu1 %vm5913_vm9, %v13568_v37  ;;  %v9407_v39 = vor.u32 %v9868_v33, %v9406_v36 }
0x1c4f   : > { %v7530_v4 = vpack.c.bf16 %v6334_v58, %v6315_v46  ;;  %9609 = vmatmul.msk.bf16.gmra.mxu2 %vm5913_vm9, %v13568_v37  ;;  %v9828_v46 = vld [vmem:[%s12240_s18 + $0x344] sm:$0xf] }
0x1c50   : > { %7651 = vst [vmem:[%s12248_s19 + $0x198] sm:$0xff] %v7491_v5  ;;  %9611 = vmatmul.msk.bf16.gmra.mxu3 %vm5913_vm9, %v13568_v37  ;;  %v9411_v9 = vor.u32 %v9828_v46, %v9408_v1 }
0x1c51   : > { %7690 = vst [vmem:[%s12248_s19 + $0x2d0] sm:$0xff] %v7530_v4 }
0x1c52   : > { %v6352_v31 = vpop.f32.mrf.mxu2 }
0x1c53   : > { %v6353_v16 = vadd.f32 %v6352_v31, %v13611_v17  ;;  %v6371_v42 = vpop.f32.mrf.mxu3  ;;  %v6316_v41 = vpop.f32.mrf.mxu0 }
0x1c54   : > { %v6372_v19 = vadd.f32 %v6371_v42, %v13617_v7  ;;  %v6317_v2 = vadd.f32 %v6316_v41, %v13590_v32  ;;  %v6335_v14 = vpop.f32.mrf.mxu1  ;;  %v9070_v32 = vld [vmem:[%s12240_s18 + $0xb0] sm:$0xf]  ;;  %v9094_v42 = vld [vmem:[%s12240_s18 + $0xc8] sm:$0xf] }
0x1c55   : > { %v6336_v0 = vadd.f32 %v6335_v14, %v13594_v43  ;;  %v9071_v61 = vor.u32 %v9786_v45, %v9070_v32  ;;  %v9789_v41 = vld [vmem:[%s12240_s18 + $0x204] sm:$0xf0]  ;;  %v9096_v14 = vld [vmem:[%s12240_s18 + $0x208] sm:$0xf0] }
0x1c56   : > { %v7531_v47 = vpack.c.bf16 %v6372_v19, %v6353_v16  ;;  %v9095_v19 = vor.u32 %v9789_v41, %v9094_v42 }
0x1c57   : > { %v7570_v54 = vpack.c.bf16 %v6336_v0, %v6317_v2  ;;  %6763 = vmatpush.bf16.msrb.mxu0 %v9071_v61  ;;  %v9749_v2 = vld [vmem:[%s12240_s18 + $0xcc] sm:$0xf] }
0x1c58   : > { %7691 = vst [vmem:[%s12248_s19 + $0x2d8] sm:$0xff] %v7531_v47  ;;  %v9099_v32 = vor.u32 %v9749_v2, %v9096_v14 }
0x1c59   : > { %7730 = vst [vmem:[%s12248_s19 + $0x410] sm:$0xff] %v7570_v54 }
0x1c5a   : > { %v6354_v48 = vpop.f32.mrf.mxu2 }
0x1c5b   : > { %v6355_v43 = vadd.f32 %v6354_v48, %v13611_v17  ;;  %v6373_v50 = vpop.f32.mrf.mxu3  ;;  %v6385_v12 = vpop.f32.mrf.mxu0 }
0x1c5c   : > { %v6374_v18 = vadd.f32 %v6373_v50, %v13617_v7  ;;  %v6386_v8 = vadd.f32 %v6385_v12, %v13661_v55  ;;  %v6404_v20 = vpop.f32.mrf.mxu1  ;;  %v13682_v7 = vperm.slane %v13657_v51, 2  ;;  %v13729_v50 = vperm.slane %v13657_v51, 4 }
0x1c5d   : > { %v6405_v10 = vadd.f32 %v6404_v20, %v13665_v15  ;;  %v13733_v12 = vperm.slane %v13657_v51, 5  ;;  %v9748_v20 = vld [vmem:[%s12240_s18 + $0xc4] sm:$0xf] }
0x1c5e   : > { %v7571_v11 = vpack.c.bf16 %v6374_v18, %v6355_v43  ;;  %9612 = vmatmul.msk.bf16.vlgmr.msra.gmra.mxu0 %vm5913_vm9, %v13532_v49  ;;  %9614 = vmatmul.msk.bf16.vlgmr.msra.gmra.mxu1 %vm5913_vm9, %v13532_v49  ;;  %v9788_v18 = vld [vmem:[%s12240_s18 + $0x1fc] sm:$0xf0] }
0x1c5f   : > { %v7452_v17 = vpack.c.bf16 %v6405_v10, %v6386_v8  ;;  %9616 = vmatmul.msk.bf16.vlgmr.msra.gmra.mxu2 %vm5913_vm9, %v13532_v49  ;;  %6838 = vmatpush.bf16.msra.mxu0 %v9407_v39  ;;  %v9088_v10 = vld [vmem:[%s12240_s18 + $0x200] sm:$0xf0] }
0x1c60   : > { %7731 = vst [vmem:[%s12248_s19 + $0x418] sm:$0xff] %v7571_v11  ;;  %9618 = vmatmul.msk.bf16.vlgmr.msra.gmra.mxu3 %vm5913_vm9, %v13532_v49  ;;  %6876 = vmatpush.bf16.msra.mxu2 %v9415_v40  ;;  %v9091_v57 = vor.u32 %v9748_v20, %v9088_v10  ;;  %v13796_v20 = vld [vmem:[%s12246_s1 + $0x20] sm:$0xff] }
0x1c61   : > { %7612 = vst [vmem:[%s12248_s19 + $0x60] sm:$0xff] %v7452_v17  ;;  %6895 = vmatpush.bf16.msra.mxu3 %v9419_v22  ;;  %6857 = vmatpush.bf16.msra.mxu1 %v9411_v9  ;;  %v9871_v22 = vld [vmem:[%s12240_s18 + $0x494] sm:$0xf0] }
0x1c62   : > { %v6423_v21 = vpop.f32.mrf.mxu2 }
0x1c63   : > { %v6424_v29 = vadd.f32 %v6423_v21, %v13682_v7  ;;  %v6442_v30 = vpop.f32.mrf.mxu3  ;;  %v6387_v62 = vpop.f32.mrf.mxu0 }
0x1c64   : > { %v6443_v52 = vadd.f32 %v6442_v30, %v13688_v25  ;;  %v6388_v6 = vadd.f32 %v6387_v62, %v13661_v55  ;;  %v6406_v23 = vpop.f32.mrf.mxu1  ;;  %6877 = vmatpush.bf16.msra.mxu2 %v9095_v19  ;;  %v9430_v30 = vld [vmem:[%s12240_s18 + $0x358] sm:$0xf] }
0x1c65   : > { %v6407_v34 = vadd.f32 %v6406_v23, %v13665_v15  ;;  %6896 = vmatpush.bf16.msra.mxu3 %v9099_v32  ;;  %6858 = vmatpush.bf16.msra.mxu1 %v9091_v57  ;;  %v9790_v57 = vld [vmem:[%s12240_s18 + $0x20c] sm:$0xf0] }
0x1c66   : > { %v7453_v56 = vpack.c.bf16 %v6443_v52, %v6424_v29  ;;  %v13756_v29 = vperm.slane %v13657_v51, 7  ;;  %v9831_v52 = vld [vmem:[%s12240_s18 + $0x35c] sm:$0xf] }
0x1c67   : > { %v7492_v35 = vpack.c.bf16 %v6407_v34, %v6388_v6  ;;  %v9432_v6 = vld [vmem:[%s12240_s18 + $0x498] sm:$0xf0] }
0x1c68   : > { %7613 = vst [vmem:[%s12248_s19 + $0x68] sm:$0xff] %v7453_v56  ;;  %v9435_v36 = vor.u32 %v9831_v52, %v9432_v6 }
0x1c69   : > { %7652 = vst [vmem:[%s12248_s19 + $0x1a0] sm:$0xff] %v7492_v35  ;;  %v9431_v35 = vor.u32 %v9871_v22, %v9430_v30 }
0x1c6a   : > { %v6425_v38 = vpop.f32.mrf.mxu2 }
0x1c6b   : > { %v6426_v58 = vadd.f32 %v6425_v38, %v13682_v7  ;;  %v6444_v5 = vpop.f32.mrf.mxu3  ;;  %v6390_v4 = vpop.f32.mrf.mxu0 }
0x1c6c   : > { %v6445_v3 = vadd.f32 %v6444_v5, %v13688_v25  ;;  %v6391_v31 = vadd.f32 %v6390_v4, %v13661_v55  ;;  %v6409_v60 = vpop.f32.mrf.mxu1  ;;  %v9870_v5 = vld [vmem:[%s12240_s18 + $0x48c] sm:$0xf0] }
0x1c6d   : > { %v6410_v59 = vadd.f32 %v6409_v60, %v13665_v15 }
0x1c6e   : > { %v7493_v24 = vpack.c.bf16 %v6445_v3, %v6426_v58  ;;  %9613 = vmatmul.msk.bf16.gmra.mxu0 %vm5913_vm9, %v13568_v37  ;;  %9615 = vmatmul.msk.bf16.gmra.mxu1 %vm5913_vm9, %v13568_v37  ;;  %v9422_v58 = vld [vmem:[%s12240_s18 + $0x350] sm:$0xf]  ;;  %v9830_v3 = vld [vmem:[%s12240_s18 + $0x354] sm:$0xf] }
0x1c6f   : > { %v7532_v16 = vpack.c.bf16 %v6410_v59, %v6391_v31  ;;  %9617 = vmatmul.msk.bf16.gmra.mxu2 %vm5913_vm9, %v13568_v37  ;;  %v9423_v9 = vor.u32 %v9870_v5, %v9422_v58  ;;  %v9424_v31 = vld [vmem:[%s12240_s18 + $0x490] sm:$0xf0] }
0x1c70   : > { %7653 = vst [vmem:[%s12248_s19 + $0x1a8] sm:$0xff] %v7493_v24  ;;  %9619 = vmatmul.msk.bf16.gmra.mxu3 %vm5913_vm9, %v13568_v37 }
0x1c71   : > { %7692 = vst [vmem:[%s12248_s19 + $0x2e0] sm:$0xff] %v7532_v16  ;;  %v9427_v16 = vor.u32 %v9830_v3, %v9424_v31 }
0x1c72   : > { %v6428_v13 = vpop.f32.mrf.mxu2 }
0x1c73   : > { %v6429_v0 = vadd.f32 %v6428_v13, %v13682_v7  ;;  %v6447_v47 = vpop.f32.mrf.mxu3  ;;  %v6392_v54 = vpop.f32.mrf.mxu0 }
0x1c74   : > { %v6448_v45 = vadd.f32 %v6447_v47, %v13688_v25  ;;  %v6393_v48 = vadd.f32 %v6392_v54, %v13661_v55  ;;  %v6411_v61 = vpop.f32.mrf.mxu1  ;;  %v9087_v55 = vor.u32 %v9788_v18, %v9086_v63  ;;  %v9791_v47 = vld [vmem:[%s12240_s18 + $0x214] sm:$0xf0] }
0x1c75   : > { %v6412_v53 = vadd.f32 %v6411_v61, %v13665_v15 }
0x1c76   : > { %v7533_v44 = vpack.c.bf16 %v6448_v45, %v6429_v0  ;;  %6839 = vmatpush.bf16.msra.mxu0 %v9087_v55  ;;  %v9110_v0 = vld [vmem:[%s12240_s18 + $0xd8] sm:$0xf]  ;;  %v9751_v45 = vld [vmem:[%s12240_s18 + $0xdc] sm:$0xf] }
0x1c77   : > { %v7572_v43 = vpack.c.bf16 %v6412_v53, %v6393_v48  ;;  %v9111_v32 = vor.u32 %v9791_v47, %v9110_v0  ;;  %v9112_v48 = vld [vmem:[%s12240_s18 + $0x218] sm:$0xf0] }
0x1c78   : > { %7693 = vst [vmem:[%s12248_s19 + $0x2e8] sm:$0xff] %v7533_v44 }
0x1c79   : > { %7732 = vst [vmem:[%s12248_s19 + $0x420] sm:$0xff] %v7572_v43  ;;  %v9115_v43 = vor.u32 %v9751_v45, %v9112_v48 }
0x1c7a   : > { %v6430_v8 = vpop.f32.mrf.mxu2 }
0x1c7b   : > { %v6431_v11 = vadd.f32 %v6430_v8, %v13682_v7  ;;  %v6449_v15 = vpop.f32.mrf.mxu3  ;;  %v6461_v17 = vpop.f32.mrf.mxu0 }
0x1c7c   : > { %v6450_v26 = vadd.f32 %v6449_v15, %v13688_v25  ;;  %v6462_v21 = vadd.f32 %v6461_v17, %v13729_v50  ;;  %v6480_v40 = vpop.f32.mrf.mxu1  ;;  %v13750_v25 = vperm.slane %v13657_v51, 6  ;;  %v13800_v15 = vperm.slane %v13796_v20, 0 }
0x1c7d   : > { %v6481_v27 = vadd.f32 %v6480_v40, %v13733_v12  ;;  %v13804_v17 = vperm.slane %v13796_v20, 1  ;;  %v9750_v40 = vld [vmem:[%s12240_s18 + $0xd4] sm:$0xf] }
0x1c7e   : > { %v7573_v28 = vpack.c.bf16 %v6450_v26, %v6431_v11  ;;  %9620 = vmatmul.msk.bf16.vlgmr.msrb.gmra.mxu0 %vm5913_vm9, %v13532_v49  ;;  %9622 = vmatmul.msk.bf16.vlgmr.msrb.gmra.mxu1 %vm5913_vm9, %v13532_v49 }
0x1c7f   : > { %v7454_v7 = vpack.c.bf16 %v6481_v27, %v6462_v21  ;;  %9624 = vmatmul.msk.bf16.vlgmr.msrb.gmra.mxu2 %vm5913_vm9, %v13532_v49  ;;  %6914 = vmatpush.bf16.msrb.mxu0 %v9423_v9  ;;  %v9104_v27 = vld [vmem:[%s12240_s18 + $0x210] sm:$0xf0] }
0x1c80   : > { %7733 = vst [vmem:[%s12248_s19 + $0x428] sm:$0xff] %v7573_v28  ;;  %9626 = vmatmul.msk.bf16.vlgmr.msrb.gmra.mxu3 %vm5913_vm9, %v13532_v49  ;;  %6952 = vmatpush.bf16.msrb.mxu2 %v9431_v35  ;;  %v9107_v30 = vor.u32 %v9750_v40, %v9104_v27  ;;  %v9873_v35 = vld [vmem:[%s12240_s18 + $0x4a4] sm:$0xf0] }
0x1c81   : > { %7614 = vst [vmem:[%s12248_s19 + $0x70] sm:$0xff] %v7454_v7  ;;  %6971 = vmatpush.bf16.msrb.mxu3 %v9435_v36  ;;  %6933 = vmatpush.bf16.msrb.mxu1 %v9427_v16 }
0x1c82   : > { %v6499_v62 = vpop.f32.mrf.mxu2 }
0x1c83   : > { %v6500_v23 = vadd.f32 %v6499_v62, %v13750_v25  ;;  %v6518_v34 = vpop.f32.mrf.mxu3  ;;  %v6463_v56 = vpop.f32.mrf.mxu0 }
0x1c84   : > { %v6519_v51 = vadd.f32 %v6518_v34, %v13756_v29  ;;  %v6464_v33 = vadd.f32 %v6463_v56, %v13729_v50  ;;  %v6482_v38 = vpop.f32.mrf.mxu1  ;;  %6953 = vmatpush.bf16.msrb.mxu2 %v9111_v32  ;;  %v13827_v34 = vperm.slane %v13796_v20, 3  ;;  %v9446_v56 = vld [vmem:[%s12240_s18 + $0x368] sm:$0xf] }
0x1c85   : > { %v6483_v39 = vadd.f32 %v6482_v38, %v13733_v12  ;;  %6972 = vmatpush.bf16.msrb.mxu3 %v9115_v43  ;;  %6934 = vmatpush.bf16.msrb.mxu1 %v9107_v30  ;;  %v9448_v38 = vld [vmem:[%s12240_s18 + $0x4a8] sm:$0xf0]  ;;  %v9118_v30 = vld [vmem:[%s12240_s18 + $0xe0] sm:$0xf] }
0x1c86   : > { %v7455_v46 = vpack.c.bf16 %v6519_v51, %v6500_v23  ;;  %v9447_v51 = vor.u32 %v9873_v35, %v9446_v56 }
0x1c87   : > { %v7494_v1 = vpack.c.bf16 %v6483_v39, %v6464_v33  ;;  %v9833_v33 = vld [vmem:[%s12240_s18 + $0x36c] sm:$0xf] }
0x1c88   : > { %7615 = vst [vmem:[%s12248_s19 + $0x78] sm:$0xff] %v7455_v46  ;;  %v9451_v58 = vor.u32 %v9833_v33, %v9448_v38 }
0x1c89   : > { %7654 = vst [vmem:[%s12248_s19 + $0x1b0] sm:$0xff] %v7494_v1 }
0x1c8a   : > { %v6501_v4 = vpop.f32.mrf.mxu2 }
0x1c8b   : > { %v6502_v60 = vadd.f32 %v6501_v4, %v13750_v25  ;;  %v6520_v59 = vpop.f32.mrf.mxu3  ;;  %v6466_v24 = vpop.f32.mrf.mxu0 }
0x1c8c   : > { %v6521_v42 = vadd.f32 %v6520_v59, %v13756_v29  ;;  %v6467_v41 = vadd.f32 %v6466_v24, %v13729_v50  ;;  %v6485_v13 = vpop.f32.mrf.mxu1  ;;  %v9438_v59 = vld [vmem:[%s12240_s18 + $0x360] sm:$0xf] }
0x1c8d   : > { %v6486_v19 = vadd.f32 %v6485_v13, %v13733_v12  ;;  %v9872_v24 = vld [vmem:[%s12240_s18 + $0x49c] sm:$0xf0]  ;;  %v9440_v13 = vld [vmem:[%s12240_s18 + $0x4a0] sm:$0xf0] }
0x1c8e   : > { %v7495_v2 = vpack.c.bf16 %v6521_v42, %v6502_v60  ;;  %9621 = vmatmul.msk.bf16.gmra.mxu0 %vm5913_vm9, %v13568_v37  ;;  %9623 = vmatmul.msk.bf16.gmra.mxu1 %vm5913_vm9, %v13568_v37  ;;  %v9439_v42 = vor.u32 %v9872_v24, %v9438_v59 }
0x1c8f   : > { %v7534_v14 = vpack.c.bf16 %v6486_v19, %v6467_v41  ;;  %9625 = vmatmul.msk.bf16.gmra.mxu2 %vm5913_vm9, %v13568_v37  ;;  %v9832_v41 = vld [vmem:[%s12240_s18 + $0x364] sm:$0xf] }
0x1c90   : > { %7655 = vst [vmem:[%s12248_s19 + $0x1b8] sm:$0xff] %v7495_v2  ;;  %9627 = vmatmul.msk.bf16.gmra.mxu3 %vm5913_vm9, %v13568_v37  ;;  %v9443_v0 = vor.u32 %v9832_v41, %v9440_v13  ;;  %v9454_v13 = vld [vmem:[%s12240_s18 + $0x370] sm:$0xf] }
0x1c91   : > { %7694 = vst [vmem:[%s12248_s19 + $0x2f0] sm:$0xff] %v7534_v14 }
0x1c92   : > { %v6504_v54 = vpop.f32.mrf.mxu2 }
0x1c93   : > { %v6505_v61 = vadd.f32 %v6504_v54, %v13750_v25  ;;  %v6523_v53 = vpop.f32.mrf.mxu3  ;;  %v6468_v44 = vpop.f32.mrf.mxu0 }
0x1c94   : > { %v6524_v63 = vadd.f32 %v6523_v53, %v13756_v29  ;;  %v6469_v18 = vadd.f32 %v6468_v44, %v13729_v50  ;;  %v6487_v8 = vpop.f32.mrf.mxu1  ;;  %v9102_v50 = vld [vmem:[%s12240_s18 + $0xd0] sm:$0xf]  ;;  %v9126_v53 = vld [vmem:[%s12240_s18 + $0xe8] sm:$0xf] }
0x1c95   : > { %v6488_v55 = vadd.f32 %v6487_v8, %v13733_v12  ;;  %v9103_v21 = vor.u32 %v9790_v57, %v9102_v50  ;;  %v9793_v44 = vld [vmem:[%s12240_s18 + $0x224] sm:$0xf0]  ;;  %v9128_v8 = vld [vmem:[%s12240_s18 + $0x228] sm:$0xf0] }
0x1c96   : > { %v7535_v10 = vpack.c.bf16 %v6524_v63, %v6505_v61  ;;  %v9127_v63 = vor.u32 %v9793_v44, %v9126_v53 }
0x1c97   : > { %v7574_v11 = vpack.c.bf16 %v6488_v55, %v6469_v18  ;;  %6915 = vmatpush.bf16.msrb.mxu0 %v9103_v21  ;;  %v9753_v18 = vld [vmem:[%s12240_s18 + $0xec] sm:$0xf] }
0x1c98   : > { %7695 = vst [vmem:[%s12248_s19 + $0x2f8] sm:$0xff] %v7535_v10  ;;  %v9131_v50 = vor.u32 %v9753_v18, %v9128_v8  ;;  %v9142_v8 = vld [vmem:[%s12240_s18 + $0xf8] sm:$0xf] }
0x1c99   : > { %7734 = vst [vmem:[%s12248_s19 + $0x430] sm:$0xff] %v7574_v11 }
0x1c9a   : > { %v6506_v26 = vpop.f32.mrf.mxu2 }
0x1c9b   : > { %v6507_v12 = vadd.f32 %v6506_v26, %v13750_v25  ;;  %v6525_v28 = vpop.f32.mrf.mxu3  ;;  %v6537_v7 = vpop.f32.mrf.mxu0 }
0x1c9c   : > { %v6526_v62 = vadd.f32 %v6525_v28, %v13756_v29  ;;  %v6538_v22 = vadd.f32 %v6537_v7, %v13800_v15  ;;  %v6556_v52 = vpop.f32.mrf.mxu1  ;;  %v13821_v29 = vperm.slane %v13796_v20, 2  ;;  %v13868_v28 = vperm.slane %v13796_v20, 4 }
0x1c9d   : > { %v6557_v6 = vadd.f32 %v6556_v52, %v13804_v17  ;;  %v13872_v7 = vperm.slane %v13796_v20, 5  ;;  %v9752_v52 = vld [vmem:[%s12240_s18 + $0xe4] sm:$0xf] }
0x1c9e   : > { %v7575_v23 = vpack.c.bf16 %v6526_v62, %v6507_v12  ;;  %9628 = vmatmul.msk.bf16.vlgmr.msra.gmra.mxu0 %vm5913_vm9, %v13532_v49  ;;  %9630 = vmatmul.msk.bf16.vlgmr.msra.gmra.mxu1 %vm5913_vm9, %v13532_v49  ;;  %v9792_v62 = vld [vmem:[%s12240_s18 + $0x21c] sm:$0xf0] }
0x1c9f   : > { %v7456_v25 = vpack.c.bf16 %v6557_v6, %v6538_v22  ;;  %9632 = vmatmul.msk.bf16.vlgmr.msra.gmra.mxu2 %vm5913_vm9, %v13532_v49  ;;  %6990 = vmatpush.bf16.msra.mxu0 %v9439_v42  ;;  %v9120_v6 = vld [vmem:[%s12240_s18 + $0x220] sm:$0xf0] }
0x1ca0   : > { %7735 = vst [vmem:[%s12248_s19 + $0x438] sm:$0xff] %v7575_v23  ;;  %9634 = vmatmul.msk.bf16.vlgmr.msra.gmra.mxu3 %vm5913_vm9, %v13532_v49  ;;  %7028 = vmatpush.bf16.msra.mxu2 %v9447_v51  ;;  %v9123_v56 = vor.u32 %v9752_v52, %v9120_v6 }
0x1ca1   : > { %7616 = vst [vmem:[%s12248_s19 + $0x80] sm:$0xff] %v7456_v25  ;;  %7047 = vmatpush.bf16.msra.mxu3 %v9451_v58  ;;  %7009 = vmatpush.bf16.msra.mxu1 %v9443_v0  ;;  %v9875_v58 = vld [vmem:[%s12240_s18 + $0x4b4] sm:$0xf0]  ;;  %v9834_v0 = vld [vmem:[%s12240_s18 + $0x374] sm:$0xf] }
0x1ca2   : > { %v6575_v36 = vpop.f32.mrf.mxu2 }
0x1ca3   : > { %v6576_v39 = vadd.f32 %v6575_v36, %v13821_v29  ;;  %v6594_v46 = vpop.f32.mrf.mxu3  ;;  %v6539_v1 = vpop.f32.mrf.mxu0 }
0x1ca4   : > { %v6595_v5 = vadd.f32 %v6594_v46, %v13827_v34  ;;  %v6540_v4 = vadd.f32 %v6539_v1, %v13800_v15  ;;  %v6558_v9 = vpop.f32.mrf.mxu1  ;;  %7029 = vmatpush.bf16.msra.mxu2 %v9127_v63  ;;  %v9462_v46 = vld [vmem:[%s12240_s18 + $0x378] sm:$0xf] }
0x1ca5   : > { %v6559_v3 = vadd.f32 %v6558_v9, %v13804_v17  ;;  %7048 = vmatpush.bf16.msra.mxu3 %v9131_v50  ;;  %7010 = vmatpush.bf16.msra.mxu1 %v9123_v56  ;;  %v9755_v50 = vld [vmem:[%s12240_s18 + $0xfc] sm:$0xf] }
0x1ca6   : > { %v7457_v31 = vpack.c.bf16 %v6595_v5, %v6576_v39  ;;  %v13895_v39 = vperm.slane %v13796_v20, 7  ;;  %v9835_v5 = vld [vmem:[%s12240_s18 + $0x37c] sm:$0xf] }
0x1ca7   : > { %v7496_v60 = vpack.c.bf16 %v6559_v3, %v6540_v4  ;;  %v9464_v4 = vld [vmem:[%s12240_s18 + $0x4b8] sm:$0xf0] }
0x1ca8   : > { %7617 = vst [vmem:[%s12248_s19 + $0x88] sm:$0xff] %v7457_v31 }
0x1ca9   : > { %7656 = vst [vmem:[%s12248_s19 + $0x1c0] sm:$0xff] %v7496_v60  ;;  %v9463_v60 = vor.u32 %v9875_v58, %v9462_v46 }
0x1caa   : > { %v6577_v16 = vpop.f32.mrf.mxu2 }
0x1cab   : > { %v6578_v19 = vadd.f32 %v6577_v16, %v13821_v29  ;;  %v6596_v2 = vpop.f32.mrf.mxu3  ;;  %v6542_v14 = vpop.f32.mrf.mxu0 }
0x1cac   : > { %v6597_v47 = vadd.f32 %v6596_v2, %v13827_v34  ;;  %v6543_v54 = vadd.f32 %v6542_v14, %v13800_v15  ;;  %v6561_v32 = vpop.f32.mrf.mxu1 }
0x1cad   : > { %v6562_v45 = vadd.f32 %v6561_v32, %v13804_v17 }
0x1cae   : > { %v7497_v48 = vpack.c.bf16 %v6597_v47, %v6578_v19  ;;  %9629 = vmatmul.msk.bf16.gmra.mxu0 %vm5913_vm9, %v13568_v37  ;;  %9631 = vmatmul.msk.bf16.gmra.mxu1 %vm5913_vm9, %v13568_v37  ;;  %v9874_v19 = vld [vmem:[%s12240_s18 + $0x4ac] sm:$0xf0]  ;;  %v9456_v47 = vld [vmem:[%s12240_s18 + $0x4b0] sm:$0xf0] }
0x1caf   : > { %v7536_v61 = vpack.c.bf16 %v6562_v45, %v6543_v54  ;;  %9633 = vmatmul.msk.bf16.gmra.mxu2 %vm5913_vm9, %v13568_v37  ;;  %v9455_v14 = vor.u32 %v9874_v19, %v9454_v13 }
0x1cb0   : > { %7657 = vst [vmem:[%s12248_s19 + $0x1c8] sm:$0xff] %v7497_v48  ;;  %9635 = vmatmul.msk.bf16.gmra.mxu3 %vm5913_vm9, %v13568_v37  ;;  %v9459_v48 = vor.u32 %v9834_v0, %v9456_v47 }
0x1cb1   : > { %7696 = vst [vmem:[%s12248_s19 + $0x300] sm:$0xff] %v7536_v61 }
0x1cb2   : > { %v6580_v43 = vpop.f32.mrf.mxu2 }
0x1cb3   : > { %v6581_v55 = vadd.f32 %v6580_v43, %v13821_v29  ;;  %v6599_v10 = vpop.f32.mrf.mxu3  ;;  %v6544_v11 = vpop.f32.mrf.mxu0 }
0x1cb4   : > { %v6600_v57 = vadd.f32 %v6599_v10, %v13827_v34  ;;  %v6545_v26 = vadd.f32 %v6544_v11, %v13800_v15  ;;  %v6563_v21 = vpop.f32.mrf.mxu1  ;;  %v9119_v15 = vor.u32 %v9792_v62, %v9118_v30 }
0x1cb5   : > { %v6564_v40 = vadd.f32 %v6563_v21, %v13804_v17 }
0x1cb6   : > { %v7537_v27 = vpack.c.bf16 %v6600_v57, %v6581_v55  ;;  %6991 = vmatpush.bf16.msra.mxu0 %v9119_v15  ;;  %v9795_v55 = vld [vmem:[%s12240_s18 + $0x234] sm:$0xf0]  ;;  %v9144_v57 = vld [vmem:[%s12240_s18 + $0x238] sm:$0xf0] }
0x1cb7   : > { %v7576_v12 = vpack.c.bf16 %v6564_v40, %v6545_v26  ;;  %v9143_v11 = vor.u32 %v9795_v55, %v9142_v8 }
0x1cb8   : > { %7697 = vst [vmem:[%s12248_s19 + $0x308] sm:$0xff] %v7537_v27  ;;  %v9147_v27 = vor.u32 %v9755_v50, %v9144_v57  ;;  %v13989_v57 = vld [vmem:[#allocation2 + $0x8] sm:$0xff] }
0x1cb9   : > { %7736 = vst [vmem:[%s12248_s19 + $0x440] sm:$0xff] %v7576_v12 }
0x1cba   : > { %v6582_v22 = vpop.f32.mrf.mxu2 }
0x1cbb   : > { %v6583_v23 = vadd.f32 %v6582_v22, %v13821_v29  ;;  %v6601_v17 = vpop.f32.mrf.mxu3  ;;  %v6613_v25 = vpop.f32.mrf.mxu0  ;;  %v13935_v22 = vld [vmem:[%s12246_s1 + $0x28] sm:$0xff] }
0x1cbc   : > { %v6602_v35 = vadd.f32 %v6601_v17, %v13827_v34  ;;  %v6614_v36 = vadd.f32 %v6613_v25, %v13868_v28  ;;  %v6632_v51 = vpop.f32.mrf.mxu1  ;;  %v13889_v34 = vperm.slane %v13796_v20, 6  ;;  %v13939_v6 = vperm.slane %v13935_v22, 0  ;;  %v9794_v17 = vld [vmem:[%s12240_s18 + $0x22c] sm:$0xf0] }
0x1cbd   : > { %v6633_v33 = vadd.f32 %v6632_v51, %v13872_v7 }
0x1cbe   : > { %v7577_v38 = vpack.c.bf16 %v6602_v35, %v6583_v23  ;;  %9636 = vmatmul.msk.bf16.vlgmr.msrb.gmra.mxu0 %vm5913_vm9, %v13532_v49  ;;  %9638 = vmatmul.msk.bf16.vlgmr.msrb.gmra.mxu1 %vm5913_vm9, %v13532_v49  ;;  %v13943_v23 = vperm.slane %v13935_v22, 1  ;;  %v9754_v35 = vld [vmem:[%s12240_s18 + $0xf4] sm:$0xf] }
0x1cbf   : > { %v7458_v29 = vpack.c.bf16 %v6633_v33, %v6614_v36  ;;  %9640 = vmatmul.msk.bf16.vlgmr.msrb.gmra.mxu2 %vm5913_vm9, %v13532_v49  ;;  %7066 = vmatpush.bf16.msrb.mxu0 %v9455_v14  ;;  %v9136_v36 = vld [vmem:[%s12240_s18 + $0x230] sm:$0xf0] }
0x1cc0   : > { %7737 = vst [vmem:[%s12248_s19 + $0x448] sm:$0xff] %v7577_v38  ;;  %9642 = vmatmul.msk.bf16.vlgmr.msrb.gmra.mxu3 %vm5913_vm9, %v13532_v49  ;;  %v9467_v49 = vor.u32 %v9835_v5, %v9464_v4  ;;  %7104 = vmatpush.bf16.msrb.mxu2 %v9463_v60  ;;  %v9139_v38 = vor.u32 %v9754_v35, %v9136_v36 }
0x1cc1   : > { %7618 = vst [vmem:[%s12248_s19 + $0x90] sm:$0xff] %v7458_v29  ;;  %7085 = vmatpush.bf16.msrb.mxu1 %v9459_v48 }
0x1cc2   : > { %v6651_v1 = vpop.f32.mrf.mxu2  ;;  %7123 = vmatpush.bf16.msrb.mxu3 %v9467_v49 }
0x1cc3   : > { %v6652_v9 = vadd.f32 %v6651_v1, %v13889_v34  ;;  %v6670_v3 = vpop.f32.mrf.mxu3  ;;  %v6615_v31 = vpop.f32.mrf.mxu0 }
0x1cc4   : > { %v6671_v20 = vadd.f32 %v6670_v3, %v13895_v39  ;;  %v6616_v59 = vadd.f32 %v6615_v31, %v13868_v28  ;;  %v6634_v24 = vpop.f32.mrf.mxu1  ;;  %7105 = vmatpush.bf16.msrb.mxu2 %v9143_v11  ;;  %v9478_v3 = vld [vmem:[%s12240_s18 + $0x388] sm:$0xf] }
0x1cc5   : > { %v6635_v16 = vadd.f32 %v6634_v24, %v13872_v7  ;;  %7086 = vmatpush.bf16.msrb.mxu1 %v9139_v38  ;;  %v9877_v31 = vld [vmem:[%s12240_s18 + $0x4c4] sm:$0xf0]  ;;  %v9150_v38 = vld [vmem:[%s12240_s18 + $0x100] sm:$0xf] }
0x1cc6   : > { %v7459_v42 = vpack.c.bf16 %v6671_v20, %v6652_v9  ;;  %7124 = vmatpush.bf16.msrb.mxu3 %v9147_v27  ;;  %v13968_v9 = vperm.slane %v13935_v22, 3  ;;  %v9479_v49 = vor.u32 %v9877_v31, %v9478_v3  ;;  %v9837_v20 = vld [vmem:[%s12240_s18 + $0x38c] sm:$0xf] }
0x1cc7   : > { %v7498_v41 = vpack.c.bf16 %v6635_v16, %v6616_v59  ;;  %v9480_v59 = vld [vmem:[%s12240_s18 + $0x4c8] sm:$0xf0] }
0x1cc8   : > { %7619 = vst [vmem:[%s12248_s19 + $0x98] sm:$0xff] %v7459_v42 }
0x1cc9   : > { %7658 = vst [vmem:[%s12248_s19 + $0x1d0] sm:$0xff] %v7498_v41  ;;  %v9483_v41 = vor.u32 %v9837_v20, %v9480_v59 }
0x1cca   : > { %v6653_v2 = vpop.f32.mrf.mxu2 }
0x1ccb   : > { %v6654_v54 = vadd.f32 %v6653_v2, %v13889_v34  ;;  %v6672_v32 = vpop.f32.mrf.mxu3  ;;  %v6618_v45 = vpop.f32.mrf.mxu0 }
0x1ccc   : > { %v6673_v61 = vadd.f32 %v6672_v32, %v13895_v39  ;;  %v6619_v53 = vadd.f32 %v6618_v45, %v13868_v28  ;;  %v6637_v44 = vpop.f32.mrf.mxu1  ;;  %v9876_v32 = vld [vmem:[%s12240_s18 + $0x4bc] sm:$0xf0] }
0x1ccd   : > { %v6638_v43 = vadd.f32 %v6637_v44, %v13872_v7 }
0x1cce   : > { %v7499_v63 = vpack.c.bf16 %v6673_v61, %v6654_v54  ;;  %9637 = vmatmul.msk.bf16.gmra.mxu0 %vm5913_vm9, %v13568_v37  ;;  %9639 = vmatmul.msk.bf16.gmra.mxu1 %vm5913_vm9, %v13568_v37  ;;  %v9470_v54 = vld [vmem:[%s12240_s18 + $0x380] sm:$0xf]  ;;  %v9836_v61 = vld [vmem:[%s12240_s18 + $0x384] sm:$0xf] }
0x1ccf   : > { %v7538_v18 = vpack.c.bf16 %v6638_v43, %v6619_v53  ;;  %9641 = vmatmul.msk.bf16.gmra.mxu2 %vm5913_vm9, %v13568_v37  ;;  %v9471_v48 = vor.u32 %v9876_v32, %v9470_v54  ;;  %v9472_v53 = vld [vmem:[%s12240_s18 + $0x4c0] sm:$0xf0] }
0x1cd0   : > { %7659 = vst [vmem:[%s12248_s19 + $0x1d8] sm:$0xff] %v7499_v63  ;;  %9643 = vmatmul.msk.bf16.gmra.mxu3 %vm5913_vm9, %v13568_v37 }
0x1cd1   : > { %7698 = vst [vmem:[%s12248_s19 + $0x310] sm:$0xff] %v7538_v18  ;;  %v9475_v18 = vor.u32 %v9836_v61, %v9472_v53 }
0x1cd2   : > { %v6656_v10 = vpop.f32.mrf.mxu2 }
0x1cd3   : > { %v6657_v26 = vadd.f32 %v6656_v10, %v13889_v34  ;;  %v6675_v21 = vpop.f32.mrf.mxu3  ;;  %v6620_v40 = vpop.f32.mrf.mxu0 }
0x1cd4   : > { %v6676_v12 = vadd.f32 %v6675_v21, %v13895_v39  ;;  %v6621_v37 = vadd.f32 %v6620_v40, %v13868_v28  ;;  %v6639_v30 = vpop.f32.mrf.mxu1  ;;  %v9134_v28 = vld [vmem:[%s12240_s18 + $0xf0] sm:$0xf]  ;;  %v9158_v21 = vld [vmem:[%s12240_s18 + $0x108] sm:$0xf] }
0x1cd5   : > { %v6640_v62 = vadd.f32 %v6639_v30, %v13872_v7  ;;  %v9135_v56 = vor.u32 %v9794_v17, %v9134_v28  ;;  %v9797_v40 = vld [vmem:[%s12240_s18 + $0x244] sm:$0xf0]  ;;  %v9160_v30 = vld [vmem:[%s12240_s18 + $0x248] sm:$0xf0] }
0x1cd6   : > { %v7539_v15 = vpack.c.bf16 %v6676_v12, %v6657_v26  ;;  %v9159_v12 = vor.u32 %v9797_v40, %v9158_v21 }
0x1cd7   : > { %v7578_v52 = vpack.c.bf16 %v6640_v62, %v6621_v37  ;;  %7067 = vmatpush.bf16.msrb.mxu0 %v9135_v56  ;;  %v9757_v37 = vld [vmem:[%s12240_s18 + $0x10c] sm:$0xf] }
0x1cd8   : > { %7699 = vst [vmem:[%s12248_s19 + $0x318] sm:$0xff] %v7539_v15  ;;  %v9163_v28 = vor.u32 %v9757_v37, %v9160_v30 }
0x1cd9   : > { %7738 = vst [vmem:[%s12248_s19 + $0x450] sm:$0xff] %v7578_v52 }
0x1cda   : > { %v6658_v25 = vpop.f32.mrf.mxu2 }
0x1cdb   : > { %v6659_v7 = vadd.f32 %v6658_v25, %v13889_v34  ;;  %v6677_v51 = vpop.f32.mrf.mxu3  ;;  %v6689_v33 = vpop.f32.mrf.mxu0  ;;  %v13953_v34 = vld [vmem:[#allocation2] sm:$0xff] }
0x1cdc   : > { %v6678_v29 = vadd.f32 %v6677_v51, %v13895_v39  ;;  %v6690_v46 = vadd.f32 %v6689_v33, %v13939_v6  ;;  %v6708_v1 = vpop.f32.mrf.mxu1  ;;  %v13962_v39 = vperm.slane %v13935_v22, 2  ;;  %v14011_v51 = vperm.slane %v13935_v22, 4 }
0x1cdd   : > { %v6709_v58 = vadd.f32 %v6708_v1, %v13943_v23  ;;  %v14015_v33 = vperm.slane %v13935_v22, 5  ;;  %v9756_v1 = vld [vmem:[%s12240_s18 + $0x104] sm:$0xf] }
0x1cde   : > { %v7579_v5 = vpack.c.bf16 %v6678_v29, %v6659_v7  ;;  %9644 = vmatmul.msk.bf16.vlgmr.msra.gmra.mxu0 %vm5913_vm9, %v13953_v34  ;;  %9646 = vmatmul.msk.bf16.vlgmr.msra.gmra.mxu1 %vm5913_vm9, %v13953_v34  ;;  %v9796_v29 = vld [vmem:[%s12240_s18 + $0x23c] sm:$0xf0] }
0x1cdf   : > { %v7460_v4 = vpack.c.bf16 %v6709_v58, %v6690_v46  ;;  %9648 = vmatmul.msk.bf16.vlgmr.msra.gmra.mxu2 %vm5913_vm9, %v13953_v34  ;;  %7142 = vmatpush.bf16.msra.mxu0 %v9471_v48  ;;  %v9152_v58 = vld [vmem:[%s12240_s18 + $0x240] sm:$0xf0] }
0x1ce0   : > { %7739 = vst [vmem:[%s12248_s19 + $0x458] sm:$0xff] %v7579_v5  ;;  %9650 = vmatmul.msk.bf16.vlgmr.msra.gmra.mxu3 %vm5913_vm9, %v13953_v34  ;;  %7180 = vmatpush.bf16.msra.mxu2 %v9479_v49  ;;  %v9155_v3 = vor.u32 %v9756_v1, %v9152_v58  ;;  %v14078_v1 = vld [vmem:[%s12246_s1 + $0x30] sm:$0xff] }
0x1ce1   : > { %7620 = vst [vmem:[%s12248_s19 + $0xa0] sm:$0xff] %v7460_v4  ;;  %7199 = vmatpush.bf16.msra.mxu3 %v9483_v41  ;;  %7161 = vmatpush.bf16.msra.mxu1 %v9475_v18  ;;  %v9879_v41 = vld [vmem:[%s12240_s18 + $0x4d4] sm:$0xf0] }
0x1ce2   : > { %v6727_v60 = vpop.f32.mrf.mxu2 }
0x1ce3   : > { %v6728_v24 = vadd.f32 %v6727_v60, %v13962_v39  ;;  %v6746_v16 = vpop.f32.mrf.mxu3  ;;  %v6691_v42 = vpop.f32.mrf.mxu0 }
0x1ce4   : > { %v6747_v13 = vadd.f32 %v6746_v16, %v13968_v9  ;;  %v6692_v19 = vadd.f32 %v6691_v42, %v13939_v6  ;;  %v6710_v2 = vpop.f32.mrf.mxu1  ;;  %7181 = vmatpush.bf16.msra.mxu2 %v9159_v12  ;;  %v9494_v16 = vld [vmem:[%s12240_s18 + $0x398] sm:$0xf] }
0x1ce5   : > { %v6711_v14 = vadd.f32 %v6710_v2, %v13943_v23  ;;  %7200 = vmatpush.bf16.msra.mxu3 %v9163_v28  ;;  %7162 = vmatpush.bf16.msra.mxu1 %v9155_v3  ;;  %v9798_v3 = vld [vmem:[%s12240_s18 + $0x24c] sm:$0xf0] }
0x1ce6   : > { %v7461_v0 = vpack.c.bf16 %v6747_v13, %v6728_v24  ;;  %v14038_v24 = vperm.slane %v13935_v22, 7  ;;  %v9839_v13 = vld [vmem:[%s12240_s18 + $0x39c] sm:$0xf] }
0x1ce7   : > { %v7500_v47 = vpack.c.bf16 %v6711_v14, %v6692_v19  ;;  %v9496_v19 = vld [vmem:[%s12240_s18 + $0x4d8] sm:$0xf0] }
0x1ce8   : > { %7621 = vst [vmem:[%s12248_s19 + $0xa8] sm:$0xff] %v7461_v0  ;;  %v9499_v54 = vor.u32 %v9839_v13, %v9496_v19 }
0x1ce9   : > { %7660 = vst [vmem:[%s12248_s19 + $0x1e0] sm:$0xff] %v7500_v47  ;;  %v9495_v47 = vor.u32 %v9879_v41, %v9494_v16 }
0x1cea   : > { %v6729_v45 = vpop.f32.mrf.mxu2 }
0x1ceb   : > { %v6730_v44 = vadd.f32 %v6729_v45, %v13962_v39  ;;  %v6748_v43 = vpop.f32.mrf.mxu3  ;;  %v6694_v63 = vpop.f32.mrf.mxu0 }
0x1cec   : > { %v6749_v8 = vadd.f32 %v6748_v43, %v13968_v9  ;;  %v6695_v55 = vadd.f32 %v6694_v63, %v13939_v6  ;;  %v6713_v10 = vpop.f32.mrf.mxu1  ;;  %v9878_v43 = vld [vmem:[%s12240_s18 + $0x4cc] sm:$0xf0] }
0x1ced   : > { %v6714_v11 = vadd.f32 %v6713_v10, %v13943_v23 }
0x1cee   : > { %v7501_v50 = vpack.c.bf16 %v6749_v8, %v6730_v44  ;;  %9645 = vmatmul.msk.bf16.gmra.mxu0 %vm5913_vm9, %v13989_v57  ;;  %9647 = vmatmul.msk.bf16.gmra.mxu1 %vm5913_vm9, %v13989_v57  ;;  %v9486_v44 = vld [vmem:[%s12240_s18 + $0x390] sm:$0xf]  ;;  %v9838_v8 = vld [vmem:[%s12240_s18 + $0x394] sm:$0xf] }
0x1cef   : > { %v7540_v26 = vpack.c.bf16 %v6714_v11, %v6695_v55  ;;  %9649 = vmatmul.msk.bf16.gmra.mxu2 %vm5913_vm9, %v13989_v57  ;;  %v9487_v18 = vor.u32 %v9878_v43, %v9486_v44  ;;  %v9488_v55 = vld [vmem:[%s12240_s18 + $0x4d0] sm:$0xf0] }
0x1cf0   : > { %7661 = vst [vmem:[%s12248_s19 + $0x1e8] sm:$0xff] %v7501_v50  ;;  %9651 = vmatmul.msk.bf16.gmra.mxu3 %vm5913_vm9, %v13989_v57 }
0x1cf1   : > { %7700 = vst [vmem:[%s12248_s19 + $0x320] sm:$0xff] %v7540_v26  ;;  %v9491_v26 = vor.u32 %v9838_v8, %v9488_v55 }
0x1cf2   : > { %v6732_v27 = vpop.f32.mrf.mxu2 }
0x1cf3   : > { %v6733_v62 = vadd.f32 %v6732_v27, %v13962_v39  ;;  %v6751_v15 = vpop.f32.mrf.mxu3  ;;  %v6696_v52 = vpop.f32.mrf.mxu0 }
0x1cf4   : > { %v6752_v17 = vadd.f32 %v6751_v15, %v13968_v9  ;;  %v6697_v25 = vadd.f32 %v6696_v52, %v13939_v6  ;;  %v6715_v56 = vpop.f32.mrf.mxu1  ;;  %v9151_v6 = vor.u32 %v9796_v29, %v9150_v38  ;;  %v9799_v15 = vld [vmem:[%s12240_s18 + $0x254] sm:$0xf0] }
0x1cf5   : > { %v6716_v35 = vadd.f32 %v6715_v56, %v13943_v23 }
0x1cf6   : > { %v7541_v36 = vpack.c.bf16 %v6752_v17, %v6733_v62  ;;  %7143 = vmatpush.bf16.msra.mxu0 %v9151_v6  ;;  %v9174_v62 = vld [vmem:[%s12240_s18 + $0x118] sm:$0xf]  ;;  %v9759_v17 = vld [vmem:[%s12240_s18 + $0x11c] sm:$0xf] }
0x1cf7   : > { %v7580_v7 = vpack.c.bf16 %v6716_v35, %v6697_v25  ;;  %v9175_v28 = vor.u32 %v9799_v15, %v9174_v62  ;;  %v9176_v25 = vld [vmem:[%s12240_s18 + $0x258] sm:$0xf0] }
0x1cf8   : > { %7701 = vst [vmem:[%s12248_s19 + $0x328] sm:$0xff] %v7541_v36 }
0x1cf9   : > { %7740 = vst [vmem:[%s12248_s19 + $0x460] sm:$0xff] %v7580_v7  ;;  %v9179_v7 = vor.u32 %v9759_v17, %v9176_v25 }
0x1cfa   : > { %v6734_v46 = vpop.f32.mrf.mxu2 }
0x1cfb   : > { %v6735_v5 = vadd.f32 %v6734_v46, %v13962_v39  ;;  %v6753_v23 = vpop.f32.mrf.mxu3  ;;  %v6765_v4 = vpop.f32.mrf.mxu0 }
0x1cfc   : > { %v6754_v31 = vadd.f32 %v6753_v23, %v13968_v9  ;;  %v6766_v60 = vadd.f32 %v6765_v4, %v14011_v51  ;;  %v6784_v49 = vpop.f32.mrf.mxu1  ;;  %v14032_v9 = vperm.slane %v13935_v22, 6  ;;  %v14082_v23 = vperm.slane %v14078_v1, 0 }
0x1cfd   : > { %v6785_v20 = vadd.f32 %v6784_v49, %v14015_v33  ;;  %v14086_v4 = vperm.slane %v14078_v1, 1  ;;  %v9758_v49 = vld [vmem:[%s12240_s18 + $0x114] sm:$0xf] }
0x1cfe   : > { %v7581_v59 = vpack.c.bf16 %v6754_v31, %v6735_v5  ;;  %9652 = vmatmul.msk.bf16.vlgmr.msrb.gmra.mxu0 %vm5913_vm9, %v13953_v34  ;;  %9654 = vmatmul.msk.bf16.vlgmr.msrb.gmra.mxu1 %vm5913_vm9, %v13953_v34 }
0x1cff   : > { %v7462_v39 = vpack.c.bf16 %v6785_v20, %v6766_v60  ;;  %9656 = vmatmul.msk.bf16.vlgmr.msrb.gmra.mxu2 %vm5913_vm9, %v13953_v34  ;;  %7218 = vmatpush.bf16.msrb.mxu0 %v9487_v18  ;;  %v9168_v20 = vld [vmem:[%s12240_s18 + $0x250] sm:$0xf0] }
0x1d00   : > { %7741 = vst [vmem:[%s12248_s19 + $0x468] sm:$0xff] %v7581_v59  ;;  %9658 = vmatmul.msk.bf16.vlgmr.msrb.gmra.mxu3 %vm5913_vm9, %v13953_v34  ;;  %7256 = vmatpush.bf16.msrb.mxu2 %v9495_v47  ;;  %v9171_v16 = vor.u32 %v9758_v49, %v9168_v20  ;;  %v9881_v47 = vld [vmem:[%s12240_s18 + $0x4e4] sm:$0xf0] }
0x1d01   : > { %7622 = vst [vmem:[%s12248_s19 + $0xb0] sm:$0xff] %v7462_v39  ;;  %7275 = vmatpush.bf16.msrb.mxu3 %v9499_v54  ;;  %7237 = vmatpush.bf16.msrb.mxu1 %v9491_v26 }
0x1d02   : > { %v6803_v42 = vpop.f32.mrf.mxu2 }
0x1d03   : > { %v6804_v2 = vadd.f32 %v6803_v42, %v14032_v9  ;;  %v6822_v14 = vpop.f32.mrf.mxu3  ;;  %v6767_v0 = vpop.f32.mrf.mxu0 }
0x1d04   : > { %v6823_v22 = vadd.f32 %v6822_v14, %v14038_v24  ;;  %v6768_v32 = vadd.f32 %v6767_v0, %v14011_v51  ;;  %v6786_v45 = vpop.f32.mrf.mxu1  ;;  %7257 = vmatpush.bf16.msrb.mxu2 %v9175_v28  ;;  %v14109_v14 = vperm.slane %v14078_v1, 3  ;;  %v9510_v0 = vld [vmem:[%s12240_s18 + $0x3a8] sm:$0xf] }
0x1d05   : > { %v6787_v48 = vadd.f32 %v6786_v45, %v14015_v33  ;;  %7276 = vmatpush.bf16.msrb.mxu3 %v9179_v7  ;;  %7238 = vmatpush.bf16.msrb.mxu1 %v9171_v16  ;;  %v9512_v45 = vld [vmem:[%s12240_s18 + $0x4e8] sm:$0xf0]  ;;  %v9182_v16 = vld [vmem:[%s12240_s18 + $0x120] sm:$0xf] }
0x1d06   : > { %v7463_v61 = vpack.c.bf16 %v6823_v22, %v6804_v2  ;;  %v9511_v22 = vor.u32 %v9881_v47, %v9510_v0 }
0x1d07   : > { %v7502_v53 = vpack.c.bf16 %v6787_v48, %v6768_v32  ;;  %v9841_v32 = vld [vmem:[%s12240_s18 + $0x3ac] sm:$0xf] }
0x1d08   : > { %7623 = vst [vmem:[%s12248_s19 + $0xb8] sm:$0xff] %v7463_v61  ;;  %v9515_v44 = vor.u32 %v9841_v32, %v9512_v45 }
0x1d09   : > { %7662 = vst [vmem:[%s12248_s19 + $0x1f0] sm:$0xff] %v7502_v53 }
0x1d0a   : > { %v6805_v63 = vpop.f32.mrf.mxu2 }
0x1d0b   : > { %v6806_v10 = vadd.f32 %v6805_v63, %v14032_v9  ;;  %v6824_v11 = vpop.f32.mrf.mxu3  ;;  %v6770_v50 = vpop.f32.mrf.mxu0 }
0x1d0c   : > { %v6825_v21 = vadd.f32 %v6824_v11, %v14038_v24  ;;  %v6771_v40 = vadd.f32 %v6770_v50, %v14011_v51  ;;  %v6789_v27 = vpop.f32.mrf.mxu1  ;;  %v9502_v11 = vld [vmem:[%s12240_s18 + $0x3a0] sm:$0xf] }
0x1d0d   : > { %v6790_v12 = vadd.f32 %v6789_v27, %v14015_v33  ;;  %v9880_v50 = vld [vmem:[%s12240_s18 + $0x4dc] sm:$0xf0]  ;;  %v9504_v27 = vld [vmem:[%s12240_s18 + $0x4e0] sm:$0xf0] }
0x1d0e   : > { %v7503_v37 = vpack.c.bf16 %v6825_v21, %v6806_v10  ;;  %9653 = vmatmul.msk.bf16.gmra.mxu0 %vm5913_vm9, %v13989_v57  ;;  %9655 = vmatmul.msk.bf16.gmra.mxu1 %vm5913_vm9, %v13989_v57  ;;  %v9503_v21 = vor.u32 %v9880_v50, %v9502_v11 }
0x1d0f   : > { %v7542_v30 = vpack.c.bf16 %v6790_v12, %v6771_v40  ;;  %9657 = vmatmul.msk.bf16.gmra.mxu2 %vm5913_vm9, %v13989_v57  ;;  %v9840_v40 = vld [vmem:[%s12240_s18 + $0x3a4] sm:$0xf] }
0x1d10   : > { %7663 = vst [vmem:[%s12248_s19 + $0x1f8] sm:$0xff] %v7503_v37  ;;  %9659 = vmatmul.msk.bf16.gmra.mxu3 %vm5913_vm9, %v13989_v57  ;;  %v9507_v62 = vor.u32 %v9840_v40, %v9504_v27 }
0x1d11   : > { %7702 = vst [vmem:[%s12248_s19 + $0x330] sm:$0xff] %v7542_v30 }
0x1d12   : > { %v6808_v52 = vpop.f32.mrf.mxu2 }
0x1d13   : > { %v6809_v56 = vadd.f32 %v6808_v52, %v14032_v9  ;;  %v6827_v35 = vpop.f32.mrf.mxu3  ;;  %v6772_v36 = vpop.f32.mrf.mxu0 }
0x1d14   : > { %v6828_v38 = vadd.f32 %v6827_v35, %v14038_v24  ;;  %v6773_v29 = vadd.f32 %v6772_v36, %v14011_v51  ;;  %v6791_v46 = vpop.f32.mrf.mxu1  ;;  %v9166_v51 = vld [vmem:[%s12240_s18 + $0x110] sm:$0xf]  ;;  %v9190_v35 = vld [vmem:[%s12240_s18 + $0x128] sm:$0xf] }
0x1d15   : > { %v6792_v6 = vadd.f32 %v6791_v46, %v14015_v33  ;;  %v9167_v60 = vor.u32 %v9798_v3, %v9166_v51  ;;  %v9801_v36 = vld [vmem:[%s12240_s18 + $0x264] sm:$0xf0]  ;;  %v9192_v46 = vld [vmem:[%s12240_s18 + $0x268] sm:$0xf0] }
0x1d16   : > { %v7543_v58 = vpack.c.bf16 %v6828_v38, %v6809_v56  ;;  %v9191_v38 = vor.u32 %v9801_v36, %v9190_v35 }
0x1d17   : > { %v7582_v5 = vpack.c.bf16 %v6792_v6, %v6773_v29  ;;  %7219 = vmatpush.bf16.msrb.mxu0 %v9167_v60  ;;  %v9761_v29 = vld [vmem:[%s12240_s18 + $0x12c] sm:$0xf] }
0x1d18   : > { %7703 = vst [vmem:[%s12248_s19 + $0x338] sm:$0xff] %v7543_v58  ;;  %v9195_v51 = vor.u32 %v9761_v29, %v9192_v46 }
0x1d19   : > { %7742 = vst [vmem:[%s12248_s19 + $0x470] sm:$0xff] %v7582_v5 }
0x1d1a   : > { %v6810_v31 = vpop.f32.mrf.mxu2 }
0x1d1b   : > { %v6811_v33 = vadd.f32 %v6810_v31, %v14032_v9  ;;  %v6829_v59 = vpop.f32.mrf.mxu3  ;;  %v6841_v39 = vpop.f32.mrf.mxu0 }
0x1d1c   : > { %v6830_v42 = vadd.f32 %v6829_v59, %v14038_v24  ;;  %v6842_v41 = vadd.f32 %v6841_v39, %v14082_v23  ;;  %v6860_v13 = vpop.f32.mrf.mxu1  ;;  %v14103_v24 = vperm.slane %v14078_v1, 2  ;;  %v14150_v59 = vperm.slane %v14078_v1, 4 }
0x1d1d   : > { %v6861_v19 = vadd.f32 %v6860_v13, %v14086_v4  ;;  %v14154_v39 = vperm.slane %v14078_v1, 5  ;;  %v9760_v13 = vld [vmem:[%s12240_s18 + $0x124] sm:$0xf] }
0x1d1e   : > { %v7583_v2 = vpack.c.bf16 %v6830_v42, %v6811_v33  ;;  %9660 = vmatmul.msk.bf16.vlgmr.msra.gmra.mxu0 %vm5913_vm9, %v13953_v34  ;;  %9662 = vmatmul.msk.bf16.vlgmr.msra.gmra.mxu1 %vm5913_vm9, %v13953_v34  ;;  %v9800_v42 = vld [vmem:[%s12240_s18 + $0x25c] sm:$0xf0] }
0x1d1f   : > { %v7464_v9 = vpack.c.bf16 %v6861_v19, %v6842_v41  ;;  %9664 = vmatmul.msk.bf16.vlgmr.msra.gmra.mxu2 %vm5913_vm9, %v13953_v34  ;;  %7294 = vmatpush.bf16.msra.mxu0 %v9503_v21  ;;  %v9184_v19 = vld [vmem:[%s12240_s18 + $0x260] sm:$0xf0] }
0x1d20   : > { %7743 = vst [vmem:[%s12248_s19 + $0x478] sm:$0xff] %v7583_v2  ;;  %9666 = vmatmul.msk.bf16.vlgmr.msra.gmra.mxu3 %vm5913_vm9, %v13953_v34  ;;  %7332 = vmatpush.bf16.msra.mxu2 %v9511_v22  ;;  %v9187_v0 = vor.u32 %v9760_v13, %v9184_v19  ;;  %v14217_v13 = vld [vmem:[%s12246_s1 + $0x38] sm:$0xff] }
0x1d21   : > { %7624 = vst [vmem:[%s12248_s19 + $0xc0] sm:$0xff] %v7464_v9  ;;  %7351 = vmatpush.bf16.msra.mxu3 %v9515_v44  ;;  %7313 = vmatpush.bf16.msra.mxu1 %v9507_v62  ;;  %v9883_v44 = vld [vmem:[%s12240_s18 + $0x4f4] sm:$0xf0] }
0x1d22   : > { %v6879_v54 = vpop.f32.mrf.mxu2 }
0x1d23   : > { %v6880_v48 = vadd.f32 %v6879_v54, %v14103_v24  ;;  %v6898_v61 = vpop.f32.mrf.mxu3  ;;  %v6843_v53 = vpop.f32.mrf.mxu0 }
0x1d24   : > { %v6899_v43 = vadd.f32 %v6898_v61, %v14109_v14  ;;  %v6844_v63 = vadd.f32 %v6843_v53, %v14082_v23  ;;  %v6862_v18 = vpop.f32.mrf.mxu1  ;;  %7333 = vmatpush.bf16.msra.mxu2 %v9191_v38  ;;  %v9526_v61 = vld [vmem:[%s12240_s18 + $0x3b8] sm:$0xf] }
0x1d25   : > { %v6863_v8 = vadd.f32 %v6862_v18, %v14086_v4  ;;  %7352 = vmatpush.bf16.msra.mxu3 %v9195_v51  ;;  %7314 = vmatpush.bf16.msra.mxu1 %v9187_v0  ;;  %v9198_v0 = vld [vmem:[%s12240_s18 + $0x130] sm:$0xf] }
0x1d26   : > { %v7465_v55 = vpack.c.bf16 %v6899_v43, %v6880_v48  ;;  %v14177_v48 = vperm.slane %v14078_v1, 7  ;;  %v9843_v43 = vld [vmem:[%s12240_s18 + $0x3bc] sm:$0xf] }
0x1d27   : > { %v7504_v10 = vpack.c.bf16 %v6863_v8, %v6844_v63  ;;  %v9528_v63 = vld [vmem:[%s12240_s18 + $0x4f8] sm:$0xf0] }
0x1d28   : > { %7625 = vst [vmem:[%s12248_s19 + $0xc8] sm:$0xff] %v7465_v55  ;;  %v9531_v11 = vor.u32 %v9843_v43, %v9528_v63 }
0x1d29   : > { %7664 = vst [vmem:[%s12248_s19 + $0x200] sm:$0xff] %v7504_v10  ;;  %v9527_v10 = vor.u32 %v9883_v44, %v9526_v61 }
0x1d2a   : > { %v6881_v26 = vpop.f32.mrf.mxu2 }
0x1d2b   : > { %v6882_v12 = vadd.f32 %v6881_v26, %v14103_v24  ;;  %v6900_v37 = vpop.f32.mrf.mxu3  ;;  %v6846_v30 = vpop.f32.mrf.mxu0 }
0x1d2c   : > { %v6901_v15 = vadd.f32 %v6900_v37, %v14109_v14  ;;  %v6847_v52 = vadd.f32 %v6846_v30, %v14082_v23  ;;  %v6865_v28 = vpop.f32.mrf.mxu1  ;;  %v9882_v37 = vld [vmem:[%s12240_s18 + $0x4ec] sm:$0xf0] }
0x1d2d   : > { %v6866_v17 = vadd.f32 %v6865_v28, %v14086_v4 }
0x1d2e   : > { %v7505_v25 = vpack.c.bf16 %v6901_v15, %v6882_v12  ;;  %9661 = vmatmul.msk.bf16.gmra.mxu0 %vm5913_vm9, %v13989_v57  ;;  %9663 = vmatmul.msk.bf16.gmra.mxu1 %vm5913_vm9, %v13989_v57  ;;  %v9518_v12 = vld [vmem:[%s12240_s18 + $0x3b0] sm:$0xf]  ;;  %v9842_v15 = vld [vmem:[%s12240_s18 + $0x3b4] sm:$0xf] }
0x1d2f   : > { %v7544_v56 = vpack.c.bf16 %v6866_v17, %v6847_v52  ;;  %9665 = vmatmul.msk.bf16.gmra.mxu2 %vm5913_vm9, %v13989_v57  ;;  %v9519_v62 = vor.u32 %v9882_v37, %v9518_v12  ;;  %v9520_v52 = vld [vmem:[%s12240_s18 + $0x4f0] sm:$0xf0] }
0x1d30   : > { %7665 = vst [vmem:[%s12248_s19 + $0x208] sm:$0xff] %v7505_v25  ;;  %9667 = vmatmul.msk.bf16.gmra.mxu3 %vm5913_vm9, %v13989_v57 }
0x1d31   : > { %7704 = vst [vmem:[%s12248_s19 + $0x340] sm:$0xff] %v7544_v56  ;;  %v9523_v56 = vor.u32 %v9842_v15, %v9520_v52 }
0x1d32   : > { %v6884_v7 = vpop.f32.mrf.mxu2 }
0x1d33   : > { %v6885_v6 = vadd.f32 %v6884_v7, %v14103_v24  ;;  %v6903_v58 = vpop.f32.mrf.mxu3  ;;  %v6848_v5 = vpop.f32.mrf.mxu0 }
0x1d34   : > { %v6904_v3 = vadd.f32 %v6903_v58, %v14109_v14  ;;  %v6849_v31 = vadd.f32 %v6848_v5, %v14082_v23  ;;  %v6867_v60 = vpop.f32.mrf.mxu1  ;;  %v9183_v23 = vor.u32 %v9800_v42, %v9182_v16  ;;  %v9803_v58 = vld [vmem:[%s12240_s18 + $0x274] sm:$0xf0] }
0x1d35   : > { %v6868_v49 = vadd.f32 %v6867_v60, %v14086_v4 }
0x1d36   : > { %v7545_v20 = vpack.c.bf16 %v6904_v3, %v6885_v6  ;;  %7295 = vmatpush.bf16.msra.mxu0 %v9183_v23  ;;  %v9206_v6 = vld [vmem:[%s12240_s18 + $0x138] sm:$0xf]  ;;  %v9763_v3 = vld [vmem:[%s12240_s18 + $0x13c] sm:$0xf] }
0x1d37   : > { %v7584_v33 = vpack.c.bf16 %v6868_v49, %v6849_v31  ;;  %v9207_v51 = vor.u32 %v9803_v58, %v9206_v6  ;;  %v9208_v31 = vld [vmem:[%s12240_s18 + $0x278] sm:$0xf0] }
0x1d38   : > { %7705 = vst [vmem:[%s12248_s19 + $0x348] sm:$0xff] %v7545_v20 }
0x1d39   : > { %7744 = vst [vmem:[%s12248_s19 + $0x480] sm:$0xff] %v7584_v33  ;;  %v9211_v33 = vor.u32 %v9763_v3, %v9208_v31  ;;  %v5003_v31 = vperm.slane %v14217_v13, 4 }
0x1d3a   : > { %v6886_v41 = vpop.f32.mrf.mxu2 }
0x1d3b   : > { %v6887_v2 = vadd.f32 %v6886_v41, %v14103_v24  ;;  %v6905_v4 = vpop.f32.mrf.mxu3  ;;  %v6917_v9 = vpop.f32.mrf.mxu0 }
0x1d3c   : > { %v6906_v47 = vadd.f32 %v6905_v4, %v14109_v14  ;;  %v6918_v54 = vadd.f32 %v6917_v9, %v14150_v59  ;;  %v6936_v22 = vpop.f32.mrf.mxu1  ;;  %v14171_v14 = vperm.slane %v14078_v1, 6  ;;  %v4999_v4 = vperm.slane %v14217_v13, 0 }
0x1d3d   : > { %v6937_v32 = vadd.f32 %v6936_v22, %v14154_v39  ;;  %v5000_v9 = vperm.slane %v14217_v13, 1  ;;  %v9762_v22 = vld [vmem:[%s12240_s18 + $0x134] sm:$0xf] }
0x1d3e   : > { %v7585_v45 = vpack.c.bf16 %v6906_v47, %v6887_v2  ;;  %9668 = vmatmul.msk.bf16.vlgmr.msrb.gmra.mxu0 %vm5913_vm9, %v13953_v34  ;;  %9670 = vmatmul.msk.bf16.vlgmr.msrb.gmra.mxu1 %vm5913_vm9, %v13953_v34  ;;  %v9802_v47 = vld [vmem:[%s12240_s18 + $0x26c] sm:$0xf0] }
0x1d3f   : > { %v7466_v24 = vpack.c.bf16 %v6937_v32, %v6918_v54  ;;  %9672 = vmatmul.msk.bf16.vlgmr.msrb.gmra.mxu2 %vm5913_vm9, %v13953_v34  ;;  %7370 = vmatpush.bf16.msrb.mxu0 %v9519_v62  ;;  %v9199_v54 = vor.u32 %v9802_v47, %v9198_v0  ;;  %v9200_v32 = vld [vmem:[%s12240_s18 + $0x270] sm:$0xf0]  ;;  %v5006_v0 = vperm.slane %v14217_v13, 7  ;;  %s7767_s18 = smul.u32 (%p11826_p10), 80, %s11797_s15 }
0x1d40   : > { %7745 = vst [vmem:[%s12248_s19 + $0x488] sm:$0xff] %v7585_v45  ;;  %9674 = vmatmul.msk.bf16.vlgmr.msrb.gmra.mxu3 %vm5913_vm9, %v13953_v34  ;;  %7408 = vmatpush.bf16.msrb.mxu2 %v9527_v10  ;;  %v9203_v61 = vor.u32 %v9762_v22, %v9200_v32 }
0x1d41   : > { %7626 = vst [vmem:[%s12248_s19 + $0xd0] sm:$0xff] %v7466_v24  ;;  %7427 = vmatpush.bf16.msrb.mxu3 %v9531_v11  ;;  %7389 = vmatpush.bf16.msrb.mxu1 %v9523_v56 }
0x1d42   : > { %v6955_v53 = vpop.f32.mrf.mxu2 }
0x1d43   : > { %v6956_v18 = vadd.f32 %v6955_v53, %v14171_v14  ;;  %v6974_v8 = vpop.f32.mrf.mxu3  ;;  %v6919_v55 = vpop.f32.mrf.mxu0  ;;  %7371 = vmatpush.bf16.msrb.mxu0 %v9199_v54 }
0x1d44   : > { %v6975_v1 = vadd.f32 %v6974_v8, %v14177_v48  ;;  %v6920_v50 = vadd.f32 %v6919_v55, %v14150_v59  ;;  %v6938_v26 = vpop.f32.mrf.mxu1  ;;  %7409 = vmatpush.bf16.msrb.mxu2 %v9207_v51 }
0x1d45   : > { %v6939_v21 = vadd.f32 %v6938_v26, %v14154_v39  ;;  %7428 = vmatpush.bf16.msrb.mxu3 %v9211_v33  ;;  %7390 = vmatpush.bf16.msrb.mxu1 %v9203_v61 }
0x1d46   : > { %v7467_v40 = vpack.c.bf16 %v6975_v1, %v6956_v18 }
0x1d47   : > { %v7506_v27 = vpack.c.bf16 %v6939_v21, %v6920_v50 }
0x1d48   : > { %7627 = vst [vmem:[%s12248_s19 + $0xd8] sm:$0xff] %v7467_v40 }
0x1d49   : > { %7666 = vst [vmem:[%s12248_s19 + $0x210] sm:$0xff] %v7506_v27 }
0x1d4a   : > { %v6957_v30 = vpop.f32.mrf.mxu2 }
0x1d4b   : > { %v6958_v28 = vadd.f32 %v6957_v30, %v14171_v14  ;;  %v6976_v17 = vpop.f32.mrf.mxu3  ;;  %v6922_v25 = vpop.f32.mrf.mxu0 }
0x1d4c   : > { %v6977_v35 = vadd.f32 %v6976_v17, %v14177_v48  ;;  %v6923_v36 = vadd.f32 %v6922_v25, %v14150_v59  ;;  %v6941_v7 = vpop.f32.mrf.mxu1 }
0x1d4d   : > { %v6942_v38 = vadd.f32 %v6941_v7, %v14154_v39 }
0x1d4e   : > { %v7507_v29 = vpack.c.bf16 %v6977_v35, %v6958_v28  ;;  %9669 = vmatmul.msk.bf16.gmra.mxu0 %vm5913_vm9, %v13989_v57  ;;  %9671 = vmatmul.msk.bf16.gmra.mxu1 %vm5913_vm9, %v13989_v57 }
0x1d4f   : > { %v7546_v46 = vpack.c.bf16 %v6942_v38, %v6923_v36  ;;  %9673 = vmatmul.msk.bf16.gmra.mxu2 %vm5913_vm9, %v13989_v57 }
0x1d50   : > { %7667 = vst [vmem:[%s12248_s19 + $0x218] sm:$0xff] %v7507_v29  ;;  %9675 = vmatmul.msk.bf16.gmra.mxu3 %vm5913_vm9, %v13989_v57 }
0x1d51   : > { %7706 = vst [vmem:[%s12248_s19 + $0x350] sm:$0xff] %v7546_v46 }
0x1d52   : > { %v6960_v5 = vpop.f32.mrf.mxu2 }
0x1d53   : > { %v6961_v60 = vadd.f32 %v6960_v5, %v14171_v14  ;;  %v6979_v49 = vpop.f32.mrf.mxu3  ;;  %v6924_v20 = vpop.f32.mrf.mxu0 }
0x1d54   : > { %v6980_v16 = vadd.f32 %v6979_v49, %v14177_v48  ;;  %v6925_v42 = vadd.f32 %v6924_v20, %v14150_v59  ;;  %v6943_v41 = vpop.f32.mrf.mxu1 }
0x1d55   : > { %v6944_v23 = vadd.f32 %v6943_v41, %v14154_v39 }
0x1d56   : > { %v7547_v19 = vpack.c.bf16 %v6980_v16, %v6961_v60  ;;  %v5004_v60 = vperm.slane %v14217_v13, 5 }
0x1d57   : > { %v7586_v2 = vpack.c.bf16 %v6944_v23, %v6925_v42 }
0x1d58   : > { %7707 = vst [vmem:[%s12248_s19 + $0x358] sm:$0xff] %v7547_v19 }
0x1d59   : > { %7746 = vst [vmem:[%s12248_s19 + $0x490] sm:$0xff] %v7586_v2 }
0x1d5a   : > { %v6962_v59 = vpop.f32.mrf.mxu2 }
0x1d5b   : > { %v6963_v45 = vadd.f32 %v6962_v59, %v14171_v14  ;;  %v6981_v39 = vpop.f32.mrf.mxu3  ;;  %v6993_v24 = vpop.f32.mrf.mxu0  ;;  %v5001_v14 = vperm.slane %v14217_v13, 2 }
0x1d5c   : > { %v6982_v53 = vadd.f32 %v6981_v39, %v14177_v48  ;;  %v6994_v44 = vadd.f32 %v6993_v24, %v4999_v4  ;;  %v7012_v43 = vpop.f32.mrf.mxu1  ;;  %v5002_v48 = vperm.slane %v14217_v13, 3 }
0x1d5d   : > { %v7013_v63 = vadd.f32 %v7012_v43, %v5000_v9 }
0x1d5e   : > { %v7587_v18 = vpack.c.bf16 %v6982_v53, %v6963_v45  ;;  %9676 = vmatmul.msk.bf16.vlgmr.msra.gmra.mxu0 %vm5913_vm9, %v13953_v34  ;;  %9678 = vmatmul.msk.bf16.vlgmr.msra.gmra.mxu1 %vm5913_vm9, %v13953_v34 }
0x1d5f   : > { %v7468_v8 = vpack.c.bf16 %v7013_v63, %v6994_v44  ;;  %9680 = vmatmul.msk.bf16.vlgmr.msra.gmra.mxu2 %vm5913_vm9, %v13953_v34 }
0x1d60   : > { %7747 = vst [vmem:[%s12248_s19 + $0x498] sm:$0xff] %v7587_v18  ;;  %9682 = vmatmul.msk.bf16.vlgmr.msra.gmra.mxu3 %vm5913_vm9, %v13953_v34 }
0x1d61   : > { %7628 = vst [vmem:[%s12248_s19 + $0xe0] sm:$0xff] %v7468_v8 }
0x1d62   : > { %v7031_v55 = vpop.f32.mrf.mxu2 }
0x1d63   : > { %v7032_v10 = vadd.f32 %v7031_v55, %v5001_v14  ;;  %v7050_v11 = vpop.f32.mrf.mxu3  ;;  %v6995_v1 = vpop.f32.mrf.mxu0 }
0x1d64   : > { %v7051_v50 = vadd.f32 %v7050_v11, %v5002_v48  ;;  %v6996_v26 = vadd.f32 %v6995_v1, %v4999_v4  ;;  %v7014_v21 = vpop.f32.mrf.mxu1 }
0x1d65   : > { %v7015_v40 = vadd.f32 %v7014_v21, %v5000_v9 }
0x1d66   : > { %v7469_v27 = vpack.c.bf16 %v7051_v50, %v7032_v10 }
0x1d67   : > { %v7508_v12 = vpack.c.bf16 %v7015_v40, %v6996_v26 }
0x1d68   : > { %7629 = vst [vmem:[%s12248_s19 + $0xe8] sm:$0xff] %v7469_v27 }
0x1d69   : > { %7668 = vst [vmem:[%s12248_s19 + $0x220] sm:$0xff] %v7508_v12  ;;  %v14282_v12 = vld [vmem:[%s12246_s1 + $0x40] sm:$0xff] }
0x1d6a   : > { %v7033_v37 = vpop.f32.mrf.mxu2 }
0x1d6b   : > { %v7034_v30 = vadd.f32 %v7033_v37, %v5001_v14  ;;  %v7052_v62 = vpop.f32.mrf.mxu3  ;;  %v6998_v15 = vpop.f32.mrf.mxu0 }
0x1d6c   : > { %v7053_v52 = vadd.f32 %v7052_v62, %v5002_v48  ;;  %v6999_v28 = vadd.f32 %v6998_v15, %v4999_v4  ;;  %v7017_v17 = vpop.f32.mrf.mxu1  ;;  %v5007_v62 = vperm.slane %v14282_v12, 0 }
0x1d6d   : > { %v7018_v25 = vadd.f32 %v7017_v17, %v5000_v9 }
0x1d6e   : > { %v7509_v56 = vpack.c.bf16 %v7053_v52, %v7034_v30  ;;  %9677 = vmatmul.msk.bf16.gmra.mxu0 %vm5913_vm9, %v13989_v57  ;;  %9679 = vmatmul.msk.bf16.gmra.mxu1 %vm5913_vm9, %v13989_v57 }
0x1d6f   : > { %v7548_v35 = vpack.c.bf16 %v7018_v25, %v6999_v28  ;;  %9681 = vmatmul.msk.bf16.gmra.mxu2 %vm5913_vm9, %v13989_v57 }
0x1d70   : > { %7669 = vst [vmem:[%s12248_s19 + $0x228] sm:$0xff] %v7509_v56  ;;  %9683 = vmatmul.msk.bf16.gmra.mxu3 %vm5913_vm9, %v13989_v57 }
0x1d71   : > { %7708 = vst [vmem:[%s12248_s19 + $0x360] sm:$0xff] %v7548_v35 }
0x1d72   : > { %v7036_v36 = vpop.f32.mrf.mxu2 }
0x1d73   : > { %v7037_v7 = vadd.f32 %v7036_v36, %v5001_v14  ;;  %v7055_v38 = vpop.f32.mrf.mxu3  ;;  %v7000_v29 = vpop.f32.mrf.mxu0 }
0x1d74   : > { %v7056_v46 = vadd.f32 %v7055_v38, %v5002_v48  ;;  %v7001_v6 = vadd.f32 %v7000_v29, %v4999_v4  ;;  %v7019_v58 = vpop.f32.mrf.mxu1  ;;  %v5009_v29 = vperm.slane %v14282_v12, 2 }
0x1d75   : > { %v7020_v5 = vadd.f32 %v7019_v58, %v5000_v9  ;;  %v5005_v9 = vperm.slane %v14217_v13, 6 }
0x1d76   : > { %v7549_v51 = vpack.c.bf16 %v7056_v46, %v7037_v7  ;;  %v5010_v46 = vperm.slane %v14282_v12, 3 }
0x1d77   : > { %v7588_v3 = vpack.c.bf16 %v7020_v5, %v7001_v6 }
0x1d78   : > { %7709 = vst [vmem:[%s12248_s19 + $0x368] sm:$0xff] %v7549_v51 }
0x1d79   : > { %7748 = vst [vmem:[%s12248_s19 + $0x4a0] sm:$0xff] %v7588_v3 }
0x1d7a   : > { %v7038_v49 = vpop.f32.mrf.mxu2 }
0x1d7b   : > { %v7039_v20 = vadd.f32 %v7038_v49, %v5001_v14  ;;  %v7057_v33 = vpop.f32.mrf.mxu3  ;;  %v7069_v16 = vpop.f32.mrf.mxu0 }
0x1d7c   : > { %v7058_v42 = vadd.f32 %v7057_v33, %v5002_v48  ;;  %v7070_v41 = vadd.f32 %v7069_v16, %v5003_v31  ;;  %v7088_v23 = vpop.f32.mrf.mxu1 }
0x1d7d   : > { %v7089_v19 = vadd.f32 %v7088_v23, %v5004_v60 }
0x1d7e   : > { %v7589_v2 = vpack.c.bf16 %v7058_v42, %v7039_v20  ;;  %9684 = vmatmul.msk.bf16.vlgmr.msrb.gmra.mxu0 %vm5913_vm9, %v13953_v34  ;;  %9686 = vmatmul.msk.bf16.vlgmr.msrb.gmra.mxu1 %vm5913_vm9, %v13953_v34 }
0x1d7f   : > { %v7470_v4 = vpack.c.bf16 %v7089_v19, %v7070_v41  ;;  %9688 = vmatmul.msk.bf16.vlgmr.msrb.gmra.mxu2 %vm5913_vm9, %v13953_v34 }
0x1d80   : > { %7749 = vst [vmem:[%s12248_s19 + $0x4a8] sm:$0xff] %v7589_v2  ;;  %9690 = vmatmul.msk.bf16.vlgmr.msrb.gmra.mxu3 %vm5913_vm9, %v13953_v34 }
0x1d81   : > { %7630 = vst [vmem:[%s12248_s19 + $0xf0] sm:$0xff] %v7470_v4 }
0x1d82   : > { %v7107_v47 = vpop.f32.mrf.mxu2 }
0x1d83   : > { %v7108_v59 = vadd.f32 %v7107_v47, %v5005_v9  ;;  %v7126_v54 = vpop.f32.mrf.mxu3  ;;  %v7071_v22 = vpop.f32.mrf.mxu0 }
0x1d84   : > { %v7127_v32 = vadd.f32 %v7126_v54, %v5006_v0  ;;  %v7072_v45 = vadd.f32 %v7071_v22, %v5003_v31  ;;  %v7090_v39 = vpop.f32.mrf.mxu1 }
0x1d85   : > { %v7091_v24 = vadd.f32 %v7090_v39, %v5004_v60 }
0x1d86   : > { %v7471_v61 = vpack.c.bf16 %v7127_v32, %v7108_v59 }
0x1d87   : > { %v7510_v53 = vpack.c.bf16 %v7091_v24, %v7072_v45 }
0x1d88   : > { %7631 = vst [vmem:[%s12248_s19 + $0xf8] sm:$0xff] %v7471_v61 }
0x1d89   : > { %7670 = vst [vmem:[%s12248_s19 + $0x230] sm:$0xff] %v7510_v53 }
0x1d8a   : > { %v7109_v44 = vpop.f32.mrf.mxu2 }
0x1d8b   : > { %v7110_v43 = vadd.f32 %v7109_v44, %v5005_v9  ;;  %v7128_v34 = vpop.f32.mrf.mxu3  ;;  %v7074_v63 = vpop.f32.mrf.mxu0 }
0x1d8c   : > { %v7129_v13 = vadd.f32 %v7128_v34, %v5006_v0  ;;  %v7075_v18 = vadd.f32 %v7074_v63, %v5003_v31  ;;  %v7093_v8 = vpop.f32.mrf.mxu1  ;;  %v5012_v34 = vperm.slane %v14282_v12, 5 }
0x1d8d   : > { %v7094_v14 = vadd.f32 %v7093_v8, %v5004_v60 }
0x1d8e   : > { %v7511_v48 = vpack.c.bf16 %v7129_v13, %v7110_v43  ;;  %9685 = vmatmul.msk.bf16.gmra.mxu0 %vm5913_vm9, %v13989_v57  ;;  %9687 = vmatmul.msk.bf16.gmra.mxu1 %vm5913_vm9, %v13989_v57  ;;  %v5011_v43 = vperm.slane %v14282_v12, 4 }
0x1d8f   : > { %v7550_v55 = vpack.c.bf16 %v7094_v14, %v7075_v18  ;;  %9689 = vmatmul.msk.bf16.gmra.mxu2 %vm5913_vm9, %v13989_v57 }
0x1d90   : > { %7671 = vst [vmem:[%s12248_s19 + $0x238] sm:$0xff] %v7511_v48  ;;  %9691 = vmatmul.msk.bf16.gmra.mxu3 %vm5913_vm9, %v13989_v57  ;;  %v5008_v57 = vperm.slane %v14282_v12, 1 }
0x1d91   : > { %7710 = vst [vmem:[%s12248_s19 + $0x370] sm:$0xff] %v7550_v55 }
0x1d92   : > { %v7112_v10 = vpop.f32.mrf.mxu2 }
0x1d93   : > { %v7113_v11 = vadd.f32 %v7112_v10, %v5005_v9  ;;  %v7131_v1 = vpop.f32.mrf.mxu3  ;;  %v7076_v50 = vpop.f32.mrf.mxu0 }
0x1d94   : > { %v7132_v26 = vadd.f32 %v7131_v1, %v5006_v0  ;;  %v7077_v21 = vadd.f32 %v7076_v50, %v5003_v31  ;;  %v7095_v40 = vpop.f32.mrf.mxu1  ;;  %v5013_v50 = vperm.slane %v14282_v12, 6 }
0x1d95   : > { %v7096_v27 = vadd.f32 %v7095_v40, %v5004_v60 }
0x1d96   : > { %v7551_v37 = vpack.c.bf16 %v7132_v26, %v7113_v11  ;;  %v5014_v26 = vperm.slane %v14282_v12, 7 }
0x1d97   : > { %v7590_v30 = vpack.c.bf16 %v7096_v27, %v7077_v21 }
0x1d98   : > { %7711 = vst [vmem:[%s12248_s19 + $0x378] sm:$0xff] %v7551_v37 }
0x1d99   : > { %7750 = vst [vmem:[%s12248_s19 + $0x4b0] sm:$0xff] %v7590_v30 }
0x1d9a   : > { %v7114_v15 = vpop.f32.mrf.mxu2 }
0x1d9b   : > { %v7115_v52 = vadd.f32 %v7114_v15, %v5005_v9  ;;  %v7133_v28 = vpop.f32.mrf.mxu3  ;;  %v7145_v17 = vpop.f32.mrf.mxu0 }
0x1d9c   : > { %v7134_v25 = vadd.f32 %v7133_v28, %v5006_v0  ;;  %v7146_v56 = vadd.f32 %v7145_v17, %v5007_v62  ;;  %v7164_v35 = vpop.f32.mrf.mxu1 }
0x1d9d   : > { %v7165_v36 = vadd.f32 %v7164_v35, %v5008_v57 }
0x1d9e   : > { %v7591_v7 = vpack.c.bf16 %v7134_v25, %v7115_v52 }
0x1d9f   : > { %v7472_v38 = vpack.c.bf16 %v7165_v36, %v7146_v56 }
0x1da0   : > { %7751 = vst [vmem:[%s12248_s19 + $0x4b8] sm:$0xff] %v7591_v7 }
0x1da1   : > { %7632 = vst [vmem:[%s12248_s19 + $0x100] sm:$0xff] %v7472_v38 }
0x1da2   : > { %v7183_v6 = vpop.f32.mrf.mxu2 }
0x1da3   : > { %v7184_v58 = vadd.f32 %v7183_v6, %v5009_v29  ;;  %v7202_v5 = vpop.f32.mrf.mxu3  ;;  %v7147_v51 = vpop.f32.mrf.mxu0 }
0x1da4   : > { %v7203_v3 = vadd.f32 %v7202_v5, %v5010_v46  ;;  %v7148_v31 = vadd.f32 %v7147_v51, %v5007_v62  ;;  %v7166_v60 = vpop.f32.mrf.mxu1 }
0x1da5   : > { %v7167_v49 = vadd.f32 %v7166_v60, %v5008_v57 }
0x1da6   : > { %v7473_v20 = vpack.c.bf16 %v7203_v3, %v7184_v58 }
0x1da7   : > { %v7512_v33 = vpack.c.bf16 %v7167_v49, %v7148_v31 }
0x1da8   : > { %7633 = vst [vmem:[%s12248_s19 + $0x108] sm:$0xff] %v7473_v20  ;;  %v14309_v20 = vld [vmem:[%s12246_s1 + $0x48] sm:$0xff]  ;;  %s7768_s1 = ssub.s32 (%p11826_p10), 235, %s7767_s18 }
0x1da9   : > { %7672 = vst [vmem:[%s12248_s19 + $0x240] sm:$0xff] %v7512_v33  ;;  %p7769_p5 = scmp.lt.s32.totalorder (%p11826_p10), %s7768_s1, 80 }
0x1daa   : > { %v7185_v16 = vpop.f32.mrf.mxu2 }
0x1dab   : > { %v7186_v42 = vadd.f32 %v7185_v16, %v5009_v29  ;;  %v7204_v41 = vpop.f32.mrf.mxu3  ;;  %v7150_v23 = vpop.f32.mrf.mxu0 }
0x1dac   : > { %v7205_v19 = vadd.f32 %v7204_v41, %v5010_v46  ;;  %v7151_v2 = vadd.f32 %v7150_v23, %v5007_v62  ;;  %v7169_v4 = vpop.f32.mrf.mxu1  ;;  %v5016_v41 = vperm.slane %v14309_v20, 1 }
0x1dad   : > { %v7170_v9 = vadd.f32 %v7169_v4, %v5008_v57 }
0x1dae   : > { %v7513_v0 = vpack.c.bf16 %v7205_v19, %v7186_v42  ;;  %v5015_v42 = vperm.slane %v14309_v20, 0 }
0x1daf   : > { %v7552_v47 = vpack.c.bf16 %v7170_v9, %v7151_v2 }
0x1db0   : > { %7673 = vst [vmem:[%s12248_s19 + $0x248] sm:$0xff] %v7513_v0 }
0x1db1   : > { %7712 = vst [vmem:[%s12248_s19 + $0x380] sm:$0xff] %v7552_v47 }
0x1db2   : > { %v7188_v59 = vpop.f32.mrf.mxu2 }
0x1db3   : > { %v7189_v54 = vadd.f32 %v7188_v59, %v5009_v29  ;;  %v7207_v22 = vpop.f32.mrf.mxu3  ;;  %v7152_v32 = vpop.f32.mrf.mxu0 }
0x1db4   : > { %v7208_v45 = vadd.f32 %v7207_v22, %v5010_v46  ;;  %v7153_v39 = vadd.f32 %v7152_v32, %v5007_v62  ;;  %v7171_v24 = vpop.f32.mrf.mxu1  ;;  %v5017_v32 = vperm.slane %v14309_v20, 2 }
0x1db5   : > { %v7172_v61 = vadd.f32 %v7171_v24, %v5008_v57 }
0x1db6   : > { %v7553_v53 = vpack.c.bf16 %v7208_v45, %v7189_v54  ;;  %v5018_v45 = vperm.slane %v14309_v20, 3 }
0x1db7   : > { %v7592_v44 = vpack.c.bf16 %v7172_v61, %v7153_v39 }
0x1db8   : > { %7713 = vst [vmem:[%s12248_s19 + $0x388] sm:$0xff] %v7553_v53 }
0x1db9   : > { %7752 = vst [vmem:[%s12248_s19 + $0x4c0] sm:$0xff] %v7592_v44 }
0x1dba   : > { %v7190_v63 = vpop.f32.mrf.mxu2 }
0x1dbb   : > { %v7191_v13 = vadd.f32 %v7190_v63, %v5009_v29  ;;  %v7209_v18 = vpop.f32.mrf.mxu3  ;;  %v7221_v8 = vpop.f32.mrf.mxu0 }
0x1dbc   : > { %v7210_v14 = vadd.f32 %v7209_v18, %v5010_v46  ;;  %v7222_v48 = vadd.f32 %v7221_v8, %v5011_v43  ;;  %v7240_v55 = vpop.f32.mrf.mxu1 }
0x1dbd   : > { %v7241_v10 = vadd.f32 %v7240_v55, %v5012_v34 }
0x1dbe   : > { %v7593_v11 = vpack.c.bf16 %v7210_v14, %v7191_v13 }
0x1dbf   : > { %v7474_v1 = vpack.c.bf16 %v7241_v10, %v7222_v48 }
0x1dc0   : > { %7753 = vst [vmem:[%s12248_s19 + $0x4c8] sm:$0xff] %v7593_v11 }
0x1dc1   : > { %7634 = vst [vmem:[%s12248_s19 + $0x110] sm:$0xff] %v7474_v1 }
0x1dc2   : > { %v7259_v21 = vpop.f32.mrf.mxu2 }
0x1dc3   : > { %v7260_v40 = vadd.f32 %v7259_v21, %v5013_v50  ;;  %v7278_v27 = vpop.f32.mrf.mxu3  ;;  %v7223_v37 = vpop.f32.mrf.mxu0 }
0x1dc4   : > { %v7279_v30 = vadd.f32 %v7278_v27, %v5014_v26  ;;  %v7224_v62 = vadd.f32 %v7223_v37, %v5011_v43  ;;  %v7242_v57 = vpop.f32.mrf.mxu1 }
0x1dc5   : > { %v7243_v15 = vadd.f32 %v7242_v57, %v5012_v34 }
0x1dc6   : > { %v7475_v52 = vpack.c.bf16 %v7279_v30, %v7260_v40 }
0x1dc7   : > { %v7514_v28 = vpack.c.bf16 %v7243_v15, %v7224_v62 }
0x1dc8   : > { %7635 = vst [vmem:[%s12248_s19 + $0x118] sm:$0xff] %v7475_v52 }
0x1dc9   : > { %7674 = vst [vmem:[%s12248_s19 + $0x250] sm:$0xff] %v7514_v28 }
0x1dca   : > { %v7261_v17 = vpop.f32.mrf.mxu2 }
0x1dcb   : > { %v7262_v25 = vadd.f32 %v7261_v17, %v5013_v50  ;;  %v7280_v56 = vpop.f32.mrf.mxu3  ;;  %v7226_v35 = vpop.f32.mrf.mxu0 }
0x1dcc   : > { %v7281_v12 = vadd.f32 %v7280_v56, %v5014_v26  ;;  %v7227_v36 = vadd.f32 %v7226_v35, %v5011_v43  ;;  %v7245_v7 = vpop.f32.mrf.mxu1  ;;  %v5020_v56 = vperm.slane %v14309_v20, 5 }
0x1dcd   : > { %v7246_v38 = vadd.f32 %v7245_v7, %v5012_v34 }
0x1dce   : > { %v7515_v29 = vpack.c.bf16 %v7281_v12, %v7262_v25  ;;  %v5019_v25 = vperm.slane %v14309_v20, 4 }
0x1dcf   : > { %v7554_v46 = vpack.c.bf16 %v7246_v38, %v7227_v36 }
0x1dd0   : > { %7675 = vst [vmem:[%s12248_s19 + $0x258] sm:$0xff] %v7515_v29 }
0x1dd1   : > { %7714 = vst [vmem:[%s12248_s19 + $0x390] sm:$0xff] %v7554_v46 }
0x1dd2   : > { %v7264_v6 = vpop.f32.mrf.mxu2 }
0x1dd3   : > { %v7265_v58 = vadd.f32 %v7264_v6, %v5013_v50  ;;  %v7283_v5 = vpop.f32.mrf.mxu3  ;;  %v7228_v51 = vpop.f32.mrf.mxu0 }
0x1dd4   : > { %v7284_v3 = vadd.f32 %v7283_v5, %v5014_v26  ;;  %v7229_v31 = vadd.f32 %v7228_v51, %v5011_v43  ;;  %v7247_v60 = vpop.f32.mrf.mxu1  ;;  %v5021_v51 = vperm.slane %v14309_v20, 6 }
0x1dd5   : > { %v7248_v49 = vadd.f32 %v7247_v60, %v5012_v34 }
0x1dd6   : > { %v7555_v33 = vpack.c.bf16 %v7284_v3, %v7265_v58  ;;  %v5022_v3 = vperm.slane %v14309_v20, 7 }
0x1dd7   : > { %v7594_v16 = vpack.c.bf16 %v7248_v49, %v7229_v31 }
0x1dd8   : > { %7715 = vst [vmem:[%s12248_s19 + $0x398] sm:$0xff] %v7555_v33 }
0x1dd9   : > { %7754 = vst [vmem:[%s12248_s19 + $0x4d0] sm:$0xff] %v7594_v16 }
0x1dda   : > { %v7266_v23 = vpop.f32.mrf.mxu2 }
0x1ddb   : > { %v7267_v19 = vadd.f32 %v7266_v23, %v5013_v50  ;;  %v7285_v2 = vpop.f32.mrf.mxu3  ;;  %v7297_v4 = vpop.f32.mrf.mxu0 }
0x1ddc   : > { %v7286_v9 = vadd.f32 %v7285_v2, %v5014_v26  ;;  %v7298_v0 = vadd.f32 %v7297_v4, %v5015_v42  ;;  %v7316_v47 = vpop.f32.mrf.mxu1 }
0x1ddd   : > { %v7317_v59 = vadd.f32 %v7316_v47, %v5016_v41 }
0x1dde   : > { %v7595_v54 = vpack.c.bf16 %v7286_v9, %v7267_v19 }
0x1ddf   : > { %v7476_v22 = vpack.c.bf16 %v7317_v59, %v7298_v0 }
0x1de0   : > { %7755 = vst [vmem:[%s12248_s19 + $0x4d8] sm:$0xff] %v7595_v54 }
0x1de1   : > { %7636 = vst [vmem:[%s12248_s19 + $0x120] sm:$0xff] %v7476_v22 }
0x1de2   : > { %v7335_v39 = vpop.f32.mrf.mxu2 }
0x1de3   : > { %v7336_v24 = vadd.f32 %v7335_v39, %v5017_v32  ;;  %v7354_v61 = vpop.f32.mrf.mxu3  ;;  %v7299_v53 = vpop.f32.mrf.mxu0 }
0x1de4   : > { %v7355_v44 = vadd.f32 %v7354_v61, %v5018_v45  ;;  %v7300_v43 = vadd.f32 %v7299_v53, %v5015_v42  ;;  %v7318_v34 = vpop.f32.mrf.mxu1 }
0x1de5   : > { %v7319_v63 = vadd.f32 %v7318_v34, %v5016_v41 }
0x1de6   : > { %v7477_v13 = vpack.c.bf16 %v7355_v44, %v7336_v24 }
0x1de7   : > { %v7516_v18 = vpack.c.bf16 %v7319_v63, %v7300_v43 }
0x1de8   : > { %7637 = vst [vmem:[%s12248_s19 + $0x128] sm:$0xff] %v7477_v13 }
0x1de9   : > { %7676 = vst [vmem:[%s12248_s19 + $0x260] sm:$0xff] %v7516_v18 }
0x1dea   : > { %v7337_v8 = vpop.f32.mrf.mxu2 }
0x1deb   : > { %v7338_v14 = vadd.f32 %v7337_v8, %v5017_v32  ;;  %v7356_v48 = vpop.f32.mrf.mxu3  ;;  %v7302_v55 = vpop.f32.mrf.mxu0 }
0x1dec   : > { %v7357_v10 = vadd.f32 %v7356_v48, %v5018_v45  ;;  %v7303_v11 = vadd.f32 %v7302_v55, %v5015_v42  ;;  %v7321_v1 = vpop.f32.mrf.mxu1 }
0x1ded   : > { %v7322_v50 = vadd.f32 %v7321_v1, %v5016_v41 }
0x1dee   : > { %v7517_v26 = vpack.c.bf16 %v7357_v10, %v7338_v14 }
0x1def   : > { %v7556_v21 = vpack.c.bf16 %v7322_v50, %v7303_v11 }
0x1df0   : > { %7677 = vst [vmem:[%s12248_s19 + $0x268] sm:$0xff] %v7517_v26 }
0x1df1   : > { %7716 = vst [vmem:[%s12248_s19 + $0x3a0] sm:$0xff] %v7556_v21 }
0x1df2   : > { %v7340_v40 = vpop.f32.mrf.mxu2 }
0x1df3   : > { %v7341_v27 = vadd.f32 %v7340_v40, %v5017_v32  ;;  %v7359_v37 = vpop.f32.mrf.mxu3  ;;  %v7304_v30 = vpop.f32.mrf.mxu0 }
0x1df4   : > { %v7360_v62 = vadd.f32 %v7359_v37, %v5018_v45  ;;  %v7305_v57 = vadd.f32 %v7304_v30, %v5015_v42  ;;  %v7323_v15 = vpop.f32.mrf.mxu1 }
0x1df5   : > { %v7324_v52 = vadd.f32 %v7323_v15, %v5016_v41 }
0x1df6   : > { %v7557_v28 = vpack.c.bf16 %v7360_v62, %v7341_v27 }
0x1df7   : > { %v7596_v17 = vpack.c.bf16 %v7324_v52, %v7305_v57 }
0x1df8   : > { %7717 = vst [vmem:[%s12248_s19 + $0x3a8] sm:$0xff] %v7557_v28 }
0x1df9   : > { %7756 = vst [vmem:[%s12248_s19 + $0x4e0] sm:$0xff] %v7596_v17 }
0x1dfa   : > { %v7342_v35 = vpop.f32.mrf.mxu2 }
0x1dfb   : > { %v7343_v12 = vadd.f32 %v7342_v35, %v5017_v32  ;;  %v7361_v36 = vpop.f32.mrf.mxu3  ;;  %v7373_v7 = vpop.f32.mrf.mxu0 }
0x1dfc   : > { %v7362_v38 = vadd.f32 %v7361_v36, %v5018_v45  ;;  %v7374_v29 = vadd.f32 %v7373_v7, %v5019_v25  ;;  %v7392_v46 = vpop.f32.mrf.mxu1 }
0x1dfd   : > { %v7393_v6 = vadd.f32 %v7392_v46, %v5020_v56 }
0x1dfe   : > { %v7597_v58 = vpack.c.bf16 %v7362_v38, %v7343_v12 }
0x1dff   : > { %v7478_v5 = vpack.c.bf16 %v7393_v6, %v7374_v29 }
0x1e00   : > { %7757 = vst [vmem:[%s12248_s19 + $0x4e8] sm:$0xff] %v7597_v58 }
0x1e01   : > { %7638 = vst [vmem:[%s12248_s19 + $0x130] sm:$0xff] %v7478_v5 }
0x1e02   : > { %v7411_v31 = vpop.f32.mrf.mxu2 }
0x1e03   : > { %v7412_v60 = vadd.f32 %v7411_v31, %v5021_v51  ;;  %v7430_v49 = vpop.f32.mrf.mxu3  ;;  %v7375_v33 = vpop.f32.mrf.mxu0 }
0x1e04   : > { %v7431_v16 = vadd.f32 %v7430_v49, %v5022_v3  ;;  %v7376_v42 = vadd.f32 %v7375_v33, %v5019_v25  ;;  %v7394_v41 = vpop.f32.mrf.mxu1 }
0x1e05   : > { %v7395_v23 = vadd.f32 %v7394_v41, %v5020_v56 }
0x1e06   : > { %v7479_v19 = vpack.c.bf16 %v7431_v16, %v7412_v60 }
0x1e07   : > { %v7518_v2 = vpack.c.bf16 %v7395_v23, %v7376_v42 }
0x1e08   : > { %7639 = vst [vmem:[%s12248_s19 + $0x138] sm:$0xff] %v7479_v19 }
0x1e09   : > { %7678 = vst [vmem:[%s12248_s19 + $0x270] sm:$0xff] %v7518_v2 }
0x1e0a   : > { %v7413_v4 = vpop.f32.mrf.mxu2 }
0x1e0b   : > { %v7414_v9 = vadd.f32 %v7413_v4, %v5021_v51  ;;  %v7432_v0 = vpop.f32.mrf.mxu3  ;;  %v7378_v47 = vpop.f32.mrf.mxu0 }
0x1e0c   : > { %v7433_v20 = vadd.f32 %v7432_v0, %v5022_v3  ;;  %v7379_v59 = vadd.f32 %v7378_v47, %v5019_v25  ;;  %v7397_v54 = vpop.f32.mrf.mxu1 }
0x1e0d   : > { %v7398_v22 = vadd.f32 %v7397_v54, %v5020_v56 }
0x1e0e   : > { %v7519_v32 = vpack.c.bf16 %v7433_v20, %v7414_v9 }
0x1e0f   : > { %v7558_v45 = vpack.c.bf16 %v7398_v22, %v7379_v59 }
0x1e10   : > { %7679 = vst [vmem:[%s12248_s19 + $0x278] sm:$0xff] %v7519_v32 }
0x1e11   : > { %7718 = vst [vmem:[%s12248_s19 + $0x3b0] sm:$0xff] %v7558_v45 }
0x1e12   : > { %v7416_v39 = vpop.f32.mrf.mxu2 }
0x1e13   : > { %v7417_v24 = vadd.f32 %v7416_v39, %v5021_v51  ;;  %v7435_v61 = vpop.f32.mrf.mxu3  ;;  %v7380_v53 = vpop.f32.mrf.mxu0 }
0x1e14   : > { %v7436_v44 = vadd.f32 %v7435_v61, %v5022_v3  ;;  %v7381_v43 = vadd.f32 %v7380_v53, %v5019_v25  ;;  %v7399_v34 = vpop.f32.mrf.mxu1 }
0x1e15   : > { %v7400_v63 = vadd.f32 %v7399_v34, %v5020_v56 }
0x1e16   : > { %v7559_v13 = vpack.c.bf16 %v7436_v44, %v7417_v24 }
0x1e17   : > { %v7598_v18 = vpack.c.bf16 %v7400_v63, %v7381_v43 }
0x1e18   : > { %7719 = vst [vmem:[%s12248_s19 + $0x3b8] sm:$0xff] %v7559_v13 }
0x1e19   : > { %7758 = vst [vmem:[%s12248_s19 + $0x4f0] sm:$0xff] %v7598_v18 }
0x1e1a   : > { %v7418_v8 = vpop.f32.mrf.mxu2 }
0x1e1b   : > { %v7419_v14 = vadd.f32 %v7418_v8, %v5021_v51  ;;  %v7437_v48 = vpop.f32.mrf.mxu3 }
0x1e1c   : > { %v7438_v55 = vadd.f32 %v7437_v48, %v5022_v3  ;;  %7766 = sbr.rel (!%p11826_p10) target bundleno = 7867 (0x1ebb), region = 288 }
0x1e1e   : > { %v7599_v10 = vpack.c.bf16 %v7438_v55, %v7419_v14 }
0x1e20   : > { %7759 = vst [vmem:[%s12248_s19 + $0x4f8] sm:$0xff] %v7599_v10 }
0x1e21   : > { %s14853_s1 = smov (!%p7769_p5, %s7768_s1), 80 }
0x1e22   : > { %s9692_s7 = sshll.u32 %s14853_s1, 4  ;;  %s14345_s11 = sshll.u32 %s14853_s1, 2 }
0x1e23   : > { %p9696_p8 = scmp.eq.s32.totalorder %s9692_s7, 0 }
0x1e24   : > { %p7779_p11 = scmp.lt.u32.totalorder (!%p9696_p8), %s14345_s11, 8 }
0x1e25   : > { %7778 = sbr.rel (%p9696_p8) target bundleno = 7867 (0x1ebb), region = 292 }
0x1e2a   : > { %7782 = sbr.rel (%p7779_p11) target bundleno = 7855 (0x1eaf), region = 296  ;;  %s14349_s13 = sand.u32 (!%p7779_p11), 7, %s14345_s11  }
0x1e2b   : > { %p7805_p10 = scmp.eq.s32.totalorder (!%p7779_p11), %s14349_s13, 0  ;;  %p9697_p1 = scmp.ne.s32.totalorder (!%p7779_p11), %s14349_s13, 0 }
0x1e2f   : > { %7808 = sbr.rel (%p9697_p1) target bundleno = 7787 (0x1e6b), region = 311  ;;  %s14736_s15 = sshrl.u32 (!%p9697_p1), %s14345_s11, 3 }
0x1e30   : > { %s14356_s2 = sshrl.u32 (!%p9697_p1), %s14736_s15, 3 }
0x1e31   : > { %p9698_p4 = scmp.le.s32.totalorder (!%p9697_p1), %s14356_s2, 0 }
0x1e34   : > { %8159 = sbr.rel (%p9698_p4) target bundleno = 7770 (0x1e5a), region = 483  ;;  %s14831_s18 = smov (!%p9698_p4), %s14343_s10 }
0x1e35   : > { %s14832_s4 = smov (!%p9698_p4), %s12248_s19  ;;  %s14365_s1 = smov (!%p9698_p4), 0  }
0x1e36   : > { %s14367_s7 = smov (!%p9698_p4), 0  }
0x1e39 LB: >> { %v7820_v11 = vld [vmem:[%s11452_s4] sm:$0xff]  ;;  %v7822_v1 = vld [vmem:[%s11452_s4 + $0x8] sm:$0xff]  ;;  %v7824_v50 = vld [vmem:[%s11452_s4 + $0x10] sm:$0xff]  ;;  %s7884_s15 = sadd.s32 1, %s11456_s1  ;;  %s7814_s7 = sadd.s32 1, %s11460_s7   ;;  %s11460_s7 = sphi %s14367_s7, %s7814_s7   ;;  %s11456_s1 = sphi %s14365_s1, %s14835_s1   ;;  %s11452_s4 = sphi %s14832_s4, %s14834_s4   ;;  %s11448_s18 = sphi %s14831_s18, %s14833_s18  }
0x1e3a   : >> { %7821 = vst [vmem:[%s11448_s18] sm:$0xff] %v7820_v11  ;;  %v7826_v26 = vld [vmem:[%s11452_s4 + $0x18] sm:$0xff]  ;;  %p7885_p0 = scmp.ge.s32.totalorder %s7884_s15, %s14356_s2  ;;  %v7828_v21 = vld [vmem:[%s11452_s4 + $0x20] sm:$0xff]  ;;  %v7830_v40 = vld [vmem:[%s11452_s4 + $0x28] sm:$0xff]  ;;  %p7813_p2 = scmp.ge.s32.totalorder %s7814_s7, %s14356_s2 }
0x1e3b   : >> { %7823 = vst [vmem:[%s11448_s18 + $0x8] sm:$0xff] %v7822_v1  ;;  %v7832_v27 = vld [vmem:[%s11452_s4 + $0x30] sm:$0xff]  ;;  %v7834_v37 = vld [vmem:[%s11452_s4 + $0x38] sm:$0xff]  ;;  %v7836_v30 = vld [vmem:[%s11452_s4 + $0x140] sm:$0xff] }
0x1e3c   : >> { %7825 = vst [vmem:[%s11448_s18 + $0x10] sm:$0xff] %v7824_v50  ;;  %s14855_s15 = smov (%p7885_p0, %s7884_s15), 0  ;;  %v7838_v62 = vld [vmem:[%s11452_s4 + $0x148] sm:$0xff]  ;;  %v7840_v57 = vld [vmem:[%s11452_s4 + $0x150] sm:$0xff]  ;;  %v7842_v15 = vld [vmem:[%s11452_s4 + $0x158] sm:$0xff] }
0x1e3d   : >> { %7827 = vst [vmem:[%s11448_s18 + $0x18] sm:$0xff] %v7826_v26  ;;  %s9699_s1 = sshll.u32 %s14855_s15, 6  ;;  %v7844_v52 = vld [vmem:[%s11452_s4 + $0x160] sm:$0xff]  ;;  %v7846_v28 = vld [vmem:[%s11452_s4 + $0x168] sm:$0xff]  ;;  %v7848_v17 = vld [vmem:[%s11452_s4 + $0x170] sm:$0xff] }
0x1e3e   : >> { %7829 = vst [vmem:[%s11448_s18 + $0x20] sm:$0xff] %v7828_v21  ;;  %s14399_s3 = scalar_lea.vmem %s12248_s19, %s9699_s1 [#allocation45]   ;;  %s14402_s5 = scalar_lea.vmem %s14343_s10, %s9699_s1   ;;  %v7850_v25 = vld [vmem:[%s11452_s4 + $0x178] sm:$0xff]  ;;  %v7852_v56 = vld [vmem:[%s11452_s4 + $0x280] sm:$0xff]  ;;  %v7854_v35 = vld [vmem:[%s11452_s4 + $0x288] sm:$0xff] }
0x1e3f   : >> { %7831 = vst [vmem:[%s11448_s18 + $0x28] sm:$0xff] %v7830_v40  ;;  %v7856_v12 = vld [vmem:[%s11452_s4 + $0x290] sm:$0xff]  ;;  %v7858_v36 = vld [vmem:[%s11452_s4 + $0x298] sm:$0xff]  ;;  %v7860_v7 = vld [vmem:[%s11452_s4 + $0x2a0] sm:$0xff]  ;;  %s14835_s1 = smov %s14855_s15 }
0x1e40   : >> { %7833 = vst [vmem:[%s11448_s18 + $0x30] sm:$0xff] %v7832_v27  ;;  %v7862_v38 = vld [vmem:[%s11452_s4 + $0x2a8] sm:$0xff]  ;;  %v7864_v29 = vld [vmem:[%s11452_s4 + $0x2b0] sm:$0xff]  ;;  %v7866_v46 = vld [vmem:[%s11452_s4 + $0x2b8] sm:$0xff] }
0x1e41   : >> { %7835 = vst [vmem:[%s11448_s18 + $0x38] sm:$0xff] %v7834_v37  ;;  %v7868_v6 = vld [vmem:[%s11452_s4 + $0x3c0] sm:$0xff]  ;;  %v7870_v58 = vld [vmem:[%s11452_s4 + $0x3c8] sm:$0xff]  ;;  %v7872_v5 = vld [vmem:[%s11452_s4 + $0x3d0] sm:$0xff] }
0x1e42   : >> { %7837 = vst [vmem:[%s11448_s18 + $0x3ac] sm:$0xff] %v7836_v30  ;;  %v7874_v51 = vld [vmem:[%s11452_s4 + $0x3d8] sm:$0xff]  ;;  %v7876_v3 = vld [vmem:[%s11452_s4 + $0x3e0] sm:$0xff]  ;;  %v7878_v31 = vld [vmem:[%s11452_s4 + $0x3e8] sm:$0xff] }
0x1e43   : >> { %7839 = vst [vmem:[%s11448_s18 + $0x3b4] sm:$0xff] %v7838_v62  ;;  %v7880_v60 = vld [vmem:[%s11452_s4 + $0x3f0] sm:$0xff]  ;;  %v7882_v49 = vld [vmem:[%s11452_s4 + $0x3f8] sm:$0xff]  ;;  %s14834_s4 = smov %s14399_s3 }
0x1e44   : >> { %7841 = vst [vmem:[%s11448_s18 + $0x3bc] sm:$0xff] %v7840_v57 }
0x1e45   : >> { %7843 = vst [vmem:[%s11448_s18 + $0x3c4] sm:$0xff] %v7842_v15 }
0x1e46   : >> { %7845 = vst [vmem:[%s11448_s18 + $0x3cc] sm:$0xff] %v7844_v52 }
0x1e47   : >> { %7847 = vst [vmem:[%s11448_s18 + $0x3d4] sm:$0xff] %v7846_v28 }
0x1e48   : >> { %7849 = vst [vmem:[%s11448_s18 + $0x3dc] sm:$0xff] %v7848_v17 }
0x1e49   : >> { %7851 = vst [vmem:[%s11448_s18 + $0x3e4] sm:$0xff] %v7850_v25 }
0x1e4a   : >> { %7853 = vst [vmem:[%s11448_s18 + $0x758] sm:$0xff] %v7852_v56 }
0x1e4b   : >> { %7855 = vst [vmem:[%s11448_s18 + $0x760] sm:$0xff] %v7854_v35 }
0x1e4c   : >> { %7857 = vst [vmem:[%s11448_s18 + $0x768] sm:$0xff] %v7856_v12 }
0x1e4d   : >> { %7859 = vst [vmem:[%s11448_s18 + $0x770] sm:$0xff] %v7858_v36 }
0x1e4e   : >> { %7861 = vst [vmem:[%s11448_s18 + $0x778] sm:$0xff] %v7860_v7 }
0x1e4f   : >> { %7863 = vst [vmem:[%s11448_s18 + $0x780] sm:$0xff] %v7862_v38 }
0x1e50   : >> { %7865 = vst [vmem:[%s11448_s18 + $0x788] sm:$0xff] %v7864_v29 }
0x1e51   : >> { %7867 = vst [vmem:[%s11448_s18 + $0x790] sm:$0xff] %v7866_v46 }
0x1e52   : >> { %7869 = vst [vmem:[%s11448_s18 + $0xb04] sm:$0xff] %v7868_v6 }
0x1e53   : >> { %7871 = vst [vmem:[%s11448_s18 + $0xb0c] sm:$0xff] %v7870_v58 }
0x1e54   : >> { %7873 = vst [vmem:[%s11448_s18 + $0xb14] sm:$0xff] %v7872_v5 }
0x1e55   : >> { %7875 = vst [vmem:[%s11448_s18 + $0xb1c] sm:$0xff] %v7874_v51  ;;  %7816 = sbr.rel (!%p7813_p2) target bundleno = 7737 (0x1e39), region = 489 }
0x1e56   : >> { %7877 = vst [vmem:[%s11448_s18 + $0xb24] sm:$0xff] %v7876_v3 }
0x1e57   : >> { %7879 = vst [vmem:[%s11448_s18 + $0xb2c] sm:$0xff] %v7878_v31 }
0x1e58   : >> { %7881 = vst [vmem:[%s11448_s18 + $0xb34] sm:$0xff] %v7880_v60 }
0x1e59   : >> { %7883 = vst [vmem:[%s11448_s18 + $0xb3c] sm:$0xff] %v7882_v49  ;;  %s14833_s18 = smov %s14402_s5 }
0x1e5a PF: > { %s14836_s6 = sshrl.u32 %s14345_s11, 3  ;;  %s9885_s9 = sshll.u32 %s14356_s2, 6 }
0x1e5b   : > { %s14468_s8 = sand.u32 7, %s14836_s6   ;;  %s14472_s12 = scalar_lea.vmem %s12248_s19, %s9885_s9 [#allocation45]  }
0x1e5c   : > { %s14475_s14 = scalar_lea.vmem %s14343_s10, %s9885_s9   ;;  %p9704_p3 = scmp.le.s32.totalorder %s14468_s8, 0 }
0x1e5d   : > { %s14837_s3 = smov (!%p9704_p3), %s14475_s14  ;;  %s14838_s5 = smov (!%p9704_p3), %s14472_s12 }
0x1e5e   : > { %8173 = sbr.rel (%p9704_p3) target bundleno = 7787 (0x1e6b), region = 494  ;;  %s14484_s15 = smov (!%p9704_p3), 0  }
0x1e5f   : > { %s11474_s18 = smov (!%p9704_p3), 0  }
0x1e63 LB: >> { %v7907_v33 = vld [vmem:[%s11468_s5] sm:$0xff]  ;;  %s7915_s6 = sadd.s32 1, %s11472_s15  ;;  %s7901_s18 = sadd.s32 1, %s11476_s18   ;;  %s11476_s18 = sphi %s11474_s18, %s7901_s18   ;;  %s11472_s15 = sphi %s14484_s15, %s14839_s15   ;;  %s11468_s5 = sphi %s14838_s5, %s7920_s5   ;;  %s11464_s3 = sphi %s14837_s3, %s7921_s3  }
0x1e64   : >> { %v7909_v16 = vld [vmem:[%s11468_s5 + $0x140] sm:$0xff]  ;;  %7908 = vst [vmem:[%s11464_s3] sm:$0xff] %v7907_v33  ;;  %p7916_p6 = scmp.ge.s32.totalorder %s7915_s6, %s14468_s8  ;;  %p7900_p7 = scmp.ge.s32.totalorder %s7901_s18, %s14468_s8 }
0x1e65   : >> { %v7911_v42 = vld [vmem:[%s11468_s5 + $0x280] sm:$0xff]  ;;  %7910 = vst [vmem:[%s11464_s3 + $0x3ac] sm:$0xff] %v7909_v16 }
0x1e66   : >> { %v7913_v41 = vld [vmem:[%s11468_s5 + $0x3c0] sm:$0xff]  ;;  %7912 = vst [vmem:[%s11464_s3 + $0x758] sm:$0xff] %v7911_v42  ;;  %s14857_s6 = smov (%p7916_p6, %s7915_s6), 0  ;;  %7903 = sbr.rel (!%p7900_p7) target bundleno = 7779 (0x1e63), region = 500 }
0x1e67   : >> { %7914 = vst [vmem:[%s11464_s3 + $0xb04] sm:$0xff] %v7913_v41  ;;  %s9705_s9 = sshll.u32 %s14857_s6, 3  ;;  %s14839_s15 = smov %s14857_s6 }
0x1e68   : >> { %s7920_s5 = scalar_lea.vmem %s14472_s12, %s9705_s9 [#allocation45]   ;;  %s7921_s3 = scalar_lea.vmem %s14475_s14, %s9705_s9  }
0x1e6b PF: > { %7924 = sbr.rel (%p7805_p10) target bundleno = 7855 (0x1eaf), region = 329  ;;  %s7926_s2 = ssub.s32 (!%p7805_p10), %s14345_s11, %s14349_s13 }
0x1e6c   : > { %s7930_s4 = sshrl.u32 (!%p7805_p10), %s14345_s11, 3  ;;  %s14505_s7 = scalar_lea.vmem (!%p7805_p10), %s12248_s19, %s7926_s2 [#allocation45] }
0x1e6d   : > { %s14508_s1 = scalar_lea.vmem (!%p7805_p10), %s14343_s10, %s7926_s2  ;;  %s14512_s15 = sshrl.u32 (!%p7805_p10), %s7930_s4, 3 }
0x1e6e   : > { %p9707_p9 = scmp.le.s32.totalorder (!%p7805_p10), %s14512_s15, 0 }
0x1e70   : > { %8187 = sbr.rel (%p9707_p9) target bundleno = 7830 (0x1e96), region = 505  ;;  %s14840_s8 = smov (!%p9707_p9), %s14343_s10 }
0x1e71   : > { %s14841_s14 = smov (!%p9707_p9), %s12248_s19  ;;  %s14521_s12 = smov (!%p9707_p9), 0  }
0x1e72   : > { %s14523_s3 = smov (!%p9707_p9), 0  }
0x1e75 LB: >> { %v7941_v23 = vld [vmem:[%s11484_s14] sm:$0xff]  ;;  %v7943_v19 = vld [vmem:[%s11484_s14 + $0x8] sm:$0xff]  ;;  %v7945_v2 = vld [vmem:[%s11484_s14 + $0x10] sm:$0xff]  ;;  %s8005_s5 = sadd.s32 1, %s11488_s12  ;;  %s7935_s3 = sadd.s32 1, %s11492_s3   ;;  %s11492_s3 = sphi %s14523_s3, %s7935_s3   ;;  %s11488_s12 = sphi %s14521_s12, %s14844_s12   ;;  %s11484_s14 = sphi %s14841_s14, %s14843_s14   ;;  %s11480_s8 = sphi %s14840_s8, %s14842_s8  }
0x1e76   : >> { %7942 = vst [vmem:[%s11480_s8] sm:$0xff] %v7941_v23  ;;  %v7947_v4 = vld [vmem:[%s11484_s14 + $0x18] sm:$0xff]  ;;  %p8006_p12 = scmp.ge.s32.totalorder %s8005_s5, %s14512_s15  ;;  %v7949_v9 = vld [vmem:[%s11484_s14 + $0x20] sm:$0xff]  ;;  %v7951_v0 = vld [vmem:[%s11484_s14 + $0x28] sm:$0xff]  ;;  %p7934_p13 = scmp.ge.s32.totalorder %s7935_s3, %s14512_s15 }
0x1e77   : >> { %7944 = vst [vmem:[%s11480_s8 + $0x8] sm:$0xff] %v7943_v19  ;;  %v7953_v47 = vld [vmem:[%s11484_s14 + $0x30] sm:$0xff]  ;;  %v7955_v20 = vld [vmem:[%s11484_s14 + $0x38] sm:$0xff]  ;;  %v7957_v59 = vld [vmem:[%s11484_s14 + $0x140] sm:$0xff] }
0x1e78   : >> { %7946 = vst [vmem:[%s11480_s8 + $0x10] sm:$0xff] %v7945_v2  ;;  %s14859_s5 = smov (%p8006_p12, %s8005_s5), 0  ;;  %v7959_v54 = vld [vmem:[%s11484_s14 + $0x148] sm:$0xff]  ;;  %v7961_v22 = vld [vmem:[%s11484_s14 + $0x150] sm:$0xff]  ;;  %v7963_v32 = vld [vmem:[%s11484_s14 + $0x158] sm:$0xff] }
0x1e79   : >> { %7948 = vst [vmem:[%s11480_s8 + $0x18] sm:$0xff] %v7947_v4  ;;  %s9708_s18 = sshll.u32 %s14859_s5, 6  ;;  %v7965_v45 = vld [vmem:[%s11484_s14 + $0x160] sm:$0xff]  ;;  %v7967_v39 = vld [vmem:[%s11484_s14 + $0x168] sm:$0xff]  ;;  %v7969_v24 = vld [vmem:[%s11484_s14 + $0x170] sm:$0xff]  ;;  %s14844_s12 = smov %s14859_s5 }
0x1e7a   : >> { %7950 = vst [vmem:[%s11480_s8 + $0x20] sm:$0xff] %v7949_v9  ;;  %s14555_s6 = scalar_lea.vmem %s12248_s19, %s9708_s18 [#allocation45]   ;;  %s14558_s9 = scalar_lea.vmem %s14343_s10, %s9708_s18   ;;  %v7971_v61 = vld [vmem:[%s11484_s14 + $0x178] sm:$0xff]  ;;  %v7973_v53 = vld [vmem:[%s11484_s14 + $0x280] sm:$0xff]  ;;  %v7975_v44 = vld [vmem:[%s11484_s14 + $0x288] sm:$0xff] }
0x1e7b   : >> { %7952 = vst [vmem:[%s11480_s8 + $0x28] sm:$0xff] %v7951_v0  ;;  %v7977_v43 = vld [vmem:[%s11484_s14 + $0x290] sm:$0xff]  ;;  %v7979_v34 = vld [vmem:[%s11484_s14 + $0x298] sm:$0xff]  ;;  %v7981_v63 = vld [vmem:[%s11484_s14 + $0x2a0] sm:$0xff] }
0x1e7c   : >> { %7954 = vst [vmem:[%s11480_s8 + $0x30] sm:$0xff] %v7953_v47  ;;  %v7983_v13 = vld [vmem:[%s11484_s14 + $0x2a8] sm:$0xff]  ;;  %v7985_v18 = vld [vmem:[%s11484_s14 + $0x2b0] sm:$0xff]  ;;  %v7987_v8 = vld [vmem:[%s11484_s14 + $0x2b8] sm:$0xff] }
0x1e7d   : >> { %7956 = vst [vmem:[%s11480_s8 + $0x38] sm:$0xff] %v7955_v20  ;;  %v7989_v14 = vld [vmem:[%s11484_s14 + $0x3c0] sm:$0xff]  ;;  %v7991_v48 = vld [vmem:[%s11484_s14 + $0x3c8] sm:$0xff]  ;;  %v7993_v55 = vld [vmem:[%s11484_s14 + $0x3d0] sm:$0xff] }
0x1e7e   : >> { %7958 = vst [vmem:[%s11480_s8 + $0x3ac] sm:$0xff] %v7957_v59  ;;  %v7995_v10 = vld [vmem:[%s11484_s14 + $0x3d8] sm:$0xff]  ;;  %v7997_v11 = vld [vmem:[%s11484_s14 + $0x3e0] sm:$0xff]  ;;  %v7999_v1 = vld [vmem:[%s11484_s14 + $0x3e8] sm:$0xff] }
0x1e7f   : >> { %7960 = vst [vmem:[%s11480_s8 + $0x3b4] sm:$0xff] %v7959_v54  ;;  %v8001_v50 = vld [vmem:[%s11484_s14 + $0x3f0] sm:$0xff]  ;;  %v8003_v26 = vld [vmem:[%s11484_s14 + $0x3f8] sm:$0xff]  ;;  %s14843_s14 = smov %s14555_s6 }
0x1e80   : >> { %7962 = vst [vmem:[%s11480_s8 + $0x3bc] sm:$0xff] %v7961_v22 }
0x1e81   : >> { %7964 = vst [vmem:[%s11480_s8 + $0x3c4] sm:$0xff] %v7963_v32 }
0x1e82   : >> { %7966 = vst [vmem:[%s11480_s8 + $0x3cc] sm:$0xff] %v7965_v45 }
0x1e83   : >> { %7968 = vst [vmem:[%s11480_s8 + $0x3d4] sm:$0xff] %v7967_v39 }
0x1e84   : >> { %7970 = vst [vmem:[%s11480_s8 + $0x3dc] sm:$0xff] %v7969_v24 }
0x1e85   : >> { %7972 = vst [vmem:[%s11480_s8 + $0x3e4] sm:$0xff] %v7971_v61 }
0x1e86   : >> { %7974 = vst [vmem:[%s11480_s8 + $0x758] sm:$0xff] %v7973_v53 }
0x1e87   : >> { %7976 = vst [vmem:[%s11480_s8 + $0x760] sm:$0xff] %v7975_v44 }
0x1e88   : >> { %7978 = vst [vmem:[%s11480_s8 + $0x768] sm:$0xff] %v7977_v43 }
0x1e89   : >> { %7980 = vst [vmem:[%s11480_s8 + $0x770] sm:$0xff] %v7979_v34 }
0x1e8a   : >> { %7982 = vst [vmem:[%s11480_s8 + $0x778] sm:$0xff] %v7981_v63 }
0x1e8b   : >> { %7984 = vst [vmem:[%s11480_s8 + $0x780] sm:$0xff] %v7983_v13 }
0x1e8c   : >> { %7986 = vst [vmem:[%s11480_s8 + $0x788] sm:$0xff] %v7985_v18 }
0x1e8d   : >> { %7988 = vst [vmem:[%s11480_s8 + $0x790] sm:$0xff] %v7987_v8 }
0x1e8e   : >> { %7990 = vst [vmem:[%s11480_s8 + $0xb04] sm:$0xff] %v7989_v14 }
0x1e8f   : >> { %7992 = vst [vmem:[%s11480_s8 + $0xb0c] sm:$0xff] %v7991_v48 }
0x1e90   : >> { %7994 = vst [vmem:[%s11480_s8 + $0xb14] sm:$0xff] %v7993_v55 }
0x1e91   : >> { %7996 = vst [vmem:[%s11480_s8 + $0xb1c] sm:$0xff] %v7995_v10  ;;  %7937 = sbr.rel (!%p7934_p13) target bundleno = 7797 (0x1e75), region = 511 }
0x1e92   : >> { %7998 = vst [vmem:[%s11480_s8 + $0xb24] sm:$0xff] %v7997_v11 }
0x1e93   : >> { %8000 = vst [vmem:[%s11480_s8 + $0xb2c] sm:$0xff] %v7999_v1 }
0x1e94   : >> { %8002 = vst [vmem:[%s11480_s8 + $0xb34] sm:$0xff] %v8001_v50 }
0x1e95   : >> { %8004 = vst [vmem:[%s11480_s8 + $0xb3c] sm:$0xff] %v8003_v26  ;;  %s14842_s8 = smov %s14558_s9 }
0x1e96 PF: > { %s14624_s2 = sand.u32 7, %s7930_s4   ;;  %s9887_s18 = sshll.u32 %s14512_s15, 6 }
0x1e97   : > { %s14628_s16 = scalar_lea.vmem %s12248_s19, %s9887_s18 [#allocation45]   ;;  %s14631_s17 = scalar_lea.vmem %s14343_s10, %s9887_s18  }
0x1e98   : > { %p9713_p5 = scmp.le.s32.totalorder %s14624_s2, 0 }
0x1e99   : > { %s14845_s3 = smov (!%p9713_p5), %s14631_s17  ;;  %s14846_s8 = smov (!%p9713_p5), %s14628_s16 }
0x1e9a   : > { %8201 = sbr.rel (%p9713_p5) target bundleno = 7847 (0x1ea7), region = 516  ;;  %s11502_s14 = smov (!%p9713_p5), 0  }
0x1e9b   : > { %s11506_s12 = smov (!%p9713_p5), 0  }
0x1e9f LB: >> { %v8028_v21 = vld [vmem:[%s11500_s8] sm:$0xff]  ;;  %s8036_s4 = sadd.s32 1, %s11504_s14  ;;  %s8022_s12 = sadd.s32 1, %s11508_s12   ;;  %s11508_s12 = sphi %s11506_s12, %s8022_s12   ;;  %s11504_s14 = sphi %s11502_s14, %s11503_s14   ;;  %s11500_s8 = sphi %s14846_s8, %s8041_s8   ;;  %s11496_s3 = sphi %s14845_s3, %s8042_s3  }
0x1ea0   : >> { %v8030_v40 = vld [vmem:[%s11500_s8 + $0x140] sm:$0xff]  ;;  %8029 = vst [vmem:[%s11496_s3] sm:$0xff] %v8028_v21  ;;  %p8037_p8 = scmp.ge.s32.totalorder %s8036_s4, %s14624_s2  ;;  %p8021_p11 = scmp.ge.s32.totalorder %s8022_s12, %s14624_s2 }
0x1ea1   : >> { %v8032_v27 = vld [vmem:[%s11500_s8 + $0x280] sm:$0xff]  ;;  %8031 = vst [vmem:[%s11496_s3 + $0x3ac] sm:$0xff] %v8030_v40 }
0x1ea2   : >> { %v8034_v37 = vld [vmem:[%s11500_s8 + $0x3c0] sm:$0xff]  ;;  %8033 = vst [vmem:[%s11496_s3 + $0x758] sm:$0xff] %v8032_v27  ;;  %s14861_s4 = smov (%p8037_p8, %s8036_s4), 0  ;;  %8024 = sbr.rel (!%p8021_p11) target bundleno = 7839 (0x1e9f), region = 522 }
0x1ea3   : >> { %8035 = vst [vmem:[%s11496_s3 + $0xb04] sm:$0xff] %v8034_v37  ;;  %s9714_s15 = sshll.u32 %s14861_s4, 3  ;;  %s11503_s14 = smov %s14861_s4  }
0x1ea4   : >> { %s8041_s8 = scalar_lea.vmem %s14628_s16, %s9714_s15 [#allocation45]   ;;  %s8042_s3 = scalar_lea.vmem %s14631_s17, %s9714_s15  }
0x1ea7 PF: > { %s11581_s5 = smov 1  }
0x1ea8   : > { %s8043_s6 = sshll.u32 %s11581_s5, %s14349_s13 }
0x1ea9   : > { %s9716_s9 = sadd.s32 4294967295, %s8043_s6 }
0x1eaa   : > { %v8053_v30 = vld [vmem:[%s14505_s7] sm:%s9716_s9] }
0x1eab   : > { %v8055_v62 = vld [vmem:[%s14505_s7 + $0x140] sm:%s9716_s9]  ;;  %8054 = vst [vmem:[%s14508_s1] sm:%s9716_s9] %v8053_v30 }
0x1eac   : > { %v8057_v57 = vld [vmem:[%s14505_s7 + $0x280] sm:%s9716_s9]  ;;  %8056 = vst [vmem:[%s14508_s1 + $0x3ac] sm:%s9716_s9] %v8055_v62 }
0x1ead   : > { %v8059_v15 = vld [vmem:[%s14505_s7 + $0x3c0] sm:%s9716_s9]  ;;  %8058 = vst [vmem:[%s14508_s1 + $0x758] sm:%s9716_s9] %v8057_v57 }
0x1eae   : > { %8060 = vst [vmem:[%s14508_s1 + $0xb04] sm:%s9716_s9] %v8059_v15 }
0x1eaf PF: > { %p9717_p10 = scmp.ge.u32.totalorder %s14345_s11, 8 }
0x1eb0   : > { %s11582_s17 = smov (!%p9717_p10), 1  }
0x1eb1   : > { %7785 = sbr.rel (%p9717_p10) target bundleno = 7867 (0x1ebb), region = 300  ;;  %s7786_s16 = sshll.u32 (!%p9717_p10), %s11582_s17, %s14345_s11 }
0x1eb2   : > { %s9718_s13 = sadd.s32 (!%p9717_p10), 4294967295, %s7786_s16 }
0x1eb6   : > { %v7796_v52 = vld [vmem:[%s12248_s19] sm:%s9718_s13] }
0x1eb7   : > { %v7798_v28 = vld [vmem:[%s12248_s19 + $0x140] sm:%s9718_s13]  ;;  %7797 = vst [vmem:[%s14343_s10] sm:%s9718_s13] %v7796_v52 }
0x1eb8   : > { %v7800_v17 = vld [vmem:[%s12248_s19 + $0x280] sm:%s9718_s13]  ;;  %7799 = vst [vmem:[%s14343_s10 + $0x3ac] sm:%s9718_s13] %v7798_v28 }
0x1eb9   : > { %v7802_v25 = vld [vmem:[%s12248_s19 + $0x3c0] sm:%s9718_s13]  ;;  %7801 = vst [vmem:[%s14343_s10 + $0x758] sm:%s9718_s13] %v7800_v17 }
0x1eba   : > { %7803 = vst [vmem:[%s14343_s10 + $0xb04] sm:%s9718_s13] %v7802_v25 }
0x1ebb PF: > { %s14847_s11 = sld [smem:[#allocation93_spill]]  ;;  %s14850_s10 = smov %s11440_s0 }
0x1ebc   : > { %s14848_s7 = sld [smem:[#allocation92_spill]] }
0x1ebd   : > { %s14849_s1 = sld [smem:[#allocation94_spill]] }
0x1ec1   : > { %p96_p1 = scmp.ge.s32.totalorder %s14847_s11, 5  }
0x1ec3   : > { %s14851_s0 = smov %s14849_s1  ;;  %98 = sbr.rel (!%p96_p1) target bundleno = 89 (0x59), region = 533 }
0x1ec8   :  { %8074 = vsyncpa [#allocation4], 1 }
0x1ec9   :  { %8076 = vsyncpa [#allocation4 + $0x1], 1 }
0x1eca   :  { %8077 = vsyncpa [#allocation6], 1 }
0x1ecb   :  { %8078 = vsyncpa [#allocation9], 1 }
0x1ecc   :  { %8079 = vsyncpa [#allocation12], 1 }
0x1ecd   :  { %8080 = vsyncpa [#allocation15], 1 }
0x1ece   :  { %8081 = vsyncpa [#allocation18], 1 }
0x1ecf   :  { %8082 = vsyncpa [#allocation21], 1 }
0x1ed0   :  { %8083 = vsyncpa [#allocation24], 1 }
0x1ed1   :  { %8084 = vsyncpa [#allocation27], 1 }
0x1ed2   :  { %8085 = vsyncpa [#allocation30], 1 }
0x1ed3   :  { %8086 = vsyncpa [#allocation33], 1 }
0x1ed4   :  { %8087 = vsyncpa [#allocation36], 1 }
0x1ed5   :  { %8088 = vsyncpa [#allocation39], 1 }
0x1ed6   :  { %8089 = vsyncpa [#allocation42], 1 }

</bundles_post_ra>
